<compile_context>
chip_gen: v6e
topology: v6e:2x2x1
jax: 0.10.0
libtpu: 0.0.40
codegen_flags: <defaults>
</compile_context>

<pallas_src>
import numpy as np

import jax
import jax.numpy as jnp
from jax.experimental import pallas as pl
from jax.experimental.pallas import tpu as pltpu


_VMEM_LIMIT = 48 * 1024 * 1024


# ----------------------------------------------------------------------------
# Arch table (resolution-16 entry of D_arch, as used by the demo config).
# ----------------------------------------------------------------------------
def d_arch(ch=64, attention='64', input_nc=3):
    attn = [int(item) for item in attention.split('_')]
    arch = {}
    arch[16] = {
        'in_channels': [input_nc] + [ch * item for item in [1, 8, 16]],
        'out_channels': [item * ch for item in [1, 8, 16, 16]],
        'downsample': [True] * 3 + [False],
        'resolution': [16, 8, 4, 4],
        'attention': {2 ** i: (2 ** i in attn) for i in range(2, 5)},
    }
    return arch


# ----------------------------------------------------------------------------
# Wrapper-side weight preprocessing: spectral norm + Toeplitz / shift / pool mats
# ----------------------------------------------------------------------------
def _sn_sigma(w2d, u, itrs=1, eps=1e-8):
    v = None
    for _ in range(itrs):
        v = u @ w2d
        v = v / (jnp.linalg.norm(v) + eps)
        u = v @ w2d.T
        u = u / (jnp.linalg.norm(u) + eps)
    return jnp.sum((v @ w2d.T) * u)


def _sn_conv(w_hwio, u):
    cout = w_hwio.shape[-1]
    w2d = jnp.transpose(w_hwio, (3, 0, 1, 2)).reshape(cout, -1)
    return w_hwio / _sn_sigma(w2d, u)


def _sn_linear(w, u):  # w: (out, in)
    return w / _sn_sigma(w, u)


def _shift_mats(h, n_kh, pad):
    """(n_kh, h, h): output row i reads input row i + kh - pad (zero outside)."""
    L = np.zeros((n_kh, h, h), np.float32)
    for kh in range(n_kh):
        for i in range(h):
            src = i + kh - pad
            if 0 <= src < h:
                L[kh, i, src] = 1.0
    return L


def _pool_h(h):
    P = np.zeros((h // 2, h), np.float32)
    for i in range(h // 2):
        P[i, 2 * i] = 0.5
        P[i, 2 * i + 1] = 0.5
    return P


def _pool_w(w, c):
    P = np.zeros((w * c, (w // 2) * c), np.float32)
    for j in range(w):
        for cc in range(c):
            P[j * c + cc, (j // 2) * c + cc] = 0.5
    return P


def _w_sum(w, c):
    """(w*c, c): sums the W positions per channel (spatial reduce for the head)."""
    S = np.zeros((w * c, c), np.float32)
    for j in range(w):
        for cc in range(c):
            S[j * c + cc, cc] = 1.0
    return S


def _toeplitz(w_hwio, w_spatial, pad):
    """(KH, KW, Cin, Cout) -> (KH, W*Cin, W*Cout) Toeplitz-in-W weight (stride 1)."""
    kh, kw, cin, cout = w_hwio.shape
    M = np.zeros((kw, w_spatial, w_spatial), np.float32)
    for k in range(kw):
        for wo in range(w_spatial):
            wi = wo + k - pad
            if 0 <= wi < w_spatial:
                M[k, wi, wo] = 1.0
    t = jnp.einsum('kab,hkio->haibo', M, w_hwio)
    return t.reshape(kh, w_spatial * cin, w_spatial * cout)


def _batch_kron(L, n):
    """(n_kh, ho, hi) per-sample row-operator -> (n_kh, n*ho, n*hi) block-diagonal."""
    eye = np.eye(n, dtype=np.float32)
    return np.stack([np.kron(eye, L[k]) for k in range(L.shape[0])], axis=0)


# ----------------------------------------------------------------------------
# The fused whole-network Pallas kernel
# ----------------------------------------------------------------------------
def _make_fused_kernel(cfgs):
    def bilinear(x16, l_ref, r_ref, b_ref):
        # y = sum_kh (L[kh] @ x) @ R[kh] + bias;  L is kron(I_N, shift[/pool]).
        acc = None
        for kh in range(l_ref.shape[0]):           # 3 taps (3x3) or 1 tap (1x1)
            rows = jnp.dot(l_ref[kh], x16, preferred_element_type=jnp.float32)
            term = jnp.dot(rows.astype(jnp.bfloat16), r_ref[kh],
                           preferred_element_type=jnp.float32)
            acc = term if acc is None else acc + term
        return acc + b_ref[...]                    # per-channel bias tiled over W

    def kernel(*refs):
        it = iter(refs)
        x_ref = next(it)
        h = x_ref[...].astype(jnp.float32)         # (N*H, W*Cin), f32 VPU math

        for cfg in cfgs:
            l1, r1, b1, l2, r2, b2 = [next(it) for _ in range(6)]
            if cfg['learnable_sc']:
                lsc, rsc, bsc = [next(it) for _ in range(3)]

            x_in = h
            a = jnp.maximum(x_in, 0.0) if cfg['preact'] else x_in
            h1 = bilinear(a.astype(jnp.bfloat16), l1, r1, b1)          # conv1
            h1 = jnp.maximum(h1, 0.0)
            h2 = bilinear(h1.astype(jnp.bfloat16), l2, r2, b2)         # conv2 (+pool)
            if cfg['learnable_sc']:
                sc = bilinear(x_in.astype(jnp.bfloat16), lsc, rsc, bsc)  # 1x1 sc (+pool)
            else:
                sc = x_in                                              # identity
            h = h2 + sc                                                # f32 residual

        hs_ref, s_ref, wl_ref, bl_ref, proj_ref = [next(it) for _ in range(5)]
        o_ref = next(it)

        hr = jnp.maximum(h, 0.0)                                       # head relu
        rows = jnp.dot(hs_ref[...], hr, preferred_element_type=jnp.float32)   # sum H
        feat = jnp.dot(rows, s_ref[...], preferred_element_type=jnp.float32)  # sum W
        out = jnp.dot(feat, wl_ref[...], preferred_element_type=jnp.float32) + bl_ref[...]
        out = out + jnp.sum(proj_ref[...] * feat, axis=1, keepdims=True)
        o_ref[...] = out.astype(o_ref.dtype)

    return kernel


# ----------------------------------------------------------------------------
# Discriminator builder: init / prepare / forward
# ----------------------------------------------------------------------------
def build_discriminator(resolution=16, ch=8, input_nc=1, n_classes=16,
                        output_dim=1, attention='64', wide=True):
    arch = d_arch(ch, attention, input_nc)[resolution]
    n_blocks = len(arch['out_channels'])

    cfgs = []
    sp = resolution
    for idx in range(n_blocks):
        if arch['attention'][arch['resolution'][idx]]:
            raise NotImplementedError("Attention block not implemented")
        cin, cout = arch['in_channels'][idx], arch['out_channels'][idx]
        down = arch['downsample'][idx]
        cfgs.append(dict(
            H=sp, W=sp, Cin=cin, Cout=cout, Ch=(cout if wide else cin),
            downsample=down, preact=(idx > 0),
            learnable_sc=(cin != cout) or down))
        if down:
            sp //= 2
    c_last, w_last, h_last = arch['out_channels'][-1], sp, sp

    kernel = _make_fused_kernel(cfgs)

    # ---------------- raw (PyTorch-like) parameters, D_init='N02' -------------
    def init_params(key):
        ks = iter(jax.random.split(key, 128))

        def conv(cin, cout, k):
            return dict(
                w=0.02 * jax.random.normal(next(ks), (k, k, cin, cout), jnp.float32),
                b=0.02 * jax.random.normal(next(ks), (cout,), jnp.float32),
                u=jax.random.normal(next(ks), (1, cout), jnp.float32))

        blocks = []
        for cfg in cfgs:
            blk = dict(conv1=conv(cfg['Cin'], cfg['Ch'], 3),
                       conv2=conv(cfg['Ch'], cfg['Cout'], 3))
            if cfg['learnable_sc']:
                blk['conv_sc'] = conv(cfg['Cin'], cfg['Cout'], 1)
            blocks.append(blk)

        head = dict(
            w_lin=0.02 * jax.random.normal(next(ks), (output_dim, c_last), jnp.float32),
            b_lin=jnp.zeros((output_dim,), jnp.float32),
            u_lin=jax.random.normal(next(ks), (1, output_dim), jnp.float32),
            w_emb=0.02 * jax.random.normal(next(ks), (c_last, n_classes), jnp.float32),
            b_emb=jnp.zeros((c_last,), jnp.float32),
            u_emb=jax.random.normal(next(ks), (1, c_last), jnp.float32))
        return dict(blocks=blocks, head=head)

    # ---------------- one-time kernel-ready parameter preparation -------------
    def prepare_params(raw, batch):
        flat = []
        for cfg, blk in zip(cfgs, raw['blocks']):
            H, W = cfg['H'], cfg['W']
            cin, cout = cfg['Cin'], cfg['Cout']
            down = cfg['downsample']
            wo = W // 2 if down else W

            w1 = _sn_conv(blk['conv1']['w'], blk['conv1']['u'])
            w2 = _sn_conv(blk['conv2']['w'], blk['conv2']['u'])

            L3 = _shift_mats(H, 3, 1)                          # (3, H, H)
            T1 = _toeplitz(w1, W, 1)                           # (3, W*Cin, W*Ch)
            T2 = _toeplitz(w2, W, 1)                           # (3, W*Ch, W*Cout)

            l1 = _batch_kron(L3, batch)
            r1 = T1
            if down:
                PH = _pool_h(H)
                PWo = _pool_w(W, cout)
                l2 = _batch_kron(np.einsum('ij,kjl->kil', PH, L3), batch)   # fold H-pool
                r2 = jnp.einsum('kij,jl->kil', T2, jnp.asarray(PWo))        # fold W-pool
            else:
                l2 = _batch_kron(L3, batch)
                r2 = T2

            flat += [
                jnp.asarray(l1, jnp.bfloat16), r1.astype(jnp.bfloat16),
                jnp.tile(blk['conv1']['b'], W)[None, :].astype(jnp.float32),
                jnp.asarray(l2, jnp.bfloat16), r2.astype(jnp.bfloat16),
                jnp.tile(blk['conv2']['b'], wo)[None, :].astype(jnp.float32)]

            if cfg['learnable_sc']:
                wsc = _sn_conv(blk['conv_sc']['w'], blk['conv_sc']['u'])
                if cfg['preact']:                              # conv then (maybe) pool
                    Tsc = _toeplitz(wsc, W, 0)
                    if down:
                        lsc = _batch_kron(PH[None], batch)
                        rsc = jnp.einsum('kij,jl->kil', Tsc, jnp.asarray(PWo))
                    else:
                        lsc = _batch_kron(np.eye(H, dtype=np.float32)[None], batch)
                        rsc = Tsc
                else:                                          # (maybe) pool then conv
                    if down:
                        Tsc = _toeplitz(wsc, wo, 0)
                        PWi = _pool_w(W, cin)
                        lsc = _batch_kron(_pool_h(H)[None], batch)
                        rsc = jnp.einsum('ij,kjl->kil', jnp.asarray(PWi), Tsc)
                    else:
                        Tsc = _toeplitz(wsc, W, 0)
                        lsc = _batch_kron(np.eye(H, dtype=np.float32)[None], batch)
                        rsc = Tsc
                flat += [
                    jnp.asarray(lsc, jnp.bfloat16), rsc.astype(jnp.bfloat16),
                    jnp.tile(blk['conv_sc']['b'], wo)[None, :].astype(jnp.float32)]

        hd = raw['head']
        w_lin = _sn_linear(hd['w_lin'], hd['u_lin'])           # (1, C)
        w_emb = _sn_linear(hd['w_emb'], hd['u_emb'])           # (C, n_classes)
        hs = np.kron(np.eye(batch, dtype=np.float32),
                     np.ones((1, h_last), np.float32))         # per-sample H sum
        head = dict(
            hs=jnp.asarray(hs, jnp.float32),                   # (N, N*H_last)
            s=jnp.asarray(_w_sum(w_last, c_last), jnp.float32),# (W*C, C)
            wl=w_lin.T.astype(jnp.float32),                    # (C, 1)
            bl=hd['b_lin'][None, :].astype(jnp.float32),       # (1, 1)
            w_emb=w_emb.astype(jnp.float32),
            b_emb=hd['b_emb'].astype(jnp.float32))
        return dict(block_args=flat, head=head)

    # ---------------- forward --------------------------------------------------
    def forward(prepared, x, y=None):
        n, c, hh, ww = x.shape
        assert c == input_nc and hh == resolution and ww == resolution
        ph = prepared['head']
        assert ph['hs'].shape[0] == n, "prepare_params was built for a different batch"

        # NCHW -> lane-dense, batch-folded (N*H, W*C), bf16 input (halves DMA).
        h = jnp.transpose(x, (0, 2, 3, 1)).reshape(n * hh, ww * c).astype(jnp.bfloat16)

        if y is None:
            proj = jnp.zeros((n, c_last), jnp.float32)
        else:
            # which_embedding = SNLinear (bn_linear='SN'): embed(y) = onehot @ W^T + b
            onehot = jax.nn.one_hot(y, n_classes, dtype=jnp.float32)
            proj = onehot @ ph['w_emb'].T + ph['b_emb'][None, :]

        args = [h] + list(prepared['block_args']) + [ph['hs'], ph['s'], ph['wl'],
                                                     ph['bl'], proj]

        # Advisory cost estimate for the XLA scheduler.
        flops = 0
        for cfg in cfgs:
            Hi, Wi = cfg['H'], cfg['W']
            Ho = Hi // 2 if cfg['downsample'] else Hi
            Wo = Wi // 2 if cfg['downsample'] else Wi
            flops += 3 * 2 * n * Hi * (Wi * cfg['Cin']) * (Wi * cfg['Ch'])
            flops += 3 * 2 * n * Ho * (Wi * cfg['Ch']) * (Wo * cfg['Cout'])
            if cfg['learnable_sc']:
                flops += 2 * n * Ho * (Wi * cfg['Cin']) * (Wo * cfg['Cout'])
        bytes_accessed = sum(int(np.prod(a.shape)) * a.dtype.itemsize for a in args)
        bytes_accessed += n * output_dim * 4

        # Single fused call, no grid: every input is a whole-array VMEM block,
        # so weights are single-buffered and there are no per-step pipeline costs.
        return pl.pallas_call(
            kernel,
            out_shape=jax.ShapeDtypeStruct((n, output_dim), jnp.float32),
            compiler_params=pltpu.CompilerParams(vmem_limit_bytes=_VMEM_LIMIT),
            cost_estimate=pl.CostEstimate(flops=flops, transcendentals=0,
                                          bytes_accessed=bytes_accessed),
        )(*args)

    return cfgs, init_params, prepare_params, forward


# ----------------------------------------------------------------------------
if __name__ == "__main__":
    key = jax.random.PRNGKey(0)

    # Small demo config consistent with the module: resolution=16 arch, ch=8,
    # input_nc=1 -> channels [1, 8, 64, 128], spatial 16 -> 8 -> 4 -> 2.
    resolution, ch, input_nc, n_classes, batch = 16, 8, 1, 16, 2

    cfgs, init_params, prepare_params, forward = build_discriminator(
        resolution=resolution, ch=ch, input_nc=input_nc, n_classes=n_classes)

    raw = init_params(key)
    prepared = prepare_params(raw, batch)   # one-time: SN + Toeplitz/shift/pool/kron

    x = jax.random.normal(jax.random.fold_in(key, 1),
                          (batch, input_nc, resolution, resolution), jnp.float32)
    y = jnp.array([3, 11], dtype=jnp.int32)

    fwd = jax.jit(forward)
    out_uncond = jax.block_until_ready(fwd(prepared, x))        # forward(x)
    out_cond = jax.block_until_ready(fwd(prepared, x, y))       # forward(x, y)

    assert out_uncond.shape == (batch, 1), out_uncond.shape
    assert out_cond.shape == (batch, 1), out_cond.shape
    assert bool(jnp.all(jnp.isfinite(out_uncond)))
    assert bool(jnp.all(jnp.isfinite(out_cond)))
    print("KERNEL_OK")
</pallas_src>

<mosaic_0001>
module attributes {stable_mosaic.version = 11 : i64} {
  func.func @kernel(%arg0: memref<32x16xbf16, #tpu.memory_space<vmem>>, %arg1: memref<3x32x32xbf16, #tpu.memory_space<vmem>>, %arg2: memref<3x16x128xbf16, #tpu.memory_space<vmem>>, %arg3: memref<1x128xf32, #tpu.memory_space<vmem>>, %arg4: memref<3x16x32xbf16, #tpu.memory_space<vmem>>, %arg5: memref<3x128x64xbf16, #tpu.memory_space<vmem>>, %arg6: memref<1x64xf32, #tpu.memory_space<vmem>>, %arg7: memref<1x16x32xbf16, #tpu.memory_space<vmem>>, %arg8: memref<1x16x64xbf16, #tpu.memory_space<vmem>>, %arg9: memref<1x64xf32, #tpu.memory_space<vmem>>, %arg10: memref<3x16x16xbf16, #tpu.memory_space<vmem>>, %arg11: memref<3x64x512xbf16, #tpu.memory_space<vmem>>, %arg12: memref<1x512xf32, #tpu.memory_space<vmem>>, %arg13: memref<3x8x16xbf16, #tpu.memory_space<vmem>>, %arg14: memref<3x512x256xbf16, #tpu.memory_space<vmem>>, %arg15: memref<1x256xf32, #tpu.memory_space<vmem>>, %arg16: memref<1x8x16xbf16, #tpu.memory_space<vmem>>, %arg17: memref<1x64x256xbf16, #tpu.memory_space<vmem>>, %arg18: memref<1x256xf32, #tpu.memory_space<vmem>>, %arg19: memref<3x8x8xbf16, #tpu.memory_space<vmem>>, %arg20: memref<3x256x512xbf16, #tpu.memory_space<vmem>>, %arg21: memref<1x512xf32, #tpu.memory_space<vmem>>, %arg22: memref<3x4x8xbf16, #tpu.memory_space<vmem>>, %arg23: memref<3x512x256xbf16, #tpu.memory_space<vmem>>, %arg24: memref<1x256xf32, #tpu.memory_space<vmem>>, %arg25: memref<1x4x8xbf16, #tpu.memory_space<vmem>>, %arg26: memref<1x256x256xbf16, #tpu.memory_space<vmem>>, %arg27: memref<1x256xf32, #tpu.memory_space<vmem>>, %arg28: memref<3x4x4xbf16, #tpu.memory_space<vmem>>, %arg29: memref<3x256x256xbf16, #tpu.memory_space<vmem>>, %arg30: memref<1x256xf32, #tpu.memory_space<vmem>>, %arg31: memref<3x4x4xbf16, #tpu.memory_space<vmem>>, %arg32: memref<3x256x256xbf16, #tpu.memory_space<vmem>>, %arg33: memref<1x256xf32, #tpu.memory_space<vmem>>, %arg34: memref<2x4xf32, #tpu.memory_space<vmem>>, %arg35: memref<256x128xf32, #tpu.memory_space<vmem>>, %arg36: memref<128x1xf32, #tpu.memory_space<vmem>>, %arg37: memref<1x1xf32, #tpu.memory_space<vmem>>, %arg38: memref<2x128xf32, #tpu.memory_space<vmem>>, %arg39: memref<2x1xf32, #tpu.memory_space<vmem>>) attributes {dimension_semantics = [], scalar_prefetch = 0 : i64, scratch_operands = 0 : i64, tpu.core_type = #tpu.core_type<tc>} {
    %c0 = arith.constant 0 : index
    %c0_0 = arith.constant 0 : index
    %0 = vector.load %arg0[%c0, %c0_0] : memref<32x16xbf16, #tpu.memory_space<vmem>>, vector<32x16xbf16>
    %1 = arith.extf %0 : vector<32x16xbf16> to vector<32x16xf32>
    %2 = arith.truncf %1 : vector<32x16xf32> to vector<32x16xbf16>
    %c0_1 = arith.constant 0 : index
    %c0_2 = arith.constant 0 : index
    %c0_3 = arith.constant 0 : index
    %3 = vector.load %arg1[%c0_1, %c0_2, %c0_3] : memref<3x32x32xbf16, #tpu.memory_space<vmem>>, vector<1x32x32xbf16>
    %4 = vector.shape_cast %3 : vector<1x32x32xbf16> to vector<32x32xbf16>
    %cst = arith.constant dense<0.000000e+00> : vector<32x16xf32>
    %5 = tpu.matmul %4, %2, %cst {dimension_numbers = #tpu.dot_dimension_numbers<[1], [0], [0], [1], [0, 0, 1, 1], [], []>} : vector<32x32xbf16>, vector<32x16xbf16>, vector<32x16xf32> -> vector<32x16xf32>
    %6 = arith.truncf %5 : vector<32x16xf32> to vector<32x16xbf16>
    %c0_4 = arith.constant 0 : index
    %c0_5 = arith.constant 0 : index
    %c0_6 = arith.constant 0 : index
    %7 = vector.load %arg2[%c0_4, %c0_5, %c0_6] : memref<3x16x128xbf16, #tpu.memory_space<vmem>>, vector<1x16x128xbf16>
    %8 = vector.shape_cast %7 : vector<1x16x128xbf16> to vector<16x128xbf16>
    %cst_7 = arith.constant dense<0.000000e+00> : vector<32x128xf32>
    %9 = tpu.matmul %6, %8, %cst_7 {dimension_numbers = #tpu.dot_dimension_numbers<[1], [0], [0], [1], [0, 0, 1, 1], [], []>} : vector<32x16xbf16>, vector<16x128xbf16>, vector<32x128xf32> -> vector<32x128xf32>
    %c1 = arith.constant 1 : index
    %c0_8 = arith.constant 0 : index
    %c0_9 = arith.constant 0 : index
    %10 = vector.load %arg1[%c1, %c0_8, %c0_9] : memref<3x32x32xbf16, #tpu.memory_space<vmem>>, vector<1x32x32xbf16>
    %11 = vector.shape_cast %10 : vector<1x32x32xbf16> to vector<32x32xbf16>
    %cst_10 = arith.constant dense<0.000000e+00> : vector<32x16xf32>
    %12 = tpu.matmul %11, %2, %cst_10 {dimension_numbers = #tpu.dot_dimension_numbers<[1], [0], [0], [1], [0, 0, 1, 1], [], []>} : vector<32x32xbf16>, vector<32x16xbf16>, vector<32x16xf32> -> vector<32x16xf32>
    %13 = arith.truncf %12 : vector<32x16xf32> to vector<32x16xbf16>
    %c1_11 = arith.constant 1 : index
    %c0_12 = arith.constant 0 : index
    %c0_13 = arith.constant 0 : index
    %14 = vector.load %arg2[%c1_11, %c0_12, %c0_13] : memref<3x16x128xbf16, #tpu.memory_space<vmem>>, vector<1x16x128xbf16>
    %15 = vector.shape_cast %14 : vector<1x16x128xbf16> to vector<16x128xbf16>
    %cst_14 = arith.constant dense<0.000000e+00> : vector<32x128xf32>
    %16 = tpu.matmul %13, %15, %cst_14 {dimension_numbers = #tpu.dot_dimension_numbers<[1], [0], [0], [1], [0, 0, 1, 1], [], []>} : vector<32x16xbf16>, vector<16x128xbf16>, vector<32x128xf32> -> vector<32x128xf32>
    %17 = arith.addf %9, %16 : vector<32x128xf32>
    %c2 = arith.constant 2 : index
    %c0_15 = arith.constant 0 : index
    %c0_16 = arith.constant 0 : index
    %18 = vector.load %arg1[%c2, %c0_15, %c0_16] : memref<3x32x32xbf16, #tpu.memory_space<vmem>>, vector<1x32x32xbf16>
    %19 = vector.shape_cast %18 : vector<1x32x32xbf16> to vector<32x32xbf16>
    %cst_17 = arith.constant dense<0.000000e+00> : vector<32x16xf32>
    %20 = tpu.matmul %19, %2, %cst_17 {dimension_numbers = #tpu.dot_dimension_numbers<[1], [0], [0], [1], [0, 0, 1, 1], [], []>} : vector<32x32xbf16>, vector<32x16xbf16>, vector<32x16xf32> -> vector<32x16xf32>
    %21 = arith.truncf %20 : vector<32x16xf32> to vector<32x16xbf16>
    %c2_18 = arith.constant 2 : index
    %c0_19 = arith.constant 0 : index
    %c0_20 = arith.constant 0 : index
    %22 = vector.load %arg2[%c2_18, %c0_19, %c0_20] : memref<3x16x128xbf16, #tpu.memory_space<vmem>>, vector<1x16x128xbf16>
    %23 = vector.shape_cast %22 : vector<1x16x128xbf16> to vector<16x128xbf16>
    %cst_21 = arith.constant dense<0.000000e+00> : vector<32x128xf32>
    %24 = tpu.matmul %21, %23, %cst_21 {dimension_numbers = #tpu.dot_dimension_numbers<[1], [0], [0], [1], [0, 0, 1, 1], [], []>} : vector<32x16xbf16>, vector<16x128xbf16>, vector<32x128xf32> -> vector<32x128xf32>
    %25 = arith.addf %17, %24 : vector<32x128xf32>
    %c0_22 = arith.constant 0 : index
    %c0_23 = arith.constant 0 : index
    %26 = vector.load %arg3[%c0_22, %c0_23] : memref<1x128xf32, #tpu.memory_space<vmem>>, vector<1x128xf32>
    %27 = vector.broadcast %26 : vector<1x128xf32> to vector<32x128xf32>
    %28 = arith.addf %25, %27 : vector<32x128xf32>
    %cst_24 = arith.constant 0.000000e+00 : f32
    %29 = vector.broadcast %cst_24 : f32 to vector<32x128xf32>
    %30 = arith.maximumf %28, %29 : vector<32x128xf32>
    %31 = arith.truncf %30 : vector<32x128xf32> to vector<32x128xbf16>
    %c0_25 = arith.constant 0 : index
    %c0_26 = arith.constant 0 : index
    %c0_27 = arith.constant 0 : index
    %32 = vector.load %arg4[%c0_25, %c0_26, %c0_27] : memref<3x16x32xbf16, #tpu.memory_space<vmem>>, vector<1x16x32xbf16>
    %33 = vector.shape_cast %32 : vector<1x16x32xbf16> to vector<16x32xbf16>
    %cst_28 = arith.constant dense<0.000000e+00> : vector<16x128xf32>
    %34 = tpu.matmul %33, %31, %cst_28 {dimension_numbers = #tpu.dot_dimension_numbers<[1], [0], [0], [1], [0, 0, 1, 1], [], []>} : vector<16x32xbf16>, vector<32x128xbf16>, vector<16x128xf32> -> vector<16x128xf32>
    %35 = arith.truncf %34 : vector<16x128xf32> to vector<16x128xbf16>
    %c0_29 = arith.constant 0 : index
    %c0_30 = arith.constant 0 : index
    %c0_31 = arith.constant 0 : index
    %36 = vector.load %arg5[%c0_29, %c0_30, %c0_31] : memref<3x128x64xbf16, #tpu.memory_space<vmem>>, vector<1x128x64xbf16>
    %37 = vector.shape_cast %36 : vector<1x128x64xbf16> to vector<128x64xbf16>
    %cst_32 = arith.constant dense<0.000000e+00> : vector<16x64xf32>
    %38 = tpu.matmul %35, %37, %cst_32 {dimension_numbers = #tpu.dot_dimension_numbers<[1], [0], [0], [1], [0, 0, 1, 1], [], []>} : vector<16x128xbf16>, vector<128x64xbf16>, vector<16x64xf32> -> vector<16x64xf32>
    %c1_33 = arith.constant 1 : index
    %c0_34 = arith.constant 0 : index
    %c0_35 = arith.constant 0 : index
    %39 = vector.load %arg4[%c1_33, %c0_34, %c0_35] : memref<3x16x32xbf16, #tpu.memory_space<vmem>>, vector<1x16x32xbf16>
    %40 = vector.shape_cast %39 : vector<1x16x32xbf16> to vector<16x32xbf16>
    %cst_36 = arith.constant dense<0.000000e+00> : vector<16x128xf32>
    %41 = tpu.matmul %40, %31, %cst_36 {dimension_numbers = #tpu.dot_dimension_numbers<[1], [0], [0], [1], [0, 0, 1, 1], [], []>} : vector<16x32xbf16>, vector<32x128xbf16>, vector<16x128xf32> -> vector<16x128xf32>
    %42 = arith.truncf %41 : vector<16x128xf32> to vector<16x128xbf16>
    %c1_37 = arith.constant 1 : index
    %c0_38 = arith.constant 0 : index
    %c0_39 = arith.constant 0 : index
    %43 = vector.load %arg5[%c1_37, %c0_38, %c0_39] : memref<3x128x64xbf16, #tpu.memory_space<vmem>>, vector<1x128x64xbf16>
    %44 = vector.shape_cast %43 : vector<1x128x64xbf16> to vector<128x64xbf16>
    %cst_40 = arith.constant dense<0.000000e+00> : vector<16x64xf32>
    %45 = tpu.matmul %42, %44, %cst_40 {dimension_numbers = #tpu.dot_dimension_numbers<[1], [0], [0], [1], [0, 0, 1, 1], [], []>} : vector<16x128xbf16>, vector<128x64xbf16>, vector<16x64xf32> -> vector<16x64xf32>
    %46 = arith.addf %38, %45 : vector<16x64xf32>
    %c2_41 = arith.constant 2 : index
    %c0_42 = arith.constant 0 : index
    %c0_43 = arith.constant 0 : index
    %47 = vector.load %arg4[%c2_41, %c0_42, %c0_43] : memref<3x16x32xbf16, #tpu.memory_space<vmem>>, vector<1x16x32xbf16>
    %48 = vector.shape_cast %47 : vector<1x16x32xbf16> to vector<16x32xbf16>
    %cst_44 = arith.constant dense<0.000000e+00> : vector<16x128xf32>
    %49 = tpu.matmul %48, %31, %cst_44 {dimension_numbers = #tpu.dot_dimension_numbers<[1], [0], [0], [1], [0, 0, 1, 1], [], []>} : vector<16x32xbf16>, vector<32x128xbf16>, vector<16x128xf32> -> vector<16x128xf32>
    %50 = arith.truncf %49 : vector<16x128xf32> to vector<16x128xbf16>
    %c2_45 = arith.constant 2 : index
    %c0_46 = arith.constant 0 : index
    %c0_47 = arith.constant 0 : index
    %51 = vector.load %arg5[%c2_45, %c0_46, %c0_47] : memref<3x128x64xbf16, #tpu.memory_space<vmem>>, vector<1x128x64xbf16>
    %52 = vector.shape_cast %51 : vector<1x128x64xbf16> to vector<128x64xbf16>
    %cst_48 = arith.constant dense<0.000000e+00> : vector<16x64xf32>
    %53 = tpu.matmul %50, %52, %cst_48 {dimension_numbers = #tpu.dot_dimension_numbers<[1], [0], [0], [1], [0, 0, 1, 1], [], []>} : vector<16x128xbf16>, vector<128x64xbf16>, vector<16x64xf32> -> vector<16x64xf32>
    %54 = arith.addf %46, %53 : vector<16x64xf32>
    %c0_49 = arith.constant 0 : index
    %c0_50 = arith.constant 0 : index
    %55 = vector.load %arg6[%c0_49, %c0_50] : memref<1x64xf32, #tpu.memory_space<vmem>>, vector<1x64xf32>
    %56 = vector.broadcast %55 : vector<1x64xf32> to vector<16x64xf32>
    %57 = arith.addf %54, %56 : vector<16x64xf32>
    %58 = arith.truncf %1 : vector<32x16xf32> to vector<32x16xbf16>
    %c0_51 = arith.constant 0 : index
    %c0_52 = arith.constant 0 : index
    %c0_53 = arith.constant 0 : index
    %59 = vector.load %arg7[%c0_51, %c0_52, %c0_53] : memref<1x16x32xbf16, #tpu.memory_space<vmem>>, vector<1x16x32xbf16>
    %60 = vector.shape_cast %59 : vector<1x16x32xbf16> to vector<16x32xbf16>
    %cst_54 = arith.constant dense<0.000000e+00> : vector<16x16xf32>
    %61 = tpu.matmul %60, %58, %cst_54 {dimension_numbers = #tpu.dot_dimension_numbers<[1], [0], [0], [1], [0, 0, 1, 1], [], []>} : vector<16x32xbf16>, vector<32x16xbf16>, vector<16x16xf32> -> vector<16x16xf32>
    %62 = arith.truncf %61 : vector<16x16xf32> to vector<16x16xbf16>
    %c0_55 = arith.constant 0 : index
    %c0_56 = arith.constant 0 : index
    %c0_57 = arith.constant 0 : index
    %63 = vector.load %arg8[%c0_55, %c0_56, %c0_57] : memref<1x16x64xbf16, #tpu.memory_space<vmem>>, vector<1x16x64xbf16>
    %64 = vector.shape_cast %63 : vector<1x16x64xbf16> to vector<16x64xbf16>
    %cst_58 = arith.constant dense<0.000000e+00> : vector<16x64xf32>
    %65 = tpu.matmul %62, %64, %cst_58 {dimension_numbers = #tpu.dot_dimension_numbers<[1], [0], [0], [1], [0, 0, 1, 1], [], []>} : vector<16x16xbf16>, vector<16x64xbf16>, vector<16x64xf32> -> vector<16x64xf32>
    %c0_59 = arith.constant 0 : index
    %c0_60 = arith.constant 0 : index
    %66 = vector.load %arg9[%c0_59, %c0_60] : memref<1x64xf32, #tpu.memory_space<vmem>>, vector<1x64xf32>
    %67 = vector.broadcast %66 : vector<1x64xf32> to vector<16x64xf32>
    %68 = arith.addf %65, %67 : vector<16x64xf32>
    %69 = arith.addf %57, %68 : vector<16x64xf32>
    %cst_61 = arith.constant 0.000000e+00 : f32
    %70 = vector.broadcast %cst_61 : f32 to vector<16x64xf32>
    %71 = arith.maximumf %69, %70 : vector<16x64xf32>
    %72 = arith.truncf %71 : vector<16x64xf32> to vector<16x64xbf16>
    %c0_62 = arith.constant 0 : index
    %c0_63 = arith.constant 0 : index
    %c0_64 = arith.constant 0 : index
    %73 = vector.load %arg10[%c0_62, %c0_63, %c0_64] : memref<3x16x16xbf16, #tpu.memory_space<vmem>>, vector<1x16x16xbf16>
    %74 = vector.shape_cast %73 : vector<1x16x16xbf16> to vector<16x16xbf16>
    %cst_65 = arith.constant dense<0.000000e+00> : vector<16x64xf32>
    %75 = tpu.matmul %74, %72, %cst_65 {dimension_numbers = #tpu.dot_dimension_numbers<[1], [0], [0], [1], [0, 0, 1, 1], [], []>} : vector<16x16xbf16>, vector<16x64xbf16>, vector<16x64xf32> -> vector<16x64xf32>
    %76 = arith.truncf %75 : vector<16x64xf32> to vector<16x64xbf16>
    %c0_66 = arith.constant 0 : index
    %c0_67 = arith.constant 0 : index
    %c0_68 = arith.constant 0 : index
    %77 = vector.load %arg11[%c0_66, %c0_67, %c0_68] : memref<3x64x512xbf16, #tpu.memory_space<vmem>>, vector<1x64x512xbf16>
    %78 = vector.shape_cast %77 : vector<1x64x512xbf16> to vector<64x512xbf16>
    %cst_69 = arith.constant dense<0.000000e+00> : vector<16x512xf32>
    %79 = tpu.matmul %76, %78, %cst_69 {dimension_numbers = #tpu.dot_dimension_numbers<[1], [0], [0], [1], [0, 0, 1, 1], [], []>} : vector<16x64xbf16>, vector<64x512xbf16>, vector<16x512xf32> -> vector<16x512xf32>
    %c1_70 = arith.constant 1 : index
    %c0_71 = arith.constant 0 : index
    %c0_72 = arith.constant 0 : index
    %80 = vector.load %arg10[%c1_70, %c0_71, %c0_72] : memref<3x16x16xbf16, #tpu.memory_space<vmem>>, vector<1x16x16xbf16>
    %81 = vector.shape_cast %80 : vector<1x16x16xbf16> to vector<16x16xbf16>
    %cst_73 = arith.constant dense<0.000000e+00> : vector<16x64xf32>
    %82 = tpu.matmul %81, %72, %cst_73 {dimension_numbers = #tpu.dot_dimension_numbers<[1], [0], [0], [1], [0, 0, 1, 1], [], []>} : vector<16x16xbf16>, vector<16x64xbf16>, vector<16x64xf32> -> vector<16x64xf32>
    %83 = arith.truncf %82 : vector<16x64xf32> to vector<16x64xbf16>
    %c1_74 = arith.constant 1 : index
    %c0_75 = arith.constant 0 : index
    %c0_76 = arith.constant 0 : index
    %84 = vector.load %arg11[%c1_74, %c0_75, %c0_76] : memref<3x64x512xbf16, #tpu.memory_space<vmem>>, vector<1x64x512xbf16>
    %85 = vector.shape_cast %84 : vector<1x64x512xbf16> to vector<64x512xbf16>
    %cst_77 = arith.constant dense<0.000000e+00> : vector<16x512xf32>
    %86 = tpu.matmul %83, %85, %cst_77 {dimension_numbers = #tpu.dot_dimension_numbers<[1], [0], [0], [1], [0, 0, 1, 1], [], []>} : vector<16x64xbf16>, vector<64x512xbf16>, vector<16x512xf32> -> vector<16x512xf32>
    %87 = arith.addf %79, %86 : vector<16x512xf32>
    %c2_78 = arith.constant 2 : index
    %c0_79 = arith.constant 0 : index
    %c0_80 = arith.constant 0 : index
    %88 = vector.load %arg10[%c2_78, %c0_79, %c0_80] : memref<3x16x16xbf16, #tpu.memory_space<vmem>>, vector<1x16x16xbf16>
    %89 = vector.shape_cast %88 : vector<1x16x16xbf16> to vector<16x16xbf16>
    %cst_81 = arith.constant dense<0.000000e+00> : vector<16x64xf32>
    %90 = tpu.matmul %89, %72, %cst_81 {dimension_numbers = #tpu.dot_dimension_numbers<[1], [0], [0], [1], [0, 0, 1, 1], [], []>} : vector<16x16xbf16>, vector<16x64xbf16>, vector<16x64xf32> -> vector<16x64xf32>
    %91 = arith.truncf %90 : vector<16x64xf32> to vector<16x64xbf16>
    %c2_82 = arith.constant 2 : index
    %c0_83 = arith.constant 0 : index
    %c0_84 = arith.constant 0 : index
    %92 = vector.load %arg11[%c2_82, %c0_83, %c0_84] : memref<3x64x512xbf16, #tpu.memory_space<vmem>>, vector<1x64x512xbf16>
    %93 = vector.shape_cast %92 : vector<1x64x512xbf16> to vector<64x512xbf16>
    %cst_85 = arith.constant dense<0.000000e+00> : vector<16x512xf32>
    %94 = tpu.matmul %91, %93, %cst_85 {dimension_numbers = #tpu.dot_dimension_numbers<[1], [0], [0], [1], [0, 0, 1, 1], [], []>} : vector<16x64xbf16>, vector<64x512xbf16>, vector<16x512xf32> -> vector<16x512xf32>
    %95 = arith.addf %87, %94 : vector<16x512xf32>
    %c0_86 = arith.constant 0 : index
    %c0_87 = arith.constant 0 : index
    %96 = vector.load %arg12[%c0_86, %c0_87] : memref<1x512xf32, #tpu.memory_space<vmem>>, vector<1x512xf32>
    %97 = vector.broadcast %96 : vector<1x512xf32> to vector<16x512xf32>
    %98 = arith.addf %95, %97 : vector<16x512xf32>
    %cst_88 = arith.constant 0.000000e+00 : f32
    %99 = vector.broadcast %cst_88 : f32 to vector<16x512xf32>
    %100 = arith.maximumf %98, %99 : vector<16x512xf32>
    %101 = arith.truncf %100 : vector<16x512xf32> to vector<16x512xbf16>
    %c0_89 = arith.constant 0 : index
    %c0_90 = arith.constant 0 : index
    %c0_91 = arith.constant 0 : index
    %102 = vector.load %arg13[%c0_89, %c0_90, %c0_91] : memref<3x8x16xbf16, #tpu.memory_space<vmem>>, vector<1x8x16xbf16>
    %103 = vector.shape_cast %102 : vector<1x8x16xbf16> to vector<8x16xbf16>
    %cst_92 = arith.constant dense<0.000000e+00> : vector<8x512xf32>
    %104 = tpu.matmul %103, %101, %cst_92 {dimension_numbers = #tpu.dot_dimension_numbers<[1], [0], [0], [1], [0, 0, 1, 1], [], []>} : vector<8x16xbf16>, vector<16x512xbf16>, vector<8x512xf32> -> vector<8x512xf32>
    %105 = arith.truncf %104 : vector<8x512xf32> to vector<8x512xbf16>
    %c0_93 = arith.constant 0 : index
    %c0_94 = arith.constant 0 : index
    %c0_95 = arith.constant 0 : index
    %106 = vector.load %arg14[%c0_93, %c0_94, %c0_95] : memref<3x512x256xbf16, #tpu.memory_space<vmem>>, vector<1x512x256xbf16>
    %107 = vector.shape_cast %106 : vector<1x512x256xbf16> to vector<512x256xbf16>
    %cst_96 = arith.constant dense<0.000000e+00> : vector<8x256xf32>
    %108 = tpu.matmul %105, %107, %cst_96 {dimension_numbers = #tpu.dot_dimension_numbers<[1], [0], [0], [1], [0, 0, 1, 1], [], []>} : vector<8x512xbf16>, vector<512x256xbf16>, vector<8x256xf32> -> vector<8x256xf32>
    %c1_97 = arith.constant 1 : index
    %c0_98 = arith.constant 0 : index
    %c0_99 = arith.constant 0 : index
    %109 = vector.load %arg13[%c1_97, %c0_98, %c0_99] : memref<3x8x16xbf16, #tpu.memory_space<vmem>>, vector<1x8x16xbf16>
    %110 = vector.shape_cast %109 : vector<1x8x16xbf16> to vector<8x16xbf16>
    %cst_100 = arith.constant dense<0.000000e+00> : vector<8x512xf32>
    %111 = tpu.matmul %110, %101, %cst_100 {dimension_numbers = #tpu.dot_dimension_numbers<[1], [0], [0], [1], [0, 0, 1, 1], [], []>} : vector<8x16xbf16>, vector<16x512xbf16>, vector<8x512xf32> -> vector<8x512xf32>
    %112 = arith.truncf %111 : vector<8x512xf32> to vector<8x512xbf16>
    %c1_101 = arith.constant 1 : index
    %c0_102 = arith.constant 0 : index
    %c0_103 = arith.constant 0 : index
    %113 = vector.load %arg14[%c1_101, %c0_102, %c0_103] : memref<3x512x256xbf16, #tpu.memory_space<vmem>>, vector<1x512x256xbf16>
    %114 = vector.shape_cast %113 : vector<1x512x256xbf16> to vector<512x256xbf16>
    %cst_104 = arith.constant dense<0.000000e+00> : vector<8x256xf32>
    %115 = tpu.matmul %112, %114, %cst_104 {dimension_numbers = #tpu.dot_dimension_numbers<[1], [0], [0], [1], [0, 0, 1, 1], [], []>} : vector<8x512xbf16>, vector<512x256xbf16>, vector<8x256xf32> -> vector<8x256xf32>
    %116 = arith.addf %108, %115 : vector<8x256xf32>
    %c2_105 = arith.constant 2 : index
    %c0_106 = arith.constant 0 : index
    %c0_107 = arith.constant 0 : index
    %117 = vector.load %arg13[%c2_105, %c0_106, %c0_107] : memref<3x8x16xbf16, #tpu.memory_space<vmem>>, vector<1x8x16xbf16>
    %118 = vector.shape_cast %117 : vector<1x8x16xbf16> to vector<8x16xbf16>
    %cst_108 = arith.constant dense<0.000000e+00> : vector<8x512xf32>
    %119 = tpu.matmul %118, %101, %cst_108 {dimension_numbers = #tpu.dot_dimension_numbers<[1], [0], [0], [1], [0, 0, 1, 1], [], []>} : vector<8x16xbf16>, vector<16x512xbf16>, vector<8x512xf32> -> vector<8x512xf32>
    %120 = arith.truncf %119 : vector<8x512xf32> to vector<8x512xbf16>
    %c2_109 = arith.constant 2 : index
    %c0_110 = arith.constant 0 : index
    %c0_111 = arith.constant 0 : index
    %121 = vector.load %arg14[%c2_109, %c0_110, %c0_111] : memref<3x512x256xbf16, #tpu.memory_space<vmem>>, vector<1x512x256xbf16>
    %122 = vector.shape_cast %121 : vector<1x512x256xbf16> to vector<512x256xbf16>
    %cst_112 = arith.constant dense<0.000000e+00> : vector<8x256xf32>
    %123 = tpu.matmul %120, %122, %cst_112 {dimension_numbers = #tpu.dot_dimension_numbers<[1], [0], [0], [1], [0, 0, 1, 1], [], []>} : vector<8x512xbf16>, vector<512x256xbf16>, vector<8x256xf32> -> vector<8x256xf32>
    %124 = arith.addf %116, %123 : vector<8x256xf32>
    %c0_113 = arith.constant 0 : index
    %c0_114 = arith.constant 0 : index
    %125 = vector.load %arg15[%c0_113, %c0_114] : memref<1x256xf32, #tpu.memory_space<vmem>>, vector<1x256xf32>
    %126 = vector.broadcast %125 : vector<1x256xf32> to vector<8x256xf32>
    %127 = arith.addf %124, %126 : vector<8x256xf32>
    %128 = arith.truncf %69 : vector<16x64xf32> to vector<16x64xbf16>
    %c0_115 = arith.constant 0 : index
    %c0_116 = arith.constant 0 : index
    %c0_117 = arith.constant 0 : index
    %129 = vector.load %arg16[%c0_115, %c0_116, %c0_117] : memref<1x8x16xbf16, #tpu.memory_space<vmem>>, vector<1x8x16xbf16>
    %130 = vector.shape_cast %129 : vector<1x8x16xbf16> to vector<8x16xbf16>
    %cst_118 = arith.constant dense<0.000000e+00> : vector<8x64xf32>
    %131 = tpu.matmul %130, %128, %cst_118 {dimension_numbers = #tpu.dot_dimension_numbers<[1], [0], [0], [1], [0, 0, 1, 1], [], []>} : vector<8x16xbf16>, vector<16x64xbf16>, vector<8x64xf32> -> vector<8x64xf32>
    %132 = arith.truncf %131 : vector<8x64xf32> to vector<8x64xbf16>
    %c0_119 = arith.constant 0 : index
    %c0_120 = arith.constant 0 : index
    %c0_121 = arith.constant 0 : index
    %133 = vector.load %arg17[%c0_119, %c0_120, %c0_121] : memref<1x64x256xbf16, #tpu.memory_space<vmem>>, vector<1x64x256xbf16>
    %134 = vector.shape_cast %133 : vector<1x64x256xbf16> to vector<64x256xbf16>
    %cst_122 = arith.constant dense<0.000000e+00> : vector<8x256xf32>
    %135 = tpu.matmul %132, %134, %cst_122 {dimension_numbers = #tpu.dot_dimension_numbers<[1], [0], [0], [1], [0, 0, 1, 1], [], []>} : vector<8x64xbf16>, vector<64x256xbf16>, vector<8x256xf32> -> vector<8x256xf32>
    %c0_123 = arith.constant 0 : index
    %c0_124 = arith.constant 0 : index
    %136 = vector.load %arg18[%c0_123, %c0_124] : memref<1x256xf32, #tpu.memory_space<vmem>>, vector<1x256xf32>
    %137 = vector.broadcast %136 : vector<1x256xf32> to vector<8x256xf32>
    %138 = arith.addf %135, %137 : vector<8x256xf32>
    %139 = arith.addf %127, %138 : vector<8x256xf32>
    %cst_125 = arith.constant 0.000000e+00 : f32
    %140 = vector.broadcast %cst_125 : f32 to vector<8x256xf32>
    %141 = arith.maximumf %139, %140 : vector<8x256xf32>
    %142 = arith.truncf %141 : vector<8x256xf32> to vector<8x256xbf16>
    %c0_126 = arith.constant 0 : index
    %c0_127 = arith.constant 0 : index
    %c0_128 = arith.constant 0 : index
    %143 = vector.load %arg19[%c0_126, %c0_127, %c0_128] : memref<3x8x8xbf16, #tpu.memory_space<vmem>>, vector<1x8x8xbf16>
    %144 = vector.shape_cast %143 : vector<1x8x8xbf16> to vector<8x8xbf16>
    %cst_129 = arith.constant dense<0.000000e+00> : vector<8x256xf32>
    %145 = tpu.matmul %144, %142, %cst_129 {dimension_numbers = #tpu.dot_dimension_numbers<[1], [0], [0], [1], [0, 0, 1, 1], [], []>} : vector<8x8xbf16>, vector<8x256xbf16>, vector<8x256xf32> -> vector<8x256xf32>
    %146 = arith.truncf %145 : vector<8x256xf32> to vector<8x256xbf16>
    %c0_130 = arith.constant 0 : index
    %c0_131 = arith.constant 0 : index
    %c0_132 = arith.constant 0 : index
    %147 = vector.load %arg20[%c0_130, %c0_131, %c0_132] : memref<3x256x512xbf16, #tpu.memory_space<vmem>>, vector<1x256x512xbf16>
    %148 = vector.shape_cast %147 : vector<1x256x512xbf16> to vector<256x512xbf16>
    %cst_133 = arith.constant dense<0.000000e+00> : vector<8x512xf32>
    %149 = tpu.matmul %146, %148, %cst_133 {dimension_numbers = #tpu.dot_dimension_numbers<[1], [0], [0], [1], [0, 0, 1, 1], [], []>} : vector<8x256xbf16>, vector<256x512xbf16>, vector<8x512xf32> -> vector<8x512xf32>
    %c1_134 = arith.constant 1 : index
    %c0_135 = arith.constant 0 : index
    %c0_136 = arith.constant 0 : index
    %150 = vector.load %arg19[%c1_134, %c0_135, %c0_136] : memref<3x8x8xbf16, #tpu.memory_space<vmem>>, vector<1x8x8xbf16>
    %151 = vector.shape_cast %150 : vector<1x8x8xbf16> to vector<8x8xbf16>
    %cst_137 = arith.constant dense<0.000000e+00> : vector<8x256xf32>
    %152 = tpu.matmul %151, %142, %cst_137 {dimension_numbers = #tpu.dot_dimension_numbers<[1], [0], [0], [1], [0, 0, 1, 1], [], []>} : vector<8x8xbf16>, vector<8x256xbf16>, vector<8x256xf32> -> vector<8x256xf32>
    %153 = arith.truncf %152 : vector<8x256xf32> to vector<8x256xbf16>
    %c1_138 = arith.constant 1 : index
    %c0_139 = arith.constant 0 : index
    %c0_140 = arith.constant 0 : index
    %154 = vector.load %arg20[%c1_138, %c0_139, %c0_140] : memref<3x256x512xbf16, #tpu.memory_space<vmem>>, vector<1x256x512xbf16>
    %155 = vector.shape_cast %154 : vector<1x256x512xbf16> to vector<256x512xbf16>
    %cst_141 = arith.constant dense<0.000000e+00> : vector<8x512xf32>
    %156 = tpu.matmul %153, %155, %cst_141 {dimension_numbers = #tpu.dot_dimension_numbers<[1], [0], [0], [1], [0, 0, 1, 1], [], []>} : vector<8x256xbf16>, vector<256x512xbf16>, vector<8x512xf32> -> vector<8x512xf32>
    %157 = arith.addf %149, %156 : vector<8x512xf32>
    %c2_142 = arith.constant 2 : index
    %c0_143 = arith.constant 0 : index
    %c0_144 = arith.constant 0 : index
    %158 = vector.load %arg19[%c2_142, %c0_143, %c0_144] : memref<3x8x8xbf16, #tpu.memory_space<vmem>>, vector<1x8x8xbf16>
    %159 = vector.shape_cast %158 : vector<1x8x8xbf16> to vector<8x8xbf16>
    %cst_145 = arith.constant dense<0.000000e+00> : vector<8x256xf32>
    %160 = tpu.matmul %159, %142, %cst_145 {dimension_numbers = #tpu.dot_dimension_numbers<[1], [0], [0], [1], [0, 0, 1, 1], [], []>} : vector<8x8xbf16>, vector<8x256xbf16>, vector<8x256xf32> -> vector<8x256xf32>
    %161 = arith.truncf %160 : vector<8x256xf32> to vector<8x256xbf16>
    %c2_146 = arith.constant 2 : index
    %c0_147 = arith.constant 0 : index
    %c0_148 = arith.constant 0 : index
    %162 = vector.load %arg20[%c2_146, %c0_147, %c0_148] : memref<3x256x512xbf16, #tpu.memory_space<vmem>>, vector<1x256x512xbf16>
    %163 = vector.shape_cast %162 : vector<1x256x512xbf16> to vector<256x512xbf16>
    %cst_149 = arith.constant dense<0.000000e+00> : vector<8x512xf32>
    %164 = tpu.matmul %161, %163, %cst_149 {dimension_numbers = #tpu.dot_dimension_numbers<[1], [0], [0], [1], [0, 0, 1, 1], [], []>} : vector<8x256xbf16>, vector<256x512xbf16>, vector<8x512xf32> -> vector<8x512xf32>
    %165 = arith.addf %157, %164 : vector<8x512xf32>
    %c0_150 = arith.constant 0 : index
    %c0_151 = arith.constant 0 : index
    %166 = vector.load %arg21[%c0_150, %c0_151] : memref<1x512xf32, #tpu.memory_space<vmem>>, vector<1x512xf32>
    %167 = vector.broadcast %166 : vector<1x512xf32> to vector<8x512xf32>
    %168 = arith.addf %165, %167 : vector<8x512xf32>
    %cst_152 = arith.constant 0.000000e+00 : f32
    %169 = vector.broadcast %cst_152 : f32 to vector<8x512xf32>
    %170 = arith.maximumf %168, %169 : vector<8x512xf32>
    %171 = arith.truncf %170 : vector<8x512xf32> to vector<8x512xbf16>
    %c0_153 = arith.constant 0 : index
    %c0_154 = arith.constant 0 : index
    %c0_155 = arith.constant 0 : index
    %172 = vector.load %arg22[%c0_153, %c0_154, %c0_155] : memref<3x4x8xbf16, #tpu.memory_space<vmem>>, vector<1x4x8xbf16>
    %173 = vector.shape_cast %172 : vector<1x4x8xbf16> to vector<4x8xbf16>
    %cst_156 = arith.constant dense<0.000000e+00> : vector<4x512xf32>
    %174 = tpu.matmul %173, %171, %cst_156 {dimension_numbers = #tpu.dot_dimension_numbers<[1], [0], [0], [1], [0, 0, 1, 1], [], []>} : vector<4x8xbf16>, vector<8x512xbf16>, vector<4x512xf32> -> vector<4x512xf32>
    %175 = arith.truncf %174 : vector<4x512xf32> to vector<4x512xbf16>
    %c0_157 = arith.constant 0 : index
    %c0_158 = arith.constant 0 : index
    %c0_159 = arith.constant 0 : index
    %176 = vector.load %arg23[%c0_157, %c0_158, %c0_159] : memref<3x512x256xbf16, #tpu.memory_space<vmem>>, vector<1x512x256xbf16>
    %177 = vector.shape_cast %176 : vector<1x512x256xbf16> to vector<512x256xbf16>
    %cst_160 = arith.constant dense<0.000000e+00> : vector<4x256xf32>
    %178 = tpu.matmul %175, %177, %cst_160 {dimension_numbers = #tpu.dot_dimension_numbers<[1], [0], [0], [1], [0, 0, 1, 1], [], []>} : vector<4x512xbf16>, vector<512x256xbf16>, vector<4x256xf32> -> vector<4x256xf32>
    %c1_161 = arith.constant 1 : index
    %c0_162 = arith.constant 0 : index
    %c0_163 = arith.constant 0 : index
    %179 = vector.load %arg22[%c1_161, %c0_162, %c0_163] : memref<3x4x8xbf16, #tpu.memory_space<vmem>>, vector<1x4x8xbf16>
    %180 = vector.shape_cast %179 : vector<1x4x8xbf16> to vector<4x8xbf16>
    %cst_164 = arith.constant dense<0.000000e+00> : vector<4x512xf32>
    %181 = tpu.matmul %180, %171, %cst_164 {dimension_numbers = #tpu.dot_dimension_numbers<[1], [0], [0], [1], [0, 0, 1, 1], [], []>} : vector<4x8xbf16>, vector<8x512xbf16>, vector<4x512xf32> -> vector<4x512xf32>
    %182 = arith.truncf %181 : vector<4x512xf32> to vector<4x512xbf16>
    %c1_165 = arith.constant 1 : index
    %c0_166 = arith.constant 0 : index
    %c0_167 = arith.constant 0 : index
    %183 = vector.load %arg23[%c1_165, %c0_166, %c0_167] : memref<3x512x256xbf16, #tpu.memory_space<vmem>>, vector<1x512x256xbf16>
    %184 = vector.shape_cast %183 : vector<1x512x256xbf16> to vector<512x256xbf16>
    %cst_168 = arith.constant dense<0.000000e+00> : vector<4x256xf32>
    %185 = tpu.matmul %182, %184, %cst_168 {dimension_numbers = #tpu.dot_dimension_numbers<[1], [0], [0], [1], [0, 0, 1, 1], [], []>} : vector<4x512xbf16>, vector<512x256xbf16>, vector<4x256xf32> -> vector<4x256xf32>
    %186 = arith.addf %178, %185 : vector<4x256xf32>
    %c2_169 = arith.constant 2 : index
    %c0_170 = arith.constant 0 : index
    %c0_171 = arith.constant 0 : index
    %187 = vector.load %arg22[%c2_169, %c0_170, %c0_171] : memref<3x4x8xbf16, #tpu.memory_space<vmem>>, vector<1x4x8xbf16>
    %188 = vector.shape_cast %187 : vector<1x4x8xbf16> to vector<4x8xbf16>
    %cst_172 = arith.constant dense<0.000000e+00> : vector<4x512xf32>
    %189 = tpu.matmul %188, %171, %cst_172 {dimension_numbers = #tpu.dot_dimension_numbers<[1], [0], [0], [1], [0, 0, 1, 1], [], []>} : vector<4x8xbf16>, vector<8x512xbf16>, vector<4x512xf32> -> vector<4x512xf32>
    %190 = arith.truncf %189 : vector<4x512xf32> to vector<4x512xbf16>
    %c2_173 = arith.constant 2 : index
    %c0_174 = arith.constant 0 : index
    %c0_175 = arith.constant 0 : index
    %191 = vector.load %arg23[%c2_173, %c0_174, %c0_175] : memref<3x512x256xbf16, #tpu.memory_space<vmem>>, vector<1x512x256xbf16>
    %192 = vector.shape_cast %191 : vector<1x512x256xbf16> to vector<512x256xbf16>
    %cst_176 = arith.constant dense<0.000000e+00> : vector<4x256xf32>
    %193 = tpu.matmul %190, %192, %cst_176 {dimension_numbers = #tpu.dot_dimension_numbers<[1], [0], [0], [1], [0, 0, 1, 1], [], []>} : vector<4x512xbf16>, vector<512x256xbf16>, vector<4x256xf32> -> vector<4x256xf32>
    %194 = arith.addf %186, %193 : vector<4x256xf32>
    %c0_177 = arith.constant 0 : index
    %c0_178 = arith.constant 0 : index
    %195 = vector.load %arg24[%c0_177, %c0_178] : memref<1x256xf32, #tpu.memory_space<vmem>>, vector<1x256xf32>
    %196 = vector.broadcast %195 : vector<1x256xf32> to vector<4x256xf32>
    %197 = arith.addf %194, %196 : vector<4x256xf32>
    %198 = arith.truncf %139 : vector<8x256xf32> to vector<8x256xbf16>
    %c0_179 = arith.constant 0 : index
    %c0_180 = arith.constant 0 : index
    %c0_181 = arith.constant 0 : index
    %199 = vector.load %arg25[%c0_179, %c0_180, %c0_181] : memref<1x4x8xbf16, #tpu.memory_space<vmem>>, vector<1x4x8xbf16>
    %200 = vector.shape_cast %199 : vector<1x4x8xbf16> to vector<4x8xbf16>
    %cst_182 = arith.constant dense<0.000000e+00> : vector<4x256xf32>
    %201 = tpu.matmul %200, %198, %cst_182 {dimension_numbers = #tpu.dot_dimension_numbers<[1], [0], [0], [1], [0, 0, 1, 1], [], []>} : vector<4x8xbf16>, vector<8x256xbf16>, vector<4x256xf32> -> vector<4x256xf32>
    %202 = arith.truncf %201 : vector<4x256xf32> to vector<4x256xbf16>
    %c0_183 = arith.constant 0 : index
    %c0_184 = arith.constant 0 : index
    %c0_185 = arith.constant 0 : index
    %203 = vector.load %arg26[%c0_183, %c0_184, %c0_185] : memref<1x256x256xbf16, #tpu.memory_space<vmem>>, vector<1x256x256xbf16>
    %204 = vector.shape_cast %203 : vector<1x256x256xbf16> to vector<256x256xbf16>
    %cst_186 = arith.constant dense<0.000000e+00> : vector<4x256xf32>
    %205 = tpu.matmul %202, %204, %cst_186 {dimension_numbers = #tpu.dot_dimension_numbers<[1], [0], [0], [1], [0, 0, 1, 1], [], []>} : vector<4x256xbf16>, vector<256x256xbf16>, vector<4x256xf32> -> vector<4x256xf32>
    %c0_187 = arith.constant 0 : index
    %c0_188 = arith.constant 0 : index
    %206 = vector.load %arg27[%c0_187, %c0_188] : memref<1x256xf32, #tpu.memory_space<vmem>>, vector<1x256xf32>
    %207 = vector.broadcast %206 : vector<1x256xf32> to vector<4x256xf32>
    %208 = arith.addf %205, %207 : vector<4x256xf32>
    %209 = arith.addf %197, %208 : vector<4x256xf32>
    %cst_189 = arith.constant 0.000000e+00 : f32
    %210 = vector.broadcast %cst_189 : f32 to vector<4x256xf32>
    %211 = arith.maximumf %209, %210 : vector<4x256xf32>
    %212 = arith.truncf %211 : vector<4x256xf32> to vector<4x256xbf16>
    %c0_190 = arith.constant 0 : index
    %c0_191 = arith.constant 0 : index
    %c0_192 = arith.constant 0 : index
    %213 = vector.load %arg28[%c0_190, %c0_191, %c0_192] : memref<3x4x4xbf16, #tpu.memory_space<vmem>>, vector<1x4x4xbf16>
    %214 = vector.shape_cast %213 : vector<1x4x4xbf16> to vector<4x4xbf16>
    %cst_193 = arith.constant dense<0.000000e+00> : vector<4x256xf32>
    %215 = tpu.matmul %214, %212, %cst_193 {dimension_numbers = #tpu.dot_dimension_numbers<[1], [0], [0], [1], [0, 0, 1, 1], [], []>} : vector<4x4xbf16>, vector<4x256xbf16>, vector<4x256xf32> -> vector<4x256xf32>
    %216 = arith.truncf %215 : vector<4x256xf32> to vector<4x256xbf16>
    %c0_194 = arith.constant 0 : index
    %c0_195 = arith.constant 0 : index
    %c0_196 = arith.constant 0 : index
    %217 = vector.load %arg29[%c0_194, %c0_195, %c0_196] : memref<3x256x256xbf16, #tpu.memory_space<vmem>>, vector<1x256x256xbf16>
    %218 = vector.shape_cast %217 : vector<1x256x256xbf16> to vector<256x256xbf16>
    %cst_197 = arith.constant dense<0.000000e+00> : vector<4x256xf32>
    %219 = tpu.matmul %216, %218, %cst_197 {dimension_numbers = #tpu.dot_dimension_numbers<[1], [0], [0], [1], [0, 0, 1, 1], [], []>} : vector<4x256xbf16>, vector<256x256xbf16>, vector<4x256xf32> -> vector<4x256xf32>
    %c1_198 = arith.constant 1 : index
    %c0_199 = arith.constant 0 : index
    %c0_200 = arith.constant 0 : index
    %220 = vector.load %arg28[%c1_198, %c0_199, %c0_200] : memref<3x4x4xbf16, #tpu.memory_space<vmem>>, vector<1x4x4xbf16>
    %221 = vector.shape_cast %220 : vector<1x4x4xbf16> to vector<4x4xbf16>
    %cst_201 = arith.constant dense<0.000000e+00> : vector<4x256xf32>
    %222 = tpu.matmul %221, %212, %cst_201 {dimension_numbers = #tpu.dot_dimension_numbers<[1], [0], [0], [1], [0, 0, 1, 1], [], []>} : vector<4x4xbf16>, vector<4x256xbf16>, vector<4x256xf32> -> vector<4x256xf32>
    %223 = arith.truncf %222 : vector<4x256xf32> to vector<4x256xbf16>
    %c1_202 = arith.constant 1 : index
    %c0_203 = arith.constant 0 : index
    %c0_204 = arith.constant 0 : index
    %224 = vector.load %arg29[%c1_202, %c0_203, %c0_204] : memref<3x256x256xbf16, #tpu.memory_space<vmem>>, vector<1x256x256xbf16>
    %225 = vector.shape_cast %224 : vector<1x256x256xbf16> to vector<256x256xbf16>
    %cst_205 = arith.constant dense<0.000000e+00> : vector<4x256xf32>
    %226 = tpu.matmul %223, %225, %cst_205 {dimension_numbers = #tpu.dot_dimension_numbers<[1], [0], [0], [1], [0, 0, 1, 1], [], []>} : vector<4x256xbf16>, vector<256x256xbf16>, vector<4x256xf32> -> vector<4x256xf32>
    %227 = arith.addf %219, %226 : vector<4x256xf32>
    %c2_206 = arith.constant 2 : index
    %c0_207 = arith.constant 0 : index
    %c0_208 = arith.constant 0 : index
    %228 = vector.load %arg28[%c2_206, %c0_207, %c0_208] : memref<3x4x4xbf16, #tpu.memory_space<vmem>>, vector<1x4x4xbf16>
    %229 = vector.shape_cast %228 : vector<1x4x4xbf16> to vector<4x4xbf16>
    %cst_209 = arith.constant dense<0.000000e+00> : vector<4x256xf32>
    %230 = tpu.matmul %229, %212, %cst_209 {dimension_numbers = #tpu.dot_dimension_numbers<[1], [0], [0], [1], [0, 0, 1, 1], [], []>} : vector<4x4xbf16>, vector<4x256xbf16>, vector<4x256xf32> -> vector<4x256xf32>
    %231 = arith.truncf %230 : vector<4x256xf32> to vector<4x256xbf16>
    %c2_210 = arith.constant 2 : index
    %c0_211 = arith.constant 0 : index
    %c0_212 = arith.constant 0 : index
    %232 = vector.load %arg29[%c2_210, %c0_211, %c0_212] : memref<3x256x256xbf16, #tpu.memory_space<vmem>>, vector<1x256x256xbf16>
    %233 = vector.shape_cast %232 : vector<1x256x256xbf16> to vector<256x256xbf16>
    %cst_213 = arith.constant dense<0.000000e+00> : vector<4x256xf32>
    %234 = tpu.matmul %231, %233, %cst_213 {dimension_numbers = #tpu.dot_dimension_numbers<[1], [0], [0], [1], [0, 0, 1, 1], [], []>} : vector<4x256xbf16>, vector<256x256xbf16>, vector<4x256xf32> -> vector<4x256xf32>
    %235 = arith.addf %227, %234 : vector<4x256xf32>
    %c0_214 = arith.constant 0 : index
    %c0_215 = arith.constant 0 : index
    %236 = vector.load %arg30[%c0_214, %c0_215] : memref<1x256xf32, #tpu.memory_space<vmem>>, vector<1x256xf32>
    %237 = vector.broadcast %236 : vector<1x256xf32> to vector<4x256xf32>
    %238 = arith.addf %235, %237 : vector<4x256xf32>
    %cst_216 = arith.constant 0.000000e+00 : f32
    %239 = vector.broadcast %cst_216 : f32 to vector<4x256xf32>
    %240 = arith.maximumf %238, %239 : vector<4x256xf32>
    %241 = arith.truncf %240 : vector<4x256xf32> to vector<4x256xbf16>
    %c0_217 = arith.constant 0 : index
    %c0_218 = arith.constant 0 : index
    %c0_219 = arith.constant 0 : index
    %242 = vector.load %arg31[%c0_217, %c0_218, %c0_219] : memref<3x4x4xbf16, #tpu.memory_space<vmem>>, vector<1x4x4xbf16>
    %243 = vector.shape_cast %242 : vector<1x4x4xbf16> to vector<4x4xbf16>
    %cst_220 = arith.constant dense<0.000000e+00> : vector<4x256xf32>
    %244 = tpu.matmul %243, %241, %cst_220 {dimension_numbers = #tpu.dot_dimension_numbers<[1], [0], [0], [1], [0, 0, 1, 1], [], []>} : vector<4x4xbf16>, vector<4x256xbf16>, vector<4x256xf32> -> vector<4x256xf32>
    %245 = arith.truncf %244 : vector<4x256xf32> to vector<4x256xbf16>
    %c0_221 = arith.constant 0 : index
    %c0_222 = arith.constant 0 : index
    %c0_223 = arith.constant 0 : index
    %246 = vector.load %arg32[%c0_221, %c0_222, %c0_223] : memref<3x256x256xbf16, #tpu.memory_space<vmem>>, vector<1x256x256xbf16>
    %247 = vector.shape_cast %246 : vector<1x256x256xbf16> to vector<256x256xbf16>
    %cst_224 = arith.constant dense<0.000000e+00> : vector<4x256xf32>
    %248 = tpu.matmul %245, %247, %cst_224 {dimension_numbers = #tpu.dot_dimension_numbers<[1], [0], [0], [1], [0, 0, 1, 1], [], []>} : vector<4x256xbf16>, vector<256x256xbf16>, vector<4x256xf32> -> vector<4x256xf32>
    %c1_225 = arith.constant 1 : index
    %c0_226 = arith.constant 0 : index
    %c0_227 = arith.constant 0 : index
    %249 = vector.load %arg31[%c1_225, %c0_226, %c0_227] : memref<3x4x4xbf16, #tpu.memory_space<vmem>>, vector<1x4x4xbf16>
    %250 = vector.shape_cast %249 : vector<1x4x4xbf16> to vector<4x4xbf16>
    %cst_228 = arith.constant dense<0.000000e+00> : vector<4x256xf32>
    %251 = tpu.matmul %250, %241, %cst_228 {dimension_numbers = #tpu.dot_dimension_numbers<[1], [0], [0], [1], [0, 0, 1, 1], [], []>} : vector<4x4xbf16>, vector<4x256xbf16>, vector<4x256xf32> -> vector<4x256xf32>
    %252 = arith.truncf %251 : vector<4x256xf32> to vector<4x256xbf16>
    %c1_229 = arith.constant 1 : index
    %c0_230 = arith.constant 0 : index
    %c0_231 = arith.constant 0 : index
    %253 = vector.load %arg32[%c1_229, %c0_230, %c0_231] : memref<3x256x256xbf16, #tpu.memory_space<vmem>>, vector<1x256x256xbf16>
    %254 = vector.shape_cast %253 : vector<1x256x256xbf16> to vector<256x256xbf16>
    %cst_232 = arith.constant dense<0.000000e+00> : vector<4x256xf32>
    %255 = tpu.matmul %252, %254, %cst_232 {dimension_numbers = #tpu.dot_dimension_numbers<[1], [0], [0], [1], [0, 0, 1, 1], [], []>} : vector<4x256xbf16>, vector<256x256xbf16>, vector<4x256xf32> -> vector<4x256xf32>
    %256 = arith.addf %248, %255 : vector<4x256xf32>
    %c2_233 = arith.constant 2 : index
    %c0_234 = arith.constant 0 : index
    %c0_235 = arith.constant 0 : index
    %257 = vector.load %arg31[%c2_233, %c0_234, %c0_235] : memref<3x4x4xbf16, #tpu.memory_space<vmem>>, vector<1x4x4xbf16>
    %258 = vector.shape_cast %257 : vector<1x4x4xbf16> to vector<4x4xbf16>
    %cst_236 = arith.constant dense<0.000000e+00> : vector<4x256xf32>
    %259 = tpu.matmul %258, %241, %cst_236 {dimension_numbers = #tpu.dot_dimension_numbers<[1], [0], [0], [1], [0, 0, 1, 1], [], []>} : vector<4x4xbf16>, vector<4x256xbf16>, vector<4x256xf32> -> vector<4x256xf32>
    %260 = arith.truncf %259 : vector<4x256xf32> to vector<4x256xbf16>
    %c2_237 = arith.constant 2 : index
    %c0_238 = arith.constant 0 : index
    %c0_239 = arith.constant 0 : index
    %261 = vector.load %arg32[%c2_237, %c0_238, %c0_239] : memref<3x256x256xbf16, #tpu.memory_space<vmem>>, vector<1x256x256xbf16>
    %262 = vector.shape_cast %261 : vector<1x256x256xbf16> to vector<256x256xbf16>
    %cst_240 = arith.constant dense<0.000000e+00> : vector<4x256xf32>
    %263 = tpu.matmul %260, %262, %cst_240 {dimension_numbers = #tpu.dot_dimension_numbers<[1], [0], [0], [1], [0, 0, 1, 1], [], []>} : vector<4x256xbf16>, vector<256x256xbf16>, vector<4x256xf32> -> vector<4x256xf32>
    %264 = arith.addf %256, %263 : vector<4x256xf32>
    %c0_241 = arith.constant 0 : index
    %c0_242 = arith.constant 0 : index
    %265 = vector.load %arg33[%c0_241, %c0_242] : memref<1x256xf32, #tpu.memory_space<vmem>>, vector<1x256xf32>
    %266 = vector.broadcast %265 : vector<1x256xf32> to vector<4x256xf32>
    %267 = arith.addf %264, %266 : vector<4x256xf32>
    %268 = arith.addf %267, %209 : vector<4x256xf32>
    %cst_243 = arith.constant 0.000000e+00 : f32
    %269 = vector.broadcast %cst_243 : f32 to vector<4x256xf32>
    %270 = arith.maximumf %268, %269 : vector<4x256xf32>
    %c0_244 = arith.constant 0 : index
    %c0_245 = arith.constant 0 : index
    %271 = vector.load %arg34[%c0_244, %c0_245] : memref<2x4xf32, #tpu.memory_space<vmem>>, vector<2x4xf32>
    %cst_246 = arith.constant dense<0.000000e+00> : vector<2x256xf32>
    %272 = tpu.matmul %271, %270, %cst_246 {dimension_numbers = #tpu.dot_dimension_numbers<[1], [0], [0], [1], [0, 0, 1, 1], [], []>} : vector<2x4xf32>, vector<4x256xf32>, vector<2x256xf32> -> vector<2x256xf32>
    %c0_247 = arith.constant 0 : index
    %c0_248 = arith.constant 0 : index
    %273 = vector.load %arg35[%c0_247, %c0_248] : memref<256x128xf32, #tpu.memory_space<vmem>>, vector<256x128xf32>
    %cst_249 = arith.constant dense<0.000000e+00> : vector<2x128xf32>
    %274 = tpu.matmul %272, %273, %cst_249 {dimension_numbers = #tpu.dot_dimension_numbers<[1], [0], [0], [1], [0, 0, 1, 1], [], []>} : vector<2x256xf32>, vector<256x128xf32>, vector<2x128xf32> -> vector<2x128xf32>
    %c0_250 = arith.constant 0 : index
    %c0_251 = arith.constant 0 : index
    %275 = vector.load %arg36[%c0_250, %c0_251] : memref<128x1xf32, #tpu.memory_space<vmem>>, vector<128x1xf32>
    %cst_252 = arith.constant dense<0.000000e+00> : vector<2x1xf32>
    %276 = tpu.matmul %274, %275, %cst_252 {dimension_numbers = #tpu.dot_dimension_numbers<[1], [0], [0], [1], [0, 0, 1, 1], [], []>} : vector<2x128xf32>, vector<128x1xf32>, vector<2x1xf32> -> vector<2x1xf32>
    %c0_253 = arith.constant 0 : index
    %c0_254 = arith.constant 0 : index
    %277 = vector.load %arg37[%c0_253, %c0_254] : memref<1x1xf32, #tpu.memory_space<vmem>>, vector<1x1xf32>
    %278 = vector.broadcast %277 : vector<1x1xf32> to vector<2x1xf32>
    %279 = arith.addf %276, %278 : vector<2x1xf32>
    %c0_255 = arith.constant 0 : index
    %c0_256 = arith.constant 0 : index
    %280 = vector.load %arg38[%c0_255, %c0_256] : memref<2x128xf32, #tpu.memory_space<vmem>>, vector<2x128xf32>
    %281 = arith.mulf %280, %274 : vector<2x128xf32>
    %cst_257 = arith.constant dense<0.000000e+00> : vector<2xf32>
    %282 = vector.multi_reduction <add>, %281, %cst_257 [1] : vector<2x128xf32> to vector<2xf32>
    %283 = vector.shape_cast %282 : vector<2xf32> to vector<2x1xf32>
    %284 = arith.addf %279, %283 : vector<2x1xf32>
    %c0_258 = arith.constant 0 : index
    %c0_259 = arith.constant 0 : index
    %285 = vector.load %arg39[%c0_258, %c0_259] : memref<2x1xf32, #tpu.memory_space<vmem>>, vector<2x1xf32>
    tpu.vector_store %arg39[%c0_258, %c0_259], %284 {strides = array<i32>} : memref<2x1xf32, #tpu.memory_space<vmem>>, vector<2x1xf32>,
    return
  }
}

</mosaic_0001>

<bundles_post_ra>
// kernel: forward.1
= control target key start
LH: loop header
LB: loop body
LE: loop exit
PB: predicated region body
PF: predicated region fallthrough
CT: control target
= control target key end

     0   :  { %s13216_s6 = smov 1   ;;  %s13217_s10 = smov 2   ;;  %s14068_s0 = inlined_call_operand.smem [shape: u32[40], index: -1, kind: input, shape index: {}] }
   0x1   :  { %s13302_s5 = sld [smem:[%s14068_s0]]   ;;  %s13218_s14 = smov 3  }
   0x2   :  { %s13307_s9 = sld [smem:[%s14068_s0 + %s13216_s6]]   ;;  %s13219_s18 = smov 4  }
   0x3   :  { %s13312_s13 = sld [smem:[%s14068_s0 + %s13217_s10]]   ;;  %s13220_s22 = smov 5  }
   0x4   :  { %s13317_s17 = sld [smem:[%s14068_s0 + %s13218_s14]]   ;;  %s13221_s26 = smov 6  }
   0x5   :  { %s13322_s21 = sld [smem:[%s14068_s0 + %s13219_s18]]   ;;  %s13222_s30 = smov 7  }
   0x6   :  { %s13327_s25 = sld [smem:[%s14068_s0 + %s13220_s22]]   ;;  %s13223_s4 = smov 8  }
   0x7   :  { %14076 = sst [smem:[#allocation61_spill]] %s13302_s5  ;;  %s13224_s10 = smov 9  }
   0x8   :  { %s13332_s29 = sld [smem:[%s14068_s0 + %s13221_s26]]   ;;  %s13225_s15 = smov 10  }
   0x9   :  { %14077 = sst [smem:[#allocation62_spill]] %s13312_s13  ;;  %s13226_s20 = smov 11  }
   0xa   :  { %s13337_s3 = sld [smem:[%s14068_s0 + %s13222_s30]]   ;;  %s13227_s26 = smov 12  }
   0xb   :  { %14078 = sst [smem:[#allocation63_spill]] %s13322_s21  ;;  %s13228_s1 = smov 13  }
   0xc   :  { %14079 = sst [smem:[#allocation64_spill]] %s13327_s25  ;;  %s13229_s7 = smov 14  }
   0xd   :  { %s13342_s8 = sld [smem:[%s14068_s0 + %s13223_s4]]   ;;  %s13231_s22 = smov 16  }
   0xe   :  { %s13347_s14 = sld [smem:[%s14068_s0 + %s13224_s10]]   ;;  %s13232_s28 = smov 17  }
   0xf   :  { %s13352_s19 = sld [smem:[%s14068_s0 + %s13225_s15]]   ;;  %s13230_s15 = smov 15  }
  0x10   :  { %14080 = sst [smem:[#allocation65_spill]] %s13337_s3  ;;  %s13253_s10 = smov 38  }
  0x11   :  { %s13357_s24 = sld [smem:[%s14068_s0 + %s13226_s20]]   ;;  %s13254_s16 = smov 39  }
  0x12   :  { %s13362_s30 = sld [smem:[%s14068_s0 + %s13227_s26]]  }
  0x13   :  { %s13367_s6 = sld [smem:[%s14068_s0 + %s13228_s1]]  }
  0x14   :  { %14081 = sst [smem:[#allocation66_spill]] %s13347_s14 }
  0x15   :  { %s13372_s12 = sld [smem:[%s14068_s0 + %s13229_s7]]   ;;  %s13233_s7 = smov 18  }
  0x16   :  { %s13377_s20 = sld [smem:[%s14068_s0 + %s13230_s15]]   ;;  %s13234_s15 = smov 19  }
  0x17   :  { %14082 = sst [smem:[#allocation67_spill]] %s13357_s24 }
  0x18   :  { %14083 = sst [smem:[#allocation68_spill]] %s13362_s30 }
  0x19   :  { %14084 = sst [smem:[#allocation69_spill]] %s13367_s6 }
  0x1a   :  { %s13382_s27 = sld [smem:[%s14068_s0 + %s13231_s22]]   ;;  %s13235_s22 = smov 20  }
  0x1b   :  { %s13387_s4 = sld [smem:[%s14068_s0 + %s13232_s28]]   ;;  %s13236_s28 = smov 21  }
  0x1c   :  { %14085 = sst [smem:[#allocation70_spill]] %s13377_s20 }
  0x1d   :  { %s13392_s6 = sld [smem:[%s14068_s0 + %s13233_s7]]   ;;  %s13237_s7 = smov 22  }
  0x1e   :  { %s13397_s24 = sld [smem:[%s14068_s0 + %s13234_s15]]   ;;  %s13238_s15 = smov 23  }
  0x1f   :  { %s13402_s25 = sld [smem:[%s14068_s0 + %s13235_s22]]   ;;  %s13239_s22 = smov 24  }
  0x20   :  { %s13412_s13 = sld [smem:[%s14068_s0 + %s13237_s7]]   ;;  %s13241_s7 = smov 26  }
  0x21   :  { %14086 = sst [smem:[#allocation71_spill]] %s13387_s4 }
  0x22   :  { %s13407_s4 = sld [smem:[%s14068_s0 + %s13236_s28]]   ;;  %s13240_s28 = smov 25  }
  0x23   :  { %14087 = sst [smem:[#allocation72_spill]] %s13392_s6 }
  0x24   :  { %14088 = sst [smem:[#allocation73_spill]] %s13397_s24 }
  0x25   :  { %s13417_s24 = sld [smem:[%s14068_s0 + %s13238_s15]]   ;;  %s13242_s15 = smov 27  }
  0x26   :  { %14090 = sst [smem:[#allocation75_spill]] %s13412_s13 }
  0x27   :  { %s13422_s5 = sld [smem:[%s14068_s0 + %s13239_s22]]   ;;  %s13243_s22 = smov 28  }
  0x28   :  { %14089 = sst [smem:[#allocation74_spill]] %s13407_s4 }
  0x29   :  { %s13427_s4 = sld [smem:[%s14068_s0 + %s13240_s28]]   ;;  %s13244_s28 = smov 29  }
  0x2a   :  { %s13432_s13 = sld [smem:[%s14068_s0 + %s13241_s7]]   ;;  %s13245_s7 = smov 30  }
  0x2b   :  { %s13437_s6 = sld [smem:[%s14068_s0 + %s13242_s15]]   ;;  %s13246_s15 = smov 31  }
  0x2c   :  { %s13447_s20 = sld [smem:[%s14068_s0 + %s13244_s28]]   ;;  %s13248_s28 = smov 33  }
  0x2d   :  { %14091 = sst [smem:[#allocation76_spill]] %s13422_s5 }
  0x2e   :  { %s13442_s5 = sld [smem:[%s14068_s0 + %s13243_s22]]   ;;  %s13247_s22 = smov 32  }
  0x2f   :  { %s13457_s30 = sld [smem:[%s14068_s0 + %s13246_s15]]   ;;  %s13250_s15 = smov 35  }
  0x30   :  { %14092 = sst [smem:[#allocation77_spill]] %s13432_s13 }
  0x31   :  { %s13452_s13 = sld [smem:[%s14068_s0 + %s13245_s7]]   ;;  %s13249_s7 = smov 34  }
  0x32   :  { %s13467_s14 = sld [smem:[%s14068_s0 + %s13248_s28]]   ;;  %s13252_s28 = smov 37  }
  0x33   :  { %s13477_s3 = sld [smem:[%s14068_s0 + %s13250_s15]]  }
  0x34   :  { %14093 = sst [smem:[#allocation78_spill]] %s13442_s5 }
  0x35   :  { %s13462_s5 = sld [smem:[%s14068_s0 + %s13247_s22]]   ;;  %s13251_s22 = smov 36  }
  0x36   :  { %s9851_s21 = sld [smem:[%s14068_s0 + %s13252_s28]]  }
  0x37   :  { %14094 = sst [smem:[#allocation79_spill]] %s13452_s13 }
  0x38   :  { %s13472_s13 = sld [smem:[%s14068_s0 + %s13249_s7]]  }
  0x39   :  { %14097 = sst [smem:[#allocation82_spill]] %s13477_s3 }
  0x3a   :  { %s13495_s3 = sld [smem:[%s14068_s0 + %s13254_s16]]  }
  0x3b   :  { %14095 = sst [smem:[#allocation80_spill]] %s13462_s5 }
  0x3c   :  { %s13482_s5 = sld [smem:[%s14068_s0 + %s13251_s22]]   ;;  %v84_v0 = vstv %s9851_s21 }
  0x3d   :  { %85 = vst [vmem:[#allocation2] sm:$0x1] %v84_v0 }
  0x3e   :  { %14096 = sst [smem:[#allocation81_spill]] %s13472_s13 }
  0x3f   :  { %s13490_s13 = sld [smem:[%s14068_s0 + %s13253_s10]]  }
  0x40   :  { %86 = vsyncpa [#allocation4], 0 }
  0x41   :  { %87 = vsyncpa [#allocation6], 0 }
  0x42   :  { %88 = vsyncpa [#allocation9], 0 }
  0x43   :  { %89 = vsyncpa [#allocation12], 0 }
  0x44   :  { %90 = vsyncpa [#allocation15], 0 }
  0x45   :  { %91 = vsyncpa [#allocation18], 0 }
  0x46   :  { %92 = vsyncpa [#allocation21], 0 }
  0x47   :  { %93 = vsyncpa [#allocation24], 0 }
  0x48   :  { %94 = vsyncpa [#allocation27], 0 }
  0x49   :  { %95 = vsyncpa [#allocation30], 0 }
  0x4a   :  { %96 = vsyncpa [#allocation33], 0 }
  0x4b   :  { %97 = vsyncpa [#allocation36], 0 }
  0x4c   :  { %98 = vsyncpa [#allocation39], 0 }
  0x4d   :  { %99 = vsyncpa [#allocation42], 0 }
  0x4e   :  { %100 = vsyncpa [#allocation45], 0  ;;  %s13255_s22 = smov [#allocation5]   ;;  %s13256_s23 = smov [#allocation8]  }
  0x4f   :  { %s123_s0 = sshll.u32 %s13255_s22, 4  ;;  %s147_s21 = sshll.u32 %s13256_s23, 4  ;;  %s124_s0 = int_to_ptr.vmem [resolvable:$true] %s123_s0  ;;  %s148_s21 = int_to_ptr.vmem [resolvable:$true] %s147_s21 }
  0x50   :  { %s12634_s26 = scalar_lea.vmem %s124_s0, 16  ;;  %s12638_s28 = scalar_lea.vmem %s124_s0, 32 }
  0x51   :  { %p12635_p0 = scmp.ne.s32.totalorder %s124_s0, %s12634_s26  ;;  %p12639_p1 = scmp.lt.s32.totalorder %s124_s0, %s124_s0 }
  0x52   :  { %p12640_p2 = scmp.lt.s32.totalorder %s12638_s28, %s12634_s26 }
  0x54   :  { %p12641_p3 = por %p12640_p2, %p12639_p1 }
  0x56   :  { %p12642_p4 = pnand %p12641_p3, %p12635_p0 }
  0x58   :  { %12645 = shalt.err (!%p12642_p4)
}
  0x59   :  { %126 = dma.hbm_to_vmem [thread:$0]  %s13317_s17, 16, %s124_s0, [#allocation6]  }
  0x5a   :  { %s12654_s1 = scalar_lea.vmem %s148_s21, 16  ;;  %s12658_s2 = scalar_lea.vmem %s148_s21, 32 }
  0x5b   :  { %p12655_p5 = scmp.ne.s32.totalorder %s148_s21, %s12654_s1  ;;  %p12659_p6 = scmp.lt.s32.totalorder %s148_s21, %s148_s21 }
  0x5c   :  { %p12660_p7 = scmp.lt.s32.totalorder %s12658_s2, %s12654_s1 }
  0x5e   :  { %p12661_p8 = por %p12660_p7, %p12659_p6 }
  0x60   :  { %p12662_p9 = pnand %p12661_p8, %p12655_p5 }
  0x62   :  { %12665 = shalt.err (!%p12662_p9)
}
  0x63   :  { %150 = dma.hbm_to_vmem [thread:$0]  %s13332_s29, 16, %s148_s21, [#allocation9]  }
  0x64   :  { %s13257_s10 = smov [#allocation11]   ;;  %s13258_s11 = smov [#allocation14]  }
  0x65   :  { %s168_s7 = sshll.u32 %s13257_s10, 4  ;;  %s190_s16 = sshll.u32 %s13258_s11, 4  ;;  %s169_s7 = int_to_ptr.vmem [resolvable:$true] %s168_s7  ;;  %s191_s16 = int_to_ptr.vmem [resolvable:$true] %s190_s16 }
  0x66   :  { %s12674_s15 = scalar_lea.vmem %s169_s7, 128  ;;  %p12679_p11 = scmp.lt.s32.totalorder %s169_s7, %s169_s7 }
  0x67   :  { %p12675_p10 = scmp.ne.s32.totalorder %s169_s7, %s12674_s15  ;;  %p12680_p12 = scmp.lt.s32.totalorder %s12674_s15, %s12674_s15 }
  0x69   :  { %p12681_p13 = por %p12680_p12, %p12679_p11 }
  0x6b   :  { %p12682_p0 = pnand %p12681_p13, %p12675_p10 }
  0x6d   :  { %12685 = shalt.err (!%p12682_p0)
}
  0x6e   :  { %s13259_s17 = smov 64   ;;  %s13260_s18 = smov 4  }
  0x6f   :  { %174 = dma.hbm_to_vmem [thread:$0]  %s13342_s8, 128, %s169_s7, [#allocation12], %s13259_s17, %s13259_s17, %s13260_s18  }
  0x70   :  { %s12694_s29 = scalar_lea.vmem %s191_s16, 384  ;;  %p12699_p2 = scmp.lt.s32.totalorder %s191_s16, %s191_s16 }
  0x71   :  { %p12695_p1 = scmp.ne.s32.totalorder %s191_s16, %s12694_s29  ;;  %p12700_p3 = scmp.lt.s32.totalorder %s12694_s29, %s12694_s29 }
  0x73   :  { %p12701_p4 = por %p12700_p3, %p12699_p2 }
  0x75   :  { %p12702_p5 = pnand %p12701_p4, %p12695_p1 }
  0x77   :  { %12705 = shalt.err (!%p12702_p5)
}
  0x78   :  { %196 = dma.hbm_to_vmem [thread:$0]  %s13352_s19, 384, %s191_s16, [#allocation15], %s13259_s17, %s13259_s17, %s13260_s18  }
  0x79   :  { %s13261_s22 = smov [#allocation17]  }
  0x7a   :  { %s216_s0 = sshll.u32 %s13261_s22, 4  ;;  %s217_s0 = int_to_ptr.vmem [resolvable:$true] %s216_s0 }
  0x7b   :  { %s12714_s23 = scalar_lea.vmem %s217_s0, 24576  ;;  %p12719_p7 = scmp.lt.s32.totalorder %s217_s0, %s217_s0 }
  0x7c   :  { %p12715_p6 = scmp.ne.s32.totalorder %s217_s0, %s12714_s23  ;;  %p12720_p8 = scmp.lt.s32.totalorder %s12714_s23, %s12714_s23 }
  0x7e   :  { %p12721_p9 = por %p12720_p8, %p12719_p7 }
  0x80   :  { %p12722_p10 = pnand %p12721_p9, %p12715_p6 }
  0x82   :  { %12725 = shalt.err (!%p12722_p10)
}
  0x83   :  { %s13262_s8 = smov 128   ;;  %s13263_s21 = smov 8  }
  0x84   :  { %222 = dma.hbm_to_vmem [thread:$0]  %s13372_s12, 24576, %s217_s0, [#allocation18], %s13262_s8, %s13262_s8, %s13263_s21  }
  0x85   :  { %s13264_s26 = smov [#allocation20]   ;;  %s13265_s19 = smov [#allocation23]  }
  0x86   :  { %s239_s28 = sshll.u32 %s13264_s26, 4  ;;  %s262_s1 = sshll.u32 %s13265_s19, 4  ;;  %s240_s28 = int_to_ptr.vmem [resolvable:$true] %s239_s28  ;;  %s263_s1 = int_to_ptr.vmem [resolvable:$true] %s262_s1 }
  0x87   :  { %s12734_s2 = scalar_lea.vmem %s240_s28, 64  ;;  %p12739_p12 = scmp.lt.s32.totalorder %s240_s28, %s240_s28 }
  0x88   :  { %p12735_p11 = scmp.ne.s32.totalorder %s240_s28, %s12734_s2  ;;  %p12740_p13 = scmp.lt.s32.totalorder %s12734_s2, %s12734_s2 }
  0x8a   :  { %p12741_p0 = por %p12740_p13, %p12739_p12 }
  0x8c   :  { %p12742_p1 = pnand %p12741_p0, %p12735_p11 }
  0x8e   :  { %12745 = shalt.err (!%p12742_p1)
}
  0x8f   :  { %242 = dma.hbm_to_vmem [thread:$0]  %s13382_s27, 64, %s240_s28, [#allocation21]  }
  0x90   :  { %s12754_s10 = scalar_lea.vmem %s263_s1, 24576  ;;  %p12759_p3 = scmp.lt.s32.totalorder %s263_s1, %s263_s1 }
  0x91   :  { %p12755_p2 = scmp.ne.s32.totalorder %s263_s1, %s12754_s10  ;;  %p12760_p4 = scmp.lt.s32.totalorder %s12754_s10, %s12754_s10 }
  0x93   :  { %p12761_p5 = por %p12760_p4, %p12759_p3 }
  0x95   :  { %p12762_p6 = pnand %p12761_p5, %p12755_p2 }
  0x97   :  { %12765 = shalt.err (!%p12762_p6)
}
  0x98   :  { %s13266_s12 = smov 256   ;;  %s13267_s7 = smov 16  }
  0x99   :  { %268 = dma.hbm_to_vmem [thread:$0]  %s13402_s25, 24576, %s263_s1, [#allocation24], %s13266_s12, %s13266_s12, %s13267_s7  }
  0x9a   :  { %s13268_s11 = smov [#allocation26]   ;;  %s13269_s15 = smov [#allocation29]  }
  0x9b   :  { %s288_s16 = sshll.u32 %s13268_s11, 4  ;;  %s311_s29 = sshll.u32 %s13269_s15, 4  ;;  %s289_s16 = int_to_ptr.vmem [resolvable:$true] %s288_s16  ;;  %s312_s29 = int_to_ptr.vmem [resolvable:$true] %s311_s29 }
  0x9c   :  { %s12774_s22 = scalar_lea.vmem %s289_s16, 24576  ;;  %p12779_p8 = scmp.lt.s32.totalorder %s289_s16, %s289_s16 }
  0x9d   :  { %p12775_p7 = scmp.ne.s32.totalorder %s289_s16, %s12774_s22  ;;  %p12780_p9 = scmp.lt.s32.totalorder %s12774_s22, %s12774_s22 }
  0x9f   :  { %p12781_p10 = por %p12780_p9, %p12779_p8 }
  0xa1   :  { %p12782_p11 = pnand %p12781_p10, %p12775_p7 }
  0xa3   :  { %12785 = shalt.err (!%p12782_p11)
}
  0xa4   :  { %294 = dma.hbm_to_vmem [thread:$0]  %s13417_s24, 24576, %s289_s16, [#allocation27], %s13262_s8, %s13262_s8, %s13263_s21  }
  0xa5   :  { %s12794_s27 = scalar_lea.vmem %s312_s29, 32  ;;  %p12799_p13 = scmp.lt.s32.totalorder %s312_s29, %s312_s29 }
  0xa6   :  { %p12795_p12 = scmp.ne.s32.totalorder %s312_s29, %s12794_s27  ;;  %p12800_p0 = scmp.lt.s32.totalorder %s12794_s27, %s12794_s27 }
  0xa8   :  { %p12801_p1 = por %p12800_p0, %p12799_p13 }
  0xaa   :  { %p12802_p2 = pnand %p12801_p1, %p12795_p12 }
  0xac   :  { %12805 = shalt.err (!%p12802_p2)
}
  0xad   :  { %314 = dma.hbm_to_vmem [thread:$0]  %s13427_s4, 32, %s312_s29, [#allocation30]  }
  0xae   :  { %s13270_s25 = smov [#allocation32]   ;;  %s13271_s23 = smov [#allocation35]  }
  0xaf   :  { %s333_s0 = sshll.u32 %s13270_s25, 4  ;;  %s354_s26 = sshll.u32 %s13271_s23, 4  ;;  %s334_s0 = int_to_ptr.vmem [resolvable:$true] %s333_s0  ;;  %s355_s26 = int_to_ptr.vmem [resolvable:$true] %s354_s26 }
  0xb0   :  { %s12814_s28 = scalar_lea.vmem %s334_s0, 32  ;;  %p12819_p4 = scmp.lt.s32.totalorder %s334_s0, %s334_s0 }
  0xb1   :  { %p12815_p3 = scmp.ne.s32.totalorder %s334_s0, %s12814_s28  ;;  %p12820_p5 = scmp.lt.s32.totalorder %s12814_s28, %s12814_s28 }
  0xb3   :  { %p12821_p6 = por %p12820_p5, %p12819_p4 }
  0xb5   :  { %p12822_p7 = pnand %p12821_p6, %p12815_p3 }
  0xb7   :  { %12825 = shalt.err (!%p12822_p7)
}
  0xb8   :  { %336 = dma.hbm_to_vmem [thread:$0]  %s13437_s6, 32, %s334_s0, [#allocation33]  }
  0xb9   :  { %s12834_s24 = scalar_lea.vmem %s355_s26, 12288  ;;  %p12839_p9 = scmp.lt.s32.totalorder %s355_s26, %s355_s26 }
  0xba   :  { %p12835_p8 = scmp.ne.s32.totalorder %s355_s26, %s12834_s24  ;;  %p12840_p10 = scmp.lt.s32.totalorder %s12834_s24, %s12834_s24 }
  0xbc   :  { %p12841_p11 = por %p12840_p10, %p12839_p9 }
  0xbe   :  { %p12842_p12 = pnand %p12841_p11, %p12835_p8 }
  0xc0   :  { %12845 = shalt.err (!%p12842_p12)
}
  0xc1   :  { %360 = dma.hbm_to_vmem [thread:$0]  %s13447_s20, 12288, %s355_s26, [#allocation36], %s13262_s8, %s13262_s8, %s13263_s21  }
  0xc2   :  { %s13272_s4 = smov [#allocation38]   ;;  %s13273_s1 = smov [#allocation41]  }
  0xc3   :  { %s376_s19 = sshll.u32 %s13272_s4, 4  ;;  %s401_s2 = sshll.u32 %s13273_s1, 4  ;;  %s377_s19 = int_to_ptr.vmem [resolvable:$true] %s376_s19  ;;  %s402_s2 = int_to_ptr.vmem [resolvable:$true] %s401_s2 }
  0xc4   :  { %s12854_s10 = scalar_lea.vmem %s377_s19, 96  ;;  %p12859_p0 = scmp.lt.s32.totalorder %s377_s19, %s377_s19 }
  0xc5   :  { %p12855_p13 = scmp.ne.s32.totalorder %s377_s19, %s12854_s10  ;;  %p12860_p1 = scmp.lt.s32.totalorder %s12854_s10, %s12854_s10 }
  0xc7   :  { %p12861_p2 = por %p12860_p1, %p12859_p0 }
  0xc9   :  { %p12862_p3 = pnand %p12861_p2, %p12855_p13 }
  0xcb   :  { %12865 = shalt.err (!%p12862_p3)
}
  0xcc   :  { %s13274_s6 = smov 32   ;;  %s13275_s12 = smov 2  }
  0xcd   :  { %382 = dma.hbm_to_vmem [thread:$0]  %s13457_s30, 96, %s377_s19, [#allocation39], %s13274_s6, %s13274_s6, %s13275_s12  }
  0xce   :  { %s12874_s20 = scalar_lea.vmem %s402_s2, 32  ;;  %p12879_p5 = scmp.lt.s32.totalorder %s402_s2, %s402_s2 }
  0xcf   :  { %p12875_p4 = scmp.ne.s32.totalorder %s402_s2, %s12874_s20  ;;  %p12880_p6 = scmp.lt.s32.totalorder %s12874_s20, %s12874_s20 }
  0xd1   :  { %p12881_p7 = por %p12880_p6, %p12879_p5 }
  0xd3   :  { %p12882_p8 = pnand %p12881_p7, %p12875_p4 }
  0xd5   :  { %12885 = shalt.err (!%p12882_p8)
}
  0xd6   :  { %404 = dma.hbm_to_vmem [thread:$0]  %s13467_s14, 32, %s402_s2, [#allocation42]  }
  0xd7   :  { %s13276_s7 = smov [#allocation3]   ;;  %s13277_s16 = smov [#allocation7]  }
  0xd8   :  { %s108_s11 = sshll.u32 %s13276_s7, 4  ;;  %s132_s15 = sshll.u32 %s13277_s16, 4  ;;  %s109_s11 = int_to_ptr.vmem [resolvable:$true] %s108_s11  ;;  %s133_s15 = int_to_ptr.vmem [resolvable:$true] %s132_s15 }
  0xd9   :  { %s12894_s29 = scalar_lea.vmem %s109_s11, 768  ;;  %p12899_p10 = scmp.lt.s32.totalorder %s109_s11, %s109_s11 }
  0xda   :  { %p12895_p9 = scmp.ne.s32.totalorder %s109_s11, %s12894_s29  ;;  %p12900_p11 = scmp.lt.s32.totalorder %s12894_s29, %s12894_s29 }
  0xdc   :  { %p12901_p12 = por %p12900_p11, %p12899_p10 }
  0xde   :  { %p12902_p13 = pnand %p12901_p12, %p12895_p9 }
  0xe0   :  { %12905 = shalt.err (!%p12902_p13)
}
  0xe1   :  { %114 = dma.hbm_to_vmem [thread:$0]  %s13307_s9, 768, %s109_s11, [#allocation4], %s13259_s17, %s13259_s17, %s13260_s18  }
  0xe2   :  { %s12914_s30 = scalar_lea.vmem %s133_s15, 384  ;;  %p12919_p1 = scmp.lt.s32.totalorder %s133_s15, %s133_s15 }
  0xe3   :  { %p12915_p0 = scmp.ne.s32.totalorder %s133_s15, %s12914_s30  ;;  %p12920_p2 = scmp.lt.s32.totalorder %s12914_s30, %s12914_s30 }
  0xe5   :  { %p12921_p3 = por %p12920_p2, %p12919_p1 }
  0xe7   :  { %p12922_p4 = pnand %p12921_p3, %p12915_p0 }
  0xe9   :  { %12925 = shalt.err (!%p12922_p4)
}
  0xea   :  { %s14098_s14 = sld [smem:[#allocation63_spill]]  ;;  %s13278_s22 = smov [#allocation10]  }
  0xeb   :  { %s156_s27 = sshll.u32 %s13278_s22, 4  ;;  %s13279_s25 = smov [#allocation13]   ;;  %s157_s27 = int_to_ptr.vmem [resolvable:$true] %s156_s27 }
  0xec   :  { %s181_s0 = sshll.u32 %s13279_s25, 4  ;;  %s12934_s23 = scalar_lea.vmem %s157_s27, 128  ;;  %s182_s0 = int_to_ptr.vmem [resolvable:$true] %s181_s0 }
  0xed   :  { %p12935_p5 = scmp.ne.s32.totalorder %s157_s27, %s12934_s23  ;;  %p12939_p6 = scmp.lt.s32.totalorder %s157_s27, %s157_s27 }
  0xee   :  { %p12940_p7 = scmp.lt.s32.totalorder %s12934_s23, %s12934_s23 }
  0xf0   :  { %138 = dma.hbm_to_vmem [thread:$0]  %s14098_s14, 384, %s133_s15, [#allocation6], %s13259_s17, %s13259_s17, %s13260_s18  }
  0xf1   :  { %p12941_p8 = por %p12940_p7, %p12939_p6 }
  0xf3   :  { %p12942_p9 = pnand %p12941_p8, %p12935_p5 }
  0xf5   :  { %12945 = shalt.err (!%p12942_p9)
}
  0xf6   :  { %s14099_s9 = sld [smem:[#allocation65_spill]]  ;;  %s12954_s26 = scalar_lea.vmem %s182_s0, 16 }
  0xf7   :  { %p12955_p10 = scmp.ne.s32.totalorder %s182_s0, %s12954_s26  ;;  %s12958_s28 = scalar_lea.vmem %s182_s0, 32 }
  0xf8   :  { %p12959_p11 = scmp.lt.s32.totalorder %s182_s0, %s182_s0  ;;  %p12960_p12 = scmp.lt.s32.totalorder %s12958_s28, %s12954_s26 }
  0xfa   :  { %p12961_p13 = por %p12960_p12, %p12959_p11 }
  0xfc   :  { %162 = dma.hbm_to_vmem [thread:$0]  %s14099_s9, 128, %s157_s27, [#allocation9], %s13259_s17, %s13259_s17, %s13260_s18  }
  0xfd   :  { %p12962_p0 = pnand %p12961_p13, %p12955_p10 }
  0xff   :  { %12965 = shalt.err (!%p12962_p0)
}
 0x100   :  { %s14100_s24 = sld [smem:[#allocation66_spill]]  ;;  %s13280_s4 = smov [#allocation16]  }
 0x101   :  { %s205_s19 = sshll.u32 %s13280_s4, 4  ;;  %s13281_s1 = smov [#allocation19]   ;;  %s206_s19 = int_to_ptr.vmem [resolvable:$true] %s205_s19 }
 0x102   :  { %s229_s2 = sshll.u32 %s13281_s1, 4  ;;  %s12974_s10 = scalar_lea.vmem %s206_s19, 64  ;;  %s230_s2 = int_to_ptr.vmem [resolvable:$true] %s229_s2 }
 0x103   :  { %p12975_p1 = scmp.ne.s32.totalorder %s206_s19, %s12974_s10  ;;  %p12979_p2 = scmp.lt.s32.totalorder %s206_s19, %s206_s19 }
 0x104   :  { %p12980_p3 = scmp.lt.s32.totalorder %s12974_s10, %s12974_s10 }
 0x106   :  { %184 = dma.hbm_to_vmem [thread:$0]  %s14100_s24, 16, %s182_s0, [#allocation12]  }
 0x107   :  { %p12981_p4 = por %p12980_p3, %p12979_p2 }
 0x109   :  { %p12982_p5 = pnand %p12981_p4, %p12975_p1 }
 0x10b   :  { %12985 = shalt.err (!%p12982_p5)
}
 0x10c   :  { %s14101_s17 = sld [smem:[#allocation68_spill]]  ;;  %s12994_s18 = scalar_lea.vmem %s230_s2, 32 }
 0x10d   :  { %p12995_p6 = scmp.ne.s32.totalorder %s230_s2, %s12994_s18  ;;  %p12999_p7 = scmp.lt.s32.totalorder %s230_s2, %s230_s2 }
 0x10e   :  { %p13000_p8 = scmp.lt.s32.totalorder %s12994_s18, %s12994_s18 }
 0x110   :  { %p13001_p9 = por %p13000_p8, %p12999_p7 }
 0x112   :  { %208 = dma.hbm_to_vmem [thread:$0]  %s14101_s17, 64, %s206_s19, [#allocation15]  }
 0x113   :  { %p13002_p10 = pnand %p13001_p9, %p12995_p6 }
 0x115   :  { %13005 = shalt.err (!%p13002_p10)
}
 0x116   :  { %s14102_s20 = sld [smem:[#allocation70_spill]]  ;;  %s13282_s7 = smov [#allocation22]  }
 0x117   :  { %s251_s11 = sshll.u32 %s13282_s7, 4  ;;  %s13283_s16 = smov [#allocation25]   ;;  %s252_s11 = int_to_ptr.vmem [resolvable:$true] %s251_s11 }
 0x118   :  { %s276_s15 = sshll.u32 %s13283_s16, 4  ;;  %s13014_s29 = scalar_lea.vmem %s252_s11, 32  ;;  %s277_s15 = int_to_ptr.vmem [resolvable:$true] %s276_s15 }
 0x119   :  { %p13015_p11 = scmp.ne.s32.totalorder %s252_s11, %s13014_s29  ;;  %p13019_p12 = scmp.lt.s32.totalorder %s252_s11, %s252_s11 }
 0x11a   :  { %p13020_p13 = scmp.lt.s32.totalorder %s13014_s29, %s13014_s29 }
 0x11c   :  { %232 = dma.hbm_to_vmem [thread:$0]  %s14102_s20, 32, %s230_s2, [#allocation18]  }
 0x11d   :  { %p13021_p0 = por %p13020_p13, %p13019_p12 }
 0x11f   :  { %p13022_p1 = pnand %p13021_p0, %p13015_p11 }
 0x121   :  { %13025 = shalt.err (!%p13022_p1)
}
 0x122   :  { %s14103_s30 = sld [smem:[#allocation72_spill]]  ;;  %s13034_s14 = scalar_lea.vmem %s277_s15, 96 }
 0x123   :  { %p13035_p2 = scmp.ne.s32.totalorder %s277_s15, %s13034_s14  ;;  %p13039_p3 = scmp.lt.s32.totalorder %s277_s15, %s277_s15 }
 0x124   :  { %p13040_p4 = scmp.lt.s32.totalorder %s13034_s14, %s13034_s14 }
 0x126   :  { %p13041_p5 = por %p13040_p4, %p13039_p3 }
 0x128   :  { %254 = dma.hbm_to_vmem [thread:$0]  %s14103_s30, 32, %s252_s11, [#allocation21]  }
 0x129   :  { %p13042_p6 = pnand %p13041_p5, %p13035_p2 }
 0x12b   :  { %13045 = shalt.err (!%p13042_p6)
}
 0x12c   :  { %s14104_s22 = sld [smem:[#allocation75_spill]]  ;;  %s13284_s27 = smov [#allocation28]  }
 0x12d   :  { %s301_s25 = sshll.u32 %s13284_s27, 4  ;;  %s13285_s0 = smov [#allocation31]   ;;  %s302_s25 = int_to_ptr.vmem [resolvable:$true] %s301_s25 }
 0x12e   :  { %s320_s23 = sshll.u32 %s13285_s0, 4  ;;  %s13054_s9 = scalar_lea.vmem %s302_s25, 32  ;;  %s321_s23 = int_to_ptr.vmem [resolvable:$true] %s320_s23 }
 0x12f   :  { %p13055_p7 = scmp.ne.s32.totalorder %s302_s25, %s13054_s9  ;;  %p13059_p8 = scmp.lt.s32.totalorder %s302_s25, %s302_s25 }
 0x130   :  { %p13060_p9 = scmp.lt.s32.totalorder %s13054_s9, %s13054_s9 }
 0x132   :  { %282 = dma.hbm_to_vmem [thread:$0]  %s14104_s22, 96, %s277_s15, [#allocation24], %s13274_s6, %s13274_s6, %s13275_s12  }
 0x133   :  { %p13061_p10 = por %p13060_p9, %p13059_p8 }
 0x135   :  { %p13062_p11 = pnand %p13061_p10, %p13055_p7 }
 0x137   :  { %13065 = shalt.err (!%p13062_p11)
}
 0x138   :  { %s14105_s26 = sld [smem:[#allocation76_spill]]  ;;  %s13074_s28 = scalar_lea.vmem %s321_s23, 4096 }
 0x139   :  { %p13075_p12 = scmp.ne.s32.totalorder %s321_s23, %s13074_s28  ;;  %p13079_p13 = scmp.lt.s32.totalorder %s321_s23, %s321_s23 }
 0x13a   :  { %p13080_p0 = scmp.lt.s32.totalorder %s13074_s28, %s13074_s28 }
 0x13c   :  { %p13081_p1 = por %p13080_p0, %p13079_p13 }
 0x13e   :  { %304 = dma.hbm_to_vmem [thread:$0]  %s14105_s26, 32, %s302_s25, [#allocation27]  }
 0x13f   :  { %p13082_p2 = pnand %p13081_p1, %p13075_p12 }
 0x141   :  { %13085 = shalt.err (!%p13082_p2)
}
 0x142   :  { %s14106_s24 = sld [smem:[#allocation77_spill]]  ;;  %s13286_s4 = smov [#allocation34]  }
 0x143   :  { %s342_s19 = sshll.u32 %s13286_s4, 4  ;;  %s13287_s1 = smov [#allocation37]   ;;  %s343_s19 = int_to_ptr.vmem [resolvable:$true] %s342_s19 }
 0x144   :  { %s367_s2 = sshll.u32 %s13287_s1, 4  ;;  %s13094_s10 = scalar_lea.vmem %s343_s19, 96  ;;  %s368_s2 = int_to_ptr.vmem [resolvable:$true] %s367_s2 }
 0x145   :  { %p13095_p3 = scmp.ne.s32.totalorder %s343_s19, %s13094_s10  ;;  %p13099_p4 = scmp.lt.s32.totalorder %s343_s19, %s343_s19 }
 0x146   :  { %p13100_p5 = scmp.lt.s32.totalorder %s13094_s10, %s13094_s10 }
 0x148   :  { %326 = dma.hbm_to_vmem [thread:$0]  %s14106_s24, 4096, %s321_s23, [#allocation30], %s13262_s8, %s13262_s8, %s13263_s21  }
 0x149   :  { %p13101_p6 = por %p13100_p5, %p13099_p4 }
 0x14b   :  { %p13102_p7 = pnand %p13101_p6, %p13095_p3 }
 0x14d   :  { %13105 = shalt.err (!%p13102_p7)
}
 0x14e   :  { %s14107_s17 = sld [smem:[#allocation78_spill]]  ;;  %s13114_s18 = scalar_lea.vmem %s368_s2, 32 }
 0x14f   :  { %p13115_p8 = scmp.ne.s32.totalorder %s368_s2, %s13114_s18  ;;  %p13119_p9 = scmp.lt.s32.totalorder %s368_s2, %s368_s2 }
 0x150   :  { %p13120_p10 = scmp.lt.s32.totalorder %s13114_s18, %s13114_s18 }
 0x152   :  { %p13121_p11 = por %p13120_p10, %p13119_p9 }
 0x154   :  { %348 = dma.hbm_to_vmem [thread:$0]  %s14107_s17, 96, %s343_s19, [#allocation33], %s13274_s6, %s13274_s6, %s13275_s12  }
 0x155   :  { %p13122_p12 = pnand %p13121_p11, %p13115_p8 }
 0x157   :  { %13125 = shalt.err (!%p13122_p12)
}
 0x158   :  { %s14108_s20 = sld [smem:[#allocation79_spill]]  ;;  %s13288_s7 = smov [#allocation40]  }
 0x159   :  { %s388_s11 = sshll.u32 %s13288_s7, 4  ;;  %s13289_s16 = smov [#allocation43]   ;;  %s389_s11 = int_to_ptr.vmem [resolvable:$true] %s388_s11 }
 0x15a   :  { %s411_s15 = sshll.u32 %s13289_s16, 4  ;;  %s13134_s29 = scalar_lea.vmem %s389_s11, 12288  ;;  %s412_s15 = int_to_ptr.vmem [resolvable:$true] %s411_s15 }
 0x15b   :  { %p13135_p13 = scmp.ne.s32.totalorder %s389_s11, %s13134_s29  ;;  %p13139_p0 = scmp.lt.s32.totalorder %s389_s11, %s389_s11 }
 0x15c   :  { %p13140_p1 = scmp.lt.s32.totalorder %s13134_s29, %s13134_s29 }
 0x15e   :  { %370 = dma.hbm_to_vmem [thread:$0]  %s14108_s20, 32, %s368_s2, [#allocation36]  }
 0x15f   :  { %p13141_p2 = por %p13140_p1, %p13139_p0 }
 0x161   :  { %p13142_p3 = pnand %p13141_p2, %p13135_p13 }
 0x163   :  { %13145 = shalt.err (!%p13142_p3)
}
 0x164   :  { %s14109_s6 = sld [smem:[#allocation80_spill]]  ;;  %s13154_s12 = scalar_lea.vmem %s412_s15, 32 }
 0x165   :  { %p13155_p4 = scmp.ne.s32.totalorder %s412_s15, %s13154_s12  ;;  %p13159_p5 = scmp.lt.s32.totalorder %s412_s15, %s412_s15 }
 0x166   :  { %p13160_p6 = scmp.lt.s32.totalorder %s13154_s12, %s13154_s12 }
 0x168   :  { %p13161_p7 = por %p13160_p6, %p13159_p5 }
 0x16a   :  { %394 = dma.hbm_to_vmem [thread:$0]  %s14109_s6, 12288, %s389_s11, [#allocation39], %s13262_s8, %s13262_s8, %s13263_s21  }
 0x16b   :  { %p13162_p8 = pnand %p13161_p7, %p13155_p4 }
 0x16d   :  { %13165 = shalt.err (!%p13162_p8)
}
 0x16e   :  { %s14110_s30 = sld [smem:[#allocation81_spill]]  ;;  %s13290_s14 = smov [#allocation44]  }
 0x16f   :  { %s420_s22 = sshll.u32 %s13290_s14, 4  ;;  %s421_s22 = int_to_ptr.vmem [resolvable:$true] %s420_s22 }
 0x170   :  { %s13174_s27 = scalar_lea.vmem %s421_s22, 4096  ;;  %p13179_p10 = scmp.lt.s32.totalorder %s421_s22, %s421_s22 }
 0x171   :  { %p13175_p9 = scmp.ne.s32.totalorder %s421_s22, %s13174_s27  ;;  %p13180_p11 = scmp.lt.s32.totalorder %s13174_s27, %s13174_s27 }
 0x173   :  { %p13181_p12 = por %p13180_p11, %p13179_p10 }
 0x174   :  { %414 = dma.hbm_to_vmem [thread:$0]  %s14110_s30, 32, %s412_s15, [#allocation42]  }
 0x175   :  { %p13182_p13 = pnand %p13181_p12, %p13175_p9 }
 0x177   :  { %13185 = shalt.err (!%p13182_p13)
}
 0x178   :  { %s14111_s25 = sld [smem:[#allocation82_spill]] }
 0x17e   :  { %426 = dma.hbm_to_vmem [thread:$0]  %s14111_s25, 4096, %s421_s22, [#allocation45], %s13262_s8, %s13262_s8, %s13263_s21  }
 0x17f   :  { %13186 = dma.done.wait [#allocation4], 768  }
 0x180   :  { %13187 = vsyncadd [#allocation4], 4294966528 }
 0x181   :  { %13188 = dma.done.wait [#allocation6], 400  }
 0x182   :  { %13189 = vsyncadd [#allocation6], 4294966896 }
 0x183   :  { %13190 = dma.done.wait [#allocation9], 144  }
 0x184   :  { %13191 = vsyncadd [#allocation9], 4294967152 }
 0x185   :  { %13192 = dma.done.wait [#allocation12], 144  }
 0x186   :  { %13193 = vsyncadd [#allocation12], 4294967152 }
 0x187   :  { %13194 = dma.done.wait [#allocation15], 448  }
 0x188   :  { %13195 = vsyncadd [#allocation15], 4294966848 }
 0x189   :  { %13196 = dma.done.wait [#allocation18], 24608  }
 0x18a   :  { %13197 = vsyncadd [#allocation18], 4294942688 }
 0x18b   :  { %13198 = dma.done.wait [#allocation21], 96  }
 0x18c   :  { %13199 = vsyncadd [#allocation21], 4294967200 }
 0x18d   :  { %13200 = dma.done.wait [#allocation24], 24672  }
 0x18e   :  { %13201 = vsyncadd [#allocation24], 4294942624 }
 0x18f   :  { %13202 = dma.done.wait [#allocation27], 24608  }
 0x190   :  { %13203 = vsyncadd [#allocation27], 4294942688 }
 0x191   :  { %13204 = dma.done.wait [#allocation30], 4128  }
 0x192   :  { %13205 = vsyncadd [#allocation30], 4294963168 }
 0x193   :  { %13206 = dma.done.wait [#allocation33], 128  }
 0x194   :  { %13207 = vsyncadd [#allocation33], 4294967168 }
 0x195   :  { %13208 = dma.done.wait [#allocation36], 12320  }
 0x196   :  { %13209 = vsyncadd [#allocation36], 4294954976 }
 0x197   :  { %13210 = dma.done.wait [#allocation39], 12384  }
 0x198   :  { %13211 = vsyncadd [#allocation39], 4294954912 }
 0x199   :  { %13212 = dma.done.wait [#allocation42], 64  }
 0x19a   :  { %13213 = vsyncadd [#allocation42], 4294967232 }
 0x19b   :  { %13214 = dma.done.wait [#allocation45], 4096  }
 0x19c   :  { %13215 = vsyncadd [#allocation45], 4294963200  ;;  %s14112_s8 = sld [smem:[#allocation61_spill]]  ;;  %v11299_v3 = vld [vmem:[#allocation3] sm:$0xff]   ;;  %vm548_vm0 = vcmask 261120   ;;  %v11300_v4 = vld [vmem:[#allocation3 + $0x10] sm:$0xff]  }
 0x19d   :  { %s14113_s21 = sld [smem:[#allocation62_spill]]  ;;  %v11301_v5 = vld [vmem:[#allocation3 + $0x8] sm:$0xff]   ;;  %11024 = vmatprep.mubr.msk.bf16.mxu0 %vm548_vm0, %v11299_v3  ;;  %11032 = vmatprep.mubr.msk.bf16.mxu1 %vm548_vm0, %v11300_v4  ;;  %v11302_v6 = vld [vmem:[#allocation3 + $0x18] sm:$0xff]   ;;  %v11305_v15 = vld [vmem:[#allocation3 + $0x20] sm:$0xff]   ;;  %vm689_vm1 = vcmask 130048   ;;  %v13291_v36 = vmov 0.0  }
 0x19e   :  { %v11306_v24 = vld [vmem:[#allocation3 + $0x28] sm:$0xff]   ;;  %vm13292_vm2 = vmmov 0   ;;  %v9881_v44 = vld [vmem:[#allocation5] ss:$0 sm:$0xff]  ;;  %s14114_s0 = sld [smem:[#allocation64_spill]]  ;;  %v11308_v0 = vld [vmem:[#allocation7] sm:$0xff]  }
 0x19f   :  { %s14115_s23 = sld [smem:[#allocation67_spill]]  ;;  %vm1783_vm3 = vcmask 523264   ;;  %vm4180_vm4 = vcmask 1043456   ;;  %vm4176_vm5 = vcmask 64512   ;;  %vm7775_vm6 = vcmask 1041408  }
 0x1a0   :  { %s14116_s9 = sld [smem:[#allocation69_spill]]  ;;  %vm7771_vm7 = vcmask 31744   ;;  %vm9794_vm8 = vcmask 1024  }
 0x1a1   :  { %s14117_s26 = sld [smem:[#allocation71_spill]] }
 0x1a2   :  { %v11297_v1 = vld [vmem:[%s14112_s8 + $0x8] sm:$0xff]   ;;  %v11298_v2 = vld [vmem:[%s14112_s8] sm:$0xff]   ;;  %s14118_s28 = sld [smem:[#allocation73_spill]] }
 0x1a3   :  { %11020 = vmatprep.subr.bf16.mxu0 %v11297_v1  ;;  %11028 = vmatprep.subr.bf16.mxu1 %v11297_v1  ;;  %v11303_v7 = vld [vmem:[%s14113_s21 + $0x8] sm:$0xff]   ;;  %v11304_v8 = vld [vmem:[%s14113_s21] sm:$0xff]   ;;  %v11307_v25 = vld [vmem:[%s14113_s21 + $0x10] sm:$0xff]   ;;  %s14119_s24 = sld [smem:[#allocation74_spill]] }
 0x1a4   :  { %11021 = vmatpush3.bf16.msra.mxu0 %v11297_v1  ;;  %11029 = vmatpush3.bf16.msra.mxu1 %v11297_v1  ;;  %v13580_v22 = vld [vmem:[%s14112_s8 + $0x8] sm:$0xff]   ;;  %v13585_v23 = vld [vmem:[%s14112_s8] sm:$0xff]   ;;  %v11311_v3 = vld [vmem:[%s14114_s0 + $0x38] sm:$0xff]  }
 0x1a5   :  { %11022 = vmatprep.subr.bf16.mxu0 %v11298_v2  ;;  %11030 = vmatprep.subr.bf16.mxu1 %v11298_v2  ;;  %v11312_v4 = vld [vmem:[%s14114_s0 + $0x70] sm:$0xff]  }
 0x1a8   :  { %11023 = vmatpush3.bf16.msra.mxu0 %v11298_v2  ;;  %11031 = vmatpush3.bf16.msra.mxu1 %v11298_v2  ;;  %v11310_v2 = vld [vmem:[%s14114_s0 + $0x78] sm:$0xff]  }
 0x1a9   :  { %11036 = vmatprep.subr.bf16.mxu0 %v11303_v7  ;;  %11042 = vmatprep.subr.bf16.mxu1 %v11304_v8 }
 0x1ab   :  { %11025 = vmatmul.mubr.msk.bf16.vlgmr.msra.gmra.mxu0 %vm548_vm0, %v11301_v5  ;;  %11033 = vmatmul.mubr.msk.bf16.vlgmr.msra.gmra.mxu1 %vm548_vm0, %v11302_v6  ;;  %v11313_v5 = vld [vmem:[%s14114_s0 + $0x30] sm:$0xff]   ;;  %v11314_v6 = vld [vmem:[%s14114_s0 + $0x68] sm:$0xff]  }
 0x1ac   :  { %11037 = vmatpush3.bf16.msra.mxu0 %v11303_v7  ;;  %11043 = vmatpush3.bf16.msra.mxu1 %v11304_v8  ;;  %v11315_v7 = vld [vmem:[%s14114_s0 + $0x28] sm:$0xff]   ;;  %v11316_v8 = vld [vmem:[%s14114_s0 + $0x60] sm:$0xff]  }
 0x1ad   :  { %11048 = vmatprep.subr.bf16.mxu0 %v11297_v1  ;;  %11056 = vmatprep.subr.bf16.mxu1 %v11307_v25  ;;  %v11309_v1 = vld [vmem:[#allocation7 + $0x8] sm:$0xff]  }
 0x26b   :  { %v11026_v9 = vpop.f32.mrf.mxu0  ;;  %v11034_v10 = vpop.f32.mrf.mxu1 }
 0x26d   :  { %v589_v11 = vpop.f32.mrf.mxu0  ;;  %v663_v12 = vpop.f32.mrf.mxu1 }
 0x26f   :  { %v11027_v13 = vpop.f32.mrf.mxu0  ;;  %v11035_v14 = vpop.f32.mrf.mxu1 }
 0x270   :  { %v605_v16 = vpack.c.bf16 %v11027_v13, %v11026_v9  ;;  %v679_v21 = vpack.c.bf16 %v11035_v14, %v11034_v10  ;;  %v11317_v9 = vld [vmem:[%s14114_s0 + $0x20] sm:$0xff]   ;;  %v11318_v10 = vld [vmem:[%s14114_s0 + $0x58] sm:$0xff]   ;;  %v11321_v13 = vld [vmem:[%s14114_s0 + $0x10] sm:$0xff]  }
 0x271   :  { %v592_v17 = vpop.f32.mrf.mxu0  ;;  %v666_v18 = vpop.f32.mrf.mxu1  ;;  %v11322_v14 = vld [vmem:[%s14114_s0 + $0x48] sm:$0xff]  }
 0x272   :  { %v604_v19 = vpack.c.bf16 %v592_v17, %v589_v11  ;;  %v678_v20 = vpack.c.bf16 %v666_v18, %v663_v12  ;;  %v11319_v11 = vld [vmem:[%s14114_s0 + $0x18] sm:$0xff]   ;;  %v11320_v12 = vld [vmem:[%s14114_s0 + $0x50] sm:$0xff]   ;;  %v11325_v17 = vld [vmem:[%s14114_s0] sm:$0xff]  }
 0x274   :  { %11038 = vmatprep.mubr.msk.bf16.mxu0 %vm689_vm1, %v678_v20  ;;  %11044 = vmatprep.mubr.msk.bf16.mxu1 %vm689_vm1, %v604_v19 }
 0x275   :  { %11039 = vmatmul.mubr.msk.bf16.vlgmr.msra.gmra.mxu0 %vm689_vm1, %v679_v21  ;;  %11045 = vmatmul.mubr.msk.bf16.vlgmr.msra.gmra.mxu1 %vm689_vm1, %v605_v16  ;;  %v11324_v16 = vld [vmem:[%s14114_s0 + $0x40] sm:$0xff]  }
 0x276   :  { %11049 = vmatpush3.bf16.msra.mxu0 %v13580_v22  ;;  %11052 = vmatprep.mubr.msk.bf16.mxu0 %vm548_vm0, %v11305_v15  ;;  %v11323_v15 = vld [vmem:[%s14114_s0 + $0x8] sm:$0xff]  }
 0x277   :  { %11050 = vmatprep.subr.bf16.mxu0 %v13585_v23  ;;  %11057 = vmatpush3.bf16.msra.mxu1 %v11307_v25 }
 0x278   :  { %11070 = vmatprep.subr.bf16.mxu1 %v13291_v36 }
 0x27a   :  { %11051 = vmatpush3.bf16.msra.mxu0 %v13585_v23 }
 0x27b   :  { %11062 = vmatprep.subr.bf16.mxu0 %v13291_v36 }
 0x27d   :  { %11053 = vmatmul.mubr.msk.bf16.vlgmr.msra.gmra.mxu0 %vm548_vm0, %v11306_v24 }
 0x27e   :  { %11066 = vmatprep.mubr.msk.bf16.mxu0 %vm13292_vm2, %v13291_v36 }
 0x335   :  { %v11040_v26 = vpop.f32.mrf.mxu0  ;;  %v11046_v37 = vpop.f32.mrf.mxu1 }
 0x336   :  { %v800_v41 = vadd.f32 %v11046_v37, %v11040_v26  ;;  %v11333_v37 = vld [vmem:[%s14114_s0 + $0x90] sm:$0xff]  }
 0x337   :  { %v730_v27 = vpop.f32.mrf.mxu0  ;;  %v791_v38 = vpop.f32.mrf.mxu1 }
 0x338   :  { %v792_v46 = vadd.f32 %v791_v38, %v730_v27  ;;  %v11334_v38 = vld [vmem:[%s14114_s0 + $0x88] sm:$0xff]  }
 0x339   :  { %v11041_v28 = vpop.f32.mrf.mxu0  ;;  %v11047_v39 = vpop.f32.mrf.mxu1 }
 0x33a   :  { %v803_v47 = vadd.f32 %v11047_v39, %v11041_v28  ;;  %v11328_v28 = vld [vmem:[%s14114_s0 + $0xb8] sm:$0xff]  }
 0x33b   :  { %v733_v29 = vpop.f32.mrf.mxu0  ;;  %v794_v40 = vpop.f32.mrf.mxu1  ;;  %v11336_v39 = vld [vmem:[#allocation11] sm:$0xff]  }
 0x33c   :  { %v795_v49 = vadd.f32 %v794_v40, %v733_v29 }
 0x33d   :  { %v11054_v30 = vpop.f32.mrf.mxu0 }
 0x33f   :  { %v861_v31 = vpop.f32.mrf.mxu0 }
 0x341   :  { %v11055_v32 = vpop.f32.mrf.mxu0 }
 0x342   :  { %v877_v35 = vpack.c.bf16 %v11055_v32, %v11054_v30  ;;  %v11326_v32 = vld [vmem:[#allocation7 + $0x10] sm:$0xff]  }
 0x343   :  { %v864_v33 = vpop.f32.mrf.mxu0 }
 0x344   :  { %v876_v34 = vpack.c.bf16 %v864_v33, %v861_v31  ;;  %v11329_v31 = vld [vmem:[%s14114_s0 + $0xb0] sm:$0xff]   ;;  %v11330_v33 = vld [vmem:[%s14114_s0 + $0xa8] sm:$0xff]  }
 0x346   :  { %11058 = vmatprep.mubr.msk.bf16.mxu1 %vm689_vm1, %v876_v34  ;;  %v11331_v34 = vld [vmem:[%s14114_s0 + $0xa0] sm:$0xff]  }
 0x347   :  { %11059 = vmatmul.mubr.msk.bf16.vlgmr.msra.gmra.mxu1 %vm689_vm1, %v877_v35  ;;  %v11327_v35 = vld [vmem:[#allocation10] sm:$0xff]  }
 0x348   :  { %11074 = vmatprep.mubr.msk.bf16.mxu1 %vm13292_vm2, %v13291_v36 }
 0x407   :  { %v11060_v42 = vpop.f32.mrf.mxu1 }
 0x408   :  { %v944_v43 = vadd.f32 %v11060_v42, %v800_v41 }
 0x409   :  { %v927_v45 = vpop.f32.mrf.mxu1 }
 0x40a   :  { %v955_v50 = vadd.f32 %v9881_v44, %v944_v43  ;;  %v942_v51 = vadd.f32 %v927_v45, %v792_v46 }
 0x40b   :  { %v11061_v48 = vpop.f32.mrf.mxu1 }
 0x40c   :  { %v945_v52 = vadd.f32 %v11061_v48, %v803_v47  ;;  %v959_v56 = vmax.f32 %v955_v50, 0.0  ;;  %v953_v57 = vadd.f32 %v9881_v44, %v942_v51 }
 0x40d   :  { %v930_v53 = vpop.f32.mrf.mxu1 }
 0x40e   :  { %v956_v54 = vadd.f32 %v9881_v44, %v945_v52  ;;  %v943_v55 = vadd.f32 %v930_v53, %v795_v49  ;;  %v957_v62 = vmax.f32 %v953_v57, 0.0 }
 0x410   :  { %v960_v58 = vmax.f32 %v956_v54, 0.0  ;;  %v954_v59 = vadd.f32 %v9881_v44, %v943_v55 }
 0x412   :  { %v13599_v60 = vpack.c.bf16 %v960_v58, %v959_v56  ;;  %v958_v61 = vmax.f32 %v954_v59, 0.0 }
 0x414   :  { %11063 = vmatpush3.bf16.msra.mxu0 %v13599_v60  ;;  %11071 = vmatpush3.bf16.msra.mxu1 %v13599_v60  ;;  %v13605_v63 = vpack.c.bf16 %v958_v61, %v957_v62  ;;  %v11341_v61 = vld [vmem:[%s14115_s23 + $0xe4] ss:$16 sps:$4 sm:$0xff]  }
 0x415   :  { %11064 = vmatprep.subr.bf16.mxu0 %v13291_v36  ;;  %11072 = vmatprep.subr.bf16.mxu1 %v13291_v36 }
 0x418   :  { %11065 = vmatpush3.bf16.msra.mxu0 %v13605_v63  ;;  %11073 = vmatpush3.bf16.msra.mxu1 %v13605_v63 }
 0x419   :  { %11078 = vmatprep.subr.bf16.mxu0 %v13291_v36  ;;  %11098 = vmatprep.subr.bf16.mxu1 %v13291_v36 }
 0x41b   :  { %11067 = vmatmul.mubr.msk.bf16.vlgmr.msra.gmra.mxu0 %vm548_vm0, %v11308_v0  ;;  %11075 = vmatmul.mubr.msk.bf16.vlgmr.msra.gmra.mxu1 %vm548_vm0, %v11309_v1 }
 0x41c   :  { %11079 = vmatpush3.bf16.msra.mxu0 %v11310_v2  ;;  %11099 = vmatpush3.bf16.msra.mxu1 %v11311_v3  ;;  %v9947_v2 = vld [vmem:[#allocation13] ss:$0 sm:$0xff] }
 0x41d   :  { %11080 = vmatprep.subr.bf16.mxu0 %v13291_v36  ;;  %11100 = vmatprep.subr.bf16.mxu1 %v13291_v36 }
 0x41e   :  { %11094 = vmatprep.mubr.msk.bf16.mxu0 %vm13292_vm2, %v13291_v36  ;;  %11114 = vmatprep.mubr.msk.bf16.mxu1 %vm13292_vm2, %v13291_v36 }
 0x420   :  { %11081 = vmatpush3.bf16.msra.mxu0 %v11312_v4  ;;  %11101 = vmatpush3.bf16.msra.mxu1 %v11313_v5  ;;  %v9944_v4 = vld [vmem:[#allocation8] ss:$0 sm:$0xff] }
 0x421   :  { %11082 = vmatprep.subr.bf16.mxu0 %v13291_v36  ;;  %11102 = vmatprep.subr.bf16.mxu1 %v13291_v36 }
 0x424   :  { %11083 = vmatpush3.bf16.msra.mxu0 %v11314_v6  ;;  %11103 = vmatpush3.bf16.msra.mxu1 %v11315_v7 }
 0x425   :  { %11084 = vmatprep.subr.bf16.mxu0 %v13291_v36  ;;  %11104 = vmatprep.subr.bf16.mxu1 %v13291_v36 }
 0x428   :  { %11085 = vmatpush3.bf16.msra.mxu0 %v11316_v8  ;;  %11105 = vmatpush3.bf16.msra.mxu1 %v11317_v9 }
 0x429   :  { %11086 = vmatprep.subr.bf16.mxu0 %v13291_v36  ;;  %11106 = vmatprep.subr.bf16.mxu1 %v13291_v36 }
 0x42c   :  { %11087 = vmatpush3.bf16.msra.mxu0 %v11318_v10  ;;  %11107 = vmatpush3.bf16.msra.mxu1 %v11319_v11 }
 0x42d   :  { %11088 = vmatprep.subr.bf16.mxu0 %v13291_v36  ;;  %11108 = vmatprep.subr.bf16.mxu1 %v13291_v36 }
 0x430   :  { %11089 = vmatpush3.bf16.msra.mxu0 %v11320_v12  ;;  %11109 = vmatpush3.bf16.msra.mxu1 %v11321_v13 }
 0x431   :  { %11090 = vmatprep.subr.bf16.mxu0 %v13291_v36  ;;  %11110 = vmatprep.subr.bf16.mxu1 %v13291_v36 }
 0x434   :  { %11091 = vmatpush3.bf16.msra.mxu0 %v11322_v14  ;;  %11111 = vmatpush3.bf16.msra.mxu1 %v11323_v15 }
 0x435   :  { %11092 = vmatprep.subr.bf16.mxu0 %v13291_v36  ;;  %11112 = vmatprep.subr.bf16.mxu1 %v13291_v36 }
 0x438   :  { %11093 = vmatpush3.bf16.msra.mxu0 %v11324_v16  ;;  %11113 = vmatpush3.bf16.msra.mxu1 %v11325_v17 }
 0x439   :  { %11118 = vmatprep.subr.bf16.mxu0 %v13291_v36  ;;  %11126 = vmatprep.subr.bf16.mxu1 %v13291_v36 }
 0x4db   :  { %v1007_v18 = vpop.f32.mrf.mxu0  ;;  %v1076_v19 = vpop.f32.mrf.mxu1 }
 0x4dd   :  { %v11068_v20 = vpop.f32.mrf.mxu0  ;;  %v11076_v21 = vpop.f32.mrf.mxu1 }
 0x4de   :  { %v11337_v20 = vld [vmem:[#allocation14] sm:$0xff]  }
 0x4df   :  { %v1010_v24 = vpop.f32.mrf.mxu0  ;;  %v1079_v25 = vpop.f32.mrf.mxu1  ;;  %v11344_v21 = vld [vmem:[%s14115_s23 + $0xec] ss:$16 sps:$4 sm:$0xff]  }
 0x4e0   :  { %v1014_v26 = vpack.c.bf16 %v1010_v24, %v1007_v18  ;;  %v1083_v27 = vpack.c.bf16 %v1079_v25, %v1076_v19  ;;  %v11338_v24 = vld [vmem:[#allocation14 + $0x8] sm:$0xff]  }
 0x4e1   :  { %v11077_v29 = vpop.f32.mrf.mxu1  ;;  %v11069_v30 = vpop.f32.mrf.mxu0  ;;  %v11342_v25 = vld [vmem:[%s14115_s23 + $0xe8] ss:$16 sps:$4 sm:$0xff]  }
 0x4e2   :  { %11095 = vmatmul.mubr.bf16.vlgmr.msra.gmra.mxu0 %v1083_v27  ;;  %11115 = vmatmul.mubr.bf16.vlgmr.msra.gmra.mxu1 %v1014_v26  ;;  %v11347_v26 = vld [vmem:[%s14115_s23 + $0xc4] ss:$16 sps:$4 sm:$0xff]   ;;  %v11350_v27 = vld [vmem:[%s14115_s23 + $0xcc] ss:$16 sps:$4 sm:$0xff]   ;;  %v11348_v29 = vld [vmem:[%s14115_s23 + $0xc8] ss:$16 sps:$4 sm:$0xff]  }
 0x4e3   :  { %11119 = vmatpush3.bf16.msra.mxu0 %v13599_v60  ;;  %11122 = vmatprep.mubr.msk.bf16.mxu0 %vm13292_vm2, %v13291_v36  ;;  %v11339_v60 = vld [vmem:[%s14115_s23 + $0xe0] ss:$16 sps:$4 sm:$0xff]   ;;  %v11353_v30 = vld [vmem:[%s14115_s23 + $0xa4] ss:$16 sps:$4 sm:$0xff]  }
 0x4e4   :  { %11120 = vmatprep.subr.bf16.mxu0 %v13291_v36  ;;  %11127 = vmatpush3.bf16.msra.mxu1 %v11328_v28  ;;  %v11345_v28 = vld [vmem:[%s14115_s23 + $0xc0] ss:$16 sps:$4 sm:$0xff]  }
 0x4e5   :  { %11128 = vmatprep.subr.bf16.mxu1 %v13291_v36  ;;  %11142 = vmatprep.mubr.msk.bf16.mxu1 %vm13292_vm2, %v13291_v36 }
 0x4e7   :  { %11121 = vmatpush3.bf16.msra.mxu0 %v13605_v63 }
 0x4e8   :  { %11146 = vmatprep.subr.bf16.mxu0 %v13291_v36  ;;  %11129 = vmatpush3.bf16.msra.mxu1 %v11329_v31  ;;  %v11356_v31 = vld [vmem:[%s14115_s23 + $0xac] ss:$16 sps:$4 sm:$0xff]  }
 0x4e9   :  { %11130 = vmatprep.subr.bf16.mxu1 %v13291_v36 }
 0x4ea   :  { %11123 = vmatmul.mubr.msk.bf16.vlgmr.msra.gmra.mxu0 %vm548_vm0, %v11326_v32  ;;  %v11351_v32 = vld [vmem:[%s14115_s23 + $0xa0] ss:$16 sps:$4 sm:$0xff]  }
 0x4eb   :  { %11147 = vmatpush3.bf16.msra.mxu0 %v13580_v22  ;;  %11150 = vmatprep.mubr.msk.bf16.mxu0 %vm13292_vm2, %v13291_v36  ;;  %v11332_v22 = vld [vmem:[%s14114_s0 + $0x98] sm:$0xff]  }
 0x4ec   :  { %11148 = vmatprep.subr.bf16.mxu0 %v13291_v36  ;;  %11131 = vmatpush3.bf16.msra.mxu1 %v11330_v33  ;;  %v11354_v33 = vld [vmem:[%s14115_s23 + $0xa8] ss:$16 sps:$4 sm:$0xff]  }
 0x4ed   :  { %11132 = vmatprep.subr.bf16.mxu1 %v13291_v36 }
 0x4ef   :  { %11149 = vmatpush3.bf16.msra.mxu0 %v13585_v23  ;;  %v11335_v23 = vld [vmem:[%s14114_s0 + $0x80] sm:$0xff]  }
 0x4f0   :  { %11133 = vmatpush3.bf16.msra.mxu1 %v11331_v34  ;;  %11154 = vmatprep.subr.bf16.mxu0 %v13291_v36  ;;  %v11359_v34 = vld [vmem:[%s14115_s23 + $0x84] ss:$16 sps:$4 sm:$0xff]  }
 0x4f1   :  { %11134 = vmatprep.subr.bf16.mxu1 %v13291_v36 }
 0x4f2   :  { %11151 = vmatmul.mubr.msk.bf16.vlgmr.msra.gmra.mxu0 %vm548_vm0, %v11327_v35  ;;  %v11362_v35 = vld [vmem:[%s14115_s23 + $0x8c] ss:$16 sps:$4 sm:$0xff]  }
 0x4f3   :  { %11156 = vmatprep.mubr.msk.bf16.mxu0 %vm13292_vm2, %v13291_v36  ;;  %11155 = vmatpush3.bf16.msra.mxu0 %v11336_v39  ;;  %v13293_v39 = vmov 0  }
 0x4f4   :  { %11135 = vmatpush3.bf16.msra.mxu1 %v11332_v22  ;;  %11160 = vmatprep.subr.bf16.mxu0 %v13291_v36  ;;  %v11357_v22 = vld [vmem:[%s14115_s23 + $0x80] ss:$16 sps:$4 sm:$0xff]  }
 0x4f5   :  { %11136 = vmatprep.subr.bf16.mxu1 %v13291_v36 }
 0x4f8   :  { %11137 = vmatpush3.bf16.msra.mxu1 %v11333_v37  ;;  %v11360_v37 = vld [vmem:[%s14115_s23 + $0x88] ss:$16 sps:$4 sm:$0xff]  }
 0x4f9   :  { %11138 = vmatprep.subr.bf16.mxu1 %v13291_v36 }
 0x4fc   :  { %11139 = vmatpush3.bf16.msra.mxu1 %v11334_v38  ;;  %v11365_v38 = vld [vmem:[%s14115_s23 + $0x64] ss:$16 sps:$4 sm:$0xff]  }
 0x4fd   :  { %11140 = vmatprep.subr.bf16.mxu1 %v13291_v36 }
 0x500   :  { %11141 = vmatpush3.bf16.msra.mxu1 %v11335_v23  ;;  %v11368_v23 = vld [vmem:[%s14115_s23 + $0x6c] ss:$16 sps:$4 sm:$0xff]  }
 0x501   :  { %1795 = vmatprep.subr.bf16.mxu1 %v11341_v61  ;;  %v11381_v61 = vld [vmem:[%s14115_s23] ss:$16 sps:$4 sm:$0xff]  }
 0x5a2   :  { %v1183_v40 = vpop.f32.mrf.mxu0  ;;  %v1272_v41 = vpop.f32.mrf.mxu1 }
 0x5a3   :  { %v1273_v42 = vadd.f32 %v1272_v41, %v1183_v40 }
 0x5a4   :  { %v11096_v43 = vpop.f32.mrf.mxu0  ;;  %v11116_v44 = vpop.f32.mrf.mxu1 }
 0x5a6   :  { %v1186_v45 = vpop.f32.mrf.mxu0  ;;  %v1275_v46 = vpop.f32.mrf.mxu1 }
 0x5a7   :  { %v1276_v47 = vadd.f32 %v1275_v46, %v1186_v45 }
 0x5a8   :  { %v11097_v48 = vpop.f32.mrf.mxu0  ;;  %v11117_v49 = vpop.f32.mrf.mxu1 }
 0x5a9   :  { %v11366_v48 = vld [vmem:[%s14115_s23 + $0x68] ss:$16 sps:$4 sm:$0xff]  }
 0x5aa   :  { %v1324_v50 = vpop.f32.mrf.mxu0 }
 0x5ac   :  { %v11124_v51 = vpop.f32.mrf.mxu0 }
 0x5ad   :  { %v11374_v51 = vld [vmem:[%s14115_s23 + $0x4c] ss:$16 sps:$4 sm:$0xff]  }
 0x5ae   :  { %v1327_v52 = vpop.f32.mrf.mxu0 }
 0x5af   :  { %v1331_v53 = vpack.c.bf16 %v1327_v52, %v1324_v50  ;;  %v11371_v50 = vld [vmem:[%s14115_s23 + $0x44] ss:$16 sps:$4 sm:$0xff]  }
 0x5b0   :  { %v11125_v54 = vpop.f32.mrf.mxu0 }
 0x5b1   :  { %11143 = vmatmul.mubr.bf16.vlgmr.msra.gmra.mxu1 %v1331_v53  ;;  %v11369_v53 = vld [vmem:[%s14115_s23 + $0x40] ss:$16 sps:$4 sm:$0xff]   ;;  %v11372_v54 = vld [vmem:[%s14115_s23 + $0x48] ss:$16 sps:$4 sm:$0xff]  }
 0x5b2   :  { %v1493_v55 = vpop.f32.mrf.mxu0  ;;  %1796 = vmatpush1.bf16.msra.mxu1 %v11339_v60  ;;  %1819 = vmatprep.mubr.bf16.mxu1 %v13293_v39  ;;  %v11386_v60 = vld [vmem:[%s14115_s23 + $0xc] ss:$16 sps:$4 sm:$0xff]  }
 0x5b3   :  { %1797 = vmatprep.subr.bf16.mxu1 %v11347_v26 }
 0x5b4   :  { %v11152_v56 = vpop.f32.mrf.mxu0 }
 0x5b5   :  { %v11380_v56 = vld [vmem:[%s14115_s23 + $0x2c] ss:$16 sps:$4 sm:$0xff]  }
 0x5b6   :  { %v1496_v57 = vpop.f32.mrf.mxu0  ;;  %1798 = vmatpush1.bf16.msra.mxu1 %v11345_v28 }
 0x5b7   :  { %v1500_v58 = vpack.c.bf16 %v1496_v57, %v1493_v55  ;;  %1799 = vmatprep.subr.bf16.mxu1 %v11353_v30  ;;  %v11377_v55 = vld [vmem:[%s14115_s23 + $0x24] ss:$16 sps:$4 sm:$0xff]   ;;  %v11375_v57 = vld [vmem:[%s14115_s23 + $0x20] ss:$16 sps:$4 sm:$0xff]  }
 0x5b8   :  { %v11153_v59 = vpop.f32.mrf.mxu0 }
 0x5b9   :  { %11157 = vmatmul.mubr.msk.bf16.vlgmr.msra.gmra.mxu0 %vm689_vm1, %v1500_v58  ;;  %v11378_v58 = vld [vmem:[%s14115_s23 + $0x28] ss:$16 sps:$4 sm:$0xff]   ;;  %v11383_v59 = vld [vmem:[%s14115_s23 + $0x4] ss:$16 sps:$4 sm:$0xff]  }
 0x5ba   :  { %11162 = vmatprep.mubr.msk.bf16.mxu0 %vm13292_vm2, %v13291_v36  ;;  %1800 = vmatpush1.bf16.msra.mxu1 %v11351_v32 }
 0x5bb   :  { %1801 = vmatprep.subr.bf16.mxu1 %v11359_v34 }
 0x5be   :  { %1802 = vmatpush1.bf16.msra.mxu1 %v11357_v22 }
 0x5bf   :  { %1964 = vmatprep.subr.bf16.mxu1 %v11365_v38 }
 0x671   :  { %v1431_v62 = vpop.f32.mrf.mxu1 }
 0x672   :  { %v1438_v3 = vadd.f32 %v1431_v62, %v1273_v42  ;;  %v11384_v62 = vld [vmem:[%s14115_s23 + $0x8] ss:$16 sps:$4 sm:$0xff]  }
 0x673   :  { %v11144_v63 = vpop.f32.mrf.mxu1 }
 0x674   :  { %v1447_v9 = vadd.f32 %v9944_v4, %v1438_v3  ;;  %v11391_v3 = vld [vmem:[%s14115_s23 + $0x168] ss:$16 sps:$4 sm:$0xff]  }
 0x675   :  { %v1434_v0 = vpop.f32.mrf.mxu1 }
 0x676   :  { %v1439_v6 = vadd.f32 %v1434_v0, %v1276_v47  ;;  %v11363_v47 = vld [vmem:[%s14115_s23 + $0x60] ss:$16 sps:$4 sm:$0xff]  }
 0x677   :  { %v11145_v1 = vpop.f32.mrf.mxu1  ;;  %v11387_v0 = vld [vmem:[#allocation14 + $0x10] sm:$0xff]  }
 0x678   :  { %v1448_v11 = vadd.f32 %v9944_v4, %v1439_v6  ;;  %v11388_v1 = vld [vmem:[%s14115_s23 + $0x160] ss:$16 sps:$4 sm:$0xff]   ;;  %v11393_v4 = vld [vmem:[%s14115_s23 + $0x16c] ss:$16 sps:$4 sm:$0xff]  }
 0x679   :  { %v1553_v5 = vpop.f32.mrf.mxu0  ;;  %v11399_v6 = vld [vmem:[%s14115_s23 + $0x14c] ss:$16 sps:$4 sm:$0xff]  }
 0x67a   :  { %v1554_v7 = vadd.f32 %v9947_v2, %v1553_v5  ;;  %v11396_v5 = vld [vmem:[%s14115_s23 + $0x144] ss:$16 sps:$4 sm:$0xff]  }
 0x67b   :  { %v11158_v8 = vpop.f32.mrf.mxu0 }
 0x67c   :  { %v13688_v12 = vadd.f32 %v1554_v7, %v1447_v9  ;;  %v11394_v7 = vld [vmem:[%s14115_s23 + $0x140] ss:$16 sps:$4 sm:$0xff]   ;;  %v11397_v8 = vld [vmem:[%s14115_s23 + $0x148] ss:$16 sps:$4 sm:$0xff]   ;;  %v11402_v9 = vld [vmem:[%s14115_s23 + $0x124] ss:$16 sps:$4 sm:$0xff]  }
 0x67d   :  { %v1556_v10 = vpop.f32.mrf.mxu0 }
 0x67e   :  { %v1557_v13 = vadd.f32 %v9947_v2, %v1556_v10  ;;  %v1562_v16 = vmax.f32 %v13688_v12, 0.0  ;;  %v11390_v2 = vld [vmem:[%s14115_s23 + $0x164] ss:$16 sps:$4 sm:$0xff]   ;;  %v11405_v10 = vld [vmem:[%s14115_s23 + $0x12c] ss:$16 sps:$4 sm:$0xff]  }
 0x67f   :  { %v11159_v14 = vpop.f32.mrf.mxu0 }
 0x680   :  { %v13690_v15 = vadd.f32 %v1557_v13, %v1448_v11  ;;  %v11400_v11 = vld [vmem:[%s14115_s23 + $0x120] ss:$16 sps:$4 sm:$0xff]   ;;  %v11403_v13 = vld [vmem:[%s14115_s23 + $0x128] ss:$16 sps:$4 sm:$0xff]   ;;  %v11408_v14 = vld [vmem:[%s14115_s23 + $0x104] ss:$16 sps:$4 sm:$0xff]  }
 0x682   :  { %v1563_v17 = vmax.f32 %v13690_v15, 0.0  ;;  %v4019_v18 = vpack.c.bf16 %v13690_v15, %v13688_v12  ;;  %v11709_v12 = vld [vmem:[%s14117_s26] ss:$8 sps:$4 sm:$0xff]   ;;  %v11711_v15 = vld [vmem:[%s14117_s26 + $0x4] ss:$8 sps:$4 sm:$0xff]  }
 0x684   :  { %v13696_v19 = vpack.c.bf16 %v1563_v17, %v1562_v16  ;;  %v11411_v16 = vld [vmem:[%s14115_s23 + $0x10c] ss:$16 sps:$4 sm:$0xff]   ;;  %v11406_v17 = vld [vmem:[%s14115_s23 + $0x100] ss:$16 sps:$4 sm:$0xff]  }
 0x686   :  { %11161 = vmatpush3.bf16.msra.mxu0 %v13696_v19 }
 0x687   :  { %11166 = vmatprep.subr.bf16.mxu0 %v13291_v36 }
 0x689   :  { %11163 = vmatmul.mubr.msk.bf16.vlgmr.msra.gmra.mxu0 %vm689_vm1, %v11337_v20 }
 0x68a   :  { %11167 = vmatpush3.bf16.msra.mxu0 %v13696_v19  ;;  %11168 = vmatprep.mubr.msk.bf16.mxu0 %vm13292_vm2, %v13291_v36 }
 0x68b   :  { %1838 = vmatprep.subr.bf16.mxu0 %v11344_v21 }
 0x691   :  { %11169 = vmatmul.mubr.msk.bf16.vlgmr.msra.gmra.mxu0 %vm689_vm1, %v11338_v24 }
 0x692   :  { %1839 = vmatpush1.bf16.msra.mxu0 %v11342_v25  ;;  %1862 = vmatprep.mubr.bf16.mxu0 %v13293_v39 }
 0x693   :  { %1840 = vmatprep.subr.bf16.mxu0 %v11350_v27 }
 0x696   :  { %1841 = vmatpush1.bf16.msra.mxu0 %v11348_v29 }
 0x697   :  { %1842 = vmatprep.subr.bf16.mxu0 %v11356_v31 }
 0x69a   :  { %1843 = vmatpush1.bf16.msra.mxu0 %v11354_v33 }
 0x69b   :  { %1844 = vmatprep.subr.bf16.mxu0 %v11362_v35 }
 0x69e   :  { %1845 = vmatpush1.bf16.msra.mxu0 %v11360_v37 }
 0x69f   :  { %2007 = vmatprep.subr.bf16.mxu0 %v11368_v23 }
 0x749   :  { %v1609_v40 = vpop.f32.mrf.mxu0 }
 0x74b   :  { %v11164_v41 = vpop.f32.mrf.mxu0 }
 0x74d   :  { %v1612_v42 = vpop.f32.mrf.mxu0 }
 0x74e   :  { %v1616_v63 = vpack.c.bf16 %v1612_v42, %v1609_v40 }
 0x74f   :  { %v11165_v43 = vpop.f32.mrf.mxu0 }
 0x751   :  { %v1678_v44 = vpop.f32.mrf.mxu0 }
 0x753   :  { %v11170_v45 = vpop.f32.mrf.mxu0 }
 0x755   :  { %v1681_v46 = vpop.f32.mrf.mxu0 }
 0x756   :  { %v1685_v49 = vpack.c.bf16 %v1681_v46, %v1678_v44  ;;  %v2291_v44 = vlaneseq }
 0x757   :  { %v11171_v52 = vpop.f32.mrf.mxu0 }
 0x758   :  { %9986 = vmatmul.mubr.msk.bf16.vlgmr.msra.gmra.mxu1 %vm1783_vm3, %v1685_v49  ;;  %9987 = vmatmul.mubr.msk.bf16.vlgmr.msra.gmra.mxu0 %vm1783_vm3, %v1685_v49  ;;  %v13770_v46 = vshrl.u32 %v2291_v44, 7  ;;  %v2289_v49 = vld [vmem:[#allocation16] sm:$0xf]  ;;  %v11415_v44 = vld [vmem:[#allocation17 + $0x370] ss:$8 sps:$4 sm:$0xff]  }
 0x759   :  { %1965 = vmatpush1.bf16.msra.mxu1 %v11363_v47  ;;  %2008 = vmatpush1.bf16.msra.mxu0 %v11366_v48 }
 0x75a   :  { %1966 = vmatprep.subr.bf16.mxu1 %v11371_v50  ;;  %2009 = vmatprep.subr.bf16.mxu0 %v11374_v51  ;;  %v13773_v48 = vsub.s32 0, %v13770_v46  ;;  %v13776_v50 = vsub.s32 1, %v13770_v46  ;;  %v2305_v51 = vsub.s32 3, %v13770_v46 }
 0x75b   :  { %1988 = vmatprep.mubr.bf16.mxu1 %v13293_v39  ;;  %2031 = vmatprep.mubr.bf16.mxu0 %v13293_v39 }
 0x75d   :  { %1967 = vmatpush1.bf16.msra.mxu1 %v11369_v53  ;;  %2010 = vmatpush1.bf16.msra.mxu0 %v11372_v54  ;;  %v2301_v54 = vsub.s32 2, %v13770_v46 }
 0x75e   :  { %1968 = vmatprep.subr.bf16.mxu1 %v11377_v55  ;;  %2011 = vmatprep.subr.bf16.mxu0 %v11380_v56 }
 0x761   :  { %1969 = vmatpush1.bf16.msra.mxu1 %v11375_v57  ;;  %2012 = vmatpush1.bf16.msra.mxu0 %v11378_v58 }
 0x762   :  { %1970 = vmatprep.subr.bf16.mxu1 %v11383_v59  ;;  %2013 = vmatprep.subr.bf16.mxu0 %v11386_v60  ;;  %v2294_v59 = vrot.slane %v2289_v49, %v13773_v48 }
 0x765   :  { %1971 = vmatpush1.bf16.msra.mxu1 %v11381_v61  ;;  %2014 = vmatpush1.bf16.msra.mxu0 %v11384_v62 }
 0x766   :  { %11172 = vmatprep.subr.bf16.mxu1 %v13291_v36  ;;  %2203 = vmatprep.subr.bf16.mxu0 %v11390_v2 }
 0x768   :  { %10004 = vmatmul.mubr.msk.bf16.vlgmr.msra.gmra.mxu1 %vm1783_vm3, %v1616_v63  ;;  %10005 = vmatmul.mubr.msk.bf16.vlgmr.msra.gmra.mxu0 %vm1783_vm3, %v1616_v63  ;;  %v2298_v63 = vrot.slane %v2289_v49, %v13776_v50 }
 0x769   :  { %11173 = vmatpush3.bf16.msra.mxu1 %v13696_v19  ;;  %11174 = vmatprep.mubr.msk.bf16.mxu1 %vm13292_vm2, %v13291_v36  ;;  %v11409_v19 = vld [vmem:[%s14115_s23 + $0x108] ss:$16 sps:$4 sm:$0xff]  }
 0x76a   :  { %2227 = vmatprep.mubr.bf16.mxu0 %v13293_v39  ;;  %2246 = vmatprep.subr.bf16.mxu1 %v11393_v4  ;;  %v2302_v4 = vrot.slane %v2289_v49, %v2301_v54 }
 0x76b   :  { %2204 = vmatpush1.bf16.msra.mxu0 %v11388_v1  ;;  %v2306_v1 = vrot.slane %v2289_v49, %v2305_v51  ;;  %v11418_v49 = vld [vmem:[#allocation17 + $0x260] ss:$8 sps:$4 sm:$0xff]  }
 0x76c   :  { %2205 = vmatprep.subr.bf16.mxu0 %v11396_v5 }
 0x76f   :  { %2206 = vmatpush1.bf16.msra.mxu0 %v11394_v7 }
 0x770   :  { %11175 = vmatmul.mubr.msk.bf16.vlgmr.msra.gmra.mxu1 %vm689_vm1, %v11387_v0  ;;  %2207 = vmatprep.subr.bf16.mxu0 %v11402_v9 }
 0x771   :  { %2270 = vmatprep.mubr.bf16.mxu1 %v13293_v39  ;;  %2247 = vmatpush1.bf16.msra.mxu1 %v11391_v3 }
 0x772   :  { %2248 = vmatprep.subr.bf16.mxu1 %v11399_v6 }
 0x773   :  { %2208 = vmatpush1.bf16.msra.mxu0 %v11400_v11 }
 0x774   :  { %2209 = vmatprep.subr.bf16.mxu0 %v11408_v14 }
 0x775   :  { %2249 = vmatpush1.bf16.msra.mxu1 %v11397_v8 }
 0x776   :  { %2250 = vmatprep.subr.bf16.mxu1 %v11405_v10 }
 0x777   :  { %2210 = vmatpush1.bf16.msra.mxu0 %v11406_v17 }
 0x779   :  { %2251 = vmatpush1.bf16.msra.mxu1 %v11403_v13 }
 0x77a   :  { %2252 = vmatprep.subr.bf16.mxu1 %v11411_v16 }
 0x77d   :  { %2253 = vmatpush1.bf16.msra.mxu1 %v11409_v19 }
 0x818   :  { %v1821_v20 = vpop.f32.mrf.mxu1  ;;  %v1864_v38 = vpop.f32.mrf.mxu0 }
 0x81a   :  { %v1823_v21 = vpop.f32.mrf.mxu1  ;;  %v1866_v23 = vpop.f32.mrf.mxu0 }
 0x81c   :  { %v1825_v24 = vpop.f32.mrf.mxu1  ;;  %v1868_v40 = vpop.f32.mrf.mxu0 }
 0x81e   :  { %v1827_v25 = vpop.f32.mrf.mxu1  ;;  %v1870_v41 = vpop.f32.mrf.mxu0 }
 0x828   :  { %v1990_v26 = vpop.f32.mrf.mxu1  ;;  %v2033_v42 = vpop.f32.mrf.mxu0 }
 0x829   :  { %v1991_v27 = vadd.f32 %v1990_v26, %v1821_v20  ;;  %v2034_v57 = vadd.f32 %v2033_v42, %v1864_v38  ;;  %v10044_v42 = vld [vmem:[%s14116_s9 + $0x4] sm:$0xf] }
 0x82a   :  { %v1992_v28 = vpop.f32.mrf.mxu1  ;;  %v2035_v43 = vpop.f32.mrf.mxu0 }
 0x82b   :  { %v1993_v55 = vadd.f32 %v1992_v28, %v1823_v21  ;;  %v2036_v56 = vadd.f32 %v2035_v43, %v1866_v23  ;;  %v2331_v23 = vld [vmem:[%s14116_s9] sm:$0xf]  ;;  %v11412_v43 = vld [vmem:[#allocation17 + $0x270] ss:$8 sps:$4 sm:$0xff]  }
 0x82c   :  { %v1994_v29 = vpop.f32.mrf.mxu1  ;;  %v2037_v45 = vpop.f32.mrf.mxu0 }
 0x82d   :  { %v1995_v30 = vadd.f32 %v1994_v29, %v1825_v24  ;;  %v2038_v2 = vadd.f32 %v2037_v45, %v1868_v40  ;;  %v11414_v40 = vld [vmem:[#allocation17 + $0x274] ss:$8 sps:$4 sm:$0xff]   ;;  %v11420_v45 = vld [vmem:[#allocation17 + $0x264] ss:$8 sps:$4 sm:$0xff]  }
 0x82e   :  { %v1996_v31 = vpop.f32.mrf.mxu1  ;;  %v2039_v47 = vpop.f32.mrf.mxu0 }
 0x82f   :  { %v1997_v32 = vadd.f32 %v1996_v31, %v1827_v25  ;;  %v2040_v7 = vadd.f32 %v2039_v47, %v1870_v41  ;;  %v11417_v41 = vld [vmem:[#allocation17 + $0x374] ss:$8 sps:$4 sm:$0xff]   ;;  %v11423_v47 = vld [vmem:[#allocation17 + $0x364] ss:$8 sps:$4 sm:$0xff]  }
 0x830   :  { %v2087_v33 = vpop.f32.mrf.mxu1 }
 0x832   :  { %v11176_v34 = vpop.f32.mrf.mxu1 }
 0x834   :  { %v2090_v35 = vpop.f32.mrf.mxu1 }
 0x835   :  { %v2094_v22 = vpack.c.bf16 %v2090_v35, %v2087_v33 }
 0x836   :  { %v11177_v37 = vpop.f32.mrf.mxu1 }
 0x837   :  { %10040 = vmatmul.mubr.msk.bf16.vlgmr.msra.gmra.mxu0 %vm1783_vm3, %v2094_v22  ;;  %10041 = vmatmul.mubr.msk.bf16.vlgmr.msra.gmra.mxu1 %vm1783_vm3, %v2094_v22 }
 0x838   :  { %2367 = vmatprep.mubr.bf16.mxu0 %v13293_v39  ;;  %2408 = vmatprep.mubr.bf16.mxu1 %v13293_v39 }
 0x8f7   :  { %v2229_v52 = vpop.f32.mrf.mxu0  ;;  %v2272_v53 = vpop.f32.mrf.mxu1 }
 0x8f8   :  { %v2281_v58 = vadd.f32 %v2229_v52, %v1991_v27  ;;  %v2283_v3 = vadd.f32 %v2272_v53, %v2034_v57  ;;  %v11421_v52 = vld [vmem:[#allocation17 + $0x360] ss:$8 sps:$4 sm:$0xff]   ;;  %v11426_v53 = vld [vmem:[#allocation17 + $0x254] ss:$8 sps:$4 sm:$0xff]   ;;  %v11427_v57 = vld [vmem:[#allocation17 + $0x350] ss:$8 sps:$4 sm:$0xff]  }
 0x8f9   :  { %v2231_v60 = vpop.f32.mrf.mxu0  ;;  %v2274_v61 = vpop.f32.mrf.mxu1 }
 0x8fa   :  { %v2282_v62 = vadd.f32 %v2231_v60, %v1993_v55  ;;  %v2284_v0 = vadd.f32 %v2274_v61, %v2036_v56  ;;  %v2311_v8 = vadd.f32 %v2294_v59, %v2281_v58  ;;  %v2313_v20 = vadd.f32 %v2302_v4, %v2283_v3  ;;  %v11429_v55 = vld [vmem:[#allocation17 + $0x354] ss:$8 sps:$4 sm:$0xff]   ;;  %v11424_v56 = vld [vmem:[#allocation17 + $0x250] ss:$8 sps:$4 sm:$0xff]   ;;  %v11432_v58 = vld [vmem:[#allocation17 + $0x244] ss:$8 sps:$4 sm:$0xff]  }
 0x8fb   :  { %v2233_v5 = vpop.f32.mrf.mxu0  ;;  %v2276_v6 = vpop.f32.mrf.mxu1  ;;  %v11430_v60 = vld [vmem:[#allocation17 + $0x240] ss:$8 sps:$4 sm:$0xff]   ;;  %v11447_v3 = vld [vmem:[#allocation17 + $0x324] ss:$8 sps:$4 sm:$0xff]  }
 0x8fc   :  { %v2285_v9 = vadd.f32 %v2233_v5, %v1995_v30  ;;  %v2287_v10 = vadd.f32 %v2276_v6, %v2038_v2  ;;  %v2312_v14 = vadd.f32 %v2298_v63, %v2282_v62  ;;  %v2314_v16 = vadd.f32 %v2306_v1, %v2284_v0  ;;  %v11433_v61 = vld [vmem:[#allocation17 + $0x340] ss:$8 sps:$4 sm:$0xff]   ;;  %v11438_v62 = vld [vmem:[#allocation17 + $0x234] ss:$8 sps:$4 sm:$0xff]   ;;  %v11436_v0 = vld [vmem:[#allocation17 + $0x230] ss:$8 sps:$4 sm:$0xff]  }
 0x8fd   :  { %v2235_v11 = vpop.f32.mrf.mxu0  ;;  %v2278_v13 = vpop.f32.mrf.mxu1  ;;  %v2319_v27 = vmax.f32 %v2311_v8, 0.0  ;;  %v2321_v35 = vmax.f32 %v2313_v20, 0.0  ;;  %v11444_v2 = vld [vmem:[#allocation17 + $0x224] ss:$8 sps:$4 sm:$0xff]   ;;  %v11445_v5 = vld [vmem:[#allocation17 + $0x320] ss:$8 sps:$4 sm:$0xff]  }
 0x8fe   :  { %v2286_v17 = vadd.f32 %v2235_v11, %v1997_v32  ;;  %v2288_v19 = vadd.f32 %v2278_v13, %v2040_v7  ;;  %v2315_v21 = vadd.f32 %v2294_v59, %v2285_v9  ;;  %v2317_v24 = vadd.f32 %v2302_v4, %v2287_v10  ;;  %v11435_v59 = vld [vmem:[#allocation17 + $0x344] ss:$8 sps:$4 sm:$0xff]   ;;  %v11442_v4 = vld [vmem:[#allocation17 + $0x220] ss:$8 sps:$4 sm:$0xff]   ;;  %v11450_v6 = vld [vmem:[#allocation17 + $0x214] ss:$8 sps:$4 sm:$0xff]  }
 0x8ff   :  { %v2320_v31 = vmax.f32 %v2312_v14, 0.0  ;;  %v2322_v33 = vmax.f32 %v2314_v16, 0.0  ;;  %v11453_v7 = vld [vmem:[#allocation17 + $0x314] ss:$8 sps:$4 sm:$0xff]   ;;  %v11448_v8 = vld [vmem:[#allocation17 + $0x210] ss:$8 sps:$4 sm:$0xff]  }
 0x900   :  { %v2316_v25 = vadd.f32 %v2298_v63, %v2286_v17  ;;  %v2318_v26 = vadd.f32 %v2306_v1, %v2288_v19  ;;  %v2323_v28 = vmax.f32 %v2315_v21, 0.0  ;;  %v2325_v29 = vmax.f32 %v2317_v24, 0.0  ;;  %v11441_v63 = vld [vmem:[#allocation17 + $0x334] ss:$8 sps:$4 sm:$0xff]   ;;  %v11439_v1 = vld [vmem:[#allocation17 + $0x330] ss:$8 sps:$4 sm:$0xff]  }
 0x901   :  { %v11451_v9 = vld [vmem:[#allocation17 + $0x310] ss:$8 sps:$4 sm:$0xff]   ;;  %v11456_v10 = vld [vmem:[#allocation17 + $0x204] ss:$8 sps:$4 sm:$0xff]   ;;  %v11454_v13 = vld [vmem:[#allocation17 + $0x200] ss:$8 sps:$4 sm:$0xff]  }
 0x902   :  { %v2324_v34 = vmax.f32 %v2316_v25, 0.0  ;;  %v2326_v30 = vmax.f32 %v2318_v26, 0.0  ;;  %v13786_v22 = vpack.c.bf16 %v2323_v28, %v2319_v27  ;;  %v13792_v38 = vpack.c.bf16 %v2325_v29, %v2321_v35  ;;  %v11459_v11 = vld [vmem:[#allocation17 + $0x304] ss:$8 sps:$4 sm:$0xff]   ;;  %v11457_v14 = vld [vmem:[#allocation17 + $0x300] ss:$8 sps:$4 sm:$0xff]  }
 0x903   :  { %v11462_v16 = vld [vmem:[#allocation17 + $0x2f4] ss:$8 sps:$4 sm:$0xff]   ;;  %v11460_v19 = vld [vmem:[#allocation17 + $0x2f0] ss:$8 sps:$4 sm:$0xff]   ;;  %v11468_v21 = vld [vmem:[#allocation17 + $0x2e4] ss:$8 sps:$4 sm:$0xff]  }
 0x904   :  { %v13788_v37 = vpack.c.bf16 %v2324_v34, %v2320_v31  ;;  %v13790_v32 = vpack.c.bf16 %v2326_v30, %v2322_v33  ;;  %v11465_v17 = vld [vmem:[#allocation17 + $0x3f4] ss:$8 sps:$4 sm:$0xff]   ;;  %v11463_v20 = vld [vmem:[#allocation17 + $0x3f0] ss:$8 sps:$4 sm:$0xff]   ;;  %v11471_v24 = vld [vmem:[#allocation17 + $0x3e4] ss:$8 sps:$4 sm:$0xff]  }
 0x905   :  { %v11466_v25 = vld [vmem:[#allocation17 + $0x2e0] ss:$8 sps:$4 sm:$0xff]   ;;  %v11474_v27 = vld [vmem:[#allocation17 + $0x2d4] ss:$8 sps:$4 sm:$0xff]   ;;  %v11472_v29 = vld [vmem:[#allocation17 + $0x2d0] ss:$8 sps:$4 sm:$0xff]  }
 0x906   :  { %2349 = vmatprep.subr.bf16.mxu0 %v13788_v37  ;;  %2390 = vmatprep.subr.bf16.mxu1 %v13790_v32  ;;  %v11469_v26 = vld [vmem:[#allocation17 + $0x3e0] ss:$8 sps:$4 sm:$0xff]   ;;  %v11477_v28 = vld [vmem:[#allocation17 + $0x3d4] ss:$8 sps:$4 sm:$0xff]   ;;  %v11475_v31 = vld [vmem:[#allocation17 + $0x3d0] ss:$8 sps:$4 sm:$0xff]  }
 0x907   :  { %2350 = vmatpush1.bf16.msra.mxu0 %v13786_v22  ;;  %2391 = vmatpush1.bf16.msra.mxu1 %v13792_v38  ;;  %v11480_v33 = vld [vmem:[#allocation17 + $0x2c4] ss:$8 sps:$4 sm:$0xff]   ;;  %v11478_v30 = vld [vmem:[#allocation17 + $0x2c0] ss:$8 sps:$4 sm:$0xff]  }
 0x908   :  { %2504 = vmatprep.subr.bf16.mxu0 %v13788_v37  ;;  %2545 = vmatprep.subr.bf16.mxu1 %v13790_v32  ;;  %v11483_v34 = vld [vmem:[#allocation17 + $0x3c4] ss:$8 sps:$4 sm:$0xff]   ;;  %v11481_v35 = vld [vmem:[#allocation17 + $0x3c0] ss:$8 sps:$4 sm:$0xff]  }
 0x90a   :  { %10042 = vmatmul.mubr.msk.bf16.vlgmr.msra.gmra.mxu0 %vm689_vm1, %v2331_v23  ;;  %10043 = vmatmul.mubr.msk.bf16.vlgmr.msra.gmra.mxu1 %vm689_vm1, %v2331_v23  ;;  %v11486_v23 = vld [vmem:[#allocation17 + $0x2b4] ss:$8 sps:$4 sm:$0xff]  }
 0x90b   :  { %2505 = vmatpush1.bf16.msra.mxu0 %v13786_v22  ;;  %2546 = vmatpush1.bf16.msra.mxu1 %v13792_v38 }
 0x90c   :  { %2522 = vmatprep.mubr.bf16.mxu0 %v13293_v39  ;;  %2563 = vmatprep.mubr.bf16.mxu1 %v13293_v39 }
 0x90d   :  { %2961 = vmatprep.subr.bf16.mxu0 %v11414_v40  ;;  %3002 = vmatprep.subr.bf16.mxu1 %v11417_v41  ;;  %v11489_v40 = vld [vmem:[#allocation17 + $0x3b4] ss:$8 sps:$4 sm:$0xff]   ;;  %v11484_v41 = vld [vmem:[#allocation17 + $0x2b0] ss:$8 sps:$4 sm:$0xff]  }
 0x912   :  { %10045 = vmatmul.mubr.msk.bf16.vlgmr.msra.gmra.mxu0 %vm689_vm1, %v10044_v42  ;;  %10046 = vmatmul.mubr.msk.bf16.vlgmr.msra.gmra.mxu1 %vm689_vm1, %v10044_v42  ;;  %v11487_v42 = vld [vmem:[#allocation17 + $0x3b0] ss:$8 sps:$4 sm:$0xff]  }
 0x913   :  { %2962 = vmatpush1.bf16.msra.mxu0 %v11412_v43  ;;  %3003 = vmatpush1.bf16.msra.mxu1 %v11415_v44  ;;  %v11492_v43 = vld [vmem:[#allocation17 + $0x2a4] ss:$8 sps:$4 sm:$0xff]  }
 0x914   :  { %2963 = vmatprep.subr.bf16.mxu0 %v11420_v45  ;;  %3004 = vmatprep.subr.bf16.mxu1 %v11423_v47  ;;  %v11495_v44 = vld [vmem:[#allocation17 + $0x3a4] ss:$8 sps:$4 sm:$0xff]   ;;  %v11490_v45 = vld [vmem:[#allocation17 + $0x2a0] ss:$8 sps:$4 sm:$0xff]  }
 0x915   :  { %v11493_v47 = vld [vmem:[#allocation17 + $0x3a0] ss:$8 sps:$4 sm:$0xff]  }
 0x917   :  { %2964 = vmatpush1.bf16.msra.mxu0 %v11418_v49  ;;  %3005 = vmatpush1.bf16.msra.mxu1 %v11421_v52  ;;  %v11496_v49 = vld [vmem:[#allocation17 + $0x290] ss:$8 sps:$4 sm:$0xff]   ;;  %v11498_v52 = vld [vmem:[#allocation17 + $0x294] ss:$8 sps:$4 sm:$0xff]  }
 0x918   :  { %2965 = vmatprep.subr.bf16.mxu0 %v11426_v53  ;;  %3006 = vmatprep.subr.bf16.mxu1 %v11429_v55  ;;  %v11499_v53 = vld [vmem:[#allocation17 + $0x390] ss:$8 sps:$4 sm:$0xff]   ;;  %v11501_v55 = vld [vmem:[#allocation17 + $0x394] ss:$8 sps:$4 sm:$0xff]  }
 0x91b   :  { %2966 = vmatpush1.bf16.msra.mxu0 %v11424_v56  ;;  %3007 = vmatpush1.bf16.msra.mxu1 %v11427_v57  ;;  %v11504_v56 = vld [vmem:[#allocation17 + $0x284] ss:$8 sps:$4 sm:$0xff]  }
 0x91c   :  { %2967 = vmatprep.subr.bf16.mxu0 %v11432_v58  ;;  %3008 = vmatprep.subr.bf16.mxu1 %v11435_v59  ;;  %v11507_v57 = vld [vmem:[#allocation17 + $0x384] ss:$8 sps:$4 sm:$0xff]   ;;  %v11502_v58 = vld [vmem:[#allocation17 + $0x280] ss:$8 sps:$4 sm:$0xff]  }
 0x91d   :  { %v11505_v59 = vld [vmem:[#allocation17 + $0x380] ss:$8 sps:$4 sm:$0xff]  }
 0x91f   :  { %2968 = vmatpush1.bf16.msra.mxu0 %v11430_v60  ;;  %3009 = vmatpush1.bf16.msra.mxu1 %v11433_v61  ;;  %v11510_v60 = vld [vmem:[#allocation17 + $0x74] ss:$8 sps:$4 sm:$0xff]  }
 0x920   :  { %2969 = vmatprep.subr.bf16.mxu0 %v11438_v62  ;;  %3010 = vmatprep.subr.bf16.mxu1 %v11441_v63  ;;  %v11513_v61 = vld [vmem:[#allocation17 + $0x174] ss:$8 sps:$4 sm:$0xff]  }
 0x923   :  { %2970 = vmatpush1.bf16.msra.mxu0 %v11436_v0  ;;  %3011 = vmatpush1.bf16.msra.mxu1 %v11439_v1 }
 0x924   :  { %2971 = vmatprep.subr.bf16.mxu0 %v11444_v2  ;;  %3012 = vmatprep.subr.bf16.mxu1 %v11447_v3 }
 0x927   :  { %2972 = vmatpush1.bf16.msra.mxu0 %v11442_v4  ;;  %3013 = vmatpush1.bf16.msra.mxu1 %v11445_v5 }
 0x928   :  { %2973 = vmatprep.subr.bf16.mxu0 %v11450_v6  ;;  %3014 = vmatprep.subr.bf16.mxu1 %v11453_v7 }
 0x92b   :  { %2974 = vmatpush1.bf16.msra.mxu0 %v11448_v8  ;;  %3015 = vmatpush1.bf16.msra.mxu1 %v11451_v9 }
 0x92c   :  { %2975 = vmatprep.subr.bf16.mxu0 %v11456_v10  ;;  %3016 = vmatprep.subr.bf16.mxu1 %v11459_v11 }
 0x92f   :  { %2976 = vmatpush1.bf16.msra.mxu0 %v11454_v13  ;;  %3017 = vmatpush1.bf16.msra.mxu1 %v11457_v14  ;;  %v11508_v14 = vld [vmem:[#allocation17 + $0x70] ss:$8 sps:$4 sm:$0xff]  }
 0x930   :  { %2977 = vmatprep.subr.bf16.mxu0 %v11462_v16  ;;  %3018 = vmatprep.subr.bf16.mxu1 %v11465_v17  ;;  %v11511_v16 = vld [vmem:[#allocation17 + $0x170] ss:$8 sps:$4 sm:$0xff]  }
 0x933   :  { %2978 = vmatpush2.bf16.msra.mxu0 %v11460_v19  ;;  %3019 = vmatpush2.bf16.msra.mxu1 %v11463_v20  ;;  %v11516_v20 = vld [vmem:[#allocation17 + $0x64] ss:$8 sps:$4 sm:$0xff]  }
 0x934   :  { %2979 = vmatprep.subr.bf16.mxu0 %v11468_v21  ;;  %3020 = vmatprep.subr.bf16.mxu1 %v11471_v24 }
 0x937   :  { %2980 = vmatpush2.bf16.msra.mxu0 %v11466_v25  ;;  %3021 = vmatpush2.bf16.msra.mxu1 %v11469_v26  ;;  %v11519_v25 = vld [vmem:[#allocation17 + $0x164] ss:$8 sps:$4 sm:$0xff]  }
 0x938   :  { %2981 = vmatprep.subr.bf16.mxu0 %v11474_v27  ;;  %3022 = vmatprep.subr.bf16.mxu1 %v11477_v28 }
 0x93b   :  { %2982 = vmatpush2.bf16.msra.mxu0 %v11472_v29  ;;  %3023 = vmatpush2.bf16.msra.mxu1 %v11475_v31  ;;  %v11514_v29 = vld [vmem:[#allocation17 + $0x60] ss:$8 sps:$4 sm:$0xff]  }
 0x93c   :  { %2983 = vmatprep.subr.bf16.mxu0 %v11480_v33  ;;  %3024 = vmatprep.subr.bf16.mxu1 %v11483_v34  ;;  %v11517_v31 = vld [vmem:[#allocation17 + $0x160] ss:$8 sps:$4 sm:$0xff]   ;;  %v11522_v33 = vld [vmem:[#allocation17 + $0x54] ss:$8 sps:$4 sm:$0xff]  }
 0x93d   :  { %v11525_v34 = vld [vmem:[#allocation17 + $0x154] ss:$8 sps:$4 sm:$0xff]  }
 0x93f   :  { %2984 = vmatpush2.bf16.msra.mxu0 %v11478_v30  ;;  %3025 = vmatpush2.bf16.msra.mxu1 %v11481_v35  ;;  %v11520_v30 = vld [vmem:[#allocation17 + $0x50] ss:$8 sps:$4 sm:$0xff]  }
 0x940   :  { %2985 = vmatprep.subr.bf16.mxu0 %v11486_v23  ;;  %3026 = vmatprep.subr.bf16.mxu1 %v11489_v40  ;;  %v11523_v35 = vld [vmem:[#allocation17 + $0x150] ss:$8 sps:$4 sm:$0xff]   ;;  %v11528_v23 = vld [vmem:[#allocation17 + $0x44] ss:$8 sps:$4 sm:$0xff]  }
 0x941   :  { %v11531_v40 = vld [vmem:[#allocation17 + $0x144] ss:$8 sps:$4 sm:$0xff]  }
 0x943   :  { %2986 = vmatpush2.bf16.msra.mxu0 %v11484_v41  ;;  %3027 = vmatpush2.bf16.msra.mxu1 %v11487_v42  ;;  %v11526_v41 = vld [vmem:[#allocation17 + $0x40] ss:$8 sps:$4 sm:$0xff]  }
 0x944   :  { %2987 = vmatprep.subr.bf16.mxu0 %v11492_v43  ;;  %3028 = vmatprep.subr.bf16.mxu1 %v11495_v44  ;;  %v11529_v42 = vld [vmem:[#allocation17 + $0x140] ss:$8 sps:$4 sm:$0xff]   ;;  %v11534_v43 = vld [vmem:[#allocation17 + $0x34] ss:$8 sps:$4 sm:$0xff]  }
 0x945   :  { %v11537_v44 = vld [vmem:[#allocation17 + $0x134] ss:$8 sps:$4 sm:$0xff]  }
 0x947   :  { %2988 = vmatpush2.bf16.msra.mxu0 %v11490_v45  ;;  %3029 = vmatpush2.bf16.msra.mxu1 %v11493_v47  ;;  %v11532_v45 = vld [vmem:[#allocation17 + $0x30] ss:$8 sps:$4 sm:$0xff]  }
 0x948   :  { %2989 = vmatprep.subr.bf16.mxu0 %v11498_v52  ;;  %3030 = vmatprep.subr.bf16.mxu1 %v11501_v55  ;;  %v11535_v47 = vld [vmem:[#allocation17 + $0x130] ss:$8 sps:$4 sm:$0xff]   ;;  %v11543_v52 = vld [vmem:[#allocation17 + $0x124] ss:$8 sps:$4 sm:$0xff]   ;;  %v11541_v55 = vld [vmem:[#allocation17 + $0x120] ss:$8 sps:$4 sm:$0xff]  }
 0x94b   :  { %2990 = vmatpush2.bf16.msra.mxu0 %v11496_v49  ;;  %3031 = vmatpush2.bf16.msra.mxu1 %v11499_v53  ;;  %v11540_v49 = vld [vmem:[#allocation17 + $0x24] ss:$8 sps:$4 sm:$0xff]   ;;  %v11538_v53 = vld [vmem:[#allocation17 + $0x20] ss:$8 sps:$4 sm:$0xff]  }
 0x94c   :  { %2991 = vmatprep.subr.bf16.mxu0 %v11504_v56  ;;  %3032 = vmatprep.subr.bf16.mxu1 %v11507_v57  ;;  %v11546_v56 = vld [vmem:[#allocation17 + $0x14] ss:$8 sps:$4 sm:$0xff]  }
 0x94d   :  { %v11549_v57 = vld [vmem:[#allocation17 + $0x114] ss:$8 sps:$4 sm:$0xff]  }
 0x94f   :  { %2992 = vmatpush2.bf16.msra.mxu0 %v11502_v58  ;;  %3033 = vmatpush2.bf16.msra.mxu1 %v11505_v59  ;;  %v11544_v58 = vld [vmem:[#allocation17 + $0x10] ss:$8 sps:$4 sm:$0xff]  }
 0x950   :  { %3363 = vmatprep.subr.bf16.mxu0 %v11510_v60  ;;  %3404 = vmatprep.subr.bf16.mxu1 %v11513_v61  ;;  %v11547_v59 = vld [vmem:[#allocation17 + $0x110] ss:$8 sps:$4 sm:$0xff]   ;;  %v11552_v60 = vld [vmem:[#allocation17 + $0x4] ss:$8 sps:$4 sm:$0xff]  }
 0x951   :  { %v11555_v61 = vld [vmem:[#allocation17 + $0x104] ss:$8 sps:$4 sm:$0xff]  }
 0x9ca   :  { %v13810_v62 = vpop.f32.mrf.mxu0  ;;  %v13812_v63 = vpop.f32.mrf.mxu1 }
 0x9cc   :  { %v2371_v0 = vpop.f32.mrf.mxu0  ;;  %v2412_v1 = vpop.f32.mrf.mxu1 }
 0x9cd   :  { %v2420_v24 = vpack.c.bf16 %v2412_v1, %v2412_v1  ;;  %v2418_v26 = vpack.c.bf16 %v2371_v0, %v2371_v0  ;;  %v11550_v0 = vld [vmem:[#allocation17] ss:$8 sps:$4 sm:$0xff]  }
 0x9ce   :  { %v2373_v2 = vpop.f32.mrf.mxu0  ;;  %v2414_v3 = vpop.f32.mrf.mxu1  ;;  %v11553_v1 = vld [vmem:[#allocation17 + $0x100] ss:$8 sps:$4 sm:$0xff]  }
 0x9cf   :  { %v11558_v2 = vld [vmem:[#allocation17 + $0xf4] ss:$8 sps:$4 sm:$0xff]  }
 0x9d0   :  { %v2374_v4 = vpop.f32.mrf.mxu0  ;;  %v2415_v5 = vpop.f32.mrf.mxu1  ;;  %v11561_v3 = vld [vmem:[#allocation17 + $0x1f4] ss:$8 sps:$4 sm:$0xff]  }
 0x9d1   :  { %v11556_v4 = vld [vmem:[#allocation17 + $0xf0] ss:$8 sps:$4 sm:$0xff]  }
 0x9d2   :  { %v2524_v6 = vpop.f32.mrf.mxu0  ;;  %v2565_v7 = vpop.f32.mrf.mxu1  ;;  %v11559_v5 = vld [vmem:[#allocation17 + $0x1f0] ss:$8 sps:$4 sm:$0xff]  }
 0x9d3   :  { %v2574_v8 = vpack.c.bf16 %v2565_v7, %v2565_v7  ;;  %v2572_v17 = vpack.c.bf16 %v2524_v6, %v2524_v6  ;;  %v11564_v6 = vld [vmem:[#allocation17 + $0xe4] ss:$8 sps:$4 sm:$0xff]  }
 0x9d4   :  { %v2526_v9 = vpop.f32.mrf.mxu0  ;;  %v2567_v10 = vpop.f32.mrf.mxu1  ;;  %v11567_v7 = vld [vmem:[#allocation17 + $0x1e4] ss:$8 sps:$4 sm:$0xff]  }
 0x9d5   :  { %v2573_v11 = vpack.c.bf16 %v2526_v9, %v2526_v9  ;;  %v2575_v13 = vpack.c.bf16 %v2567_v10, %v2567_v10  ;;  %v11565_v9 = vld [vmem:[#allocation17 + $0x1e0] ss:$8 sps:$4 sm:$0xff]   ;;  %v11570_v10 = vld [vmem:[#allocation17 + $0xd4] ss:$8 sps:$4 sm:$0xff]  }
 0x9d6   :  { %v2528_v19 = vpop.f32.mrf.mxu0  ;;  %v2569_v21 = vpop.f32.mrf.mxu1 }
 0x9d7   :  { %2993 = vmatprep.mubr.bf16.mxu0 %v2573_v11  ;;  %3034 = vmatprep.mubr.bf16.mxu1 %v2575_v13  ;;  %v11573_v11 = vld [vmem:[#allocation17 + $0x1d4] ss:$8 sps:$4 sm:$0xff]   ;;  %v11568_v13 = vld [vmem:[#allocation17 + $0xd0] ss:$8 sps:$4 sm:$0xff]   ;;  %v11574_v19 = vld [vmem:[#allocation17 + $0xc0] ss:$8 sps:$4 sm:$0xff]  }
 0x9d8   :  { %v2529_v27 = vpop.f32.mrf.mxu0  ;;  %2994 = vmatmul.mubr.bf16.vlgmr.msra.gmra.mxu0 %v2572_v17  ;;  %3035 = vmatmul.mubr.bf16.vlgmr.msra.gmra.mxu1 %v2574_v8  ;;  %v2570_v28 = vpop.f32.mrf.mxu1  ;;  %v11562_v8 = vld [vmem:[#allocation17 + $0xe0] ss:$8 sps:$4 sm:$0xff]   ;;  %v11579_v17 = vld [vmem:[#allocation17 + $0x1c4] ss:$8 sps:$4 sm:$0xff]   ;;  %v11582_v21 = vld [vmem:[#allocation17 + $0xb4] ss:$8 sps:$4 sm:$0xff]  }
 0x9d9   :  { %3364 = vmatpush1.bf16.msra.mxu0 %v11508_v14  ;;  %3405 = vmatpush1.bf16.msra.mxu1 %v11511_v16  ;;  %v11571_v14 = vld [vmem:[#allocation17 + $0x1d0] ss:$8 sps:$4 sm:$0xff]   ;;  %v11576_v16 = vld [vmem:[#allocation17 + $0xc4] ss:$8 sps:$4 sm:$0xff]  }
 0x9da   :  { %3395 = vmatprep.mubr.bf16.mxu0 %v2418_v26  ;;  %3365 = vmatprep.subr.bf16.mxu0 %v11516_v20  ;;  %v11577_v20 = vld [vmem:[#allocation17 + $0x1c0] ss:$8 sps:$4 sm:$0xff]   ;;  %v11583_v26 = vld [vmem:[#allocation17 + $0x1b0] ss:$8 sps:$4 sm:$0xff]   ;;  %v11588_v27 = vld [vmem:[#allocation17 + $0xa4] ss:$8 sps:$4 sm:$0xff]  }
 0x9db   :  { %3406 = vmatprep.subr.bf16.mxu1 %v11519_v25  ;;  %3436 = vmatprep.mubr.bf16.mxu1 %v2420_v24  ;;  %v11585_v24 = vld [vmem:[#allocation17 + $0x1b4] ss:$8 sps:$4 sm:$0xff]   ;;  %v11580_v25 = vld [vmem:[#allocation17 + $0xb0] ss:$8 sps:$4 sm:$0xff]   ;;  %v11591_v28 = vld [vmem:[#allocation17 + $0x1a4] ss:$8 sps:$4 sm:$0xff]  }
 0x9dd   :  { %3366 = vmatpush1.bf16.msra.mxu0 %v11514_v29  ;;  %3407 = vmatpush1.bf16.msra.mxu1 %v11517_v31  ;;  %v11586_v29 = vld [vmem:[#allocation17 + $0xa0] ss:$8 sps:$4 sm:$0xff]  }
 0x9de   :  { %3367 = vmatprep.subr.bf16.mxu0 %v11522_v33  ;;  %3408 = vmatprep.subr.bf16.mxu1 %v11525_v34  ;;  %v11589_v31 = vld [vmem:[#allocation17 + $0x1a0] ss:$8 sps:$4 sm:$0xff]   ;;  %v11594_v33 = vld [vmem:[#allocation17 + $0x94] ss:$8 sps:$4 sm:$0xff]  }
 0x9df   :  { %v11597_v34 = vld [vmem:[#allocation17 + $0x194] ss:$8 sps:$4 sm:$0xff]  }
 0x9e1   :  { %3368 = vmatpush1.bf16.msra.mxu0 %v11520_v30  ;;  %3409 = vmatpush1.bf16.msra.mxu1 %v11523_v35  ;;  %v11592_v30 = vld [vmem:[#allocation17 + $0x90] ss:$8 sps:$4 sm:$0xff]  }
 0x9e2   :  { %3369 = vmatprep.subr.bf16.mxu0 %v11528_v23  ;;  %3410 = vmatprep.subr.bf16.mxu1 %v11531_v40  ;;  %v11595_v35 = vld [vmem:[#allocation17 + $0x190] ss:$8 sps:$4 sm:$0xff]   ;;  %v11600_v23 = vld [vmem:[#allocation17 + $0x84] ss:$8 sps:$4 sm:$0xff]  }
 0x9e3   :  { %v11603_v40 = vld [vmem:[#allocation17 + $0x184] ss:$8 sps:$4 sm:$0xff]  }
 0x9e5   :  { %3370 = vmatpush1.bf16.msra.mxu0 %v11526_v41  ;;  %3411 = vmatpush1.bf16.msra.mxu1 %v11529_v42  ;;  %v11598_v41 = vld [vmem:[#allocation17 + $0x80] ss:$8 sps:$4 sm:$0xff]  }
 0x9e6   :  { %3371 = vmatprep.subr.bf16.mxu0 %v11534_v43  ;;  %3412 = vmatprep.subr.bf16.mxu1 %v11537_v44  ;;  %v11601_v42 = vld [vmem:[#allocation17 + $0x180] ss:$8 sps:$4 sm:$0xff]   ;;  %v2419_v43 = vpack.c.bf16 %v13812_v63, %v13812_v63  ;;  %v2417_v44 = vpack.c.bf16 %v13810_v62, %v13810_v62  ;;  %v10175_v63 = vld [vmem:[%s14116_s9 + $0x8] sm:$0xf] }
 0x9e7   :  { %v11612_v62 = vld [vmem:[#allocation17 + $0x464] ss:$8 sps:$4 sm:$0xff]  }
 0x9e9   :  { %3372 = vmatpush1.bf16.msra.mxu0 %v11532_v45  ;;  %3413 = vmatpush1.bf16.msra.mxu1 %v11535_v47  ;;  %v11604_v45 = vld [vmem:[#allocation17 + $0x470] ss:$8 sps:$4 sm:$0xff]   ;;  %v11606_v47 = vld [vmem:[#allocation17 + $0x474] ss:$8 sps:$4 sm:$0xff]  }
 0x9ea   :  { %3373 = vmatprep.subr.bf16.mxu0 %v11540_v49  ;;  %3414 = vmatprep.subr.bf16.mxu1 %v11543_v52  ;;  %v11607_v49 = vld [vmem:[#allocation17 + $0x570] ss:$8 sps:$4 sm:$0xff]   ;;  %v11609_v52 = vld [vmem:[#allocation17 + $0x574] ss:$8 sps:$4 sm:$0xff]  }
 0x9ed   :  { %3374 = vmatpush1.bf16.msra.mxu0 %v11538_v53  ;;  %3415 = vmatpush1.bf16.msra.mxu1 %v11541_v55  ;;  %v11621_v53 = vld [vmem:[#allocation17 + $0x554] ss:$8 sps:$4 sm:$0xff]   ;;  %v11616_v55 = vld [vmem:[#allocation17 + $0x450] ss:$8 sps:$4 sm:$0xff]  }
 0x9ee   :  { %3375 = vmatprep.subr.bf16.mxu0 %v11546_v56  ;;  %3416 = vmatprep.subr.bf16.mxu1 %v11549_v57  ;;  %v11619_v56 = vld [vmem:[#allocation17 + $0x550] ss:$8 sps:$4 sm:$0xff]   ;;  %v11624_v57 = vld [vmem:[#allocation17 + $0x444] ss:$8 sps:$4 sm:$0xff]  }
 0x9f1   :  { %3376 = vmatpush1.bf16.msra.mxu0 %v11544_v58  ;;  %3417 = vmatpush1.bf16.msra.mxu1 %v11547_v59  ;;  %v11627_v58 = vld [vmem:[#allocation17 + $0x544] ss:$8 sps:$4 sm:$0xff]   ;;  %v11622_v59 = vld [vmem:[#allocation17 + $0x440] ss:$8 sps:$4 sm:$0xff]  }
 0x9f2   :  { %3377 = vmatprep.subr.bf16.mxu0 %v11552_v60  ;;  %3418 = vmatprep.subr.bf16.mxu1 %v11555_v61  ;;  %v11625_v60 = vld [vmem:[#allocation17 + $0x540] ss:$8 sps:$4 sm:$0xff]   ;;  %v11630_v61 = vld [vmem:[#allocation17 + $0x434] ss:$8 sps:$4 sm:$0xff]  }
 0x9f5   :  { %3378 = vmatpush1.bf16.msra.mxu0 %v11550_v0  ;;  %3419 = vmatpush1.bf16.msra.mxu1 %v11553_v1  ;;  %v11633_v0 = vld [vmem:[#allocation17 + $0x534] ss:$8 sps:$4 sm:$0xff]   ;;  %v11628_v1 = vld [vmem:[#allocation17 + $0x430] ss:$8 sps:$4 sm:$0xff]  }
 0x9f6   :  { %3379 = vmatprep.subr.bf16.mxu0 %v11558_v2  ;;  %3420 = vmatprep.subr.bf16.mxu1 %v11561_v3  ;;  %v11631_v2 = vld [vmem:[#allocation17 + $0x530] ss:$8 sps:$4 sm:$0xff]   ;;  %v11636_v3 = vld [vmem:[#allocation17 + $0x424] ss:$8 sps:$4 sm:$0xff]  }
 0x9f9   :  { %3380 = vmatpush2.bf16.msra.mxu0 %v11556_v4  ;;  %3421 = vmatpush2.bf16.msra.mxu1 %v11559_v5  ;;  %v11639_v4 = vld [vmem:[#allocation17 + $0x524] ss:$8 sps:$4 sm:$0xff]   ;;  %v11634_v5 = vld [vmem:[#allocation17 + $0x420] ss:$8 sps:$4 sm:$0xff]  }
 0x9fa   :  { %3381 = vmatprep.subr.bf16.mxu0 %v11564_v6  ;;  %3422 = vmatprep.subr.bf16.mxu1 %v11567_v7  ;;  %v11637_v6 = vld [vmem:[#allocation17 + $0x520] ss:$8 sps:$4 sm:$0xff]   ;;  %v11642_v7 = vld [vmem:[#allocation17 + $0x414] ss:$8 sps:$4 sm:$0xff]  }
 0x9fd   :  { %3382 = vmatpush2.bf16.msra.mxu0 %v11562_v8  ;;  %3423 = vmatpush2.bf16.msra.mxu1 %v11565_v9  ;;  %v11645_v8 = vld [vmem:[#allocation17 + $0x514] ss:$8 sps:$4 sm:$0xff]   ;;  %v11640_v9 = vld [vmem:[#allocation17 + $0x410] ss:$8 sps:$4 sm:$0xff]  }
 0x9fe   :  { %3383 = vmatprep.subr.bf16.mxu0 %v11570_v10  ;;  %3424 = vmatprep.subr.bf16.mxu1 %v11573_v11  ;;  %v11643_v10 = vld [vmem:[#allocation17 + $0x510] ss:$8 sps:$4 sm:$0xff]   ;;  %v11648_v11 = vld [vmem:[#allocation17 + $0x404] ss:$8 sps:$4 sm:$0xff]  }
 0xa01   :  { %3384 = vmatpush2.bf16.msra.mxu0 %v11568_v13  ;;  %3425 = vmatpush2.bf16.msra.mxu1 %v11571_v14  ;;  %v11651_v13 = vld [vmem:[#allocation17 + $0x504] ss:$8 sps:$4 sm:$0xff]   ;;  %v11646_v14 = vld [vmem:[#allocation17 + $0x400] ss:$8 sps:$4 sm:$0xff]  }
 0xa02   :  { %3385 = vmatprep.subr.bf16.mxu0 %v11576_v16  ;;  %3426 = vmatprep.subr.bf16.mxu1 %v11579_v17  ;;  %v11649_v16 = vld [vmem:[#allocation17 + $0x500] ss:$8 sps:$4 sm:$0xff]   ;;  %v11654_v17 = vld [vmem:[#allocation17 + $0x4f4] ss:$8 sps:$4 sm:$0xff]  }
 0xa05   :  { %3386 = vmatpush2.bf16.msra.mxu0 %v11574_v19  ;;  %3427 = vmatpush2.bf16.msra.mxu1 %v11577_v20  ;;  %v11657_v19 = vld [vmem:[#allocation17 + $0x5f4] ss:$8 sps:$4 sm:$0xff]   ;;  %v11652_v20 = vld [vmem:[#allocation17 + $0x4f0] ss:$8 sps:$4 sm:$0xff]  }
 0xa06   :  { %3387 = vmatprep.subr.bf16.mxu0 %v11582_v21  ;;  %3428 = vmatprep.subr.bf16.mxu1 %v11585_v24  ;;  %v11655_v21 = vld [vmem:[#allocation17 + $0x5f0] ss:$8 sps:$4 sm:$0xff]   ;;  %v11660_v24 = vld [vmem:[#allocation17 + $0x4e4] ss:$8 sps:$4 sm:$0xff]  }
 0xa09   :  { %3388 = vmatpush2.bf16.msra.mxu0 %v11580_v25  ;;  %3429 = vmatpush2.bf16.msra.mxu1 %v11583_v26  ;;  %v11663_v25 = vld [vmem:[#allocation17 + $0x5e4] ss:$8 sps:$4 sm:$0xff]   ;;  %v11658_v26 = vld [vmem:[#allocation17 + $0x4e0] ss:$8 sps:$4 sm:$0xff]  }
 0xa0a   :  { %3389 = vmatprep.subr.bf16.mxu0 %v11588_v27  ;;  %3430 = vmatprep.subr.bf16.mxu1 %v11591_v28  ;;  %v11661_v27 = vld [vmem:[#allocation17 + $0x5e0] ss:$8 sps:$4 sm:$0xff]   ;;  %v11666_v28 = vld [vmem:[#allocation17 + $0x4d4] ss:$8 sps:$4 sm:$0xff]  }
 0xa0d   :  { %3390 = vmatpush2.bf16.msra.mxu0 %v11586_v29  ;;  %3431 = vmatpush2.bf16.msra.mxu1 %v11589_v31  ;;  %v11669_v29 = vld [vmem:[#allocation17 + $0x5d4] ss:$8 sps:$4 sm:$0xff]   ;;  %v11664_v31 = vld [vmem:[#allocation17 + $0x4d0] ss:$8 sps:$4 sm:$0xff]  }
 0xa0e   :  { %3391 = vmatprep.subr.bf16.mxu0 %v11594_v33  ;;  %3432 = vmatprep.subr.bf16.mxu1 %v11597_v34  ;;  %v11667_v33 = vld [vmem:[#allocation17 + $0x5d0] ss:$8 sps:$4 sm:$0xff]   ;;  %v11672_v34 = vld [vmem:[#allocation17 + $0x4c4] ss:$8 sps:$4 sm:$0xff]  }
 0xa11   :  { %3392 = vmatpush2.bf16.msra.mxu0 %v11592_v30  ;;  %3433 = vmatpush2.bf16.msra.mxu1 %v11595_v35  ;;  %v11675_v30 = vld [vmem:[#allocation17 + $0x5c4] ss:$8 sps:$4 sm:$0xff]   ;;  %v11670_v35 = vld [vmem:[#allocation17 + $0x4c0] ss:$8 sps:$4 sm:$0xff]  }
 0xa12   :  { %3393 = vmatprep.subr.bf16.mxu0 %v11600_v23  ;;  %3434 = vmatprep.subr.bf16.mxu1 %v11603_v40  ;;  %v11673_v23 = vld [vmem:[#allocation17 + $0x5c0] ss:$8 sps:$4 sm:$0xff]   ;;  %v11678_v40 = vld [vmem:[#allocation17 + $0x4b4] ss:$8 sps:$4 sm:$0xff]  }
 0xa15   :  { %3394 = vmatpush2.bf16.msra.mxu0 %v11598_v41  ;;  %3435 = vmatpush2.bf16.msra.mxu1 %v11601_v42  ;;  %v11681_v41 = vld [vmem:[#allocation17 + $0x5b4] ss:$8 sps:$4 sm:$0xff]   ;;  %v11676_v42 = vld [vmem:[#allocation17 + $0x4b0] ss:$8 sps:$4 sm:$0xff]  }
 0xa16   :  { %3464 = vmatprep.subr.bf16.mxu0 %v13788_v37  ;;  %3505 = vmatprep.subr.bf16.mxu1 %v13790_v32  ;;  %v11615_v37 = vld [vmem:[#allocation17 + $0x564] ss:$8 sps:$4 sm:$0xff]   ;;  %v11613_v32 = vld [vmem:[#allocation17 + $0x560] ss:$8 sps:$4 sm:$0xff]  }
 0xa18   :  { %3396 = vmatmul.mubr.bf16.vlgmr.msra.gmra.mxu0 %v2417_v44  ;;  %3437 = vmatmul.mubr.bf16.vlgmr.msra.gmra.mxu1 %v2419_v43  ;;  %v11679_v43 = vld [vmem:[#allocation17 + $0x5b0] ss:$8 sps:$4 sm:$0xff]   ;;  %v11684_v44 = vld [vmem:[#allocation17 + $0x4a4] ss:$8 sps:$4 sm:$0xff]  }
 0xa19   :  { %3465 = vmatpush1.bf16.msra.mxu0 %v13786_v22  ;;  %3506 = vmatpush1.bf16.msra.mxu1 %v13792_v38  ;;  %v11610_v22 = vld [vmem:[#allocation17 + $0x460] ss:$8 sps:$4 sm:$0xff]   ;;  %v11618_v38 = vld [vmem:[#allocation17 + $0x454] ss:$8 sps:$4 sm:$0xff]  }
 0xa1a   :  { %3482 = vmatprep.mubr.bf16.mxu0 %v13293_v39  ;;  %3523 = vmatprep.mubr.bf16.mxu1 %v13293_v39 }
 0xa1b   :  { %3921 = vmatprep.subr.bf16.mxu0 %v11606_v47  ;;  %3962 = vmatprep.subr.bf16.mxu1 %v11609_v52  ;;  %v11685_v47 = vld [vmem:[#allocation17 + $0x5a0] ss:$8 sps:$4 sm:$0xff]   ;;  %v11688_v52 = vld [vmem:[#allocation17 + $0x490] ss:$8 sps:$4 sm:$0xff]  }
 0xa20   :  { %10176 = vmatmul.mubr.msk.bf16.vlgmr.msra.gmra.mxu0 %vm689_vm1, %v10175_v63  ;;  %10177 = vmatmul.mubr.msk.bf16.vlgmr.msra.gmra.mxu1 %vm689_vm1, %v10175_v63  ;;  %v11682_v63 = vld [vmem:[#allocation17 + $0x4a0] ss:$8 sps:$4 sm:$0xff]  }
 0xa21   :  { %3922 = vmatpush1.bf16.msra.mxu0 %v11604_v45  ;;  %3963 = vmatpush1.bf16.msra.mxu1 %v11607_v49  ;;  %v11687_v45 = vld [vmem:[#allocation17 + $0x5a4] ss:$8 sps:$4 sm:$0xff]   ;;  %v11690_v49 = vld [vmem:[#allocation17 + $0x494] ss:$8 sps:$4 sm:$0xff]  }
 0xa22   :  { %3923 = vmatprep.subr.bf16.mxu0 %v11612_v62  ;;  %3964 = vmatprep.subr.bf16.mxu1 %v11615_v37  ;;  %v11693_v62 = vld [vmem:[#allocation17 + $0x594] ss:$8 sps:$4 sm:$0xff]   ;;  %v11691_v37 = vld [vmem:[#allocation17 + $0x590] ss:$8 sps:$4 sm:$0xff]  }
 0xa25   :  { %3924 = vmatpush1.bf16.msra.mxu0 %v11610_v22  ;;  %3965 = vmatpush1.bf16.msra.mxu1 %v11613_v32  ;;  %v11696_v22 = vld [vmem:[#allocation17 + $0x484] ss:$8 sps:$4 sm:$0xff]   ;;  %v11694_v32 = vld [vmem:[#allocation17 + $0x480] ss:$8 sps:$4 sm:$0xff]  }
 0xa26   :  { %3925 = vmatprep.subr.bf16.mxu0 %v11618_v38  ;;  %3966 = vmatprep.subr.bf16.mxu1 %v11621_v53  ;;  %v11699_v38 = vld [vmem:[#allocation17 + $0x584] ss:$8 sps:$4 sm:$0xff]   ;;  %v11697_v53 = vld [vmem:[#allocation17 + $0x580] ss:$8 sps:$4 sm:$0xff]  }
 0xa29   :  { %3926 = vmatpush1.bf16.msra.mxu0 %v11616_v55  ;;  %3967 = vmatpush1.bf16.msra.mxu1 %v11619_v56  ;;  %v11702_v55 = vld [vmem:[%s14117_s26 + $0x34] ss:$8 sps:$4 sm:$0xff]  }
 0xa2a   :  { %3927 = vmatprep.subr.bf16.mxu0 %v11624_v57  ;;  %3968 = vmatprep.subr.bf16.mxu1 %v11627_v58 }
 0xa2d   :  { %3928 = vmatpush1.bf16.msra.mxu0 %v11622_v59  ;;  %3969 = vmatpush1.bf16.msra.mxu1 %v11625_v60 }
 0xa2e   :  { %3929 = vmatprep.subr.bf16.mxu0 %v11630_v61  ;;  %3970 = vmatprep.subr.bf16.mxu1 %v11633_v0 }
 0xa31   :  { %3930 = vmatpush1.bf16.msra.mxu0 %v11628_v1  ;;  %3971 = vmatpush1.bf16.msra.mxu1 %v11631_v2 }
 0xa32   :  { %3931 = vmatprep.subr.bf16.mxu0 %v11636_v3  ;;  %3972 = vmatprep.subr.bf16.mxu1 %v11639_v4 }
 0xa35   :  { %3932 = vmatpush1.bf16.msra.mxu0 %v11634_v5  ;;  %3973 = vmatpush1.bf16.msra.mxu1 %v11637_v6 }
 0xa36   :  { %3933 = vmatprep.subr.bf16.mxu0 %v11642_v7  ;;  %3974 = vmatprep.subr.bf16.mxu1 %v11645_v8 }
 0xa39   :  { %3934 = vmatpush1.bf16.msra.mxu0 %v11640_v9  ;;  %3975 = vmatpush1.bf16.msra.mxu1 %v11643_v10 }
 0xa3a   :  { %3935 = vmatprep.subr.bf16.mxu0 %v11648_v11  ;;  %3976 = vmatprep.subr.bf16.mxu1 %v11651_v13 }
 0xa3d   :  { %3936 = vmatpush1.bf16.msra.mxu0 %v11646_v14  ;;  %3977 = vmatpush1.bf16.msra.mxu1 %v11649_v16 }
 0xa3e   :  { %3937 = vmatprep.subr.bf16.mxu0 %v11654_v17  ;;  %3978 = vmatprep.subr.bf16.mxu1 %v11657_v19 }
 0xa41   :  { %3938 = vmatpush2.bf16.msra.mxu0 %v11652_v20  ;;  %3979 = vmatpush2.bf16.msra.mxu1 %v11655_v21 }
 0xa42   :  { %3939 = vmatprep.subr.bf16.mxu0 %v11660_v24  ;;  %3980 = vmatprep.subr.bf16.mxu1 %v11663_v25 }
 0xa45   :  { %3940 = vmatpush2.bf16.msra.mxu0 %v11658_v26  ;;  %3981 = vmatpush2.bf16.msra.mxu1 %v11661_v27 }
 0xa46   :  { %3941 = vmatprep.subr.bf16.mxu0 %v11666_v28  ;;  %3982 = vmatprep.subr.bf16.mxu1 %v11669_v29 }
 0xa49   :  { %3942 = vmatpush2.bf16.msra.mxu0 %v11664_v31  ;;  %3983 = vmatpush2.bf16.msra.mxu1 %v11667_v33  ;;  %v11700_v33 = vld [vmem:[%s14117_s26 + $0x30] ss:$8 sps:$4 sm:$0xff]  }
 0xa4a   :  { %3943 = vmatprep.subr.bf16.mxu0 %v11672_v34  ;;  %3984 = vmatprep.subr.bf16.mxu1 %v11675_v30  ;;  %v11705_v34 = vld [vmem:[%s14117_s26 + $0x24] ss:$8 sps:$4 sm:$0xff]  }
 0xa4d   :  { %3944 = vmatpush2.bf16.msra.mxu0 %v11670_v35  ;;  %3985 = vmatpush2.bf16.msra.mxu1 %v11673_v23  ;;  %v11703_v23 = vld [vmem:[%s14117_s26 + $0x20] ss:$8 sps:$4 sm:$0xff]  }
 0xa4e   :  { %3945 = vmatprep.subr.bf16.mxu0 %v11678_v40  ;;  %3986 = vmatprep.subr.bf16.mxu1 %v11681_v41  ;;  %v4020_v40 = vld [vmem:[#allocation20] sm:$0xf] }
 0xa4f   :  { %v11708_v41 = vld [vmem:[%s14117_s26 + $0x14] ss:$8 sps:$4 sm:$0xff]  }
 0xa51   :  { %3946 = vmatpush2.bf16.msra.mxu0 %v11676_v42  ;;  %3987 = vmatpush2.bf16.msra.mxu1 %v11679_v43  ;;  %v11706_v42 = vld [vmem:[%s14117_s26 + $0x10] ss:$8 sps:$4 sm:$0xff]  }
 0xa52   :  { %3947 = vmatprep.subr.bf16.mxu0 %v11684_v44  ;;  %3988 = vmatprep.subr.bf16.mxu1 %v11687_v45 }
 0xa55   :  { %3948 = vmatpush2.bf16.msra.mxu0 %v11682_v63  ;;  %3989 = vmatpush2.bf16.msra.mxu1 %v11685_v47 }
 0xa56   :  { %3949 = vmatprep.subr.bf16.mxu0 %v11690_v49  ;;  %3990 = vmatprep.subr.bf16.mxu1 %v11693_v62 }
 0xa59   :  { %3950 = vmatpush2.bf16.msra.mxu0 %v11688_v52  ;;  %3991 = vmatpush2.bf16.msra.mxu1 %v11691_v37 }
 0xa5a   :  { %3951 = vmatprep.subr.bf16.mxu0 %v11696_v22  ;;  %3992 = vmatprep.subr.bf16.mxu1 %v11699_v38 }
 0xa5d   :  { %3952 = vmatpush2.bf16.msra.mxu0 %v11694_v32  ;;  %3993 = vmatpush2.bf16.msra.mxu1 %v11697_v53 }
 0xa5e   :  { %11178 = vmatprep.subr.bf16.mxu0 %v13291_v36  ;;  %4136 = vmatprep.subr.bf16.mxu1 %v11702_v55 }
 0xa98   :  { %v2995_v56 = vpop.f32.mrf.mxu0  ;;  %v3036_v57 = vpop.f32.mrf.mxu1 }
 0xa99   :  { %v3037_v58 = vadd.f32 %v3036_v57, %v2995_v56 }
 0xa9a   :  { %v2997_v59 = vpop.f32.mrf.mxu0  ;;  %v3038_v60 = vpop.f32.mrf.mxu1 }
 0xa9b   :  { %v3039_v61 = vadd.f32 %v3038_v60, %v2997_v59  ;;  %v11714_v59 = vld [vmem:[#allocation23 + $0x2e4] ss:$16 sps:$4 sm:$0xff]  }
 0xa9c   :  { %v2999_v0 = vpop.f32.mrf.mxu0  ;;  %v3040_v1 = vpop.f32.mrf.mxu1  ;;  %v11720_v60 = vld [vmem:[#allocation23 + $0x2c4] ss:$16 sps:$4 sm:$0xff]  }
 0xa9d   :  { %v11726_v0 = vld [vmem:[#allocation23 + $0x2a4] ss:$16 sps:$4 sm:$0xff]   ;;  %v11724_v1 = vld [vmem:[#allocation23 + $0x2a0] ss:$16 sps:$4 sm:$0xff]  }
 0xa9e   :  { %v3000_v2 = vpop.f32.mrf.mxu0  ;;  %v3041_v3 = vpop.f32.mrf.mxu1 }
 0xa9f   :  { %v11732_v2 = vld [vmem:[#allocation23 + $0x284] ss:$16 sps:$4 sm:$0xff]   ;;  %v11730_v3 = vld [vmem:[#allocation23 + $0x280] ss:$16 sps:$4 sm:$0xff]  }
 0xad8   :  { %v3397_v4 = vpop.f32.mrf.mxu0  ;;  %v3438_v5 = vpop.f32.mrf.mxu1 }
 0xad9   :  { %v3398_v6 = vadd.f32 %v3397_v4, %v3037_v58  ;;  %v11712_v58 = vld [vmem:[#allocation23 + $0x2e0] ss:$16 sps:$4 sm:$0xff]   ;;  %v11738_v4 = vld [vmem:[#allocation23 + $0x264] ss:$16 sps:$4 sm:$0xff]  }
 0xada   :  { %v3399_v7 = vpop.f32.mrf.mxu0  ;;  %v3440_v8 = vpop.f32.mrf.mxu1 }
 0xadb   :  { %v3439_v9 = vadd.f32 %v3438_v5, %v3398_v6  ;;  %v3400_v10 = vadd.f32 %v3399_v7, %v3039_v61  ;;  %v11718_v61 = vld [vmem:[#allocation23 + $0x2c0] ss:$16 sps:$4 sm:$0xff]   ;;  %v11744_v6 = vld [vmem:[#allocation23 + $0x244] ss:$16 sps:$4 sm:$0xff]  }
 0xadc   :  { %v3401_v11 = vpop.f32.mrf.mxu0  ;;  %v3442_v13 = vpop.f32.mrf.mxu1  ;;  %v11736_v5 = vld [vmem:[#allocation23 + $0x260] ss:$16 sps:$4 sm:$0xff]  }
 0xadd   :  { %v3441_v14 = vadd.f32 %v3440_v8, %v3400_v10  ;;  %v11742_v7 = vld [vmem:[#allocation23 + $0x240] ss:$16 sps:$4 sm:$0xff]   ;;  %v11750_v8 = vld [vmem:[#allocation23 + $0x224] ss:$16 sps:$4 sm:$0xff]  }
 0xade   :  { %v3402_v16 = vpop.f32.mrf.mxu0  ;;  %v3443_v17 = vpop.f32.mrf.mxu1  ;;  %v11756_v10 = vld [vmem:[#allocation23 + $0x204] ss:$16 sps:$4 sm:$0xff]   ;;  %v11754_v11 = vld [vmem:[#allocation23 + $0x200] ss:$16 sps:$4 sm:$0xff]  }
 0xadf   :  { %v11762_v13 = vld [vmem:[#allocation23 + $0x3e4] ss:$16 sps:$4 sm:$0xff]   ;;  %v11766_v17 = vld [vmem:[#allocation23 + $0x3c0] ss:$16 sps:$4 sm:$0xff]  }
 0xae0   :  { %v3484_v19 = vpop.f32.mrf.mxu0  ;;  %v3525_v20 = vpop.f32.mrf.mxu1  ;;  %v11768_v16 = vld [vmem:[#allocation23 + $0x3c4] ss:$16 sps:$4 sm:$0xff]  }
 0xae1   :  { %v3534_v21 = vpack.c.bf16 %v3525_v20, %v3525_v20  ;;  %v3532_v28 = vpack.c.bf16 %v3484_v19, %v3484_v19  ;;  %v11774_v19 = vld [vmem:[#allocation23 + $0x3a4] ss:$16 sps:$4 sm:$0xff]   ;;  %v11772_v20 = vld [vmem:[#allocation23 + $0x3a0] ss:$16 sps:$4 sm:$0xff]  }
 0xae2   :  { %v3486_v24 = vpop.f32.mrf.mxu0  ;;  %v3527_v25 = vpop.f32.mrf.mxu1 }
 0xae3   :  { %v3533_v26 = vpack.c.bf16 %v3486_v24, %v3486_v24  ;;  %v3535_v27 = vpack.c.bf16 %v3527_v25, %v3527_v25  ;;  %v11778_v24 = vld [vmem:[#allocation23 + $0x380] ss:$16 sps:$4 sm:$0xff]   ;;  %v11786_v25 = vld [vmem:[#allocation23 + $0x364] ss:$16 sps:$4 sm:$0xff]  }
 0xae4   :  { %v3488_v29 = vpop.f32.mrf.mxu0  ;;  %v3529_v31 = vpop.f32.mrf.mxu1 }
 0xae5   :  { %3953 = vmatprep.mubr.bf16.mxu0 %v3533_v26  ;;  %3994 = vmatprep.mubr.bf16.mxu1 %v3535_v27  ;;  %v11784_v26 = vld [vmem:[#allocation23 + $0x360] ss:$16 sps:$4 sm:$0xff]   ;;  %v4005_v27 = vld [vmem:[#allocation19] sm:$0x3] }
 0xae6   :  { %v3489_v30 = vpop.f32.mrf.mxu0  ;;  %3954 = vmatmul.mubr.bf16.vlgmr.msra.gmra.mxu0 %v3532_v28  ;;  %3995 = vmatmul.mubr.bf16.vlgmr.msra.gmra.mxu1 %v3534_v21  ;;  %v3530_v35 = vpop.f32.mrf.mxu1  ;;  %v11780_v21 = vld [vmem:[#allocation23 + $0x384] ss:$16 sps:$4 sm:$0xff]   ;;  %v4073_v28 = vld [vmem:[#allocation22] sm:$0x3]  ;;  %v4010_v29 = vrot.slane %v4005_v27, %v13773_v48 }
 0xae7   :  { %11179 = vmatpush3.bf16.msra.mxu0 %v4019_v18  ;;  %11180 = vmatprep.mubr.msk.bf16.mxu0 %vm13292_vm2, %v13291_v36  ;;  %v4078_v31 = vrot.slane %v4073_v28, %v13773_v48 }
 0xae8   :  { %4137 = vmatpush1.bf16.msra.mxu1 %v11700_v33  ;;  %4160 = vmatprep.mubr.bf16.mxu1 %v13293_v39  ;;  %v4014_v33 = vrot.slane %v4005_v27, %v13776_v50  ;;  %v11804_v27 = vld [vmem:[#allocation23 + $0x304] ss:$16 sps:$4 sm:$0xff]  }
 0xae9   :  { %4138 = vmatprep.subr.bf16.mxu1 %v11705_v34  ;;  %v4082_v34 = vrot.slane %v4073_v28, %v13776_v50  ;;  %v11807_v28 = vld [vmem:[#allocation23 + $0x30c] ss:$16 sps:$4 sm:$0xff]  }
 0xaec   :  { %4139 = vmatpush1.bf16.msra.mxu1 %v11703_v23 }
 0xaed   :  { %4140 = vmatprep.subr.bf16.mxu1 %v11708_v41 }
 0xaee   :  { %11181 = vmatmul.mubr.msk.bf16.vlgmr.msra.gmra.mxu0 %vm689_vm1, %v4020_v40 }
 0xaef   :  { %4219 = vmatprep.mubr.bf16.mxu0 %v13293_v39 }
 0xaf0   :  { %4141 = vmatpush1.bf16.msra.mxu1 %v11706_v42 }
 0xaf1   :  { %4142 = vmatprep.subr.bf16.mxu1 %v11711_v15 }
 0xaf4   :  { %4143 = vmatpush1.bf16.msra.mxu1 %v11709_v12 }
 0xaf5   :  { %4727 = vmatprep.subr.bf16.mxu1 %v11714_v59  ;;  %v11739_v59 = vld [vmem:[#allocation23 + $0x268] ss:$16 sps:$4 sm:$0xff]  }
 0xba6   :  { %v3955_v18 = vpop.f32.mrf.mxu0  ;;  %v3996_v43 = vpop.f32.mrf.mxu1 }
 0xba7   :  { %v3997_v44 = vadd.f32 %v3996_v43, %v3955_v18 }
 0xba8   :  { %v3957_v63 = vpop.f32.mrf.mxu0  ;;  %v3998_v45 = vpop.f32.mrf.mxu1 }
 0xba9   :  { %v13844_v47 = vadd.f32 %v3997_v44, %v3439_v9  ;;  %v3999_v49 = vadd.f32 %v3998_v45, %v3957_v63  ;;  %v11748_v9 = vld [vmem:[#allocation23 + $0x220] ss:$16 sps:$4 sm:$0xff]  }
 0xbaa   :  { %v3959_v52 = vpop.f32.mrf.mxu0  ;;  %v4000_v62 = vpop.f32.mrf.mxu1 }
 0xbab   :  { %v13846_v37 = vadd.f32 %v3999_v49, %v3441_v14  ;;  %v11760_v14 = vld [vmem:[#allocation23 + $0x3e0] ss:$16 sps:$4 sm:$0xff]   ;;  %v4017_v35 = vadd.f32 %v4010_v29, %v13844_v47  ;;  %v11717_v62 = vld [vmem:[#allocation23 + $0x2ec] ss:$16 sps:$4 sm:$0xff]  }
 0xbac   :  { %v3960_v22 = vpop.f32.mrf.mxu0  ;;  %v4001_v32 = vpop.f32.mrf.mxu1  ;;  %v4175_v52 = vld [vmem:[%s14118_s28] sm:$0xf] }
 0xbad   :  { %v4018_v42 = vadd.f32 %v4014_v33, %v13846_v37  ;;  %v10254_v37 = vld [vmem:[%s14118_s28 + $0x4] sm:$0xf]  ;;  %v11715_v22 = vld [vmem:[#allocation23 + $0x2e8] ss:$16 sps:$4 sm:$0xff]   ;;  %v11723_v32 = vld [vmem:[#allocation23 + $0x2cc] ss:$16 sps:$4 sm:$0xff]  }
 0xbae   :  { %v4058_v38 = vpop.f32.mrf.mxu0  ;;  %v11802_v29 = vld [vmem:[#allocation23 + $0x300] ss:$16 sps:$4 sm:$0xff]   ;;  %v11810_v33 = vld [vmem:[#allocation23 + $0xe4] ss:$16 sps:$4 sm:$0xff]  }
 0xbaf   :  { %v4064_v53 = vpack.c.bf16 %v4058_v38, %v4058_v38  ;;  %v11721_v38 = vld [vmem:[#allocation23 + $0x2c8] ss:$16 sps:$4 sm:$0xff]  }
 0xbb0   :  { %v11182_v55 = vpop.f32.mrf.mxu0 }
 0xbb1   :  { %10251 = vmatmul.mubr.msk.bf16.vlgmr.msra.gmra.mxu1 %vm1783_vm3, %v4064_v53  ;;  %v11729_v53 = vld [vmem:[#allocation23 + $0x2ac] ss:$16 sps:$4 sm:$0xff]   ;;  %v11727_v55 = vld [vmem:[#allocation23 + $0x2a8] ss:$16 sps:$4 sm:$0xff]  }
 0xbb2   :  { %v4061_v56 = vpop.f32.mrf.mxu0  ;;  %4728 = vmatpush1.bf16.msra.mxu1 %v11712_v58  ;;  %v11741_v58 = vld [vmem:[#allocation23 + $0x26c] ss:$16 sps:$4 sm:$0xff]  }
 0xbb3   :  { %4729 = vmatprep.subr.bf16.mxu1 %v11720_v60  ;;  %v11735_v56 = vld [vmem:[#allocation23 + $0x28c] ss:$16 sps:$4 sm:$0xff]  }
 0xbb4   :  { %v11183_v57 = vpop.f32.mrf.mxu0  ;;  %v11747_v60 = vld [vmem:[#allocation23 + $0x24c] ss:$16 sps:$4 sm:$0xff]  }
 0xbb5   :  { %v11733_v57 = vld [vmem:[#allocation23 + $0x288] ss:$16 sps:$4 sm:$0xff]  }
 0xbb6   :  { %4730 = vmatpush1.bf16.msra.mxu1 %v11718_v61  ;;  %v11745_v61 = vld [vmem:[#allocation23 + $0x248] ss:$16 sps:$4 sm:$0xff]  }
 0xbb7   :  { %4731 = vmatprep.subr.bf16.mxu1 %v11726_v0  ;;  %v11753_v0 = vld [vmem:[#allocation23 + $0x22c] ss:$16 sps:$4 sm:$0xff]  }
 0xbba   :  { %4732 = vmatpush1.bf16.msra.mxu1 %v11724_v1  ;;  %v11751_v1 = vld [vmem:[#allocation23 + $0x228] ss:$16 sps:$4 sm:$0xff]  }
 0xbbb   :  { %4733 = vmatprep.subr.bf16.mxu1 %v11732_v2  ;;  %v11759_v2 = vld [vmem:[#allocation23 + $0x20c] ss:$16 sps:$4 sm:$0xff]  }
 0xbbe   :  { %4734 = vmatpush1.bf16.msra.mxu1 %v11730_v3  ;;  %v11757_v3 = vld [vmem:[#allocation23 + $0x208] ss:$16 sps:$4 sm:$0xff]  }
 0xbbf   :  { %4735 = vmatprep.subr.bf16.mxu1 %v11738_v4  ;;  %v11765_v4 = vld [vmem:[#allocation23 + $0x3ec] ss:$16 sps:$4 sm:$0xff]  }
 0xbc2   :  { %4736 = vmatpush1.bf16.msra.mxu1 %v11736_v5  ;;  %v11763_v5 = vld [vmem:[#allocation23 + $0x3e8] ss:$16 sps:$4 sm:$0xff]  }
 0xbc3   :  { %4737 = vmatprep.subr.bf16.mxu1 %v11744_v6  ;;  %v11771_v6 = vld [vmem:[#allocation23 + $0x3cc] ss:$16 sps:$4 sm:$0xff]  }
 0xbc6   :  { %4738 = vmatpush1.bf16.msra.mxu1 %v11742_v7  ;;  %v11769_v7 = vld [vmem:[#allocation23 + $0x3c8] ss:$16 sps:$4 sm:$0xff]  }
 0xbc7   :  { %4739 = vmatprep.subr.bf16.mxu1 %v11750_v8  ;;  %v11777_v8 = vld [vmem:[#allocation23 + $0x3ac] ss:$16 sps:$4 sm:$0xff]  }
 0xbca   :  { %4740 = vmatpush1.bf16.msra.mxu1 %v11748_v9  ;;  %v11775_v9 = vld [vmem:[#allocation23 + $0x3a8] ss:$16 sps:$4 sm:$0xff]  }
 0xbcb   :  { %4741 = vmatprep.subr.bf16.mxu1 %v11756_v10  ;;  %v11783_v10 = vld [vmem:[#allocation23 + $0x38c] ss:$16 sps:$4 sm:$0xff]  }
 0xbce   :  { %4742 = vmatpush1.bf16.msra.mxu1 %v11754_v11  ;;  %v11781_v11 = vld [vmem:[#allocation23 + $0x388] ss:$16 sps:$4 sm:$0xff]  }
 0xbcf   :  { %4743 = vmatprep.subr.bf16.mxu1 %v11762_v13  ;;  %v11789_v13 = vld [vmem:[#allocation23 + $0x36c] ss:$16 sps:$4 sm:$0xff]  }
 0xbd2   :  { %4744 = vmatpush2.bf16.msra.mxu1 %v11760_v14  ;;  %v11787_v14 = vld [vmem:[#allocation23 + $0x368] ss:$16 sps:$4 sm:$0xff]  }
 0xbd3   :  { %4745 = vmatprep.subr.bf16.mxu1 %v11768_v16  ;;  %v11792_v16 = vld [vmem:[#allocation23 + $0x344] ss:$16 sps:$4 sm:$0xff]  }
 0xbd6   :  { %4746 = vmatpush2.bf16.msra.mxu1 %v11766_v17  ;;  %v11795_v17 = vld [vmem:[#allocation23 + $0x34c] ss:$16 sps:$4 sm:$0xff]  }
 0xbd7   :  { %4747 = vmatprep.subr.bf16.mxu1 %v11774_v19  ;;  %v11790_v19 = vld [vmem:[#allocation23 + $0x340] ss:$16 sps:$4 sm:$0xff]  }
 0xbda   :  { %4748 = vmatpush2.bf16.msra.mxu1 %v11772_v20  ;;  %v11793_v20 = vld [vmem:[#allocation23 + $0x348] ss:$16 sps:$4 sm:$0xff]  }
 0xbdb   :  { %4749 = vmatprep.subr.bf16.mxu1 %v11780_v21  ;;  %v11796_v21 = vld [vmem:[#allocation23 + $0x320] ss:$16 sps:$4 sm:$0xff]  }
 0xbde   :  { %4750 = vmatpush2.bf16.msra.mxu1 %v11778_v24  ;;  %v11798_v24 = vld [vmem:[#allocation23 + $0x324] ss:$16 sps:$4 sm:$0xff]  }
 0xbdf   :  { %4751 = vmatprep.subr.bf16.mxu1 %v11786_v25  ;;  %v11799_v25 = vld [vmem:[#allocation23 + $0x328] ss:$16 sps:$4 sm:$0xff]  }
 0xbe2   :  { %4752 = vmatpush2.bf16.msra.mxu1 %v11784_v26  ;;  %v11801_v26 = vld [vmem:[#allocation23 + $0x32c] ss:$16 sps:$4 sm:$0xff]  }
 0xbe3   :  { %4753 = vmatprep.subr.bf16.mxu1 %v11792_v16  ;;  %v11850_v16 = vld [vmem:[#allocation23] ss:$16 sps:$4 sm:$0xff]  }
 0xbe6   :  { %4754 = vmatpush2.bf16.msra.mxu1 %v11790_v19  ;;  %v11858_v19 = vld [vmem:[#allocation23 + $0x1e4] ss:$16 sps:$4 sm:$0xff]  }
 0xbe7   :  { %4755 = vmatprep.subr.bf16.mxu1 %v11798_v24  ;;  %v11859_v24 = vld [vmem:[#allocation23 + $0x1e8] ss:$16 sps:$4 sm:$0xff]  }
 0xbea   :  { %4756 = vmatpush2.bf16.msra.mxu1 %v11796_v21  ;;  %v11856_v21 = vld [vmem:[#allocation23 + $0x1e0] ss:$16 sps:$4 sm:$0xff]  }
 0xbeb   :  { %4757 = vmatprep.subr.bf16.mxu1 %v11804_v27  ;;  %v11862_v27 = vld [vmem:[#allocation23 + $0x1c0] ss:$16 sps:$4 sm:$0xff]  }
 0xbee   :  { %4758 = vmatpush2.bf16.msra.mxu1 %v11802_v29  ;;  %v11870_v29 = vld [vmem:[#allocation23 + $0x1a4] ss:$16 sps:$4 sm:$0xff]  }
 0xbef   :  { %5129 = vmatprep.subr.bf16.mxu1 %v11810_v33  ;;  %v11868_v33 = vld [vmem:[#allocation23 + $0x1a0] ss:$16 sps:$4 sm:$0xff]  }
 0xc71   :  { %v4162_v30 = vpop.f32.mrf.mxu1 }
 0xc72   :  { %v4163_v23 = vadd.f32 %v4162_v30, %v4078_v31  ;;  %v11805_v31 = vld [vmem:[#allocation23 + $0x308] ss:$16 sps:$4 sm:$0xff]  }
 0xc73   :  { %v4164_v40 = vpop.f32.mrf.mxu1 }
 0xc74   :  { %v13854_v41 = vadd.f32 %v4163_v23, %v4017_v35  ;;  %v4165_v12 = vadd.f32 %v4164_v40, %v4082_v34  ;;  %v11813_v34 = vld [vmem:[#allocation23 + $0xec] ss:$16 sps:$4 sm:$0xff]  }
 0xc75   :  { %v4166_v15 = vpop.f32.mrf.mxu1 }
 0xc76   :  { %v4171_v18 = vmax.f32 %v13854_v41, 0.0  ;;  %v13858_v43 = vadd.f32 %v4165_v12, %v4018_v42 }
 0xc77   :  { %v4167_v44 = vpop.f32.mrf.mxu1 }
 0xc78   :  { %v4173_v63 = vpack.c.bf16 %v4171_v18, %v4171_v18  ;;  %v4172_v45 = vmax.f32 %v13858_v43, 0.0  ;;  %v11808_v18 = vld [vmem:[#allocation23 + $0xe0] ss:$16 sps:$4 sm:$0xff]   ;;  %v11811_v44 = vld [vmem:[#allocation23 + $0xe8] ss:$16 sps:$4 sm:$0xff]  }
 0xc7a   :  { %v13861_v49 = vpack.c.bf16 %v4172_v45, %v4172_v45  ;;  %v13866_v47 = vsel %vm4180_vm4, %v4173_v63, 0 }
 0xc7c   :  { %10252 = vmatprep.subr.msk.bf16.mxu0 %vm4180_vm4, %v13861_v49 }
 0xc7d   :  { %4202 = vmatpush1.bf16.msra.mxu0 %v13866_v47 }
 0xc7e   :  { %10255 = vmatprep.subr.msk.bf16.mxu0 %vm4180_vm4, %v13861_v49 }
 0xc80   :  { %10253 = vmatmul.mubr.msk.bf16.vlgmr.msra.gmra.mxu0 %vm4176_vm5, %v4175_v52  ;;  %v11816_v52 = vld [vmem:[#allocation23 + $0xc4] ss:$16 sps:$4 sm:$0xff]  }
 0xc81   :  { %4314 = vmatpush1.bf16.msra.mxu0 %v13866_v47  ;;  %4331 = vmatprep.mubr.bf16.mxu0 %v13293_v39 }
 0xc82   :  { %4768 = vmatprep.subr.bf16.mxu0 %v11717_v62  ;;  %v11819_v62 = vld [vmem:[#allocation23 + $0xcc] ss:$16 sps:$4 sm:$0xff]  }
 0xc88   :  { %10256 = vmatmul.mubr.msk.bf16.vlgmr.msra.gmra.mxu0 %vm4176_vm5, %v10254_v37 }
 0xc89   :  { %4769 = vmatpush1.bf16.msra.mxu0 %v11715_v22 }
 0xc8a   :  { %4770 = vmatprep.subr.bf16.mxu0 %v11723_v32  ;;  %v11814_v32 = vld [vmem:[#allocation23 + $0xc0] ss:$16 sps:$4 sm:$0xff]  }
 0xc8d   :  { %4771 = vmatpush1.bf16.msra.mxu0 %v11721_v38  ;;  %v11817_v38 = vld [vmem:[#allocation23 + $0xc8] ss:$16 sps:$4 sm:$0xff]  }
 0xc8e   :  { %4772 = vmatprep.subr.bf16.mxu0 %v11729_v53  ;;  %v11822_v53 = vld [vmem:[#allocation23 + $0xa4] ss:$16 sps:$4 sm:$0xff]  }
 0xc91   :  { %4773 = vmatpush1.bf16.msra.mxu0 %v11727_v55  ;;  %v11825_v55 = vld [vmem:[#allocation23 + $0xac] ss:$16 sps:$4 sm:$0xff]  }
 0xc92   :  { %4774 = vmatprep.subr.bf16.mxu0 %v11735_v56  ;;  %v11820_v56 = vld [vmem:[#allocation23 + $0xa0] ss:$16 sps:$4 sm:$0xff]  }
 0xc95   :  { %4775 = vmatpush1.bf16.msra.mxu0 %v11733_v57  ;;  %v11823_v57 = vld [vmem:[#allocation23 + $0xa8] ss:$16 sps:$4 sm:$0xff]  }
 0xc96   :  { %4776 = vmatprep.subr.bf16.mxu0 %v11741_v58  ;;  %v11828_v58 = vld [vmem:[#allocation23 + $0x84] ss:$16 sps:$4 sm:$0xff]  }
 0xc99   :  { %4777 = vmatpush1.bf16.msra.mxu0 %v11739_v59  ;;  %v11831_v59 = vld [vmem:[#allocation23 + $0x8c] ss:$16 sps:$4 sm:$0xff]  }
 0xc9a   :  { %4778 = vmatprep.subr.bf16.mxu0 %v11747_v60  ;;  %v11826_v60 = vld [vmem:[#allocation23 + $0x80] ss:$16 sps:$4 sm:$0xff]  }
 0xc9d   :  { %4779 = vmatpush1.bf16.msra.mxu0 %v11745_v61  ;;  %v11829_v61 = vld [vmem:[#allocation23 + $0x88] ss:$16 sps:$4 sm:$0xff]  }
 0xc9e   :  { %4780 = vmatprep.subr.bf16.mxu0 %v11753_v0  ;;  %v11834_v0 = vld [vmem:[#allocation23 + $0x64] ss:$16 sps:$4 sm:$0xff]  }
 0xca1   :  { %4781 = vmatpush1.bf16.msra.mxu0 %v11751_v1  ;;  %v11837_v1 = vld [vmem:[#allocation23 + $0x6c] ss:$16 sps:$4 sm:$0xff]  }
 0xca2   :  { %4782 = vmatprep.subr.bf16.mxu0 %v11759_v2  ;;  %v11832_v2 = vld [vmem:[#allocation23 + $0x60] ss:$16 sps:$4 sm:$0xff]  }
 0xca5   :  { %4783 = vmatpush1.bf16.msra.mxu0 %v11757_v3  ;;  %v11835_v3 = vld [vmem:[#allocation23 + $0x68] ss:$16 sps:$4 sm:$0xff]  }
 0xca6   :  { %4784 = vmatprep.subr.bf16.mxu0 %v11765_v4  ;;  %v11840_v4 = vld [vmem:[#allocation23 + $0x44] ss:$16 sps:$4 sm:$0xff]  }
 0xca9   :  { %4785 = vmatpush2.bf16.msra.mxu0 %v11763_v5  ;;  %v11843_v5 = vld [vmem:[#allocation23 + $0x4c] ss:$16 sps:$4 sm:$0xff]  }
 0xcaa   :  { %4786 = vmatprep.subr.bf16.mxu0 %v11771_v6  ;;  %v11838_v6 = vld [vmem:[#allocation23 + $0x40] ss:$16 sps:$4 sm:$0xff]  }
 0xcad   :  { %4787 = vmatpush2.bf16.msra.mxu0 %v11769_v7  ;;  %v11841_v7 = vld [vmem:[#allocation23 + $0x48] ss:$16 sps:$4 sm:$0xff]  }
 0xcae   :  { %4788 = vmatprep.subr.bf16.mxu0 %v11777_v8  ;;  %v11846_v8 = vld [vmem:[#allocation23 + $0x24] ss:$16 sps:$4 sm:$0xff]  }
 0xcb1   :  { %4789 = vmatpush2.bf16.msra.mxu0 %v11775_v9  ;;  %v11849_v9 = vld [vmem:[#allocation23 + $0x2c] ss:$16 sps:$4 sm:$0xff]  }
 0xcb2   :  { %4790 = vmatprep.subr.bf16.mxu0 %v11783_v10  ;;  %v11844_v10 = vld [vmem:[#allocation23 + $0x20] ss:$16 sps:$4 sm:$0xff]  }
 0xcb5   :  { %4791 = vmatpush2.bf16.msra.mxu0 %v11781_v11  ;;  %v11847_v11 = vld [vmem:[#allocation23 + $0x28] ss:$16 sps:$4 sm:$0xff]  }
 0xcb6   :  { %4792 = vmatprep.subr.bf16.mxu0 %v11789_v13  ;;  %v11852_v13 = vld [vmem:[#allocation23 + $0x4] ss:$16 sps:$4 sm:$0xff]  }
 0xcb9   :  { %4793 = vmatpush2.bf16.msra.mxu0 %v11787_v14  ;;  %v11855_v14 = vld [vmem:[#allocation23 + $0xc] ss:$16 sps:$4 sm:$0xff]  }
 0xcba   :  { %4794 = vmatprep.subr.bf16.mxu0 %v11795_v17  ;;  %v11853_v17 = vld [vmem:[#allocation23 + $0x8] ss:$16 sps:$4 sm:$0xff]  }
 0xcbd   :  { %4795 = vmatpush2.bf16.msra.mxu0 %v11793_v20  ;;  %v11861_v20 = vld [vmem:[#allocation23 + $0x1ec] ss:$16 sps:$4 sm:$0xff]  }
 0xcbe   :  { %4796 = vmatprep.subr.bf16.mxu0 %v11801_v26  ;;  %v11867_v26 = vld [vmem:[#allocation23 + $0x1cc] ss:$16 sps:$4 sm:$0xff]  }
 0xcc1   :  { %4797 = vmatpush2.bf16.msra.mxu0 %v11799_v25  ;;  %v11864_v25 = vld [vmem:[#allocation23 + $0x1c4] ss:$16 sps:$4 sm:$0xff]  }
 0xcc2   :  { %4798 = vmatprep.subr.bf16.mxu0 %v11807_v28  ;;  %v11865_v28 = vld [vmem:[#allocation23 + $0x1c8] ss:$16 sps:$4 sm:$0xff]  }
 0xcc5   :  { %4799 = vmatpush2.bf16.msra.mxu0 %v11805_v31  ;;  %v11873_v31 = vld [vmem:[#allocation23 + $0x1ac] ss:$16 sps:$4 sm:$0xff]  }
 0xcc6   :  { %5170 = vmatprep.subr.bf16.mxu0 %v11813_v34  ;;  %v11871_v34 = vld [vmem:[#allocation23 + $0x1a8] ss:$16 sps:$4 sm:$0xff]  }
 0xd40   :  { %v13877_v30 = vpop.f32.mrf.mxu0 }
 0xd42   :  { %v4223_v35 = vpop.f32.mrf.mxu0 }
 0xd43   :  { %v4229_v37 = vpack.c.bf16 %v4223_v35, %v4223_v35  ;;  %v11876_v35 = vld [vmem:[#allocation23 + $0x184] ss:$16 sps:$4 sm:$0xff]  }
 0xd44   :  { %v4225_v23 = vpop.f32.mrf.mxu0 }
 0xd45   :  { %v11879_v23 = vld [vmem:[#allocation23 + $0x18c] ss:$16 sps:$4 sm:$0xff]  }
 0xd46   :  { %v4226_v40 = vpop.f32.mrf.mxu0 }
 0xd47   :  { %v11874_v40 = vld [vmem:[#allocation23 + $0x180] ss:$16 sps:$4 sm:$0xff]  }
 0xd48   :  { %v4333_v42 = vpop.f32.mrf.mxu0 }
 0xd49   :  { %v4340_v63 = vpack.c.bf16 %v4333_v42, %v4333_v42  ;;  %v11877_v42 = vld [vmem:[#allocation23 + $0x188] ss:$16 sps:$4 sm:$0xff]  }
 0xd4a   :  { %v4335_v12 = vpop.f32.mrf.mxu0 }
 0xd4b   :  { %v4341_v15 = vpack.c.bf16 %v4335_v12, %v4335_v12  ;;  %v11882_v12 = vld [vmem:[#allocation23 + $0x164] ss:$16 sps:$4 sm:$0xff]  }
 0xd4c   :  { %v4337_v45 = vpop.f32.mrf.mxu0 }
 0xd4d   :  { %4759 = vmatprep.mubr.bf16.mxu1 %v4341_v15  ;;  %4800 = vmatprep.mubr.bf16.mxu0 %v4341_v15  ;;  %v11885_v15 = vld [vmem:[#allocation23 + $0x16c] ss:$16 sps:$4 sm:$0xff]  }
 0xd4e   :  { %v4338_v22 = vpop.f32.mrf.mxu0  ;;  %4760 = vmatmul.mubr.bf16.vlgmr.msra.gmra.mxu1 %v4340_v63  ;;  %4801 = vmatmul.mubr.bf16.vlgmr.msra.gmra.mxu0 %v4340_v63  ;;  %v11888_v63 = vld [vmem:[#allocation23 + $0x144] ss:$16 sps:$4 sm:$0xff]   ;;  %v11891_v45 = vld [vmem:[#allocation23 + $0x14c] ss:$16 sps:$4 sm:$0xff]  }
 0xd4f   :  { %5130 = vmatpush1.bf16.msra.mxu1 %v11808_v18  ;;  %5171 = vmatpush1.bf16.msra.mxu0 %v11811_v44  ;;  %v11880_v18 = vld [vmem:[#allocation23 + $0x160] ss:$16 sps:$4 sm:$0xff]   ;;  %v11883_v44 = vld [vmem:[#allocation23 + $0x168] ss:$16 sps:$4 sm:$0xff]   ;;  %v11897_v22 = vld [vmem:[#allocation23 + $0x12c] ss:$16 sps:$4 sm:$0xff]  }
 0xd50   :  { %5161 = vmatprep.mubr.bf16.mxu1 %v4229_v37  ;;  %5202 = vmatprep.mubr.bf16.mxu0 %v4229_v37  ;;  %v11894_v37 = vld [vmem:[#allocation23 + $0x124] ss:$16 sps:$4 sm:$0xff]  }
 0xd51   :  { %5131 = vmatprep.subr.bf16.mxu1 %v11816_v52  ;;  %5172 = vmatprep.subr.bf16.mxu0 %v11819_v62  ;;  %v11886_v52 = vld [vmem:[#allocation23 + $0x140] ss:$16 sps:$4 sm:$0xff]   ;;  %v11889_v62 = vld [vmem:[#allocation23 + $0x148] ss:$16 sps:$4 sm:$0xff]  }
 0xd53   :  { %5132 = vmatpush1.bf16.msra.mxu1 %v11814_v32  ;;  %5173 = vmatpush1.bf16.msra.mxu0 %v11817_v38  ;;  %v11892_v32 = vld [vmem:[#allocation23 + $0x120] ss:$16 sps:$4 sm:$0xff]   ;;  %v11895_v38 = vld [vmem:[#allocation23 + $0x128] ss:$16 sps:$4 sm:$0xff]  }
 0xd54   :  { %5133 = vmatprep.subr.bf16.mxu1 %v11822_v53  ;;  %5174 = vmatprep.subr.bf16.mxu0 %v11825_v55  ;;  %v11900_v53 = vld [vmem:[#allocation23 + $0x104] ss:$16 sps:$4 sm:$0xff]   ;;  %v11903_v55 = vld [vmem:[#allocation23 + $0x10c] ss:$16 sps:$4 sm:$0xff]  }
 0xd57   :  { %5134 = vmatpush1.bf16.msra.mxu1 %v11820_v56  ;;  %5175 = vmatpush1.bf16.msra.mxu0 %v11823_v57  ;;  %v11898_v56 = vld [vmem:[#allocation23 + $0x100] ss:$16 sps:$4 sm:$0xff]   ;;  %v11901_v57 = vld [vmem:[#allocation23 + $0x108] ss:$16 sps:$4 sm:$0xff]  }
 0xd58   :  { %5135 = vmatprep.subr.bf16.mxu1 %v11828_v58  ;;  %5176 = vmatprep.subr.bf16.mxu0 %v11831_v59  ;;  %v4228_v58 = vpack.c.bf16 %v13877_v30, %v13877_v30  ;;  %v10385_v59 = vld [vmem:[%s14118_s28 + $0x8] sm:$0xf]  ;;  %v11910_v30 = vld [vmem:[#allocation23 + $0x4c0] ss:$16 sps:$4 sm:$0xff]  }
 0xd5b   :  { %5136 = vmatpush1.bf16.msra.mxu1 %v11826_v60  ;;  %5177 = vmatpush1.bf16.msra.mxu0 %v11829_v61  ;;  %v11904_v60 = vld [vmem:[#allocation23 + $0x4e0] ss:$16 sps:$4 sm:$0xff]   ;;  %v11906_v61 = vld [vmem:[#allocation23 + $0x4e4] ss:$16 sps:$4 sm:$0xff]  }
 0xd5c   :  { %5137 = vmatprep.subr.bf16.mxu1 %v11834_v0  ;;  %5178 = vmatprep.subr.bf16.mxu0 %v11837_v1  ;;  %v11907_v0 = vld [vmem:[#allocation23 + $0x4e8] ss:$16 sps:$4 sm:$0xff]   ;;  %v11909_v1 = vld [vmem:[#allocation23 + $0x4ec] ss:$16 sps:$4 sm:$0xff]  }
 0xd5f   :  { %5138 = vmatpush1.bf16.msra.mxu1 %v11832_v2  ;;  %5179 = vmatpush1.bf16.msra.mxu0 %v11835_v3  ;;  %v11912_v2 = vld [vmem:[#allocation23 + $0x4c4] ss:$16 sps:$4 sm:$0xff]   ;;  %v11915_v3 = vld [vmem:[#allocation23 + $0x4cc] ss:$16 sps:$4 sm:$0xff]  }
 0xd60   :  { %5139 = vmatprep.subr.bf16.mxu1 %v11840_v4  ;;  %5180 = vmatprep.subr.bf16.mxu0 %v11843_v5  ;;  %v11918_v4 = vld [vmem:[#allocation23 + $0x4a4] ss:$16 sps:$4 sm:$0xff]   ;;  %v11916_v5 = vld [vmem:[#allocation23 + $0x4a0] ss:$16 sps:$4 sm:$0xff]  }
 0xd63   :  { %5140 = vmatpush1.bf16.msra.mxu1 %v11838_v6  ;;  %5181 = vmatpush1.bf16.msra.mxu0 %v11841_v7  ;;  %v11919_v6 = vld [vmem:[#allocation23 + $0x4a8] ss:$16 sps:$4 sm:$0xff]   ;;  %v11924_v7 = vld [vmem:[#allocation23 + $0x484] ss:$16 sps:$4 sm:$0xff]  }
 0xd64   :  { %5141 = vmatprep.subr.bf16.mxu1 %v11846_v8  ;;  %5182 = vmatprep.subr.bf16.mxu0 %v11849_v9  ;;  %v11927_v8 = vld [vmem:[#allocation23 + $0x48c] ss:$16 sps:$4 sm:$0xff]   ;;  %v11922_v9 = vld [vmem:[#allocation23 + $0x480] ss:$16 sps:$4 sm:$0xff]  }
 0xd67   :  { %5142 = vmatpush1.bf16.msra.mxu1 %v11844_v10  ;;  %5183 = vmatpush1.bf16.msra.mxu0 %v11847_v11  ;;  %v11925_v10 = vld [vmem:[#allocation23 + $0x488] ss:$16 sps:$4 sm:$0xff]   ;;  %v11930_v11 = vld [vmem:[#allocation23 + $0x464] ss:$16 sps:$4 sm:$0xff]  }
 0xd68   :  { %5143 = vmatprep.subr.bf16.mxu1 %v11852_v13  ;;  %5184 = vmatprep.subr.bf16.mxu0 %v11855_v14  ;;  %v11933_v13 = vld [vmem:[#allocation23 + $0x46c] ss:$16 sps:$4 sm:$0xff]   ;;  %v11928_v14 = vld [vmem:[#allocation23 + $0x460] ss:$16 sps:$4 sm:$0xff]  }
 0xd6b   :  { %5144 = vmatpush1.bf16.msra.mxu1 %v11850_v16  ;;  %5185 = vmatpush1.bf16.msra.mxu0 %v11853_v17  ;;  %v11931_v16 = vld [vmem:[#allocation23 + $0x468] ss:$16 sps:$4 sm:$0xff]   ;;  %v11936_v17 = vld [vmem:[#allocation23 + $0x444] ss:$16 sps:$4 sm:$0xff]  }
 0xd6c   :  { %5145 = vmatprep.subr.bf16.mxu1 %v11858_v19  ;;  %5186 = vmatprep.subr.bf16.mxu0 %v11861_v20  ;;  %v11939_v19 = vld [vmem:[#allocation23 + $0x44c] ss:$16 sps:$4 sm:$0xff]   ;;  %v11934_v20 = vld [vmem:[#allocation23 + $0x440] ss:$16 sps:$4 sm:$0xff]  }
 0xd6f   :  { %5146 = vmatpush2.bf16.msra.mxu1 %v11856_v21  ;;  %5187 = vmatpush2.bf16.msra.mxu0 %v11859_v24  ;;  %v11937_v21 = vld [vmem:[#allocation23 + $0x448] ss:$16 sps:$4 sm:$0xff]   ;;  %v11942_v24 = vld [vmem:[#allocation23 + $0x424] ss:$16 sps:$4 sm:$0xff]  }
 0xd70   :  { %5147 = vmatprep.subr.bf16.mxu1 %v11864_v25  ;;  %5188 = vmatprep.subr.bf16.mxu0 %v11867_v26  ;;  %v11945_v25 = vld [vmem:[#allocation23 + $0x42c] ss:$16 sps:$4 sm:$0xff]   ;;  %v11940_v26 = vld [vmem:[#allocation23 + $0x420] ss:$16 sps:$4 sm:$0xff]  }
 0xd73   :  { %5148 = vmatpush2.bf16.msra.mxu1 %v11862_v27  ;;  %5189 = vmatpush2.bf16.msra.mxu0 %v11865_v28  ;;  %v11943_v27 = vld [vmem:[#allocation23 + $0x428] ss:$16 sps:$4 sm:$0xff]   ;;  %v11948_v28 = vld [vmem:[#allocation23 + $0x404] ss:$16 sps:$4 sm:$0xff]  }
 0xd74   :  { %5149 = vmatprep.subr.bf16.mxu1 %v11870_v29  ;;  %5190 = vmatprep.subr.bf16.mxu0 %v11873_v31  ;;  %v11951_v29 = vld [vmem:[#allocation23 + $0x40c] ss:$16 sps:$4 sm:$0xff]   ;;  %v11946_v31 = vld [vmem:[#allocation23 + $0x400] ss:$16 sps:$4 sm:$0xff]  }
 0xd77   :  { %5150 = vmatpush2.bf16.msra.mxu1 %v11868_v33  ;;  %5191 = vmatpush2.bf16.msra.mxu0 %v11871_v34  ;;  %v11949_v33 = vld [vmem:[#allocation23 + $0x408] ss:$16 sps:$4 sm:$0xff]   ;;  %v11954_v34 = vld [vmem:[#allocation23 + $0x5e4] ss:$16 sps:$4 sm:$0xff]  }
 0xd78   :  { %5151 = vmatprep.subr.bf16.mxu1 %v11876_v35  ;;  %5192 = vmatprep.subr.bf16.mxu0 %v11879_v23  ;;  %v11957_v35 = vld [vmem:[#allocation23 + $0x5ec] ss:$16 sps:$4 sm:$0xff]   ;;  %v11952_v23 = vld [vmem:[#allocation23 + $0x5e0] ss:$16 sps:$4 sm:$0xff]  }
 0xd7b   :  { %5152 = vmatpush2.bf16.msra.mxu1 %v11874_v40  ;;  %5193 = vmatpush2.bf16.msra.mxu0 %v11877_v42  ;;  %v11955_v40 = vld [vmem:[#allocation23 + $0x5e8] ss:$16 sps:$4 sm:$0xff]   ;;  %v11960_v42 = vld [vmem:[#allocation23 + $0x5c4] ss:$16 sps:$4 sm:$0xff]  }
 0xd7c   :  { %5153 = vmatprep.subr.bf16.mxu1 %v11882_v12  ;;  %5194 = vmatprep.subr.bf16.mxu0 %v11885_v15  ;;  %v11963_v12 = vld [vmem:[#allocation23 + $0x5cc] ss:$16 sps:$4 sm:$0xff]   ;;  %v11958_v15 = vld [vmem:[#allocation23 + $0x5c0] ss:$16 sps:$4 sm:$0xff]  }
 0xd7f   :  { %5154 = vmatpush2.bf16.msra.mxu1 %v11880_v18  ;;  %5195 = vmatpush2.bf16.msra.mxu0 %v11883_v44  ;;  %v11961_v18 = vld [vmem:[#allocation23 + $0x5c8] ss:$16 sps:$4 sm:$0xff]   ;;  %v11966_v44 = vld [vmem:[#allocation23 + $0x5a4] ss:$16 sps:$4 sm:$0xff]  }
 0xd80   :  { %5155 = vmatprep.subr.bf16.mxu1 %v11888_v63  ;;  %5196 = vmatprep.subr.bf16.mxu0 %v11891_v45  ;;  %v11969_v63 = vld [vmem:[#allocation23 + $0x5ac] ss:$16 sps:$4 sm:$0xff]   ;;  %v11964_v45 = vld [vmem:[#allocation23 + $0x5a0] ss:$16 sps:$4 sm:$0xff]  }
 0xd83   :  { %5156 = vmatpush2.bf16.msra.mxu1 %v11886_v52  ;;  %5197 = vmatpush2.bf16.msra.mxu0 %v11889_v62  ;;  %v11967_v52 = vld [vmem:[#allocation23 + $0x5a8] ss:$16 sps:$4 sm:$0xff]   ;;  %v11972_v62 = vld [vmem:[#allocation23 + $0x584] ss:$16 sps:$4 sm:$0xff]  }
 0xd84   :  { %5157 = vmatprep.subr.bf16.mxu1 %v11894_v37  ;;  %5198 = vmatprep.subr.bf16.mxu0 %v11897_v22  ;;  %v11975_v37 = vld [vmem:[#allocation23 + $0x58c] ss:$16 sps:$4 sm:$0xff]   ;;  %v11970_v22 = vld [vmem:[#allocation23 + $0x580] ss:$16 sps:$4 sm:$0xff]  }
 0xd87   :  { %5158 = vmatpush2.bf16.msra.mxu1 %v11892_v32  ;;  %5199 = vmatpush2.bf16.msra.mxu0 %v11895_v38  ;;  %v11973_v32 = vld [vmem:[#allocation23 + $0x588] ss:$16 sps:$4 sm:$0xff]   ;;  %v11978_v38 = vld [vmem:[#allocation23 + $0x564] ss:$16 sps:$4 sm:$0xff]  }
 0xd88   :  { %5159 = vmatprep.subr.bf16.mxu1 %v11900_v53  ;;  %5200 = vmatprep.subr.bf16.mxu0 %v11903_v55  ;;  %v11981_v53 = vld [vmem:[#allocation23 + $0x56c] ss:$16 sps:$4 sm:$0xff]   ;;  %v11976_v55 = vld [vmem:[#allocation23 + $0x560] ss:$16 sps:$4 sm:$0xff]  }
 0xd8b   :  { %5160 = vmatpush2.bf16.msra.mxu1 %v11898_v56  ;;  %5201 = vmatpush2.bf16.msra.mxu0 %v11901_v57  ;;  %v11979_v56 = vld [vmem:[#allocation23 + $0x568] ss:$16 sps:$4 sm:$0xff]   ;;  %v11984_v57 = vld [vmem:[#allocation23 + $0x544] ss:$16 sps:$4 sm:$0xff]  }
 0xd8c   :  { %10386 = vmatprep.subr.msk.bf16.mxu1 %vm4180_vm4, %v13861_v49  ;;  %5644 = vmatprep.subr.bf16.mxu0 %v11906_v61  ;;  %v11913_v49 = vld [vmem:[#allocation23 + $0x4c8] ss:$16 sps:$4 sm:$0xff]   ;;  %v11990_v61 = vld [vmem:[#allocation23 + $0x524] ss:$16 sps:$4 sm:$0xff]  }
 0xd8e   :  { %5162 = vmatmul.mubr.bf16.vlgmr.msra.gmra.mxu1 %v4228_v58  ;;  %5203 = vmatmul.mubr.bf16.vlgmr.msra.gmra.mxu0 %v4228_v58  ;;  %v11987_v58 = vld [vmem:[#allocation23 + $0x54c] ss:$16 sps:$4 sm:$0xff]  }
 0xd8f   :  { %5231 = vmatpush1.bf16.msra.mxu1 %v13866_v47  ;;  %5248 = vmatprep.mubr.bf16.mxu1 %v13293_v39  ;;  %v11921_v47 = vld [vmem:[#allocation23 + $0x4ac] ss:$16 sps:$4 sm:$0xff]  }
 0xd90   :  { %5685 = vmatprep.subr.bf16.mxu1 %v11909_v1  ;;  %5645 = vmatpush1.bf16.msra.mxu0 %v11904_v60  ;;  %v11985_v60 = vld [vmem:[#allocation23 + $0x548] ss:$16 sps:$4 sm:$0xff]   ;;  %v11988_v1 = vld [vmem:[#allocation23 + $0x520] ss:$16 sps:$4 sm:$0xff]  }
 0xd91   :  { %5646 = vmatprep.subr.bf16.mxu0 %v11912_v2  ;;  %v11991_v2 = vld [vmem:[#allocation23 + $0x528] ss:$16 sps:$4 sm:$0xff]  }
 0xd94   :  { %5647 = vmatpush1.bf16.msra.mxu0 %v11910_v30  ;;  %v11999_v30 = vld [vmem:[#allocation23 + $0x50c] ss:$16 sps:$4 sm:$0xff]  }
 0xd95   :  { %5648 = vmatprep.subr.bf16.mxu0 %v11918_v4  ;;  %v11997_v4 = vld [vmem:[#allocation23 + $0x508] ss:$16 sps:$4 sm:$0xff]  }
 0xd96   :  { %10387 = vmatmul.mubr.msk.bf16.vlgmr.msra.gmra.mxu1 %vm4176_vm5, %v10385_v59  ;;  %v11982_v59 = vld [vmem:[#allocation23 + $0x540] ss:$16 sps:$4 sm:$0xff]  }
 0xd97   :  { %5686 = vmatpush1.bf16.msra.mxu1 %v11907_v0  ;;  %v11993_v0 = vld [vmem:[#allocation23 + $0x52c] ss:$16 sps:$4 sm:$0xff]  }
 0xd98   :  { %5687 = vmatprep.subr.bf16.mxu1 %v11915_v3  ;;  %5649 = vmatpush1.bf16.msra.mxu0 %v11916_v5  ;;  %v11996_v3 = vld [vmem:[#allocation23 + $0x504] ss:$16 sps:$4 sm:$0xff]  }
 0xd99   :  { %5650 = vmatprep.subr.bf16.mxu0 %v11924_v7 }
 0xd9b   :  { %5688 = vmatpush1.bf16.msra.mxu1 %v11913_v49  ;;  %v11994_v49 = vld [vmem:[#allocation23 + $0x500] ss:$16 sps:$4 sm:$0xff]  }
 0xd9c   :  { %5689 = vmatprep.subr.bf16.mxu1 %v11921_v47  ;;  %5651 = vmatpush1.bf16.msra.mxu0 %v11922_v9 }
 0xd9d   :  { %5652 = vmatprep.subr.bf16.mxu0 %v11930_v11 }
 0xd9f   :  { %5690 = vmatpush1.bf16.msra.mxu1 %v11919_v6 }
 0xda0   :  { %5691 = vmatprep.subr.bf16.mxu1 %v11927_v8  ;;  %5653 = vmatpush1.bf16.msra.mxu0 %v11928_v14 }
 0xda1   :  { %5654 = vmatprep.subr.bf16.mxu0 %v11936_v17 }
 0xda3   :  { %5692 = vmatpush1.bf16.msra.mxu1 %v11925_v10 }
 0xda4   :  { %5693 = vmatprep.subr.bf16.mxu1 %v11933_v13  ;;  %5655 = vmatpush1.bf16.msra.mxu0 %v11934_v20 }
 0xda5   :  { %5656 = vmatprep.subr.bf16.mxu0 %v11942_v24 }
 0xda7   :  { %5694 = vmatpush1.bf16.msra.mxu1 %v11931_v16 }
 0xda8   :  { %5695 = vmatprep.subr.bf16.mxu1 %v11939_v19  ;;  %5657 = vmatpush1.bf16.msra.mxu0 %v11940_v26 }
 0xda9   :  { %5658 = vmatprep.subr.bf16.mxu0 %v11948_v28 }
 0xdab   :  { %5696 = vmatpush1.bf16.msra.mxu1 %v11937_v21 }
 0xdac   :  { %5697 = vmatprep.subr.bf16.mxu1 %v11945_v25  ;;  %5659 = vmatpush1.bf16.msra.mxu0 %v11946_v31 }
 0xdad   :  { %5660 = vmatprep.subr.bf16.mxu0 %v11954_v34 }
 0xdaf   :  { %5698 = vmatpush1.bf16.msra.mxu1 %v11943_v27 }
 0xdb0   :  { %5699 = vmatprep.subr.bf16.mxu1 %v11951_v29  ;;  %5661 = vmatpush2.bf16.msra.mxu0 %v11952_v23 }
 0xdb1   :  { %5662 = vmatprep.subr.bf16.mxu0 %v11960_v42 }
 0xdb3   :  { %5700 = vmatpush1.bf16.msra.mxu1 %v11949_v33 }
 0xdb4   :  { %5701 = vmatprep.subr.bf16.mxu1 %v11957_v35  ;;  %5663 = vmatpush2.bf16.msra.mxu0 %v11958_v15 }
 0xdb5   :  { %5664 = vmatprep.subr.bf16.mxu0 %v11966_v44 }
 0xdb7   :  { %5702 = vmatpush2.bf16.msra.mxu1 %v11955_v40  ;;  %v5730_v40 = vld [vmem:[%s14119_s24] sm:$0xf] }
 0xdb8   :  { %5703 = vmatprep.subr.bf16.mxu1 %v11963_v12  ;;  %5665 = vmatpush2.bf16.msra.mxu0 %v11964_v45  ;;  %v5735_v42 = vrot.slane %v5730_v40, %v13773_v48  ;;  %v5743_v12 = vrot.slane %v5730_v40, %v2301_v54  ;;  %v5739_v45 = vrot.slane %v5730_v40, %v13776_v50 }
 0xdb9   :  { %5666 = vmatprep.subr.bf16.mxu0 %v11972_v62 }
 0xdbb   :  { %5704 = vmatpush2.bf16.msra.mxu1 %v11961_v18 }
 0xdbc   :  { %5705 = vmatprep.subr.bf16.mxu1 %v11969_v63  ;;  %5667 = vmatpush2.bf16.msra.mxu0 %v11970_v22 }
 0xdbd   :  { %5668 = vmatprep.subr.bf16.mxu0 %v11978_v38 }
 0xdbf   :  { %5706 = vmatpush2.bf16.msra.mxu1 %v11967_v52  ;;  %v5747_v52 = vrot.slane %v5730_v40, %v2305_v51  ;;  %v12041_v40 = vld [vmem:[#allocation26 + $0x314] ss:$8 sps:$4 sm:$0xff]  }
 0xdc0   :  { %5707 = vmatprep.subr.bf16.mxu1 %v11975_v37  ;;  %5669 = vmatpush2.bf16.msra.mxu0 %v11976_v55 }
 0xdc1   :  { %5670 = vmatprep.subr.bf16.mxu0 %v11984_v57 }
 0xdc3   :  { %5708 = vmatpush2.bf16.msra.mxu1 %v11973_v32 }
 0xdc4   :  { %5709 = vmatprep.subr.bf16.mxu1 %v11981_v53  ;;  %5671 = vmatpush2.bf16.msra.mxu0 %v11982_v59 }
 0xdc5   :  { %5672 = vmatprep.subr.bf16.mxu0 %v11990_v61 }
 0xdc7   :  { %5710 = vmatpush2.bf16.msra.mxu1 %v11979_v56 }
 0xdc8   :  { %5711 = vmatprep.subr.bf16.mxu1 %v11987_v58  ;;  %5673 = vmatpush2.bf16.msra.mxu0 %v11988_v1 }
 0xdc9   :  { %5674 = vmatprep.subr.bf16.mxu0 %v11996_v3 }
 0xdcb   :  { %5712 = vmatpush2.bf16.msra.mxu1 %v11985_v60 }
 0xdcc   :  { %5713 = vmatprep.subr.bf16.mxu1 %v11993_v0  ;;  %5675 = vmatpush2.bf16.msra.mxu0 %v11994_v49 }
 0xdcf   :  { %5714 = vmatpush2.bf16.msra.mxu1 %v11991_v2 }
 0xdd0   :  { %5715 = vmatprep.subr.bf16.mxu1 %v11999_v30 }
 0xdd3   :  { %5716 = vmatpush2.bf16.msra.mxu1 %v11997_v4  ;;  %v5764_v4 = vld [vmem:[#allocation25] sm:$0x3] }
 0xe0e   :  { %v4761_v47 = vpop.f32.mrf.mxu1  ;;  %v4802_v5 = vpop.f32.mrf.mxu0 }
 0xe10   :  { %v4763_v6 = vpop.f32.mrf.mxu1  ;;  %v4804_v7 = vpop.f32.mrf.mxu0 }
 0xe12   :  { %v4765_v8 = vpop.f32.mrf.mxu1  ;;  %v4806_v9 = vpop.f32.mrf.mxu0 }
 0xe13   :  { %v12003_v8 = vld [vmem:[#allocation26 + $0x370] ss:$8 sps:$4 sm:$0xff]   ;;  %v12008_v9 = vld [vmem:[#allocation26 + $0x264] ss:$8 sps:$4 sm:$0xff]  }
 0xe14   :  { %v4766_v10 = vpop.f32.mrf.mxu1  ;;  %v4807_v11 = vpop.f32.mrf.mxu0 }
 0xe15   :  { %v12011_v10 = vld [vmem:[#allocation26 + $0x364] ss:$8 sps:$4 sm:$0xff]   ;;  %v12006_v11 = vld [vmem:[#allocation26 + $0x260] ss:$8 sps:$4 sm:$0xff]  }
 0xe4e   :  { %v5163_v13 = vpop.f32.mrf.mxu1  ;;  %v5204_v14 = vpop.f32.mrf.mxu0 }
 0xe4f   :  { %v5164_v16 = vadd.f32 %v5163_v13, %v4761_v47  ;;  %v5205_v17 = vadd.f32 %v5204_v14, %v4802_v5  ;;  %v12002_v47 = vld [vmem:[#allocation26 + $0x274] ss:$8 sps:$4 sm:$0xff]   ;;  %v12009_v13 = vld [vmem:[#allocation26 + $0x360] ss:$8 sps:$4 sm:$0xff]  }
 0xe50   :  { %v5165_v19 = vpop.f32.mrf.mxu1  ;;  %v5206_v20 = vpop.f32.mrf.mxu0  ;;  %v12005_v5 = vld [vmem:[#allocation26 + $0x374] ss:$8 sps:$4 sm:$0xff]  }
 0xe51   :  { %v5166_v21 = vadd.f32 %v5165_v19, %v4763_v6  ;;  %v5207_v24 = vadd.f32 %v5206_v20, %v4804_v7  ;;  %v5931_v6 = vld [vmem:[#allocation25 + $0x2] sm:$0x3]  ;;  %v12000_v7 = vld [vmem:[#allocation26 + $0x270] ss:$8 sps:$4 sm:$0xff]   ;;  %v12020_v20 = vld [vmem:[#allocation26 + $0x244] ss:$8 sps:$4 sm:$0xff]  }
 0xe52   :  { %v5167_v25 = vpop.f32.mrf.mxu1  ;;  %v5208_v26 = vpop.f32.mrf.mxu0  ;;  %v12014_v14 = vld [vmem:[#allocation26 + $0x254] ss:$8 sps:$4 sm:$0xff]   ;;  %v12015_v19 = vld [vmem:[#allocation26 + $0x350] ss:$8 sps:$4 sm:$0xff]  }
 0xe53   :  { %v12021_v25 = vld [vmem:[#allocation26 + $0x340] ss:$8 sps:$4 sm:$0xff]   ;;  %v12026_v26 = vld [vmem:[#allocation26 + $0x234] ss:$8 sps:$4 sm:$0xff]  }
 0xe54   :  { %v5168_v27 = vpop.f32.mrf.mxu1  ;;  %v5209_v28 = vpop.f32.mrf.mxu0 }
 0xe55   :  { %v12029_v27 = vld [vmem:[#allocation26 + $0x334] ss:$8 sps:$4 sm:$0xff]   ;;  %v12024_v28 = vld [vmem:[#allocation26 + $0x230] ss:$8 sps:$4 sm:$0xff]  }
 0xe56   :  { %v5250_v29 = vpop.f32.mrf.mxu1 }
 0xe57   :  { %v5257_v34 = vpack.c.bf16 %v5250_v29, %v5250_v29  ;;  %v12027_v29 = vld [vmem:[#allocation26 + $0x330] ss:$8 sps:$4 sm:$0xff]  }
 0xe58   :  { %v5252_v31 = vpop.f32.mrf.mxu1 }
 0xe59   :  { %v5258_v33 = vpack.c.bf16 %v5252_v31, %v5252_v31  ;;  %v12032_v31 = vld [vmem:[#allocation26 + $0x224] ss:$8 sps:$4 sm:$0xff]  }
 0xe5a   :  { %v5254_v35 = vpop.f32.mrf.mxu1 }
 0xe5b   :  { %5676 = vmatprep.mubr.bf16.mxu0 %v5258_v33  ;;  %5717 = vmatprep.mubr.bf16.mxu1 %v5258_v33  ;;  %v12035_v33 = vld [vmem:[#allocation26 + $0x324] ss:$8 sps:$4 sm:$0xff]   ;;  %v12033_v35 = vld [vmem:[#allocation26 + $0x320] ss:$8 sps:$4 sm:$0xff]  }
 0xe5c   :  { %v5255_v23 = vpop.f32.mrf.mxu1  ;;  %5677 = vmatmul.mubr.bf16.vlgmr.msra.gmra.mxu0 %v5257_v34  ;;  %5718 = vmatmul.mubr.bf16.vlgmr.msra.gmra.mxu1 %v5257_v34  ;;  %v12030_v34 = vld [vmem:[#allocation26 + $0x220] ss:$8 sps:$4 sm:$0xff]  }
 0xe5d   :  { %5812 = vmatprep.mubr.bf16.mxu0 %v13293_v39  ;;  %5853 = vmatprep.mubr.bf16.mxu1 %v13293_v39  ;;  %v12038_v23 = vld [vmem:[#allocation26 + $0x214] ss:$8 sps:$4 sm:$0xff]  }
 0xf1c   :  { %v5678_v15 = vpop.f32.mrf.mxu0  ;;  %v5719_v18 = vpop.f32.mrf.mxu1 }
 0xf1d   :  { %v5726_v44 = vadd.f32 %v5678_v15, %v5164_v16  ;;  %v5728_v63 = vadd.f32 %v5719_v18, %v5205_v17  ;;  %v12017_v16 = vld [vmem:[#allocation26 + $0x354] ss:$8 sps:$4 sm:$0xff]   ;;  %v12012_v17 = vld [vmem:[#allocation26 + $0x250] ss:$8 sps:$4 sm:$0xff]   ;;  %v12044_v15 = vld [vmem:[#allocation26 + $0x204] ss:$8 sps:$4 sm:$0xff]  }
 0xf1e   :  { %v5680_v62 = vpop.f32.mrf.mxu0  ;;  %v5721_v37 = vpop.f32.mrf.mxu1  ;;  %v12047_v18 = vld [vmem:[#allocation26 + $0x304] ss:$8 sps:$4 sm:$0xff]  }
 0xf1f   :  { %v5752_v22 = vadd.f32 %v5735_v42, %v5726_v44  ;;  %v5754_v32 = vadd.f32 %v5743_v12, %v5728_v63  ;;  %v5727_v38 = vadd.f32 %v5680_v62, %v5166_v21  ;;  %v5729_v53 = vadd.f32 %v5721_v37, %v5207_v24  ;;  %v12023_v21 = vld [vmem:[#allocation26 + $0x344] ss:$8 sps:$4 sm:$0xff]   ;;  %v12018_v24 = vld [vmem:[#allocation26 + $0x240] ss:$8 sps:$4 sm:$0xff]   ;;  %v12036_v42 = vld [vmem:[#allocation26 + $0x210] ss:$8 sps:$4 sm:$0xff]  }
 0xf20   :  { %v5682_v55 = vpop.f32.mrf.mxu0  ;;  %v5723_v56 = vpop.f32.mrf.mxu1  ;;  %v12039_v12 = vld [vmem:[#allocation26 + $0x310] ss:$8 sps:$4 sm:$0xff]   ;;  %v12042_v44 = vld [vmem:[#allocation26 + $0x200] ss:$8 sps:$4 sm:$0xff]  }
 0xf21   :  { %v5756_v57 = vmax.f32 %v5752_v22, 0.0  ;;  %v5758_v58 = vmax.f32 %v5754_v32, 0.0  ;;  %v5753_v54 = vadd.f32 %v5739_v45, %v5727_v38  ;;  %v5755_v59 = vadd.f32 %v5747_v52, %v5729_v53  ;;  %v12045_v63 = vld [vmem:[#allocation26 + $0x300] ss:$8 sps:$4 sm:$0xff]   ;;  %v12050_v45 = vld [vmem:[#allocation26 + $0x2f4] ss:$8 sps:$4 sm:$0xff]  }
 0xf22   :  { %v5683_v60 = vpop.f32.mrf.mxu0  ;;  %v5724_v61 = vpop.f32.mrf.mxu1  ;;  %v12053_v52 = vld [vmem:[#allocation26 + $0x3f4] ss:$8 sps:$4 sm:$0xff]   ;;  %v12048_v62 = vld [vmem:[#allocation26 + $0x2f0] ss:$8 sps:$4 sm:$0xff]   ;;  %v12056_v22 = vld [vmem:[#allocation26 + $0x2e4] ss:$8 sps:$4 sm:$0xff]  }
 0xf23   :  { %v5760_v0 = vpack.c.bf16 %v5756_v57, %v5756_v57  ;;  %v5762_v1 = vpack.c.bf16 %v5758_v58, %v5758_v58  ;;  %v5757_v2 = vmax.f32 %v5753_v54, 0.0  ;;  %v5759_v3 = vmax.f32 %v5755_v59, 0.0  ;;  %v12051_v37 = vld [vmem:[#allocation26 + $0x3f0] ss:$8 sps:$4 sm:$0xff]   ;;  %v12059_v32 = vld [vmem:[#allocation26 + $0x3e4] ss:$8 sps:$4 sm:$0xff]  }
 0xf24   :  { %v12054_v38 = vld [vmem:[#allocation26 + $0x2e0] ss:$8 sps:$4 sm:$0xff]   ;;  %v12062_v55 = vld [vmem:[#allocation26 + $0x2d4] ss:$8 sps:$4 sm:$0xff]   ;;  %v12060_v57 = vld [vmem:[#allocation26 + $0x2d0] ss:$8 sps:$4 sm:$0xff]  }
 0xf25   :  { %v13896_v46 = vpack.c.bf16 %v5757_v2, %v5757_v2  ;;  %v13898_v51 = vpack.c.bf16 %v5759_v3, %v5759_v3  ;;  %v13905_v30 = vsel %vm4180_vm4, %v5760_v0, 0  ;;  %v13908_v49 = vsel %vm4180_vm4, %v5762_v1, 0  ;;  %v12057_v53 = vld [vmem:[#allocation26 + $0x3e0] ss:$8 sps:$4 sm:$0xff]   ;;  %v12065_v56 = vld [vmem:[#allocation26 + $0x3d4] ss:$8 sps:$4 sm:$0xff]  }
 0xf26   :  { %v12063_v58 = vld [vmem:[#allocation26 + $0x3d0] ss:$8 sps:$4 sm:$0xff]   ;;  %v12068_v54 = vld [vmem:[#allocation26 + $0x2c4] ss:$8 sps:$4 sm:$0xff]   ;;  %v12066_v60 = vld [vmem:[#allocation26 + $0x2c0] ss:$8 sps:$4 sm:$0xff]  }
 0xf27   :  { %10452 = vmatprep.subr.msk.bf16.mxu0 %vm4180_vm4, %v13896_v46  ;;  %10454 = vmatprep.subr.msk.bf16.mxu1 %vm4180_vm4, %v13898_v51  ;;  %v12071_v59 = vld [vmem:[#allocation26 + $0x3c4] ss:$8 sps:$4 sm:$0xff]   ;;  %v12069_v61 = vld [vmem:[#allocation26 + $0x3c0] ss:$8 sps:$4 sm:$0xff]   ;;  %v12074_v0 = vld [vmem:[#allocation26 + $0x2b4] ss:$8 sps:$4 sm:$0xff]  }
 0xf28   :  { %5795 = vmatpush1.bf16.msra.mxu0 %v13905_v30  ;;  %5836 = vmatpush1.bf16.msra.mxu1 %v13908_v49  ;;  %v12077_v1 = vld [vmem:[#allocation26 + $0x3b4] ss:$8 sps:$4 sm:$0xff]   ;;  %v12072_v2 = vld [vmem:[#allocation26 + $0x2b0] ss:$8 sps:$4 sm:$0xff]  }
 0xf29   :  { %10456 = vmatprep.subr.msk.bf16.mxu0 %vm4180_vm4, %v13896_v46  ;;  %10458 = vmatprep.subr.msk.bf16.mxu1 %vm4180_vm4, %v13898_v51  ;;  %v12075_v3 = vld [vmem:[#allocation26 + $0x3b0] ss:$8 sps:$4 sm:$0xff]  }
 0xf2b   :  { %10453 = vmatmul.mubr.msk.bf16.vlgmr.msra.gmra.mxu0 %vm4176_vm5, %v5764_v4  ;;  %10455 = vmatmul.mubr.msk.bf16.vlgmr.msra.gmra.mxu1 %vm4176_vm5, %v5764_v4  ;;  %v12080_v4 = vld [vmem:[#allocation26 + $0x2a4] ss:$8 sps:$4 sm:$0xff]  }
 0xf2c   :  { %5950 = vmatpush1.bf16.msra.mxu0 %v13905_v30  ;;  %5991 = vmatpush1.bf16.msra.mxu1 %v13908_v49 }
 0xf2d   :  { %5967 = vmatprep.mubr.bf16.mxu0 %v13293_v39  ;;  %6008 = vmatprep.mubr.bf16.mxu1 %v13293_v39 }
 0xf2e   :  { %6406 = vmatprep.subr.bf16.mxu0 %v12002_v47  ;;  %6447 = vmatprep.subr.bf16.mxu1 %v12005_v5  ;;  %v12083_v47 = vld [vmem:[#allocation26 + $0x3a4] ss:$8 sps:$4 sm:$0xff]   ;;  %v12078_v5 = vld [vmem:[#allocation26 + $0x2a0] ss:$8 sps:$4 sm:$0xff]  }
 0xf33   :  { %10457 = vmatmul.mubr.msk.bf16.vlgmr.msra.gmra.mxu0 %vm4176_vm5, %v5931_v6  ;;  %10459 = vmatmul.mubr.msk.bf16.vlgmr.msra.gmra.mxu1 %vm4176_vm5, %v5931_v6  ;;  %v12081_v6 = vld [vmem:[#allocation26 + $0x3a0] ss:$8 sps:$4 sm:$0xff]  }
 0xf34   :  { %6407 = vmatpush1.bf16.msra.mxu0 %v12000_v7  ;;  %6448 = vmatpush1.bf16.msra.mxu1 %v12003_v8  ;;  %v12086_v7 = vld [vmem:[#allocation26 + $0x294] ss:$8 sps:$4 sm:$0xff]  }
 0xf35   :  { %6408 = vmatprep.subr.bf16.mxu0 %v12008_v9  ;;  %6449 = vmatprep.subr.bf16.mxu1 %v12011_v10  ;;  %v12089_v8 = vld [vmem:[#allocation26 + $0x394] ss:$8 sps:$4 sm:$0xff]   ;;  %v12084_v9 = vld [vmem:[#allocation26 + $0x290] ss:$8 sps:$4 sm:$0xff]  }
 0xf36   :  { %v12087_v10 = vld [vmem:[#allocation26 + $0x390] ss:$8 sps:$4 sm:$0xff]  }
 0xf38   :  { %6409 = vmatpush1.bf16.msra.mxu0 %v12006_v11  ;;  %6450 = vmatpush1.bf16.msra.mxu1 %v12009_v13  ;;  %v12092_v11 = vld [vmem:[#allocation26 + $0x284] ss:$8 sps:$4 sm:$0xff]  }
 0xf39   :  { %6410 = vmatprep.subr.bf16.mxu0 %v12014_v14  ;;  %6451 = vmatprep.subr.bf16.mxu1 %v12017_v16  ;;  %v12095_v13 = vld [vmem:[#allocation26 + $0x384] ss:$8 sps:$4 sm:$0xff]   ;;  %v12090_v14 = vld [vmem:[#allocation26 + $0x280] ss:$8 sps:$4 sm:$0xff]  }
 0xf3a   :  { %v12093_v16 = vld [vmem:[#allocation26 + $0x380] ss:$8 sps:$4 sm:$0xff]  }
 0xf3c   :  { %6411 = vmatpush1.bf16.msra.mxu0 %v12012_v17  ;;  %6452 = vmatpush1.bf16.msra.mxu1 %v12015_v19  ;;  %v12098_v17 = vld [vmem:[#allocation26 + $0x74] ss:$8 sps:$4 sm:$0xff]  }
 0xf3d   :  { %6412 = vmatprep.subr.bf16.mxu0 %v12020_v20  ;;  %6453 = vmatprep.subr.bf16.mxu1 %v12023_v21  ;;  %v12101_v19 = vld [vmem:[#allocation26 + $0x174] ss:$8 sps:$4 sm:$0xff]  }
 0xf40   :  { %6413 = vmatpush1.bf16.msra.mxu0 %v12018_v24  ;;  %6454 = vmatpush1.bf16.msra.mxu1 %v12021_v25 }
 0xf41   :  { %6414 = vmatprep.subr.bf16.mxu0 %v12026_v26  ;;  %6455 = vmatprep.subr.bf16.mxu1 %v12029_v27 }
 0xf44   :  { %6415 = vmatpush1.bf16.msra.mxu0 %v12024_v28  ;;  %6456 = vmatpush1.bf16.msra.mxu1 %v12027_v29 }
 0xf45   :  { %6416 = vmatprep.subr.bf16.mxu0 %v12032_v31  ;;  %6457 = vmatprep.subr.bf16.mxu1 %v12035_v33 }
 0xf48   :  { %6417 = vmatpush1.bf16.msra.mxu0 %v12030_v34  ;;  %6458 = vmatpush1.bf16.msra.mxu1 %v12033_v35 }
 0xf49   :  { %6418 = vmatprep.subr.bf16.mxu0 %v12038_v23  ;;  %6459 = vmatprep.subr.bf16.mxu1 %v12041_v40 }
 0xf4c   :  { %6419 = vmatpush1.bf16.msra.mxu0 %v12036_v42  ;;  %6460 = vmatpush1.bf16.msra.mxu1 %v12039_v12  ;;  %v12096_v12 = vld [vmem:[#allocation26 + $0x70] ss:$8 sps:$4 sm:$0xff]  }
 0xf4d   :  { %6420 = vmatprep.subr.bf16.mxu0 %v12044_v15  ;;  %6461 = vmatprep.subr.bf16.mxu1 %v12047_v18  ;;  %v12099_v15 = vld [vmem:[#allocation26 + $0x170] ss:$8 sps:$4 sm:$0xff]  }
 0xf50   :  { %6421 = vmatpush1.bf16.msra.mxu0 %v12042_v44  ;;  %6462 = vmatpush1.bf16.msra.mxu1 %v12045_v63  ;;  %v12104_v63 = vld [vmem:[#allocation26 + $0x64] ss:$8 sps:$4 sm:$0xff]  }
 0xf51   :  { %6422 = vmatprep.subr.bf16.mxu0 %v12050_v45  ;;  %6463 = vmatprep.subr.bf16.mxu1 %v12053_v52 }
 0xf54   :  { %6423 = vmatpush2.bf16.msra.mxu0 %v12048_v62  ;;  %6464 = vmatpush2.bf16.msra.mxu1 %v12051_v37  ;;  %v12107_v62 = vld [vmem:[#allocation26 + $0x164] ss:$8 sps:$4 sm:$0xff]  }
 0xf55   :  { %6424 = vmatprep.subr.bf16.mxu0 %v12056_v22  ;;  %6465 = vmatprep.subr.bf16.mxu1 %v12059_v32 }
 0xf58   :  { %6425 = vmatpush2.bf16.msra.mxu0 %v12054_v38  ;;  %6466 = vmatpush2.bf16.msra.mxu1 %v12057_v53  ;;  %v12102_v38 = vld [vmem:[#allocation26 + $0x60] ss:$8 sps:$4 sm:$0xff]  }
 0xf59   :  { %6426 = vmatprep.subr.bf16.mxu0 %v12062_v55  ;;  %6467 = vmatprep.subr.bf16.mxu1 %v12065_v56  ;;  %v12105_v53 = vld [vmem:[#allocation26 + $0x160] ss:$8 sps:$4 sm:$0xff]   ;;  %v12110_v55 = vld [vmem:[#allocation26 + $0x54] ss:$8 sps:$4 sm:$0xff]  }
 0xf5a   :  { %v12113_v56 = vld [vmem:[#allocation26 + $0x154] ss:$8 sps:$4 sm:$0xff]  }
 0xf5c   :  { %6427 = vmatpush2.bf16.msra.mxu0 %v12060_v57  ;;  %6468 = vmatpush2.bf16.msra.mxu1 %v12063_v58  ;;  %v12108_v57 = vld [vmem:[#allocation26 + $0x50] ss:$8 sps:$4 sm:$0xff]  }
 0xf5d   :  { %6428 = vmatprep.subr.bf16.mxu0 %v12068_v54  ;;  %6469 = vmatprep.subr.bf16.mxu1 %v12071_v59  ;;  %v12111_v58 = vld [vmem:[#allocation26 + $0x150] ss:$8 sps:$4 sm:$0xff]   ;;  %v12116_v54 = vld [vmem:[#allocation26 + $0x44] ss:$8 sps:$4 sm:$0xff]  }
 0xf5e   :  { %v12119_v59 = vld [vmem:[#allocation26 + $0x144] ss:$8 sps:$4 sm:$0xff]  }
 0xf60   :  { %6429 = vmatpush2.bf16.msra.mxu0 %v12066_v60  ;;  %6470 = vmatpush2.bf16.msra.mxu1 %v12069_v61  ;;  %v12114_v60 = vld [vmem:[#allocation26 + $0x40] ss:$8 sps:$4 sm:$0xff]  }
 0xf61   :  { %6430 = vmatprep.subr.bf16.mxu0 %v12074_v0  ;;  %6471 = vmatprep.subr.bf16.mxu1 %v12077_v1  ;;  %v12117_v61 = vld [vmem:[#allocation26 + $0x140] ss:$8 sps:$4 sm:$0xff]   ;;  %v12122_v0 = vld [vmem:[#allocation26 + $0x34] ss:$8 sps:$4 sm:$0xff]  }
 0xf62   :  { %v12125_v1 = vld [vmem:[#allocation26 + $0x134] ss:$8 sps:$4 sm:$0xff]  }
 0xf64   :  { %6431 = vmatpush2.bf16.msra.mxu0 %v12072_v2  ;;  %6472 = vmatpush2.bf16.msra.mxu1 %v12075_v3  ;;  %v12120_v2 = vld [vmem:[#allocation26 + $0x30] ss:$8 sps:$4 sm:$0xff]  }
 0xf65   :  { %6432 = vmatprep.subr.bf16.mxu0 %v12080_v4  ;;  %6473 = vmatprep.subr.bf16.mxu1 %v12083_v47  ;;  %v12123_v3 = vld [vmem:[#allocation26 + $0x130] ss:$8 sps:$4 sm:$0xff]   ;;  %v12128_v4 = vld [vmem:[#allocation26 + $0x24] ss:$8 sps:$4 sm:$0xff]  }
 0xf66   :  { %v12131_v47 = vld [vmem:[#allocation26 + $0x124] ss:$8 sps:$4 sm:$0xff]  }
 0xf68   :  { %6433 = vmatpush2.bf16.msra.mxu0 %v12078_v5  ;;  %6474 = vmatpush2.bf16.msra.mxu1 %v12081_v6  ;;  %v12126_v5 = vld [vmem:[#allocation26 + $0x20] ss:$8 sps:$4 sm:$0xff]  }
 0xf69   :  { %6434 = vmatprep.subr.bf16.mxu0 %v12086_v7  ;;  %6475 = vmatprep.subr.bf16.mxu1 %v12089_v8  ;;  %v12129_v6 = vld [vmem:[#allocation26 + $0x120] ss:$8 sps:$4 sm:$0xff]   ;;  %v12134_v7 = vld [vmem:[#allocation26 + $0x14] ss:$8 sps:$4 sm:$0xff]  }
 0xf6a   :  { %v12137_v8 = vld [vmem:[#allocation26 + $0x114] ss:$8 sps:$4 sm:$0xff]  }
 0xf6c   :  { %6435 = vmatpush2.bf16.msra.mxu0 %v12084_v9  ;;  %6476 = vmatpush2.bf16.msra.mxu1 %v12087_v10  ;;  %v12132_v9 = vld [vmem:[#allocation26 + $0x10] ss:$8 sps:$4 sm:$0xff]  }
 0xf6d   :  { %6436 = vmatprep.subr.bf16.mxu0 %v12092_v11  ;;  %6477 = vmatprep.subr.bf16.mxu1 %v12095_v13  ;;  %v12135_v10 = vld [vmem:[#allocation26 + $0x110] ss:$8 sps:$4 sm:$0xff]   ;;  %v12140_v11 = vld [vmem:[#allocation26 + $0x4] ss:$8 sps:$4 sm:$0xff]  }
 0xf6e   :  { %v12143_v13 = vld [vmem:[#allocation26 + $0x104] ss:$8 sps:$4 sm:$0xff]  }
 0xf70   :  { %6437 = vmatpush2.bf16.msra.mxu0 %v12090_v14  ;;  %6478 = vmatpush2.bf16.msra.mxu1 %v12093_v16  ;;  %v12138_v14 = vld [vmem:[#allocation26] ss:$8 sps:$4 sm:$0xff]  }
 0xf71   :  { %6808 = vmatprep.subr.bf16.mxu0 %v12098_v17  ;;  %6849 = vmatprep.subr.bf16.mxu1 %v12101_v19  ;;  %v12141_v16 = vld [vmem:[#allocation26 + $0x100] ss:$8 sps:$4 sm:$0xff]   ;;  %v12146_v17 = vld [vmem:[#allocation26 + $0xf4] ss:$8 sps:$4 sm:$0xff]  }
 0xf72   :  { %v12149_v19 = vld [vmem:[#allocation26 + $0x1f4] ss:$8 sps:$4 sm:$0xff]  }
 0xfeb   :  { %v13924_v20 = vpop.f32.mrf.mxu0  ;;  %v13926_v21 = vpop.f32.mrf.mxu1 }
 0xfed   :  { %v5816_v24 = vpop.f32.mrf.mxu0  ;;  %v5857_v25 = vpop.f32.mrf.mxu1 }
 0xfee   :  { %v5865_v52 = vpack.c.bf16 %v5857_v25, %v5857_v25  ;;  %v5863_v37 = vpack.c.bf16 %v5816_v24, %v5816_v24  ;;  %v12144_v24 = vld [vmem:[#allocation26 + $0xf0] ss:$8 sps:$4 sm:$0xff]  }
 0xfef   :  { %v5818_v26 = vpop.f32.mrf.mxu0  ;;  %v5859_v27 = vpop.f32.mrf.mxu1  ;;  %v12147_v25 = vld [vmem:[#allocation26 + $0x1f0] ss:$8 sps:$4 sm:$0xff]  }
 0xff0   :  { %v12152_v26 = vld [vmem:[#allocation26 + $0xe4] ss:$8 sps:$4 sm:$0xff]  }
 0xff1   :  { %v5819_v28 = vpop.f32.mrf.mxu0  ;;  %v5860_v29 = vpop.f32.mrf.mxu1  ;;  %v12155_v27 = vld [vmem:[#allocation26 + $0x1e4] ss:$8 sps:$4 sm:$0xff]  }
 0xff2   :  { %v12150_v28 = vld [vmem:[#allocation26 + $0xe0] ss:$8 sps:$4 sm:$0xff]  }
 0xff3   :  { %v5969_v31 = vpop.f32.mrf.mxu0  ;;  %v6010_v33 = vpop.f32.mrf.mxu1  ;;  %v12153_v29 = vld [vmem:[#allocation26 + $0x1e0] ss:$8 sps:$4 sm:$0xff]  }
 0xff4   :  { %v6019_v34 = vpack.c.bf16 %v6010_v33, %v6010_v33  ;;  %v6017_v18 = vpack.c.bf16 %v5969_v31, %v5969_v31  ;;  %v12158_v31 = vld [vmem:[#allocation26 + $0xd4] ss:$8 sps:$4 sm:$0xff]  }
 0xff5   :  { %v5971_v35 = vpop.f32.mrf.mxu0  ;;  %v6012_v23 = vpop.f32.mrf.mxu1  ;;  %v12161_v33 = vld [vmem:[#allocation26 + $0x1d4] ss:$8 sps:$4 sm:$0xff]  }
 0xff6   :  { %v6018_v40 = vpack.c.bf16 %v5971_v35, %v5971_v35  ;;  %v6020_v42 = vpack.c.bf16 %v6012_v23, %v6012_v23  ;;  %v12159_v35 = vld [vmem:[#allocation26 + $0x1d0] ss:$8 sps:$4 sm:$0xff]   ;;  %v12164_v23 = vld [vmem:[#allocation26 + $0xc4] ss:$8 sps:$4 sm:$0xff]  }
 0xff7   :  { %v5973_v44 = vpop.f32.mrf.mxu0  ;;  %v6014_v45 = vpop.f32.mrf.mxu1 }
 0xff8   :  { %6438 = vmatprep.mubr.bf16.mxu0 %v6018_v40  ;;  %6479 = vmatprep.mubr.bf16.mxu1 %v6020_v42  ;;  %v12167_v40 = vld [vmem:[#allocation26 + $0x1c4] ss:$8 sps:$4 sm:$0xff]   ;;  %v12162_v42 = vld [vmem:[#allocation26 + $0xc0] ss:$8 sps:$4 sm:$0xff]   ;;  %v12168_v44 = vld [vmem:[#allocation26 + $0xb0] ss:$8 sps:$4 sm:$0xff]  }
 0xff9   :  { %v5974_v22 = vpop.f32.mrf.mxu0  ;;  %6439 = vmatmul.mubr.bf16.vlgmr.msra.gmra.mxu0 %v6017_v18  ;;  %6480 = vmatmul.mubr.bf16.vlgmr.msra.gmra.mxu1 %v6019_v34  ;;  %v6015_v32 = vpop.f32.mrf.mxu1  ;;  %v12156_v34 = vld [vmem:[#allocation26 + $0xd0] ss:$8 sps:$4 sm:$0xff]   ;;  %v12173_v18 = vld [vmem:[#allocation26 + $0x1b4] ss:$8 sps:$4 sm:$0xff]   ;;  %v12176_v45 = vld [vmem:[#allocation26 + $0xa4] ss:$8 sps:$4 sm:$0xff]  }
 0xffa   :  { %6809 = vmatpush1.bf16.msra.mxu0 %v12096_v12  ;;  %6850 = vmatpush1.bf16.msra.mxu1 %v12099_v15  ;;  %v12165_v12 = vld [vmem:[#allocation26 + $0x1c0] ss:$8 sps:$4 sm:$0xff]   ;;  %v12170_v15 = vld [vmem:[#allocation26 + $0xb4] ss:$8 sps:$4 sm:$0xff]  }
 0xffb   :  { %6840 = vmatprep.mubr.bf16.mxu0 %v5863_v37  ;;  %6810 = vmatprep.subr.bf16.mxu0 %v12104_v63  ;;  %v12171_v63 = vld [vmem:[#allocation26 + $0x1b0] ss:$8 sps:$4 sm:$0xff]   ;;  %v12177_v37 = vld [vmem:[#allocation26 + $0x1a0] ss:$8 sps:$4 sm:$0xff]   ;;  %v12182_v22 = vld [vmem:[#allocation26 + $0x94] ss:$8 sps:$4 sm:$0xff]  }
 0xffc   :  { %6851 = vmatprep.subr.bf16.mxu1 %v12107_v62  ;;  %6881 = vmatprep.mubr.bf16.mxu1 %v5865_v52  ;;  %v12179_v52 = vld [vmem:[#allocation26 + $0x1a4] ss:$8 sps:$4 sm:$0xff]   ;;  %v12174_v62 = vld [vmem:[#allocation26 + $0xa0] ss:$8 sps:$4 sm:$0xff]   ;;  %v12185_v32 = vld [vmem:[#allocation26 + $0x194] ss:$8 sps:$4 sm:$0xff]  }
 0xffe   :  { %6811 = vmatpush1.bf16.msra.mxu0 %v12102_v38  ;;  %6852 = vmatpush1.bf16.msra.mxu1 %v12105_v53  ;;  %v12180_v38 = vld [vmem:[#allocation26 + $0x90] ss:$8 sps:$4 sm:$0xff]  }
 0xfff   :  { %6812 = vmatprep.subr.bf16.mxu0 %v12110_v55  ;;  %6853 = vmatprep.subr.bf16.mxu1 %v12113_v56  ;;  %v12183_v53 = vld [vmem:[#allocation26 + $0x190] ss:$8 sps:$4 sm:$0xff]   ;;  %v12188_v55 = vld [vmem:[#allocation26 + $0x84] ss:$8 sps:$4 sm:$0xff]  }
0x1000   :  { %v12191_v56 = vld [vmem:[#allocation26 + $0x184] ss:$8 sps:$4 sm:$0xff]  }
0x1002   :  { %6813 = vmatpush1.bf16.msra.mxu0 %v12108_v57  ;;  %6854 = vmatpush1.bf16.msra.mxu1 %v12111_v58  ;;  %v12186_v57 = vld [vmem:[#allocation26 + $0x80] ss:$8 sps:$4 sm:$0xff]  }
0x1003   :  { %6814 = vmatprep.subr.bf16.mxu0 %v12116_v54  ;;  %6855 = vmatprep.subr.bf16.mxu1 %v12119_v59  ;;  %v12189_v58 = vld [vmem:[#allocation26 + $0x180] ss:$8 sps:$4 sm:$0xff]   ;;  %v5864_v54 = vpack.c.bf16 %v13926_v21, %v13926_v21  ;;  %v5862_v59 = vpack.c.bf16 %v13924_v20, %v13924_v20  ;;  %v12192_v21 = vld [vmem:[#allocation26 + $0x470] ss:$8 sps:$4 sm:$0xff]   ;;  %v6891_v20 = vld [vmem:[#allocation25 + $0x4] sm:$0x3] }
0x1006   :  { %6815 = vmatpush1.bf16.msra.mxu0 %v12114_v60  ;;  %6856 = vmatpush1.bf16.msra.mxu1 %v12117_v61  ;;  %v12194_v60 = vld [vmem:[#allocation26 + $0x474] ss:$8 sps:$4 sm:$0xff]   ;;  %v12197_v61 = vld [vmem:[#allocation26 + $0x464] ss:$8 sps:$4 sm:$0xff]  }
0x1007   :  { %6816 = vmatprep.subr.bf16.mxu0 %v12122_v0  ;;  %6857 = vmatprep.subr.bf16.mxu1 %v12125_v1  ;;  %v12240_v0 = vld [vmem:[#allocation26 + $0x570] ss:$8 sps:$4 sm:$0xff]   ;;  %v12245_v1 = vld [vmem:[#allocation26 + $0x564] ss:$8 sps:$4 sm:$0xff]  }
0x100a   :  { %6817 = vmatpush1.bf16.msra.mxu0 %v12120_v2  ;;  %6858 = vmatpush1.bf16.msra.mxu1 %v12123_v3  ;;  %v12248_v2 = vld [vmem:[#allocation26 + $0x554] ss:$8 sps:$4 sm:$0xff]   ;;  %v12198_v3 = vld [vmem:[#allocation26 + $0x450] ss:$8 sps:$4 sm:$0xff]  }
0x100b   :  { %6818 = vmatprep.subr.bf16.mxu0 %v12128_v4  ;;  %6859 = vmatprep.subr.bf16.mxu1 %v12131_v47  ;;  %v12203_v4 = vld [vmem:[#allocation26 + $0x444] ss:$8 sps:$4 sm:$0xff]   ;;  %v12246_v47 = vld [vmem:[#allocation26 + $0x550] ss:$8 sps:$4 sm:$0xff]  }
0x100e   :  { %6819 = vmatpush1.bf16.msra.mxu0 %v12126_v5  ;;  %6860 = vmatpush1.bf16.msra.mxu1 %v12129_v6  ;;  %v12251_v5 = vld [vmem:[#allocation26 + $0x544] ss:$8 sps:$4 sm:$0xff]   ;;  %v12201_v6 = vld [vmem:[#allocation26 + $0x440] ss:$8 sps:$4 sm:$0xff]  }
0x100f   :  { %6820 = vmatprep.subr.bf16.mxu0 %v12134_v7  ;;  %6861 = vmatprep.subr.bf16.mxu1 %v12137_v8  ;;  %v12206_v7 = vld [vmem:[#allocation26 + $0x434] ss:$8 sps:$4 sm:$0xff]   ;;  %v12249_v8 = vld [vmem:[#allocation26 + $0x540] ss:$8 sps:$4 sm:$0xff]  }
0x1012   :  { %6821 = vmatpush1.bf16.msra.mxu0 %v12132_v9  ;;  %6862 = vmatpush1.bf16.msra.mxu1 %v12135_v10  ;;  %v12254_v9 = vld [vmem:[#allocation26 + $0x534] ss:$8 sps:$4 sm:$0xff]   ;;  %v12204_v10 = vld [vmem:[#allocation26 + $0x430] ss:$8 sps:$4 sm:$0xff]  }
0x1013   :  { %6822 = vmatprep.subr.bf16.mxu0 %v12140_v11  ;;  %6863 = vmatprep.subr.bf16.mxu1 %v12143_v13  ;;  %v12209_v11 = vld [vmem:[#allocation26 + $0x424] ss:$8 sps:$4 sm:$0xff]   ;;  %v12252_v13 = vld [vmem:[#allocation26 + $0x530] ss:$8 sps:$4 sm:$0xff]  }
0x1016   :  { %6823 = vmatpush1.bf16.msra.mxu0 %v12138_v14  ;;  %6864 = vmatpush1.bf16.msra.mxu1 %v12141_v16  ;;  %v12257_v14 = vld [vmem:[#allocation26 + $0x524] ss:$8 sps:$4 sm:$0xff]   ;;  %v12207_v16 = vld [vmem:[#allocation26 + $0x420] ss:$8 sps:$4 sm:$0xff]  }
0x1017   :  { %6824 = vmatprep.subr.bf16.mxu0 %v12146_v17  ;;  %6865 = vmatprep.subr.bf16.mxu1 %v12149_v19  ;;  %v12212_v17 = vld [vmem:[#allocation26 + $0x414] ss:$8 sps:$4 sm:$0xff]   ;;  %v12255_v19 = vld [vmem:[#allocation26 + $0x520] ss:$8 sps:$4 sm:$0xff]  }
0x101a   :  { %6825 = vmatpush2.bf16.msra.mxu0 %v12144_v24  ;;  %6866 = vmatpush2.bf16.msra.mxu1 %v12147_v25  ;;  %v12260_v24 = vld [vmem:[#allocation26 + $0x514] ss:$8 sps:$4 sm:$0xff]   ;;  %v12210_v25 = vld [vmem:[#allocation26 + $0x410] ss:$8 sps:$4 sm:$0xff]  }
0x101b   :  { %6826 = vmatprep.subr.bf16.mxu0 %v12152_v26  ;;  %6867 = vmatprep.subr.bf16.mxu1 %v12155_v27  ;;  %v12215_v26 = vld [vmem:[#allocation26 + $0x404] ss:$8 sps:$4 sm:$0xff]   ;;  %v12258_v27 = vld [vmem:[#allocation26 + $0x510] ss:$8 sps:$4 sm:$0xff]  }
0x101e   :  { %6827 = vmatpush2.bf16.msra.mxu0 %v12150_v28  ;;  %6868 = vmatpush2.bf16.msra.mxu1 %v12153_v29  ;;  %v12263_v28 = vld [vmem:[#allocation26 + $0x504] ss:$8 sps:$4 sm:$0xff]   ;;  %v12213_v29 = vld [vmem:[#allocation26 + $0x400] ss:$8 sps:$4 sm:$0xff]  }
0x101f   :  { %6828 = vmatprep.subr.bf16.mxu0 %v12158_v31  ;;  %6869 = vmatprep.subr.bf16.mxu1 %v12161_v33  ;;  %v12218_v31 = vld [vmem:[#allocation26 + $0x4f4] ss:$8 sps:$4 sm:$0xff]   ;;  %v12261_v33 = vld [vmem:[#allocation26 + $0x500] ss:$8 sps:$4 sm:$0xff]  }
0x1022   :  { %6829 = vmatpush2.bf16.msra.mxu0 %v12156_v34  ;;  %6870 = vmatpush2.bf16.msra.mxu1 %v12159_v35  ;;  %v12266_v34 = vld [vmem:[#allocation26 + $0x5f4] ss:$8 sps:$4 sm:$0xff]   ;;  %v12216_v35 = vld [vmem:[#allocation26 + $0x4f0] ss:$8 sps:$4 sm:$0xff]  }
0x1023   :  { %6830 = vmatprep.subr.bf16.mxu0 %v12164_v23  ;;  %6871 = vmatprep.subr.bf16.mxu1 %v12167_v40  ;;  %v12221_v23 = vld [vmem:[#allocation26 + $0x4e4] ss:$8 sps:$4 sm:$0xff]   ;;  %v12264_v40 = vld [vmem:[#allocation26 + $0x5f0] ss:$8 sps:$4 sm:$0xff]  }
0x1026   :  { %6831 = vmatpush2.bf16.msra.mxu0 %v12162_v42  ;;  %6872 = vmatpush2.bf16.msra.mxu1 %v12165_v12  ;;  %v12269_v42 = vld [vmem:[#allocation26 + $0x5e4] ss:$8 sps:$4 sm:$0xff]   ;;  %v12219_v12 = vld [vmem:[#allocation26 + $0x4e0] ss:$8 sps:$4 sm:$0xff]  }
0x1027   :  { %6832 = vmatprep.subr.bf16.mxu0 %v12170_v15  ;;  %6873 = vmatprep.subr.bf16.mxu1 %v12173_v18  ;;  %v12224_v15 = vld [vmem:[#allocation26 + $0x4d4] ss:$8 sps:$4 sm:$0xff]   ;;  %v12267_v18 = vld [vmem:[#allocation26 + $0x5e0] ss:$8 sps:$4 sm:$0xff]  }
0x102a   :  { %6833 = vmatpush2.bf16.msra.mxu0 %v12168_v44  ;;  %6874 = vmatpush2.bf16.msra.mxu1 %v12171_v63  ;;  %v12272_v44 = vld [vmem:[#allocation26 + $0x5d4] ss:$8 sps:$4 sm:$0xff]   ;;  %v12222_v63 = vld [vmem:[#allocation26 + $0x4d0] ss:$8 sps:$4 sm:$0xff]  }
0x102b   :  { %6834 = vmatprep.subr.bf16.mxu0 %v12176_v45  ;;  %6875 = vmatprep.subr.bf16.mxu1 %v12179_v52  ;;  %v12227_v45 = vld [vmem:[#allocation26 + $0x4c4] ss:$8 sps:$4 sm:$0xff]   ;;  %v12270_v52 = vld [vmem:[#allocation26 + $0x5d0] ss:$8 sps:$4 sm:$0xff]  }
0x102e   :  { %6835 = vmatpush2.bf16.msra.mxu0 %v12174_v62  ;;  %6876 = vmatpush2.bf16.msra.mxu1 %v12177_v37  ;;  %v12275_v62 = vld [vmem:[#allocation26 + $0x5c4] ss:$8 sps:$4 sm:$0xff]   ;;  %v12225_v37 = vld [vmem:[#allocation26 + $0x4c0] ss:$8 sps:$4 sm:$0xff]  }
0x102f   :  { %6836 = vmatprep.subr.bf16.mxu0 %v12182_v22  ;;  %6877 = vmatprep.subr.bf16.mxu1 %v12185_v32  ;;  %v12230_v22 = vld [vmem:[#allocation26 + $0x4b4] ss:$8 sps:$4 sm:$0xff]   ;;  %v12273_v32 = vld [vmem:[#allocation26 + $0x5c0] ss:$8 sps:$4 sm:$0xff]  }
0x1032   :  { %6837 = vmatpush2.bf16.msra.mxu0 %v12180_v38  ;;  %6878 = vmatpush2.bf16.msra.mxu1 %v12183_v53  ;;  %v12278_v38 = vld [vmem:[#allocation26 + $0x5b4] ss:$8 sps:$4 sm:$0xff]   ;;  %v12228_v53 = vld [vmem:[#allocation26 + $0x4b0] ss:$8 sps:$4 sm:$0xff]  }
0x1033   :  { %6838 = vmatprep.subr.bf16.mxu0 %v12188_v55  ;;  %6879 = vmatprep.subr.bf16.mxu1 %v12191_v56  ;;  %v12233_v55 = vld [vmem:[#allocation26 + $0x4a4] ss:$8 sps:$4 sm:$0xff]   ;;  %v12276_v56 = vld [vmem:[#allocation26 + $0x5b0] ss:$8 sps:$4 sm:$0xff]  }
0x1036   :  { %6839 = vmatpush2.bf16.msra.mxu0 %v12186_v57  ;;  %6880 = vmatpush2.bf16.msra.mxu1 %v12189_v58  ;;  %v12231_v57 = vld [vmem:[#allocation26 + $0x4a0] ss:$8 sps:$4 sm:$0xff]   ;;  %v12236_v58 = vld [vmem:[#allocation26 + $0x494] ss:$8 sps:$4 sm:$0xff]  }
0x1037   :  { %10588 = vmatprep.subr.msk.bf16.mxu0 %vm4180_vm4, %v13896_v46  ;;  %10590 = vmatprep.subr.msk.bf16.mxu1 %vm4180_vm4, %v13898_v51  ;;  %v12242_v46 = vld [vmem:[#allocation26 + $0x574] ss:$8 sps:$4 sm:$0xff]   ;;  %v12195_v51 = vld [vmem:[#allocation26 + $0x460] ss:$8 sps:$4 sm:$0xff]  }
0x1039   :  { %6841 = vmatmul.mubr.bf16.vlgmr.msra.gmra.mxu0 %v5862_v59  ;;  %6882 = vmatmul.mubr.bf16.vlgmr.msra.gmra.mxu1 %v5864_v54  ;;  %v12234_v54 = vld [vmem:[#allocation26 + $0x490] ss:$8 sps:$4 sm:$0xff]   ;;  %v12239_v59 = vld [vmem:[#allocation26 + $0x484] ss:$8 sps:$4 sm:$0xff]  }
0x103a   :  { %6910 = vmatpush1.bf16.msra.mxu0 %v13905_v30  ;;  %6951 = vmatpush1.bf16.msra.mxu1 %v13908_v49  ;;  %v12200_v30 = vld [vmem:[#allocation26 + $0x454] ss:$8 sps:$4 sm:$0xff]   ;;  %v12243_v49 = vld [vmem:[#allocation26 + $0x560] ss:$8 sps:$4 sm:$0xff]  }
0x103b   :  { %6927 = vmatprep.mubr.bf16.mxu0 %v13293_v39  ;;  %6968 = vmatprep.mubr.bf16.mxu1 %v13293_v39 }
0x103c   :  { %7366 = vmatprep.subr.bf16.mxu0 %v12194_v60  ;;  %7407 = vmatprep.subr.bf16.mxu1 %v12242_v46  ;;  %v12237_v60 = vld [vmem:[#allocation26 + $0x480] ss:$8 sps:$4 sm:$0xff]   ;;  %v12282_v46 = vld [vmem:[#allocation26 + $0x590] ss:$8 sps:$4 sm:$0xff]  }
0x1041   :  { %10589 = vmatmul.mubr.msk.bf16.vlgmr.msra.gmra.mxu0 %vm4176_vm5, %v6891_v20  ;;  %10591 = vmatmul.mubr.msk.bf16.vlgmr.msra.gmra.mxu1 %vm4176_vm5, %v6891_v20  ;;  %v12279_v20 = vld [vmem:[#allocation26 + $0x5a0] ss:$8 sps:$4 sm:$0xff]  }
0x1042   :  { %7367 = vmatpush1.bf16.msra.mxu0 %v12192_v21  ;;  %7408 = vmatpush1.bf16.msra.mxu1 %v12240_v0  ;;  %v12281_v21 = vld [vmem:[#allocation26 + $0x5a4] ss:$8 sps:$4 sm:$0xff]   ;;  %v12284_v0 = vld [vmem:[#allocation26 + $0x594] ss:$8 sps:$4 sm:$0xff]  }
0x1043   :  { %7368 = vmatprep.subr.bf16.mxu0 %v12197_v61  ;;  %7409 = vmatprep.subr.bf16.mxu1 %v12245_v1  ;;  %v7465_v61 = vpack.c.bf16 %v13858_v43, %v13858_v43  ;;  %v12287_v1 = vld [vmem:[#allocation26 + $0x584] ss:$8 sps:$4 sm:$0xff]  }
0x1046   :  { %7369 = vmatpush1.bf16.msra.mxu0 %v12195_v51  ;;  %7410 = vmatpush1.bf16.msra.mxu1 %v12243_v49  ;;  %v12285_v51 = vld [vmem:[#allocation26 + $0x580] ss:$8 sps:$4 sm:$0xff]  }
0x1047   :  { %7370 = vmatprep.subr.bf16.mxu0 %v12200_v30  ;;  %7411 = vmatprep.subr.bf16.mxu1 %v12248_v2  ;;  %v12290_v30 = vld [vmem:[#allocation31 + $0x74] ss:$8 sps:$4 sm:$0xff]  }
0x104a   :  { %7371 = vmatpush1.bf16.msra.mxu0 %v12198_v3  ;;  %7412 = vmatpush1.bf16.msra.mxu1 %v12246_v47 }
0x104b   :  { %7372 = vmatprep.subr.bf16.mxu0 %v12203_v4  ;;  %7413 = vmatprep.subr.bf16.mxu1 %v12251_v5 }
0x104e   :  { %7373 = vmatpush1.bf16.msra.mxu0 %v12201_v6  ;;  %7414 = vmatpush1.bf16.msra.mxu1 %v12249_v8 }
0x104f   :  { %7374 = vmatprep.subr.bf16.mxu0 %v12206_v7  ;;  %7415 = vmatprep.subr.bf16.mxu1 %v12254_v9 }
0x1052   :  { %7375 = vmatpush1.bf16.msra.mxu0 %v12204_v10  ;;  %7416 = vmatpush1.bf16.msra.mxu1 %v12252_v13 }
0x1053   :  { %7376 = vmatprep.subr.bf16.mxu0 %v12209_v11  ;;  %7417 = vmatprep.subr.bf16.mxu1 %v12257_v14 }
0x1056   :  { %7377 = vmatpush1.bf16.msra.mxu0 %v12207_v16  ;;  %7418 = vmatpush1.bf16.msra.mxu1 %v12255_v19 }
0x1057   :  { %7378 = vmatprep.subr.bf16.mxu0 %v12212_v17  ;;  %7419 = vmatprep.subr.bf16.mxu1 %v12260_v24 }
0x105a   :  { %7379 = vmatpush1.bf16.msra.mxu0 %v12210_v25  ;;  %7420 = vmatpush1.bf16.msra.mxu1 %v12258_v27 }
0x105b   :  { %7380 = vmatprep.subr.bf16.mxu0 %v12215_v26  ;;  %7421 = vmatprep.subr.bf16.mxu1 %v12263_v28 }
0x105e   :  { %7381 = vmatpush1.bf16.msra.mxu0 %v12213_v29  ;;  %7422 = vmatpush1.bf16.msra.mxu1 %v12261_v33 }
0x105f   :  { %7382 = vmatprep.subr.bf16.mxu0 %v12218_v31  ;;  %7423 = vmatprep.subr.bf16.mxu1 %v12266_v34  ;;  %v7464_v31 = vpack.c.bf16 %v13854_v41, %v13854_v41  ;;  %v12291_v41 = vld [vmem:[#allocation31 + $0x60] ss:$8 sps:$4 sm:$0xff]  }
0x1062   :  { %7383 = vmatpush2.bf16.msra.mxu0 %v12216_v35  ;;  %7424 = vmatpush2.bf16.msra.mxu1 %v12264_v40 }
0x1063   :  { %7384 = vmatprep.subr.bf16.mxu0 %v12221_v23  ;;  %7425 = vmatprep.subr.bf16.mxu1 %v12269_v42 }
0x1066   :  { %7385 = vmatpush2.bf16.msra.mxu0 %v12219_v12  ;;  %7426 = vmatpush2.bf16.msra.mxu1 %v12267_v18  ;;  %v12288_v18 = vld [vmem:[#allocation31 + $0x70] ss:$8 sps:$4 sm:$0xff]  }
0x1067   :  { %7386 = vmatprep.subr.bf16.mxu0 %v12224_v15  ;;  %7427 = vmatprep.subr.bf16.mxu1 %v12272_v44  ;;  %v12293_v44 = vld [vmem:[#allocation31 + $0x64] ss:$8 sps:$4 sm:$0xff]  }
0x106a   :  { %7387 = vmatpush2.bf16.msra.mxu0 %v12222_v63  ;;  %7428 = vmatpush2.bf16.msra.mxu1 %v12270_v52 }
0x106b   :  { %7388 = vmatprep.subr.bf16.mxu0 %v12227_v45  ;;  %7429 = vmatprep.subr.bf16.mxu1 %v12275_v62  ;;  %v7471_v45 = vsel %vm4180_vm4, %v7464_v31, 0  ;;  %v12296_v62 = vld [vmem:[#allocation31 + $0x54] ss:$8 sps:$4 sm:$0xff]  }
0x106e   :  { %7389 = vmatpush2.bf16.msra.mxu0 %v12225_v37  ;;  %7430 = vmatpush2.bf16.msra.mxu1 %v12273_v32  ;;  %v7466_v37 = vld [vmem:[#allocation29] sm:$0x3]  ;;  %v12299_v32 = vld [vmem:[#allocation31 + $0x44] ss:$8 sps:$4 sm:$0xff]  }
0x106f   :  { %7390 = vmatprep.subr.bf16.mxu0 %v12230_v22  ;;  %7431 = vmatprep.subr.bf16.mxu1 %v12278_v38  ;;  %v12294_v22 = vld [vmem:[#allocation31 + $0x50] ss:$8 sps:$4 sm:$0xff]   ;;  %v12297_v38 = vld [vmem:[#allocation31 + $0x40] ss:$8 sps:$4 sm:$0xff]  }
0x1072   :  { %7391 = vmatpush2.bf16.msra.mxu0 %v12228_v53  ;;  %7432 = vmatpush2.bf16.msra.mxu1 %v12276_v56  ;;  %v12302_v53 = vld [vmem:[#allocation31 + $0x34] ss:$8 sps:$4 sm:$0xff]   ;;  %v12305_v56 = vld [vmem:[#allocation31 + $0x24] ss:$8 sps:$4 sm:$0xff]  }
0x1073   :  { %7392 = vmatprep.subr.bf16.mxu0 %v12233_v55  ;;  %7433 = vmatprep.subr.bf16.mxu1 %v12281_v21  ;;  %v12300_v55 = vld [vmem:[#allocation31 + $0x30] ss:$8 sps:$4 sm:$0xff]   ;;  %v12314_v21 = vld [vmem:[#allocation31 + $0xf4] ss:$8 sps:$4 sm:$0xff]  }
0x1076   :  { %7393 = vmatpush2.bf16.msra.mxu0 %v12231_v57  ;;  %7434 = vmatpush2.bf16.msra.mxu1 %v12279_v20  ;;  %v12303_v57 = vld [vmem:[#allocation31 + $0x20] ss:$8 sps:$4 sm:$0xff]   ;;  %v12312_v20 = vld [vmem:[#allocation31 + $0xf0] ss:$8 sps:$4 sm:$0xff]  }
0x1077   :  { %7394 = vmatprep.subr.bf16.mxu0 %v12236_v58  ;;  %7435 = vmatprep.subr.bf16.mxu1 %v12284_v0  ;;  %v12308_v58 = vld [vmem:[#allocation31 + $0x14] ss:$8 sps:$4 sm:$0xff]   ;;  %v12315_v0 = vld [vmem:[#allocation31 + $0xe0] ss:$8 sps:$4 sm:$0xff]  }
0x107a   :  { %7395 = vmatpush2.bf16.msra.mxu0 %v12234_v54  ;;  %7436 = vmatpush2.bf16.msra.mxu1 %v12282_v46  ;;  %v12306_v54 = vld [vmem:[#allocation31 + $0x10] ss:$8 sps:$4 sm:$0xff]   ;;  %v12320_v46 = vld [vmem:[#allocation31 + $0xd4] ss:$8 sps:$4 sm:$0xff]  }
0x107b   :  { %7396 = vmatprep.subr.bf16.mxu0 %v12239_v59  ;;  %7437 = vmatprep.subr.bf16.mxu1 %v12287_v1  ;;  %v12311_v59 = vld [vmem:[#allocation31 + $0x4] ss:$8 sps:$4 sm:$0xff]   ;;  %v12318_v1 = vld [vmem:[#allocation31 + $0xd0] ss:$8 sps:$4 sm:$0xff]  }
0x107e   :  { %7397 = vmatpush2.bf16.msra.mxu0 %v12237_v60  ;;  %7438 = vmatpush2.bf16.msra.mxu1 %v12285_v51  ;;  %v12309_v60 = vld [vmem:[#allocation31] ss:$8 sps:$4 sm:$0xff]   ;;  %v12323_v51 = vld [vmem:[#allocation31 + $0xc4] ss:$8 sps:$4 sm:$0xff]  }
0x107f   :  { %10656 = vmatprep.subr.msk.bf16.mxu0 %vm4180_vm4, %v7465_v61  ;;  %7723 = vmatprep.subr.bf16.mxu1 %v12290_v30  ;;  %v12317_v61 = vld [vmem:[#allocation31 + $0xe4] ss:$8 sps:$4 sm:$0xff]   ;;  %v12321_v30 = vld [vmem:[#allocation31 + $0xc0] ss:$8 sps:$4 sm:$0xff]  }
0x10b9   :  { %v6440_v49 = vpop.f32.mrf.mxu0  ;;  %v6481_v2 = vpop.f32.mrf.mxu1 }
0x10ba   :  { %v6482_v3 = vadd.f32 %v6481_v2, %v6440_v49  ;;  %v12326_v49 = vld [vmem:[#allocation31 + $0xb4] ss:$8 sps:$4 sm:$0xff]   ;;  %v12324_v2 = vld [vmem:[#allocation31 + $0xb0] ss:$8 sps:$4 sm:$0xff]  }
0x10bb   :  { %v6442_v4 = vpop.f32.mrf.mxu0  ;;  %v6483_v47 = vpop.f32.mrf.mxu1 }
0x10bc   :  { %v6484_v43 = vadd.f32 %v6483_v47, %v6442_v4  ;;  %v12327_v4 = vld [vmem:[#allocation31 + $0xa0] ss:$8 sps:$4 sm:$0xff]   ;;  %v12332_v47 = vld [vmem:[#allocation31 + $0x94] ss:$8 sps:$4 sm:$0xff]  }
0x10bd   :  { %v6444_v5 = vpop.f32.mrf.mxu0  ;;  %v6485_v6 = vpop.f32.mrf.mxu1 }
0x10be   :  { %v12335_v5 = vld [vmem:[#allocation31 + $0x84] ss:$8 sps:$4 sm:$0xff]   ;;  %v12333_v6 = vld [vmem:[#allocation31 + $0x80] ss:$8 sps:$4 sm:$0xff]  }
0x10bf   :  { %v6445_v7 = vpop.f32.mrf.mxu0  ;;  %v6486_v8 = vpop.f32.mrf.mxu1 }
0x10f9   :  { %v6842_v9 = vpop.f32.mrf.mxu0  ;;  %v6883_v10 = vpop.f32.mrf.mxu1 }
0x10fa   :  { %v6843_v11 = vadd.f32 %v6842_v9, %v6482_v3  ;;  %v12329_v3 = vld [vmem:[#allocation31 + $0xa4] ss:$8 sps:$4 sm:$0xff]  }
0x10fb   :  { %v6844_v13 = vpop.f32.mrf.mxu0  ;;  %v6885_v14 = vpop.f32.mrf.mxu1 }
0x10fc   :  { %v13945_v16 = vadd.f32 %v6883_v10, %v6843_v11  ;;  %v6845_v17 = vadd.f32 %v6844_v13, %v6484_v43  ;;  %v12330_v43 = vld [vmem:[#allocation31 + $0x90] ss:$8 sps:$4 sm:$0xff]  }
0x10fd   :  { %v6846_v19 = vpop.f32.mrf.mxu0  ;;  %v6887_v24 = vpop.f32.mrf.mxu1 }
0x10fe   :  { %v13947_v25 = vadd.f32 %v6885_v14, %v6845_v17 }
0x10ff   :  { %v6847_v26 = vpop.f32.mrf.mxu0  ;;  %v6888_v27 = vpop.f32.mrf.mxu1 }
0x1101   :  { %v6929_v28 = vpop.f32.mrf.mxu0  ;;  %v6970_v29 = vpop.f32.mrf.mxu1 }
0x1102   :  { %v6979_v33 = vpack.c.bf16 %v6970_v29, %v6970_v29  ;;  %v6977_v42 = vpack.c.bf16 %v6929_v28, %v6929_v28 }
0x1103   :  { %v6931_v34 = vpop.f32.mrf.mxu0  ;;  %v6972_v35 = vpop.f32.mrf.mxu1 }
0x1104   :  { %v6978_v23 = vpack.c.bf16 %v6931_v34, %v6931_v34  ;;  %v6980_v40 = vpack.c.bf16 %v6972_v35, %v6972_v35 }
0x1105   :  { %v6933_v12 = vpop.f32.mrf.mxu0  ;;  %v6974_v15 = vpop.f32.mrf.mxu1 }
0x1106   :  { %7398 = vmatprep.mubr.bf16.mxu0 %v6978_v23  ;;  %7439 = vmatprep.mubr.bf16.mxu1 %v6980_v40  ;;  %v12384_v23 = vld [vmem:[#allocation35 + $0x70] ss:$8 sps:$4 sm:$0xff]   ;;  %v12386_v40 = vld [vmem:[#allocation35 + $0x74] ss:$8 sps:$4 sm:$0xff]   ;;  %v12395_v15 = vld [vmem:[#allocation35 + $0x44] ss:$8 sps:$4 sm:$0xff]  }
0x1107   :  { %v6934_v63 = vpop.f32.mrf.mxu0  ;;  %7399 = vmatmul.mubr.bf16.vlgmr.msra.gmra.mxu0 %v6977_v42  ;;  %7440 = vmatmul.mubr.bf16.vlgmr.msra.gmra.mxu1 %v6979_v33  ;;  %v6975_v52 = vpop.f32.mrf.mxu1  ;;  %v12387_v42 = vld [vmem:[#allocation35 + $0x60] ss:$8 sps:$4 sm:$0xff]   ;;  %v12392_v12 = vld [vmem:[#allocation35 + $0x54] ss:$8 sps:$4 sm:$0xff]  }
0x1108   :  { %7491 = vmatpush1.bf16.msra.mxu0 %v7471_v45  ;;  %7508 = vmatprep.mubr.bf16.mxu0 %v13293_v39  ;;  %v12396_v63 = vld [vmem:[#allocation35 + $0x30] ss:$8 sps:$4 sm:$0xff]   ;;  %v12401_v45 = vld [vmem:[#allocation35 + $0x24] ss:$8 sps:$4 sm:$0xff]   ;;  %v12399_v52 = vld [vmem:[#allocation35 + $0x20] ss:$8 sps:$4 sm:$0xff]  }
0x1109   :  { %7724 = vmatpush1.bf16.msra.mxu1 %v12288_v18  ;;  %v12393_v18 = vld [vmem:[#allocation35 + $0x40] ss:$8 sps:$4 sm:$0xff]  }
0x110a   :  { %7725 = vmatprep.subr.bf16.mxu1 %v12293_v44  ;;  %v12398_v44 = vld [vmem:[#allocation35 + $0x34] ss:$8 sps:$4 sm:$0xff]  }
0x110d   :  { %7726 = vmatpush1.bf16.msra.mxu1 %v12291_v41  ;;  %v12404_v41 = vld [vmem:[#allocation35 + $0x14] ss:$8 sps:$4 sm:$0xff]  }
0x110e   :  { %7727 = vmatprep.subr.bf16.mxu1 %v12296_v62  ;;  %v12402_v62 = vld [vmem:[#allocation35 + $0x10] ss:$8 sps:$4 sm:$0xff]  }
0x110f   :  { %10657 = vmatmul.mubr.msk.bf16.vlgmr.msra.gmra.mxu0 %vm4176_vm5, %v7466_v37  ;;  %v12407_v37 = vld [vmem:[#allocation35 + $0x4] ss:$8 sps:$4 sm:$0xff]  }
0x1110   :  { %7814 = vmatprep.mubr.bf16.mxu0 %v13293_v39 }
0x1111   :  { %7728 = vmatpush1.bf16.msra.mxu1 %v12294_v22  ;;  %v12405_v22 = vld [vmem:[#allocation35] ss:$8 sps:$4 sm:$0xff]  }
0x1112   :  { %7729 = vmatprep.subr.bf16.mxu1 %v12299_v32  ;;  %v12410_v32 = vld [vmem:[#allocation35 + $0xf4] ss:$8 sps:$4 sm:$0xff]  }
0x1115   :  { %7730 = vmatpush1.bf16.msra.mxu1 %v12297_v38  ;;  %v12408_v38 = vld [vmem:[#allocation35 + $0xf0] ss:$8 sps:$4 sm:$0xff]  }
0x1116   :  { %7731 = vmatprep.subr.bf16.mxu1 %v12302_v53  ;;  %v12413_v53 = vld [vmem:[#allocation35 + $0xe4] ss:$8 sps:$4 sm:$0xff]  }
0x1119   :  { %7732 = vmatpush1.bf16.msra.mxu1 %v12300_v55  ;;  %v12411_v55 = vld [vmem:[#allocation35 + $0xe0] ss:$8 sps:$4 sm:$0xff]  }
0x111a   :  { %7733 = vmatprep.subr.bf16.mxu1 %v12305_v56  ;;  %v12416_v56 = vld [vmem:[#allocation35 + $0xd4] ss:$8 sps:$4 sm:$0xff]  }
0x111d   :  { %7734 = vmatpush1.bf16.msra.mxu1 %v12303_v57  ;;  %v7450_v57 = vld [vmem:[#allocation28] sm:$0x3] }
0x111e   :  { %7735 = vmatprep.subr.bf16.mxu1 %v12308_v58  ;;  %v7551_v58 = vld [vmem:[#allocation32] sm:$0x3] }
0x1121   :  { %7736 = vmatpush1.bf16.msra.mxu1 %v12306_v54  ;;  %v12414_v54 = vld [vmem:[#allocation35 + $0xd0] ss:$8 sps:$4 sm:$0xff]  }
0x1122   :  { %7737 = vmatprep.subr.bf16.mxu1 %v12311_v59  ;;  %v7455_v59 = vrot.slane %v7450_v57, %v13773_v48 }
0x1125   :  { %7738 = vmatpush1.bf16.msra.mxu1 %v12309_v60  ;;  %v7556_v60 = vrot.slane %v7551_v58, %v13773_v48 }
0x1126   :  { %7739 = vmatprep.subr.bf16.mxu1 %v12314_v21  ;;  %v12419_v21 = vld [vmem:[#allocation35 + $0xc4] ss:$8 sps:$4 sm:$0xff]  }
0x1129   :  { %7740 = vmatpush2.bf16.msra.mxu1 %v12312_v20  ;;  %v7459_v20 = vrot.slane %v7450_v57, %v13776_v50  ;;  %v12380_v57 = vld [vmem:[#allocation35 + $0x194] ss:$8 sps:$4 sm:$0xff]  }
0x112a   :  { %7741 = vmatprep.subr.bf16.mxu1 %v12317_v61  ;;  %v7560_v61 = vrot.slane %v7551_v58, %v13776_v50  ;;  %v12378_v58 = vld [vmem:[#allocation35 + $0x190] ss:$8 sps:$4 sm:$0xff]  }
0x112d   :  { %7742 = vmatpush2.bf16.msra.mxu1 %v12315_v0 }
0x112e   :  { %7743 = vmatprep.subr.bf16.mxu1 %v12320_v46  ;;  %v12417_v46 = vld [vmem:[#allocation35 + $0xc0] ss:$8 sps:$4 sm:$0xff]  }
0x1131   :  { %7744 = vmatpush2.bf16.msra.mxu1 %v12318_v1 }
0x1132   :  { %7745 = vmatprep.subr.bf16.mxu1 %v12323_v51 }
0x1135   :  { %7746 = vmatpush2.bf16.msra.mxu1 %v12321_v30  ;;  %v12422_v30 = vld [vmem:[#allocation35 + $0xb4] ss:$8 sps:$4 sm:$0xff]  }
0x1136   :  { %7747 = vmatprep.subr.bf16.mxu1 %v12326_v49 }
0x1139   :  { %7748 = vmatpush2.bf16.msra.mxu1 %v12324_v2 }
0x113a   :  { %7749 = vmatprep.subr.bf16.mxu1 %v12329_v3 }
0x113d   :  { %7750 = vmatpush2.bf16.msra.mxu1 %v12327_v4 }
0x113e   :  { %7751 = vmatprep.subr.bf16.mxu1 %v12332_v47 }
0x1141   :  { %7752 = vmatpush2.bf16.msra.mxu1 %v12330_v43  ;;  %v12420_v43 = vld [vmem:[#allocation35 + $0xb0] ss:$8 sps:$4 sm:$0xff]  }
0x1142   :  { %7753 = vmatprep.subr.bf16.mxu1 %v12335_v5 }
0x1145   :  { %7754 = vmatpush2.bf16.msra.mxu1 %v12333_v6 }
0x1146   :  { %8299 = vmatprep.subr.bf16.mxu1 %v12386_v40  ;;  %v12350_v40 = vld [vmem:[#allocation35 + $0x134] ss:$8 sps:$4 sm:$0xff]  }
0x11c7   :  { %v7400_v7 = vpop.f32.mrf.mxu0  ;;  %v7441_v8 = vpop.f32.mrf.mxu1 }
0x11c8   :  { %v7442_v9 = vadd.f32 %v7441_v8, %v7400_v7  ;;  %v12425_v7 = vld [vmem:[#allocation35 + $0xa4] ss:$8 sps:$4 sm:$0xff]  }
0x11c9   :  { %v7402_v10 = vpop.f32.mrf.mxu0  ;;  %v7443_v11 = vpop.f32.mrf.mxu1 }
0x11ca   :  { %v13956_v13 = vadd.f32 %v7442_v9, %v13945_v16  ;;  %v7444_v14 = vadd.f32 %v7443_v11, %v7402_v10  ;;  %v12389_v16 = vld [vmem:[#allocation35 + $0x64] ss:$8 sps:$4 sm:$0xff]   ;;  %v12423_v11 = vld [vmem:[#allocation35 + $0xa0] ss:$8 sps:$4 sm:$0xff]  }
0x11cb   :  { %v7404_v17 = vpop.f32.mrf.mxu0  ;;  %v7445_v19 = vpop.f32.mrf.mxu1 }
0x11cc   :  { %v13959_v24 = vadd.f32 %v7444_v14, %v13947_v25  ;;  %v12390_v25 = vld [vmem:[#allocation35 + $0x50] ss:$8 sps:$4 sm:$0xff]   ;;  %v7462_v1 = vadd.f32 %v7455_v59, %v13956_v13  ;;  %v12428_v14 = vld [vmem:[#allocation35 + $0x94] ss:$8 sps:$4 sm:$0xff]   ;;  %v12381_v59 = vld [vmem:[#allocation35 + $0x180] ss:$8 sps:$4 sm:$0xff]  }
0x11cd   :  { %v7405_v26 = vpop.f32.mrf.mxu0  ;;  %v7446_v27 = vpop.f32.mrf.mxu1  ;;  %v7770_v19 = vld [vmem:[#allocation34] sm:$0x3] }
0x11ce   :  { %v7463_v3 = vadd.f32 %v7459_v20, %v13959_v24  ;;  %v12338_v24 = vld [vmem:[#allocation35 + $0x174] ss:$8 sps:$4 sm:$0xff]   ;;  %v12426_v26 = vld [vmem:[#allocation35 + $0x90] ss:$8 sps:$4 sm:$0xff]  }
0x11cf   :  { %v7510_v28 = vpop.f32.mrf.mxu0  ;;  %v12336_v27 = vld [vmem:[#allocation35 + $0x170] ss:$8 sps:$4 sm:$0xff]  }
0x11d0   :  { %v7517_v33 = vpack.c.bf16 %v7510_v28, %v7510_v28  ;;  %v7858_v28 = vld [vmem:[#allocation34 + $0x2] sm:$0x3] }
0x11d1   :  { %v7512_v29 = vpop.f32.mrf.mxu0 }
0x11d2   :  { %v7518_v31 = vpack.c.bf16 %v7512_v29, %v7512_v29  ;;  %v12341_v29 = vld [vmem:[#allocation35 + $0x164] ss:$8 sps:$4 sm:$0xff]  }
0x11d3   :  { %v7514_v34 = vpop.f32.mrf.mxu0 }
0x11d4   :  { %7755 = vmatprep.mubr.bf16.mxu1 %v7518_v31  ;;  %v12339_v31 = vld [vmem:[#allocation35 + $0x160] ss:$8 sps:$4 sm:$0xff]   ;;  %v12342_v34 = vld [vmem:[#allocation35 + $0x150] ss:$8 sps:$4 sm:$0xff]  }
0x11d5   :  { %v7515_v35 = vpop.f32.mrf.mxu0  ;;  %7756 = vmatmul.mubr.bf16.vlgmr.msra.gmra.mxu1 %v7517_v33  ;;  %v12344_v33 = vld [vmem:[#allocation35 + $0x154] ss:$8 sps:$4 sm:$0xff]  }
0x11d6   :  { %8300 = vmatpush1.bf16.msra.mxu1 %v12384_v23  ;;  %v12347_v35 = vld [vmem:[#allocation35 + $0x144] ss:$8 sps:$4 sm:$0xff]   ;;  %v12345_v23 = vld [vmem:[#allocation35 + $0x140] ss:$8 sps:$4 sm:$0xff]  }
0x11d7   :  { %8301 = vmatprep.subr.bf16.mxu1 %v12389_v16  ;;  %v12348_v16 = vld [vmem:[#allocation35 + $0x130] ss:$8 sps:$4 sm:$0xff]  }
0x11da   :  { %8302 = vmatpush1.bf16.msra.mxu1 %v12387_v42  ;;  %v12353_v42 = vld [vmem:[#allocation35 + $0x124] ss:$8 sps:$4 sm:$0xff]  }
0x11db   :  { %8303 = vmatprep.subr.bf16.mxu1 %v12392_v12  ;;  %v12351_v12 = vld [vmem:[#allocation35 + $0x120] ss:$8 sps:$4 sm:$0xff]  }
0x11de   :  { %8304 = vmatpush1.bf16.msra.mxu1 %v12390_v25  ;;  %v12356_v25 = vld [vmem:[#allocation35 + $0x114] ss:$8 sps:$4 sm:$0xff]  }
0x11df   :  { %8305 = vmatprep.subr.bf16.mxu1 %v12395_v15  ;;  %v12354_v15 = vld [vmem:[#allocation35 + $0x110] ss:$8 sps:$4 sm:$0xff]  }
0x11e2   :  { %8306 = vmatpush1.bf16.msra.mxu1 %v12393_v18  ;;  %v12359_v18 = vld [vmem:[#allocation35 + $0x104] ss:$8 sps:$4 sm:$0xff]  }
0x11e3   :  { %8307 = vmatprep.subr.bf16.mxu1 %v12398_v44  ;;  %v12357_v44 = vld [vmem:[#allocation35 + $0x100] ss:$8 sps:$4 sm:$0xff]  }
0x11e6   :  { %8308 = vmatpush1.bf16.msra.mxu1 %v12396_v63  ;;  %v12362_v63 = vld [vmem:[#allocation35 + $0x1f4] ss:$8 sps:$4 sm:$0xff]  }
0x11e7   :  { %8309 = vmatprep.subr.bf16.mxu1 %v12401_v45  ;;  %v12360_v45 = vld [vmem:[#allocation35 + $0x1f0] ss:$8 sps:$4 sm:$0xff]  }
0x11ea   :  { %8310 = vmatpush1.bf16.msra.mxu1 %v12399_v52  ;;  %v12365_v52 = vld [vmem:[#allocation35 + $0x1e4] ss:$8 sps:$4 sm:$0xff]  }
0x11eb   :  { %8311 = vmatprep.subr.bf16.mxu1 %v12404_v41  ;;  %v12363_v41 = vld [vmem:[#allocation35 + $0x1e0] ss:$8 sps:$4 sm:$0xff]  }
0x11ee   :  { %8312 = vmatpush1.bf16.msra.mxu1 %v12402_v62  ;;  %v12368_v62 = vld [vmem:[#allocation35 + $0x1d4] ss:$8 sps:$4 sm:$0xff]  }
0x11ef   :  { %8313 = vmatprep.subr.bf16.mxu1 %v12407_v37  ;;  %v12366_v37 = vld [vmem:[#allocation35 + $0x1d0] ss:$8 sps:$4 sm:$0xff]  }
0x11f2   :  { %8314 = vmatpush1.bf16.msra.mxu1 %v12405_v22  ;;  %v12371_v22 = vld [vmem:[#allocation35 + $0x1c4] ss:$8 sps:$4 sm:$0xff]  }
0x11f3   :  { %8315 = vmatprep.subr.bf16.mxu1 %v12410_v32  ;;  %v12369_v32 = vld [vmem:[#allocation35 + $0x1c0] ss:$8 sps:$4 sm:$0xff]  }
0x11f6   :  { %8316 = vmatpush2.bf16.msra.mxu1 %v12408_v38  ;;  %v12374_v38 = vld [vmem:[#allocation35 + $0x1b4] ss:$8 sps:$4 sm:$0xff]  }
0x11f7   :  { %8317 = vmatprep.subr.bf16.mxu1 %v12413_v53  ;;  %v12372_v53 = vld [vmem:[#allocation35 + $0x1b0] ss:$8 sps:$4 sm:$0xff]  }
0x11fa   :  { %8318 = vmatpush2.bf16.msra.mxu1 %v12411_v55  ;;  %v12377_v55 = vld [vmem:[#allocation35 + $0x1a4] ss:$8 sps:$4 sm:$0xff]  }
0x11fb   :  { %8319 = vmatprep.subr.bf16.mxu1 %v12416_v56  ;;  %v12375_v56 = vld [vmem:[#allocation35 + $0x1a0] ss:$8 sps:$4 sm:$0xff]  }
0x11fe   :  { %8320 = vmatpush2.bf16.msra.mxu1 %v12414_v54  ;;  %v12383_v54 = vld [vmem:[#allocation35 + $0x184] ss:$8 sps:$4 sm:$0xff]  }
0x11ff   :  { %8321 = vmatprep.subr.bf16.mxu1 %v12419_v21  ;;  %v12429_v21 = vld [vmem:[#allocation35 + $0x80] ss:$8 sps:$4 sm:$0xff]  }
0x1202   :  { %8322 = vmatpush2.bf16.msra.mxu1 %v12417_v46 }
0x1203   :  { %8323 = vmatprep.subr.bf16.mxu1 %v12422_v30 }
0x1206   :  { %8324 = vmatpush2.bf16.msra.mxu1 %v12420_v43  ;;  %v12434_v43 = vld [vmem:[#allocation35 + $0x274] ss:$8 sps:$4 sm:$0xff]  }
0x1207   :  { %8325 = vmatprep.subr.bf16.mxu1 %v12425_v7  ;;  %v8341_v7 = vld [vmem:[#allocation34 + $0x4] sm:$0x3] }
0x120a   :  { %8326 = vmatpush2.bf16.msra.mxu1 %v12423_v11  ;;  %v12440_v11 = vld [vmem:[#allocation35 + $0x254] ss:$8 sps:$4 sm:$0xff]  }
0x120b   :  { %8327 = vmatprep.subr.bf16.mxu1 %v12428_v14  ;;  %v12443_v14 = vld [vmem:[#allocation35 + $0x244] ss:$8 sps:$4 sm:$0xff]  }
0x120e   :  { %8328 = vmatpush2.bf16.msra.mxu1 %v12426_v26  ;;  %v12449_v26 = vld [vmem:[#allocation35 + $0x224] ss:$8 sps:$4 sm:$0xff]  }
0x1295   :  { %v7757_v0 = vpop.f32.mrf.mxu1 }
0x1296   :  { %v7758_v51 = vadd.f32 %v7757_v0, %v7556_v60  ;;  %v12431_v60 = vld [vmem:[#allocation35 + $0x84] ss:$8 sps:$4 sm:$0xff]  }
0x1297   :  { %v7759_v49 = vpop.f32.mrf.mxu1  ;;  %8329 = vmatprep.subr.bf16.mxu1 %v12431_v60 }
0x1298   :  { %v13966_v2 = vadd.f32 %v7758_v51, %v7462_v1  ;;  %v7760_v4 = vadd.f32 %v7759_v49, %v7560_v61  ;;  %8330 = vmatpush2.bf16.msra.mxu1 %v12429_v21 }
0x1299   :  { %v7761_v47 = vpop.f32.mrf.mxu1 }
0x129a   :  { %v7766_v5 = vmax.f32 %v13966_v2, 0.0  ;;  %v13970_v6 = vadd.f32 %v7760_v4, %v7463_v3 }
0x129b   :  { %v7762_v8 = vpop.f32.mrf.mxu1 }
0x129c   :  { %v7768_v9 = vpack.c.bf16 %v7766_v5, %v7766_v5  ;;  %v7767_v10 = vmax.f32 %v13970_v6, 0.0  ;;  %v12432_v8 = vld [vmem:[#allocation35 + $0x270] ss:$8 sps:$4 sm:$0xff]  }
0x129e   :  { %v13973_v13 = vpack.c.bf16 %v7767_v10, %v7767_v10  ;;  %v13978_v17 = vsel %vm7775_vm6, %v7768_v9, 0  ;;  %v12437_v9 = vld [vmem:[#allocation35 + $0x264] ss:$8 sps:$4 sm:$0xff]   ;;  %v12435_v10 = vld [vmem:[#allocation35 + $0x260] ss:$8 sps:$4 sm:$0xff]  }
0x12a0   :  { %10690 = vmatprep.subr.msk.bf16.mxu0 %vm7775_vm6, %v13973_v13 }
0x12a1   :  { %7797 = vmatpush1.bf16.msra.mxu0 %v13978_v17 }
0x12a2   :  { %10692 = vmatprep.subr.msk.bf16.mxu0 %vm7775_vm6, %v13973_v13 }
0x12a4   :  { %10691 = vmatmul.mubr.msk.bf16.vlgmr.msra.gmra.mxu0 %vm7771_vm7, %v7770_v19  ;;  %v12441_v19 = vld [vmem:[#allocation35 + $0x240] ss:$8 sps:$4 sm:$0xff]  }
0x12a5   :  { %7877 = vmatpush1.bf16.msra.mxu0 %v13978_v17  ;;  %7894 = vmatprep.mubr.bf16.mxu0 %v13293_v39 }
0x12a6   :  { %8098 = vmatprep.subr.bf16.mxu0 %v12338_v24  ;;  %v12444_v24 = vld [vmem:[#allocation35 + $0x230] ss:$8 sps:$4 sm:$0xff]  }
0x12ac   :  { %10693 = vmatmul.mubr.msk.bf16.vlgmr.msra.gmra.mxu0 %vm7771_vm7, %v7858_v28  ;;  %v12452_v28 = vld [vmem:[#allocation35 + $0x214] ss:$8 sps:$4 sm:$0xff]  }
0x12ad   :  { %8099 = vmatpush1.bf16.msra.mxu0 %v12336_v27  ;;  %v12447_v27 = vld [vmem:[#allocation35 + $0x220] ss:$8 sps:$4 sm:$0xff]  }
0x12ae   :  { %8100 = vmatprep.subr.bf16.mxu0 %v12341_v29  ;;  %v12450_v29 = vld [vmem:[#allocation35 + $0x210] ss:$8 sps:$4 sm:$0xff]  }
0x12b1   :  { %8101 = vmatpush1.bf16.msra.mxu0 %v12339_v31  ;;  %v12455_v31 = vld [vmem:[#allocation35 + $0x204] ss:$8 sps:$4 sm:$0xff]  }
0x12b2   :  { %8102 = vmatprep.subr.bf16.mxu0 %v12344_v33  ;;  %v12453_v33 = vld [vmem:[#allocation35 + $0x200] ss:$8 sps:$4 sm:$0xff]  }
0x12b5   :  { %8103 = vmatpush1.bf16.msra.mxu0 %v12342_v34  ;;  %v12458_v34 = vld [vmem:[#allocation35 + $0x2f4] ss:$8 sps:$4 sm:$0xff]  }
0x12b6   :  { %8104 = vmatprep.subr.bf16.mxu0 %v12347_v35  ;;  %v12456_v35 = vld [vmem:[#allocation35 + $0x2f0] ss:$8 sps:$4 sm:$0xff]  }
0x12b9   :  { %8105 = vmatpush1.bf16.msra.mxu0 %v12345_v23  ;;  %v12461_v23 = vld [vmem:[#allocation35 + $0x2e4] ss:$8 sps:$4 sm:$0xff]  }
0x12ba   :  { %8106 = vmatprep.subr.bf16.mxu0 %v12350_v40  ;;  %v12459_v40 = vld [vmem:[#allocation35 + $0x2e0] ss:$8 sps:$4 sm:$0xff]  }
0x12bd   :  { %8107 = vmatpush1.bf16.msra.mxu0 %v12348_v16  ;;  %v12464_v16 = vld [vmem:[#allocation35 + $0x2d4] ss:$8 sps:$4 sm:$0xff]  }
0x12be   :  { %8108 = vmatprep.subr.bf16.mxu0 %v12353_v42  ;;  %v12462_v42 = vld [vmem:[#allocation35 + $0x2d0] ss:$8 sps:$4 sm:$0xff]  }
0x12c1   :  { %8109 = vmatpush1.bf16.msra.mxu0 %v12351_v12  ;;  %v12467_v12 = vld [vmem:[#allocation35 + $0x2c4] ss:$8 sps:$4 sm:$0xff]  }
0x12c2   :  { %8110 = vmatprep.subr.bf16.mxu0 %v12356_v25  ;;  %v12465_v25 = vld [vmem:[#allocation35 + $0x2c0] ss:$8 sps:$4 sm:$0xff]  }
0x12c5   :  { %8111 = vmatpush1.bf16.msra.mxu0 %v12354_v15  ;;  %v12470_v15 = vld [vmem:[#allocation35 + $0x2b4] ss:$8 sps:$4 sm:$0xff]  }
0x12c6   :  { %8112 = vmatprep.subr.bf16.mxu0 %v12359_v18  ;;  %v12468_v18 = vld [vmem:[#allocation35 + $0x2b0] ss:$8 sps:$4 sm:$0xff]  }
0x12c9   :  { %8113 = vmatpush1.bf16.msra.mxu0 %v12357_v44  ;;  %v12473_v44 = vld [vmem:[#allocation35 + $0x2a4] ss:$8 sps:$4 sm:$0xff]  }
0x12ca   :  { %8114 = vmatprep.subr.bf16.mxu0 %v12362_v63  ;;  %v12471_v63 = vld [vmem:[#allocation35 + $0x2a0] ss:$8 sps:$4 sm:$0xff]  }
0x12cd   :  { %8115 = vmatpush2.bf16.msra.mxu0 %v12360_v45  ;;  %v12476_v45 = vld [vmem:[#allocation35 + $0x294] ss:$8 sps:$4 sm:$0xff]  }
0x12ce   :  { %8116 = vmatprep.subr.bf16.mxu0 %v12365_v52  ;;  %v12474_v52 = vld [vmem:[#allocation35 + $0x290] ss:$8 sps:$4 sm:$0xff]  }
0x12d1   :  { %8117 = vmatpush2.bf16.msra.mxu0 %v12363_v41  ;;  %v12479_v41 = vld [vmem:[#allocation35 + $0x284] ss:$8 sps:$4 sm:$0xff]  }
0x12d2   :  { %8118 = vmatprep.subr.bf16.mxu0 %v12368_v62  ;;  %v12477_v62 = vld [vmem:[#allocation35 + $0x280] ss:$8 sps:$4 sm:$0xff]  }
0x12d5   :  { %8119 = vmatpush2.bf16.msra.mxu0 %v12366_v37 }
0x12d6   :  { %8120 = vmatprep.subr.bf16.mxu0 %v12371_v22 }
0x12d9   :  { %8121 = vmatpush2.bf16.msra.mxu0 %v12369_v32 }
0x12da   :  { %8122 = vmatprep.subr.bf16.mxu0 %v12374_v38 }
0x12dd   :  { %8123 = vmatpush2.bf16.msra.mxu0 %v12372_v53 }
0x12de   :  { %8124 = vmatprep.subr.bf16.mxu0 %v12377_v55 }
0x12e1   :  { %8125 = vmatpush2.bf16.msra.mxu0 %v12375_v56 }
0x12e2   :  { %8126 = vmatprep.subr.bf16.mxu0 %v12380_v57 }
0x12e5   :  { %8127 = vmatpush2.bf16.msra.mxu0 %v12378_v58 }
0x12e6   :  { %8128 = vmatprep.subr.bf16.mxu0 %v12383_v54 }
0x12e9   :  { %8129 = vmatpush2.bf16.msra.mxu0 %v12381_v59 }
0x12ea   :  { %10758 = vmatprep.subr.msk.bf16.mxu0 %vm7775_vm6, %v13973_v13  ;;  %v12438_v13 = vld [vmem:[#allocation35 + $0x250] ss:$8 sps:$4 sm:$0xff]  }
0x1364   :  { %v7816_v20 = vpop.f32.mrf.mxu0 }
0x1365   :  { %v7823_v46 = vpack.c.bf16 %v7816_v20, %v7816_v20 }
0x1366   :  { %v7818_v61 = vpop.f32.mrf.mxu0 }
0x1367   :  { %v7824_v0 = vpack.c.bf16 %v7818_v61, %v7818_v61 }
0x1368   :  { %v7820_v1 = vpop.f32.mrf.mxu0 }
0x1369   :  { %8331 = vmatprep.mubr.bf16.mxu1 %v7824_v0  ;;  %v12530_v1 = vld [vmem:[#allocation40 + $0x74] ss:$8 sps:$4 sm:$0xff]  }
0x136a   :  { %v7821_v51 = vpop.f32.mrf.mxu0  ;;  %8332 = vmatmul.mubr.bf16.vlgmr.msra.gmra.mxu1 %v7823_v46  ;;  %v12528_v46 = vld [vmem:[#allocation40 + $0x70] ss:$8 sps:$4 sm:$0xff]  }
0x136b   :  { %8684 = vmatprep.mubr.bf16.mxu1 %v13293_v39  ;;  %v12533_v51 = vld [vmem:[#allocation40 + $0x64] ss:$8 sps:$4 sm:$0xff]  }
0x136c   :  { %v7896_v30 = vpop.f32.mrf.mxu0 }
0x136d   :  { %v7903_v4 = vpack.c.bf16 %v7896_v30, %v7896_v30  ;;  %v12531_v30 = vld [vmem:[#allocation40 + $0x60] ss:$8 sps:$4 sm:$0xff]  }
0x136e   :  { %v7898_v49 = vpop.f32.mrf.mxu0 }
0x136f   :  { %v7904_v3 = vpack.c.bf16 %v7898_v49, %v7898_v49  ;;  %v12536_v49 = vld [vmem:[#allocation40 + $0x54] ss:$8 sps:$4 sm:$0xff]  }
0x1370   :  { %v7900_v47 = vpop.f32.mrf.mxu0 }
0x1371   :  { %8130 = vmatprep.mubr.bf16.mxu0 %v7904_v3  ;;  %v12534_v3 = vld [vmem:[#allocation40 + $0x50] ss:$8 sps:$4 sm:$0xff]   ;;  %v12537_v47 = vld [vmem:[#allocation40 + $0x40] ss:$8 sps:$4 sm:$0xff]  }
0x1372   :  { %v7901_v5 = vpop.f32.mrf.mxu0  ;;  %8131 = vmatmul.mubr.bf16.vlgmr.msra.gmra.mxu0 %v7903_v4  ;;  %v12539_v4 = vld [vmem:[#allocation40 + $0x44] ss:$8 sps:$4 sm:$0xff]  }
0x1373   :  { %8360 = vmatpush1.bf16.msra.mxu0 %v13978_v17  ;;  %8377 = vmatprep.mubr.bf16.mxu0 %v13293_v39  ;;  %v12446_v17 = vld [vmem:[#allocation35 + $0x234] ss:$8 sps:$4 sm:$0xff]   ;;  %v12540_v5 = vld [vmem:[#allocation40 + $0x30] ss:$8 sps:$4 sm:$0xff]  }
0x1374   :  { %8581 = vmatprep.subr.bf16.mxu0 %v12434_v43  ;;  %v12542_v43 = vld [vmem:[#allocation40 + $0x34] ss:$8 sps:$4 sm:$0xff]  }
0x137a   :  { %10759 = vmatmul.mubr.msk.bf16.vlgmr.msra.gmra.mxu0 %vm7771_vm7, %v8341_v7  ;;  %v12545_v7 = vld [vmem:[#allocation40 + $0x24] ss:$8 sps:$4 sm:$0xff]  }
0x137b   :  { %8582 = vmatpush1.bf16.msra.mxu0 %v12432_v8  ;;  %v12543_v8 = vld [vmem:[#allocation40 + $0x20] ss:$8 sps:$4 sm:$0xff]  }
0x137c   :  { %8583 = vmatprep.subr.bf16.mxu0 %v12437_v9  ;;  %v12548_v9 = vld [vmem:[#allocation40 + $0x14] ss:$8 sps:$4 sm:$0xff]  }
0x137f   :  { %8584 = vmatpush1.bf16.msra.mxu0 %v12435_v10  ;;  %v12546_v10 = vld [vmem:[#allocation40 + $0x10] ss:$8 sps:$4 sm:$0xff]  }
0x1380   :  { %8585 = vmatprep.subr.bf16.mxu0 %v12440_v11  ;;  %v12551_v11 = vld [vmem:[#allocation40 + $0x4] ss:$8 sps:$4 sm:$0xff]  }
0x1383   :  { %8586 = vmatpush1.bf16.msra.mxu0 %v12438_v13  ;;  %v12549_v13 = vld [vmem:[#allocation40] ss:$8 sps:$4 sm:$0xff]  }
0x1384   :  { %8587 = vmatprep.subr.bf16.mxu0 %v12443_v14  ;;  %v12554_v14 = vld [vmem:[#allocation40 + $0xf4] ss:$8 sps:$4 sm:$0xff]  }
0x1387   :  { %8588 = vmatpush1.bf16.msra.mxu0 %v12441_v19  ;;  %v12552_v19 = vld [vmem:[#allocation40 + $0xf0] ss:$8 sps:$4 sm:$0xff]  }
0x1388   :  { %8589 = vmatprep.subr.bf16.mxu0 %v12446_v17  ;;  %v12557_v17 = vld [vmem:[#allocation40 + $0xe4] ss:$8 sps:$4 sm:$0xff]  }
0x138b   :  { %8590 = vmatpush1.bf16.msra.mxu0 %v12444_v24  ;;  %v12555_v24 = vld [vmem:[#allocation40 + $0xe0] ss:$8 sps:$4 sm:$0xff]  }
0x138c   :  { %8591 = vmatprep.subr.bf16.mxu0 %v12449_v26  ;;  %v12560_v26 = vld [vmem:[#allocation40 + $0xd4] ss:$8 sps:$4 sm:$0xff]  }
0x138f   :  { %8592 = vmatpush1.bf16.msra.mxu0 %v12447_v27  ;;  %v8624_v27 = vld [vmem:[#allocation37] sm:$0x3] }
0x1390   :  { %8593 = vmatprep.subr.bf16.mxu0 %v12452_v28  ;;  %v12558_v28 = vld [vmem:[#allocation40 + $0xd0] ss:$8 sps:$4 sm:$0xff]  }
0x1393   :  { %8594 = vmatpush1.bf16.msra.mxu0 %v12450_v29  ;;  %v12563_v29 = vld [vmem:[#allocation40 + $0xc4] ss:$8 sps:$4 sm:$0xff]  }
0x1394   :  { %8595 = vmatprep.subr.bf16.mxu0 %v12455_v31  ;;  %v8629_v31 = vrot.slane %v8624_v27, %v13773_v48 }
0x1397   :  { %8596 = vmatpush1.bf16.msra.mxu0 %v12453_v33 }
0x1398   :  { %8597 = vmatprep.subr.bf16.mxu0 %v12458_v34  ;;  %v12561_v34 = vld [vmem:[#allocation40 + $0xc0] ss:$8 sps:$4 sm:$0xff]  }
0x139b   :  { %8598 = vmatpush2.bf16.msra.mxu0 %v12456_v35 }
0x139c   :  { %8599 = vmatprep.subr.bf16.mxu0 %v12461_v23  ;;  %v8633_v23 = vrot.slane %v8624_v27, %v13776_v50  ;;  %v12525_v27 = vld [vmem:[#allocation40 + $0x180] ss:$8 sps:$4 sm:$0xff]  }
0x139f   :  { %8600 = vmatpush2.bf16.msra.mxu0 %v12459_v40  ;;  %v12566_v40 = vld [vmem:[#allocation40 + $0xb4] ss:$8 sps:$4 sm:$0xff]  }
0x13a0   :  { %8601 = vmatprep.subr.bf16.mxu0 %v12464_v16 }
0x13a3   :  { %8602 = vmatpush2.bf16.msra.mxu0 %v12462_v42 }
0x13a4   :  { %8603 = vmatprep.subr.bf16.mxu0 %v12467_v12 }
0x13a7   :  { %8604 = vmatpush2.bf16.msra.mxu0 %v12465_v25 }
0x13a8   :  { %8605 = vmatprep.subr.bf16.mxu0 %v12470_v15  ;;  %v12564_v15 = vld [vmem:[#allocation40 + $0xb0] ss:$8 sps:$4 sm:$0xff]  }
0x13ab   :  { %8606 = vmatpush2.bf16.msra.mxu0 %v12468_v18 }
0x13ac   :  { %8607 = vmatprep.subr.bf16.mxu0 %v12473_v44 }
0x13af   :  { %8608 = vmatpush2.bf16.msra.mxu0 %v12471_v63  ;;  %v12569_v63 = vld [vmem:[#allocation40 + $0xa4] ss:$8 sps:$4 sm:$0xff]  }
0x13b0   :  { %8609 = vmatprep.subr.bf16.mxu0 %v12476_v45 }
0x13b3   :  { %8610 = vmatpush2.bf16.msra.mxu0 %v12474_v52 }
0x13b4   :  { %8611 = vmatprep.subr.bf16.mxu0 %v12479_v41 }
0x13b7   :  { %8612 = vmatpush2.bf16.msra.mxu0 %v12477_v62  ;;  %v12567_v62 = vld [vmem:[#allocation40 + $0xa0] ss:$8 sps:$4 sm:$0xff]  }
0x13b8   :  { %9169 = vmatprep.subr.bf16.mxu0 %v12530_v1  ;;  %v12495_v1 = vld [vmem:[#allocation40 + $0x120] ss:$8 sps:$4 sm:$0xff]  }
0x142a   :  { %v8333_v37 = vpop.f32.mrf.mxu1 }
0x142c   :  { %v8335_v22 = vpop.f32.mrf.mxu1 }
0x142e   :  { %v8337_v32 = vpop.f32.mrf.mxu1 }
0x1430   :  { %v8338_v38 = vpop.f32.mrf.mxu1 }
0x1431   :  { %v8642_v38 = vld [vmem:[#allocation38] sm:$0x3] }
0x1432   :  { %v8132_v53 = vpop.f32.mrf.mxu0 }
0x1433   :  { %v8334_v55 = vadd.f32 %v8333_v37, %v8132_v53  ;;  %v12482_v53 = vld [vmem:[#allocation40 + $0x174] ss:$8 sps:$4 sm:$0xff]  }
0x1434   :  { %v8134_v56 = vpop.f32.mrf.mxu0 }
0x1435   :  { %v13993_v57 = vadd.f32 %v8335_v22, %v8134_v56  ;;  %v12572_v22 = vld [vmem:[#allocation40 + $0x94] ss:$8 sps:$4 sm:$0xff]   ;;  %v12480_v56 = vld [vmem:[#allocation40 + $0x170] ss:$8 sps:$4 sm:$0xff]  }
0x1436   :  { %v8136_v58 = vpop.f32.mrf.mxu0 }
0x1437   :  { %v12485_v58 = vld [vmem:[#allocation40 + $0x164] ss:$8 sps:$4 sm:$0xff]  }
0x1438   :  { %v8137_v54 = vpop.f32.mrf.mxu0 }
0x1439   :  { %v12483_v54 = vld [vmem:[#allocation40 + $0x160] ss:$8 sps:$4 sm:$0xff]  }
0x143a   :  { %v8379_v59 = vpop.f32.mrf.mxu0 }
0x143b   :  { %v8386_v20 = vpack.c.bf16 %v8379_v59, %v8379_v59  ;;  %v12488_v59 = vld [vmem:[#allocation40 + $0x154] ss:$8 sps:$4 sm:$0xff]  }
0x143c   :  { %v8381_v60 = vpop.f32.mrf.mxu0 }
0x143d   :  { %v8387_v21 = vpack.c.bf16 %v8381_v60, %v8381_v60  ;;  %v12486_v60 = vld [vmem:[#allocation40 + $0x150] ss:$8 sps:$4 sm:$0xff]  }
0x143e   :  { %v8383_v61 = vpop.f32.mrf.mxu0 }
0x143f   :  { %8613 = vmatprep.mubr.bf16.mxu0 %v8387_v21  ;;  %v12491_v21 = vld [vmem:[#allocation40 + $0x144] ss:$8 sps:$4 sm:$0xff]   ;;  %v12494_v61 = vld [vmem:[#allocation40 + $0x134] ss:$8 sps:$4 sm:$0xff]  }
0x1440   :  { %v8384_v0 = vpop.f32.mrf.mxu0  ;;  %8614 = vmatmul.mubr.bf16.vlgmr.msra.gmra.mxu0 %v8386_v20  ;;  %v12489_v20 = vld [vmem:[#allocation40 + $0x140] ss:$8 sps:$4 sm:$0xff]  }
0x1441   :  { %9170 = vmatpush1.bf16.msra.mxu0 %v12528_v46  ;;  %v12492_v0 = vld [vmem:[#allocation40 + $0x130] ss:$8 sps:$4 sm:$0xff]   ;;  %v12497_v46 = vld [vmem:[#allocation40 + $0x124] ss:$8 sps:$4 sm:$0xff]  }
0x1442   :  { %9171 = vmatprep.subr.bf16.mxu0 %v12533_v51  ;;  %v12500_v51 = vld [vmem:[#allocation40 + $0x114] ss:$8 sps:$4 sm:$0xff]  }
0x1445   :  { %9172 = vmatpush1.bf16.msra.mxu0 %v12531_v30  ;;  %v12498_v30 = vld [vmem:[#allocation40 + $0x110] ss:$8 sps:$4 sm:$0xff]  }
0x1446   :  { %9173 = vmatprep.subr.bf16.mxu0 %v12536_v49  ;;  %v12503_v49 = vld [vmem:[#allocation40 + $0x104] ss:$8 sps:$4 sm:$0xff]  }
0x1449   :  { %9174 = vmatpush1.bf16.msra.mxu0 %v12534_v3  ;;  %v12501_v3 = vld [vmem:[#allocation40 + $0x100] ss:$8 sps:$4 sm:$0xff]  }
0x144a   :  { %9175 = vmatprep.subr.bf16.mxu0 %v12539_v4  ;;  %v12506_v4 = vld [vmem:[#allocation40 + $0x1f4] ss:$8 sps:$4 sm:$0xff]  }
0x144d   :  { %9176 = vmatpush1.bf16.msra.mxu0 %v12537_v47  ;;  %v12504_v47 = vld [vmem:[#allocation40 + $0x1f0] ss:$8 sps:$4 sm:$0xff]  }
0x144e   :  { %9177 = vmatprep.subr.bf16.mxu0 %v12542_v43  ;;  %v12509_v43 = vld [vmem:[#allocation40 + $0x1e4] ss:$8 sps:$4 sm:$0xff]  }
0x1451   :  { %9178 = vmatpush1.bf16.msra.mxu0 %v12540_v5  ;;  %v12507_v5 = vld [vmem:[#allocation40 + $0x1e0] ss:$8 sps:$4 sm:$0xff]  }
0x1452   :  { %9179 = vmatprep.subr.bf16.mxu0 %v12545_v7  ;;  %v12512_v7 = vld [vmem:[#allocation40 + $0x1d4] ss:$8 sps:$4 sm:$0xff]  }
0x1455   :  { %9180 = vmatpush1.bf16.msra.mxu0 %v12543_v8  ;;  %v12510_v8 = vld [vmem:[#allocation40 + $0x1d0] ss:$8 sps:$4 sm:$0xff]  }
0x1456   :  { %9181 = vmatprep.subr.bf16.mxu0 %v12548_v9  ;;  %v12515_v9 = vld [vmem:[#allocation40 + $0x1c4] ss:$8 sps:$4 sm:$0xff]  }
0x1459   :  { %9182 = vmatpush1.bf16.msra.mxu0 %v12546_v10  ;;  %v12513_v10 = vld [vmem:[#allocation40 + $0x1c0] ss:$8 sps:$4 sm:$0xff]  }
0x145a   :  { %9183 = vmatprep.subr.bf16.mxu0 %v12551_v11  ;;  %v12518_v11 = vld [vmem:[#allocation40 + $0x1b4] ss:$8 sps:$4 sm:$0xff]  }
0x145d   :  { %9184 = vmatpush1.bf16.msra.mxu0 %v12549_v13  ;;  %v12516_v13 = vld [vmem:[#allocation40 + $0x1b0] ss:$8 sps:$4 sm:$0xff]  }
0x145e   :  { %9185 = vmatprep.subr.bf16.mxu0 %v12554_v14  ;;  %v12521_v14 = vld [vmem:[#allocation40 + $0x1a4] ss:$8 sps:$4 sm:$0xff]  }
0x1461   :  { %9186 = vmatpush2.bf16.msra.mxu0 %v12552_v19  ;;  %v12519_v19 = vld [vmem:[#allocation40 + $0x1a0] ss:$8 sps:$4 sm:$0xff]  }
0x1462   :  { %9187 = vmatprep.subr.bf16.mxu0 %v12557_v17  ;;  %v12524_v17 = vld [vmem:[#allocation40 + $0x194] ss:$8 sps:$4 sm:$0xff]  }
0x1465   :  { %9188 = vmatpush2.bf16.msra.mxu0 %v12555_v24  ;;  %v12522_v24 = vld [vmem:[#allocation40 + $0x190] ss:$8 sps:$4 sm:$0xff]  }
0x1466   :  { %9189 = vmatprep.subr.bf16.mxu0 %v12560_v26  ;;  %v12527_v26 = vld [vmem:[#allocation40 + $0x184] ss:$8 sps:$4 sm:$0xff]  }
0x1469   :  { %9190 = vmatpush2.bf16.msra.mxu0 %v12558_v28  ;;  %v12575_v28 = vld [vmem:[#allocation40 + $0x84] ss:$8 sps:$4 sm:$0xff]  }
0x146a   :  { %9191 = vmatprep.subr.bf16.mxu0 %v12563_v29  ;;  %v12573_v29 = vld [vmem:[#allocation40 + $0x80] ss:$8 sps:$4 sm:$0xff]  }
0x146d   :  { %9192 = vmatpush2.bf16.msra.mxu0 %v12561_v34 }
0x146e   :  { %9193 = vmatprep.subr.bf16.mxu0 %v12566_v40 }
0x1471   :  { %9194 = vmatpush2.bf16.msra.mxu0 %v12564_v15 }
0x1472   :  { %9195 = vmatprep.subr.bf16.mxu0 %v12569_v63  ;;  %v9211_v63 = vld [vmem:[#allocation38 + $0x4] sm:$0x3] }
0x1475   :  { %9196 = vmatpush2.bf16.msra.mxu0 %v12567_v62  ;;  %v12584_v62 = vld [vmem:[#allocation40 + $0x254] ss:$8 sps:$4 sm:$0xff]  }
0x1476   :  { %9197 = vmatprep.subr.bf16.mxu0 %v12572_v22  ;;  %v12587_v22 = vld [vmem:[#allocation40 + $0x244] ss:$8 sps:$4 sm:$0xff]  }
0x1500   :  { %v8615_v33 = vpop.f32.mrf.mxu0 }
0x1501   :  { %v8622_v35 = vadd.f32 %v8615_v33, %v8334_v55  ;;  %v12570_v55 = vld [vmem:[#allocation40 + $0x90] ss:$8 sps:$4 sm:$0xff]  }
0x1502   :  { %v8617_v16 = vpop.f32.mrf.mxu0  ;;  %9198 = vmatpush2.bf16.msra.mxu0 %v12570_v55  ;;  %v12591_v55 = vld [vmem:[#allocation40 + $0x220] ss:$8 sps:$4 sm:$0xff]  }
0x1503   :  { %v8636_v42 = vadd.f32 %v8629_v31, %v8622_v35  ;;  %v8623_v12 = vadd.f32 %v8617_v16, %v13993_v57  ;;  %v8728_v57 = vld [vmem:[#allocation38 + $0x2] sm:$0x3]  ;;  %9199 = vmatprep.subr.bf16.mxu0 %v12575_v28 }
0x1504   :  { %v8619_v25 = vpop.f32.mrf.mxu0 }
0x1505   :  { %v8638_v18 = vmax.f32 %v8636_v42, 0.0  ;;  %v8637_v44 = vadd.f32 %v8633_v23, %v8623_v12 }
0x1506   :  { %v8620_v45 = vpop.f32.mrf.mxu0  ;;  %9200 = vmatpush2.bf16.msra.mxu0 %v12573_v29 }
0x1507   :  { %v8640_v52 = vpack.c.bf16 %v8638_v18, %v8638_v18  ;;  %v8639_v41 = vmax.f32 %v8637_v44, 0.0  ;;  %v12578_v18 = vld [vmem:[#allocation40 + $0x274] ss:$8 sps:$4 sm:$0xff]   ;;  %v12576_v45 = vld [vmem:[#allocation40 + $0x270] ss:$8 sps:$4 sm:$0xff]  }
0x1509   :  { %v13998_v37 = vpack.c.bf16 %v8639_v41, %v8639_v41  ;;  %v14003_v32 = vsel %vm7775_vm6, %v8640_v52, 0  ;;  %v12581_v52 = vld [vmem:[#allocation40 + $0x264] ss:$8 sps:$4 sm:$0xff]   ;;  %v12579_v41 = vld [vmem:[#allocation40 + $0x260] ss:$8 sps:$4 sm:$0xff]  }
0x150b   :  { %10792 = vmatprep.subr.msk.bf16.mxu1 %vm7775_vm6, %v13998_v37 }
0x150c   :  { %8667 = vmatpush1.bf16.msra.mxu1 %v14003_v32 }
0x150d   :  { %10794 = vmatprep.subr.msk.bf16.mxu1 %vm7775_vm6, %v13998_v37 }
0x150f   :  { %10793 = vmatmul.mubr.msk.bf16.vlgmr.msra.gmra.mxu1 %vm7771_vm7, %v8642_v38  ;;  %v12585_v38 = vld [vmem:[#allocation40 + $0x240] ss:$8 sps:$4 sm:$0xff]  }
0x1510   :  { %8747 = vmatpush1.bf16.msra.mxu1 %v14003_v32  ;;  %8764 = vmatprep.mubr.bf16.mxu1 %v13293_v39 }
0x1511   :  { %8968 = vmatprep.subr.bf16.mxu1 %v12482_v53  ;;  %v12593_v53 = vld [vmem:[#allocation40 + $0x224] ss:$8 sps:$4 sm:$0xff]  }
0x1517   :  { %10795 = vmatmul.mubr.msk.bf16.vlgmr.msra.gmra.mxu1 %vm7771_vm7, %v8728_v57  ;;  %v12594_v57 = vld [vmem:[#allocation40 + $0x210] ss:$8 sps:$4 sm:$0xff]  }
0x1518   :  { %8969 = vmatpush1.bf16.msra.mxu1 %v12480_v56  ;;  %v12596_v56 = vld [vmem:[#allocation40 + $0x214] ss:$8 sps:$4 sm:$0xff]  }
0x1519   :  { %8970 = vmatprep.subr.bf16.mxu1 %v12485_v58  ;;  %v12599_v58 = vld [vmem:[#allocation40 + $0x204] ss:$8 sps:$4 sm:$0xff]  }
0x151c   :  { %8971 = vmatpush1.bf16.msra.mxu1 %v12483_v54  ;;  %v12597_v54 = vld [vmem:[#allocation40 + $0x200] ss:$8 sps:$4 sm:$0xff]  }
0x151d   :  { %8972 = vmatprep.subr.bf16.mxu1 %v12488_v59  ;;  %v12602_v59 = vld [vmem:[#allocation40 + $0x2f4] ss:$8 sps:$4 sm:$0xff]  }
0x1520   :  { %8973 = vmatpush1.bf16.msra.mxu1 %v12486_v60  ;;  %v12600_v60 = vld [vmem:[#allocation40 + $0x2f0] ss:$8 sps:$4 sm:$0xff]  }
0x1521   :  { %8974 = vmatprep.subr.bf16.mxu1 %v12491_v21  ;;  %v12605_v21 = vld [vmem:[#allocation40 + $0x2e4] ss:$8 sps:$4 sm:$0xff]  }
0x1524   :  { %8975 = vmatpush1.bf16.msra.mxu1 %v12489_v20  ;;  %v12603_v20 = vld [vmem:[#allocation40 + $0x2e0] ss:$8 sps:$4 sm:$0xff]  }
0x1525   :  { %8976 = vmatprep.subr.bf16.mxu1 %v12494_v61  ;;  %v12608_v61 = vld [vmem:[#allocation40 + $0x2d4] ss:$8 sps:$4 sm:$0xff]  }
0x1528   :  { %8977 = vmatpush1.bf16.msra.mxu1 %v12492_v0  ;;  %v12606_v0 = vld [vmem:[#allocation40 + $0x2d0] ss:$8 sps:$4 sm:$0xff]  }
0x1529   :  { %8978 = vmatprep.subr.bf16.mxu1 %v12497_v46  ;;  %v12611_v46 = vld [vmem:[#allocation40 + $0x2c4] ss:$8 sps:$4 sm:$0xff]  }
0x152c   :  { %8979 = vmatpush1.bf16.msra.mxu1 %v12495_v1  ;;  %v12609_v1 = vld [vmem:[#allocation40 + $0x2c0] ss:$8 sps:$4 sm:$0xff]  }
0x152d   :  { %8980 = vmatprep.subr.bf16.mxu1 %v12500_v51  ;;  %v12614_v51 = vld [vmem:[#allocation40 + $0x2b4] ss:$8 sps:$4 sm:$0xff]  }
0x1530   :  { %8981 = vmatpush1.bf16.msra.mxu1 %v12498_v30  ;;  %v12612_v30 = vld [vmem:[#allocation40 + $0x2b0] ss:$8 sps:$4 sm:$0xff]  }
0x1531   :  { %8982 = vmatprep.subr.bf16.mxu1 %v12503_v49  ;;  %v12617_v49 = vld [vmem:[#allocation40 + $0x2a4] ss:$8 sps:$4 sm:$0xff]  }
0x1534   :  { %8983 = vmatpush1.bf16.msra.mxu1 %v12501_v3  ;;  %v12615_v3 = vld [vmem:[#allocation40 + $0x2a0] ss:$8 sps:$4 sm:$0xff]  }
0x1535   :  { %8984 = vmatprep.subr.bf16.mxu1 %v12506_v4  ;;  %v12620_v4 = vld [vmem:[#allocation40 + $0x294] ss:$8 sps:$4 sm:$0xff]  }
0x1538   :  { %8985 = vmatpush2.bf16.msra.mxu1 %v12504_v47  ;;  %v12618_v47 = vld [vmem:[#allocation40 + $0x290] ss:$8 sps:$4 sm:$0xff]  }
0x1539   :  { %8986 = vmatprep.subr.bf16.mxu1 %v12509_v43  ;;  %v12623_v43 = vld [vmem:[#allocation40 + $0x284] ss:$8 sps:$4 sm:$0xff]  }
0x153c   :  { %8987 = vmatpush2.bf16.msra.mxu1 %v12507_v5  ;;  %v12621_v5 = vld [vmem:[#allocation40 + $0x280] ss:$8 sps:$4 sm:$0xff]  }
0x153d   :  { %8988 = vmatprep.subr.bf16.mxu1 %v12512_v7 }
0x1540   :  { %8989 = vmatpush2.bf16.msra.mxu1 %v12510_v8 }
0x1541   :  { %8990 = vmatprep.subr.bf16.mxu1 %v12515_v9 }
0x1544   :  { %8991 = vmatpush2.bf16.msra.mxu1 %v12513_v10 }
0x1545   :  { %8992 = vmatprep.subr.bf16.mxu1 %v12518_v11 }
0x1548   :  { %8993 = vmatpush2.bf16.msra.mxu1 %v12516_v13 }
0x1549   :  { %8994 = vmatprep.subr.bf16.mxu1 %v12521_v14 }
0x154c   :  { %8995 = vmatpush2.bf16.msra.mxu1 %v12519_v19 }
0x154d   :  { %8996 = vmatprep.subr.bf16.mxu1 %v12524_v17 }
0x1550   :  { %8997 = vmatpush2.bf16.msra.mxu1 %v12522_v24 }
0x1551   :  { %8998 = vmatprep.subr.bf16.mxu1 %v12527_v26 }
0x1554   :  { %8999 = vmatpush2.bf16.msra.mxu1 %v12525_v27 }
0x1555   :  { %10860 = vmatprep.subr.msk.bf16.mxu1 %vm7775_vm6, %v13998_v37  ;;  %v12582_v37 = vld [vmem:[#allocation40 + $0x250] ss:$8 sps:$4 sm:$0xff]  }
0x15cf   :  { %v8686_v31 = vpop.f32.mrf.mxu1 }
0x15d0   :  { %v8693_v35 = vpack.c.bf16 %v8686_v31, %v8686_v31 }
0x15d1   :  { %v8688_v33 = vpop.f32.mrf.mxu1 }
0x15d2   :  { %v8694_v34 = vpack.c.bf16 %v8688_v33, %v8688_v33 }
0x15d3   :  { %v8690_v23 = vpop.f32.mrf.mxu1 }
0x15d4   :  { %9201 = vmatprep.mubr.bf16.mxu0 %v8694_v34  ;;  %v9624_v34 = vld [vmem:[#allocation44 + $0xf8] sm:$0xff]  ;;  %v9623_v23 = vld [vmem:[#allocation44 + $0xf0] sm:$0xff] }
0x15d5   :  { %v8691_v40 = vpop.f32.mrf.mxu1  ;;  %9202 = vmatmul.mubr.bf16.vlgmr.msra.gmra.mxu0 %v8693_v35  ;;  %v9608_v35 = vld [vmem:[#allocation44 + $0x78] sm:$0xff]  ;;  %10968 = vmatprep.subr.mxu0 %v9624_v34  ;;  %v9697_v34 = vld [vmem:[%s13482_s5 + $0x10] sm:$0xff] }
0x15d6   :  { %v9607_v40 = vld [vmem:[#allocation44 + $0x70] sm:$0xff]  ;;  %10969 = vmatpush3.msra.mxu0 %v9608_v35  ;;  %v9696_v35 = vld [vmem:[%s13482_s5 + $0x8] sm:$0xff] }
0x15d7   :  { %v8766_v16 = vpop.f32.mrf.mxu1  ;;  %10970 = vmatprep.subr.mxu0 %v9623_v23  ;;  %v9695_v23 = vld [vmem:[%s13482_s5] sm:$0xff] }
0x15d8   :  { %v8773_v25 = vpack.c.bf16 %v8766_v16, %v8766_v16  ;;  %v9622_v16 = vld [vmem:[#allocation44 + $0xe8] sm:$0xff]  ;;  %10971 = vmatpush3.msra.mxu0 %v9607_v40 }
0x15d9   :  { %v8768_v42 = vpop.f32.mrf.mxu1  ;;  %10972 = vmatprep.subr.mxu0 %v9622_v16 }
0x15da   :  { %v8774_v12 = vpack.c.bf16 %v8768_v42, %v8768_v42  ;;  %v9606_v42 = vld [vmem:[#allocation44 + $0x68] sm:$0xff] }
0x15db   :  { %v8770_v15 = vpop.f32.mrf.mxu1  ;;  %10973 = vmatpush3.msra.mxu0 %v9606_v42  ;;  %v9788_v42 = vld [vmem:[%s13490_s13] sm:$0x3] }
0x15dc   :  { %9000 = vmatprep.mubr.bf16.mxu1 %v8774_v12  ;;  %v9621_v12 = vld [vmem:[#allocation44 + $0xe0] sm:$0xff]  ;;  %v9620_v15 = vld [vmem:[#allocation44 + $0xd8] sm:$0xff] }
0x15dd   :  { %v8771_v44 = vpop.f32.mrf.mxu1  ;;  %9001 = vmatmul.mubr.bf16.vlgmr.msra.gmra.mxu1 %v8773_v25  ;;  %v9605_v25 = vld [vmem:[#allocation44 + $0x60] sm:$0xff]  ;;  %10974 = vmatprep.subr.mxu0 %v9621_v12 }
0x15de   :  { %9230 = vmatpush1.bf16.msra.mxu1 %v14003_v32  ;;  %9247 = vmatprep.mubr.bf16.mxu1 %v13293_v39  ;;  %v12590_v32 = vld [vmem:[#allocation40 + $0x234] ss:$8 sps:$4 sm:$0xff]   ;;  %v12588_v39 = vld [vmem:[#allocation40 + $0x230] ss:$8 sps:$4 sm:$0xff]  }
0x15df   :  { %9451 = vmatprep.subr.bf16.mxu1 %v12578_v18  ;;  %v9604_v18 = vld [vmem:[#allocation44 + $0x58] sm:$0xff]  ;;  %10975 = vmatpush3.msra.mxu0 %v9605_v25  ;;  %v9619_v44 = vld [vmem:[#allocation44 + $0xd0] sm:$0xff] }
0x15e0   :  { %10976 = vmatprep.subr.mxu0 %v9620_v15 }
0x15e1   :  { %10977 = vmatpush3.msra.mxu0 %v9604_v18  ;;  %v10897_v18 = vld [vmem:[#allocation2] ss:$0 sm:$0xff] }
0x15e2   :  { %10978 = vmatprep.subr.mxu0 %v9619_v44 }
0x15e5   :  { %10861 = vmatmul.mubr.msk.bf16.vlgmr.msra.gmra.mxu1 %vm7771_vm7, %v9211_v63  ;;  %v9603_v63 = vld [vmem:[#allocation44 + $0x50] sm:$0xff] }
0x15e6   :  { %9452 = vmatpush1.bf16.msra.mxu1 %v12576_v45  ;;  %v9618_v45 = vld [vmem:[#allocation44 + $0xc8] sm:$0xff]  ;;  %10979 = vmatpush3.msra.mxu0 %v9603_v63 }
0x15e7   :  { %9453 = vmatprep.subr.bf16.mxu1 %v12581_v52  ;;  %v9602_v52 = vld [vmem:[#allocation44 + $0x48] sm:$0xff]  ;;  %10980 = vmatprep.subr.mxu0 %v9618_v45 }
0x15e8   :  { %10981 = vmatpush3.msra.mxu0 %v9602_v52 }
0x15ea   :  { %9454 = vmatpush1.bf16.msra.mxu1 %v12579_v41  ;;  %v9617_v41 = vld [vmem:[#allocation44 + $0xc0] sm:$0xff] }
0x15eb   :  { %9455 = vmatprep.subr.bf16.mxu1 %v12584_v62  ;;  %v9601_v62 = vld [vmem:[#allocation44 + $0x40] sm:$0xff]  ;;  %10982 = vmatprep.subr.mxu0 %v9617_v41 }
0x15ec   :  { %10983 = vmatpush3.msra.mxu0 %v9601_v62 }
0x15ee   :  { %9456 = vmatpush1.bf16.msra.mxu1 %v12582_v37  ;;  %v9616_v37 = vld [vmem:[#allocation44 + $0xb8] sm:$0xff] }
0x15ef   :  { %9457 = vmatprep.subr.bf16.mxu1 %v12587_v22  ;;  %v9600_v22 = vld [vmem:[#allocation44 + $0x38] sm:$0xff]  ;;  %10984 = vmatprep.subr.mxu0 %v9616_v37 }
0x15f0   :  { %10985 = vmatpush3.msra.mxu0 %v9600_v22 }
0x15f2   :  { %9458 = vmatpush1.bf16.msra.mxu1 %v12585_v38  ;;  %v9615_v38 = vld [vmem:[#allocation44 + $0xb0] sm:$0xff] }
0x15f3   :  { %9459 = vmatprep.subr.bf16.mxu1 %v12590_v32  ;;  %v9599_v32 = vld [vmem:[#allocation44 + $0x30] sm:$0xff]  ;;  %10986 = vmatprep.subr.mxu0 %v9615_v38 }
0x15f4   :  { %10987 = vmatpush3.msra.mxu0 %v9599_v32 }
0x15f6   :  { %9460 = vmatpush1.bf16.msra.mxu1 %v12588_v39  ;;  %v9614_v39 = vld [vmem:[#allocation44 + $0xa8] sm:$0xff] }
0x15f7   :  { %9461 = vmatprep.subr.bf16.mxu1 %v12593_v53  ;;  %v9598_v53 = vld [vmem:[#allocation44 + $0x28] sm:$0xff]  ;;  %10988 = vmatprep.subr.mxu0 %v9614_v39 }
0x15f8   :  { %10989 = vmatpush3.msra.mxu0 %v9598_v53 }
0x15fa   :  { %9462 = vmatpush1.bf16.msra.mxu1 %v12591_v55  ;;  %v9613_v55 = vld [vmem:[#allocation44 + $0xa0] sm:$0xff] }
0x15fb   :  { %9463 = vmatprep.subr.bf16.mxu1 %v12596_v56  ;;  %v9597_v56 = vld [vmem:[#allocation44 + $0x20] sm:$0xff]  ;;  %10990 = vmatprep.subr.mxu0 %v9613_v55 }
0x15fc   :  { %10991 = vmatpush3.msra.mxu0 %v9597_v56 }
0x15fe   :  { %9464 = vmatpush1.bf16.msra.mxu1 %v12594_v57  ;;  %v9612_v57 = vld [vmem:[#allocation44 + $0x98] sm:$0xff] }
0x15ff   :  { %9465 = vmatprep.subr.bf16.mxu1 %v12599_v58  ;;  %v9596_v58 = vld [vmem:[#allocation44 + $0x18] sm:$0xff]  ;;  %10992 = vmatprep.subr.mxu0 %v9612_v57 }
0x1600   :  { %10993 = vmatpush3.msra.mxu0 %v9596_v58 }
0x1602   :  { %9466 = vmatpush1.bf16.msra.mxu1 %v12597_v54  ;;  %v9611_v54 = vld [vmem:[#allocation44 + $0x90] sm:$0xff] }
0x1603   :  { %9467 = vmatprep.subr.bf16.mxu1 %v12602_v59  ;;  %v9595_v59 = vld [vmem:[#allocation44 + $0x10] sm:$0xff]  ;;  %10994 = vmatprep.subr.mxu0 %v9611_v54 }
0x1604   :  { %10995 = vmatpush3.msra.mxu0 %v9595_v59 }
0x1606   :  { %9468 = vmatpush2.bf16.msra.mxu1 %v12600_v60  ;;  %v9494_v60 = vld [vmem:[#allocation41] sm:$0x3] }
0x1607   :  { %9469 = vmatprep.subr.bf16.mxu1 %v12605_v21  ;;  %v9499_v21 = vrot.slane %v9494_v60, %v13773_v48  ;;  %v9512_v48 = vld [vmem:[#allocation43] sm:$0x3] }
0x160a   :  { %9470 = vmatpush2.bf16.msra.mxu1 %v12603_v20 }
0x160b   :  { %9471 = vmatprep.subr.bf16.mxu1 %v12608_v61 }
0x160e   :  { %9472 = vmatpush2.bf16.msra.mxu1 %v12606_v0  ;;  %v9503_v0 = vrot.slane %v9494_v60, %v13776_v50  ;;  %v9610_v50 = vld [vmem:[#allocation44 + $0x88] sm:$0xff] }
0x160f   :  { %9473 = vmatprep.subr.bf16.mxu1 %v12611_v46  ;;  %10996 = vmatprep.subr.mxu0 %v9610_v50 }
0x1612   :  { %9474 = vmatpush2.bf16.msra.mxu1 %v12609_v1 }
0x1613   :  { %9475 = vmatprep.subr.bf16.mxu1 %v12614_v51 }
0x1616   :  { %9476 = vmatpush2.bf16.msra.mxu1 %v12612_v30 }
0x1617   :  { %9477 = vmatprep.subr.bf16.mxu1 %v12617_v49 }
0x161a   :  { %9478 = vmatpush2.bf16.msra.mxu1 %v12615_v3 }
0x161b   :  { %9479 = vmatprep.subr.bf16.mxu1 %v12620_v4 }
0x161e   :  { %9480 = vmatpush2.bf16.msra.mxu1 %v12618_v47 }
0x161f   :  { %9481 = vmatprep.subr.bf16.mxu1 %v12623_v43 }
0x1622   :  { %9482 = vmatpush2.bf16.msra.mxu1 %v12621_v5 }
0x1695   :  { %v9203_v7 = vpop.f32.mrf.mxu0 }
0x1697   :  { %v9205_v8 = vpop.f32.mrf.mxu0 }
0x1699   :  { %v9207_v9 = vpop.f32.mrf.mxu0 }
0x169b   :  { %v9208_v10 = vpop.f32.mrf.mxu0 }
0x169c   :  { %v9710_v10 = vld [vmem:[%s13482_s5 + $0x78] sm:$0xff] }
0x169d   :  { %v9002_v11 = vpop.f32.mrf.mxu1 }
0x169e   :  { %v14017_v13 = vadd.f32 %v9203_v7, %v9002_v11  ;;  %v9594_v7 = vld [vmem:[#allocation44 + $0x8] sm:$0xff] }
0x169f   :  { %v9004_v14 = vpop.f32.mrf.mxu1  ;;  %10997 = vmatpush3.msra.mxu0 %v9594_v7  ;;  %v9709_v11 = vld [vmem:[%s13482_s5 + $0x70] sm:$0xff] }
0x16a0   :  { %v14019_v19 = vadd.f32 %v9205_v8, %v9004_v14  ;;  %v9593_v8 = vld [vmem:[#allocation44] sm:$0xff] }
0x16a1   :  { %v9006_v17 = vpop.f32.mrf.mxu1  ;;  %v9707_v14 = vld [vmem:[%s13482_s5 + $0x60] sm:$0xff] }
0x16a2   :  { %v9705_v17 = vld [vmem:[%s13482_s5 + $0x50] sm:$0xff] }
0x16a3   :  { %v9007_v24 = vpop.f32.mrf.mxu1 }
0x16a4   :  { %v9704_v24 = vld [vmem:[%s13482_s5 + $0x48] sm:$0xff] }
0x16a5   :  { %v9249_v26 = vpop.f32.mrf.mxu1 }
0x16a6   :  { %v9256_v29 = vpack.c.bf16 %v9249_v26, %v9249_v26  ;;  %v9703_v26 = vld [vmem:[%s13482_s5 + $0x40] sm:$0xff] }
0x16a7   :  { %v9251_v27 = vpop.f32.mrf.mxu1 }
0x16a8   :  { %v9257_v28 = vpack.c.bf16 %v9251_v27, %v9251_v27  ;;  %v9702_v27 = vld [vmem:[%s13482_s5 + $0x38] sm:$0xff] }
0x16a9   :  { %v9253_v31 = vpop.f32.mrf.mxu1 }
0x16aa   :  { %9483 = vmatprep.mubr.bf16.mxu1 %v9257_v28  ;;  %v9701_v28 = vld [vmem:[%s13482_s5 + $0x30] sm:$0xff]  ;;  %v9699_v31 = vld [vmem:[%s13482_s5 + $0x20] sm:$0xff] }
0x16ab   :  { %v9254_v33 = vpop.f32.mrf.mxu1  ;;  %9484 = vmatmul.mubr.bf16.vlgmr.msra.gmra.mxu1 %v9256_v29  ;;  %v9700_v29 = vld [vmem:[%s13482_s5 + $0x28] sm:$0xff] }
0x16ac   :  { %9586 = vmatprep.mubr.f32.mxu1 %v13291_v36  ;;  %v9698_v33 = vld [vmem:[%s13482_s5 + $0x18] sm:$0xff] }
0x176b   :  { %v9485_v20 = vpop.f32.mrf.mxu1 }
0x176c   :  { %v9492_v61 = vadd.f32 %v9485_v20, %v14017_v13  ;;  %v9708_v13 = vld [vmem:[%s13482_s5 + $0x68] sm:$0xff] }
0x176d   :  { %v9487_v46 = vpop.f32.mrf.mxu1 }
0x176e   :  { %v9506_v1 = vadd.f32 %v9499_v21, %v9492_v61  ;;  %v9493_v51 = vadd.f32 %v9487_v46, %v14019_v19  ;;  %v9706_v19 = vld [vmem:[%s13482_s5 + $0x58] sm:$0xff] }
0x176f   :  { %v9489_v30 = vpop.f32.mrf.mxu1 }
0x1770   :  { %v9507_v49 = vadd.f32 %v9503_v0, %v9493_v51  ;;  %v9508_v3 = vadd.f32 %v9506_v1, %v13966_v2  ;;  %v9609_v2 = vld [vmem:[#allocation44 + $0x80] sm:$0xff] }
0x1771   :  { %v9490_v4 = vpop.f32.mrf.mxu1  ;;  %10998 = vmatprep.subr.mxu0 %v9609_v2 }
0x1772   :  { %v9509_v47 = vadd.f32 %v9507_v49, %v13970_v6  ;;  %v9510_v5 = vmax.f32 %v9508_v3, 0.0  ;;  %10999 = vmatpush3.msra.mxu0 %v9593_v8 }
0x1773   :  { %11184 = vmatprep.subr.mxu0 %v13291_v36 }
0x1774   :  { %v9511_v43 = vmax.f32 %v9509_v47, 0.0 }
0x1776   :  { %10894 = vmatprep.subr.msk.mxu1 %vm4180_vm4, %v9511_v43 }
0x1777   :  { %10895 = vmatpush1.msk.msra.mxu1 %vm4180_vm4, %v9510_v5 }
0x1778   :  { %10896 = vmatmul.mubr.msk.f32.vlgmr.msra.gmra.mxu1 %vm7771_vm7, %v9512_v48 }
0x1838   :  { %v9588_v6 = vpop.f32.mrf.mxu1 }
0x183a   :  { %v9590_v9 = vpop.f32.mrf.mxu1 }
0x183b   :  { %9689 = vmatprep.mubr.f32.mxu0 %v9590_v9 }
0x183c   :  { %9690 = vmatmul.mubr.f32.vlgmr.msra.gmra.mxu0 %v9588_v6 }
0x183d   :  { %11185 = vmatpush3.msra.mxu0 %v9710_v10  ;;  %11216 = vmatprep.mubr.msk.f32.mxu0 %vm13292_vm2, %v13291_v36 }
0x183e   :  { %11186 = vmatprep.subr.mxu0 %v13291_v36 }
0x183f   :  { %11187 = vmatpush3.msra.mxu0 %v9709_v11 }
0x1840   :  { %11188 = vmatprep.subr.mxu0 %v13291_v36 }
0x1841   :  { %11189 = vmatpush3.msra.mxu0 %v9708_v13 }
0x1842   :  { %11190 = vmatprep.subr.mxu0 %v13291_v36 }
0x1843   :  { %11191 = vmatpush3.msra.mxu0 %v9707_v14 }
0x1844   :  { %11192 = vmatprep.subr.mxu0 %v13291_v36 }
0x1845   :  { %11193 = vmatpush3.msra.mxu0 %v9706_v19 }
0x1846   :  { %11194 = vmatprep.subr.mxu0 %v13291_v36 }
0x1847   :  { %11195 = vmatpush3.msra.mxu0 %v9705_v17 }
0x1848   :  { %11196 = vmatprep.subr.mxu0 %v13291_v36 }
0x1849   :  { %11197 = vmatpush3.msra.mxu0 %v9704_v24 }
0x184a   :  { %11198 = vmatprep.subr.mxu0 %v13291_v36 }
0x184b   :  { %11199 = vmatpush3.msra.mxu0 %v9703_v26 }
0x184c   :  { %11200 = vmatprep.subr.mxu0 %v13291_v36 }
0x184d   :  { %11201 = vmatpush3.msra.mxu0 %v9702_v27 }
0x184e   :  { %11202 = vmatprep.subr.mxu0 %v13291_v36 }
0x184f   :  { %11203 = vmatpush3.msra.mxu0 %v9701_v28 }
0x1850   :  { %11204 = vmatprep.subr.mxu0 %v13291_v36 }
0x1851   :  { %11205 = vmatpush3.msra.mxu0 %v9700_v29 }
0x1852   :  { %11206 = vmatprep.subr.mxu0 %v13291_v36 }
0x1853   :  { %11207 = vmatpush3.msra.mxu0 %v9699_v31 }
0x1854   :  { %11208 = vmatprep.subr.mxu0 %v13291_v36 }
0x1855   :  { %11209 = vmatpush3.msra.mxu0 %v9698_v33 }
0x1856   :  { %11210 = vmatprep.subr.mxu0 %v13291_v36 }
0x1857   :  { %11211 = vmatpush3.msra.mxu0 %v9697_v34 }
0x1858   :  { %11212 = vmatprep.subr.mxu0 %v13291_v36 }
0x1859   :  { %11213 = vmatpush3.msra.mxu0 %v9696_v35 }
0x185a   :  { %11214 = vmatprep.subr.mxu0 %v13291_v36 }
0x185b   :  { %11215 = vmatpush3.msra.mxu0 %v9695_v23 }
0x18fc   :  { %v11000_v40 = vpop.f32.mrf.mxu0 }
0x18fe   :  { %v11001_v16 = vpop.f32.mrf.mxu0 }
0x18ff   :  { %v11002_v12 = vadd.f32 %v11001_v16, %v11000_v40 }
0x1901   :  { %11217 = vmatmul.mubr.f32.vlgmr.msra.gmra.mxu0 %v11002_v12  ;;  %v9789_v25 = vmul.f32 %v11002_v12, %v9788_v42 }
0x1903   :  { %v9790_v15 = vsel %vm7775_vm6, %v9789_v25, 0.0 }
0x1904   :  { %9791 = vadd.xlane.f32.xlu0 %v9790_v15 }
0x198d   :  { %v9792_v45 = vpop.xlane.xlu0 %9791 }
0x19c1   :  { %v9784_v44 = vpop.f32.mrf.mxu0 }
0x19c2   :  { %v9785_v63 = vadd.f32 %v10897_v18, %v9784_v44 }
0x19c3   :  { %v11218_v52 = vpop.f32.mrf.mxu0 }
0x19c4   :  { %v9793_v41 = vadd.f32 %v9792_v45, %v9785_v63 }
0x19c6   :  { %9795 = vst.msk [vmem:[%s13495_s3] sm:$0x3] %vm9794_vm8, %v9793_v41 }
0x19c7   :  { %9800 = vsyncpa [#allocation4], 1 }
0x19c8   :  { %9801 = vsyncpa [#allocation6], 1 }
0x19c9   :  { %9802 = vsyncpa [#allocation9], 1 }
0x19ca   :  { %9803 = vsyncpa [#allocation12], 1 }
0x19cb   :  { %9804 = vsyncpa [#allocation15], 1 }
0x19cc   :  { %9805 = vsyncpa [#allocation18], 1 }
0x19cd   :  { %9806 = vsyncpa [#allocation21], 1 }
0x19ce   :  { %9807 = vsyncpa [#allocation24], 1 }
0x19cf   :  { %9808 = vsyncpa [#allocation27], 1 }
0x19d0   :  { %9809 = vsyncpa [#allocation30], 1 }
0x19d1   :  { %9810 = vsyncpa [#allocation33], 1 }
0x19d2   :  { %9811 = vsyncpa [#allocation36], 1 }
0x19d3   :  { %9812 = vsyncpa [#allocation39], 1 }
0x19d4   :  { %9813 = vsyncpa [#allocation42], 1 }
0x19d5   :  { %9814 = vsyncpa [#allocation45], 1 }

</bundles_post_ra>
